<compile_context>
chip_gen: v5e
topology: v5e:2x2
jax: 0.10.0
libtpu: 0.0.40
codegen_flags: <defaults>
</compile_context>

<pallas_src>
import functools

import numpy as np
import jax
import jax.numpy as jnp
from jax.experimental import pallas as pl
from jax.experimental.pallas import tpu as pltpu


# ----------------------------------------------------------------------------
# Fused stacked-conv kernel factory
# ----------------------------------------------------------------------------
def _make_stacked_conv_kernel(num_layers, ksize, H, W, c_in, hidden):
    """One grid step = one conv layer of one batch element.

    refs (in order), for num_layers > 1:
      x_ref  : (H, W, C0)            unpadded bf16 NHWC input of batch n
      w0_ref : (k*k, C0, hidden)     layer-0 weights (bf16), one (Cin,Cout)/tap
      b0_ref : (1, hidden)           layer-0 bias (f32)
      wr_ref : (k*k, hidden, hidden) CURRENT layer's weights (bf16, streamed)
      br_ref : (1, hidden)           CURRENT layer's bias (f32, streamed)
      o_ref  : (H, W, hidden)        f32 output block of batch n
      xpad   : (Hp, Wp, C0)          zero-haloed bf16 staging of the input
      buf    : (Hp, Wp, hidden)      zero-haloed bf16 layer intermediate
    """
    pad = ksize // 2

    def zero_halo(ref):
        # Zero only the halo strips; the interior is fully overwritten.
        hp, wp, c = ref.shape
        zrow = jnp.zeros((pad, wp, c), ref.dtype)
        zcol = jnp.zeros((hp, pad, c), ref.dtype)
        ref[0:pad, :, :] = zrow
        ref[hp - pad:hp, :, :] = zrow
        ref[:, 0:pad, :] = zcol
        ref[:, wp - pad:wp, :] = zcol

    def conv_relu(src_ref, w_ref, bias, cin):
        # src_ref: (Hp, Wp, cin) zero-haloed bf16; w_ref: (k*k, cin, hidden) bf16
        # bias: (1, hidden) f32.  Returns (H, W, hidden) f32.
        acc = jnp.zeros((H * W, hidden), jnp.float32)
        for dy in range(ksize):                      # fully unrolled: 9 big dots
            for dx in range(ksize):
                tap = src_ref[dy:dy + H, dx:dx + W, :].reshape(H * W, cin)
                acc = acc + jnp.dot(tap, w_ref[dy * ksize + dx],
                                    preferred_element_type=jnp.float32)
        acc = jnp.maximum(acc + bias, 0.0)           # bias + ReLU in f32
        return acc.reshape(H, W, hidden)

    def kernel(*refs):
        if num_layers > 1:
            x_ref, w0_ref, b0_ref, wr_ref, br_ref, o_ref, xpad, buf = refs
        else:
            x_ref, w0_ref, b0_ref, o_ref, xpad, buf = refs
            wr_ref = br_ref = None

        layer = pl.program_id(1)

        @pl.when(layer == 0)
        def _():
            zero_halo(xpad)
            zero_halo(buf)
            # Stage the unpadded input into the halo'd scratch interior.
            xpad[pad:pad + H, pad:pad + W, :] = x_ref[...]
            out0 = conv_relu(xpad, w0_ref, b0_ref[...], c_in)
            if num_layers == 1:
                o_ref[...] = out0
            else:
                buf[pad:pad + H, pad:pad + W, :] = out0.astype(buf.dtype)

        if num_layers > 1:
            @pl.when(layer > 0)
            def _():
                out_i = conv_relu(buf, wr_ref, br_ref[...], hidden)

                @pl.when(layer == num_layers - 1)
                def _():
                    o_ref[...] = out_i               # final layer -> f32 output

                @pl.when(layer < num_layers - 1)
                def _():
                    buf[pad:pad + H, pad:pad + W, :] = out_i.astype(buf.dtype)

    return kernel


# ----------------------------------------------------------------------------
# Forward wrapper (NCHW module boundary, NHWC/bf16 inside, one fused pallas_call)
# ----------------------------------------------------------------------------
@functools.partial(jax.jit, static_argnames=("ksize",))
def _stacked_convx_forward(x_nchw, w0, b0, wr, br, ksize):
    N, C0, H, W = x_nchw.shape
    pad = ksize // 2
    hidden = w0.shape[-1]
    num_layers = 1 if wr is None else 1 + wr.shape[0]
    Hp, Wp = H + 2 * pad, W + 2 * pad

    # Channels-last so channels sit on the lane axis; bf16 halves activation DMA.
    x = jnp.transpose(x_nchw, (0, 2, 3, 1)).astype(jnp.bfloat16)

    in_specs = [
        pl.BlockSpec((None, H, W, C0), lambda n, l: (n, 0, 0, 0)),
        pl.BlockSpec((ksize * ksize, C0, hidden), lambda n, l: (0, 0, 0)),
        pl.BlockSpec((1, hidden), lambda n, l: (0, 0)),
    ]
    args = [x, w0, b0]
    if num_layers > 1:
        # Stream ONE layer's weights/bias per grid step (clamped so step l==0
        # prefetches layer-1's block, which is then reused at l==1 without a
        # second DMA).
        in_specs += [
            pl.BlockSpec((None, ksize * ksize, hidden, hidden),
                         lambda n, l: (jnp.maximum(l - 1, 0), 0, 0, 0)),
            pl.BlockSpec((None, 1, hidden),
                         lambda n, l: (jnp.maximum(l - 1, 0), 0, 0)),
        ]
        args += [wr, br]

    out_nhwc = pl.pallas_call(
        _make_stacked_conv_kernel(num_layers, ksize, H, W, C0, hidden),
        out_shape=jax.ShapeDtypeStruct((N, H, W, hidden), jnp.float32),
        grid=(N, num_layers),
        in_specs=in_specs,
        out_specs=pl.BlockSpec((None, H, W, hidden), lambda n, l: (n, 0, 0, 0)),
        scratch_shapes=[pltpu.VMEM((Hp, Wp, C0), jnp.bfloat16),
                        pltpu.VMEM((Hp, Wp, hidden), jnp.bfloat16)],
        compiler_params=pltpu.CompilerParams(
            dimension_semantics=("parallel", "arbitrary"),
            vmem_limit_bytes=48 * 1024 * 1024),
    )(*args)

    return jnp.transpose(out_nhwc, (0, 3, 1, 2))                  # back to NCHW


# ----------------------------------------------------------------------------
# Module (forward only, deterministic synthetic weights)
# ----------------------------------------------------------------------------
class DensePoseV1ConvXHeadPallas:
    """Pallas port of DensePoseV1ConvXHead: n_stacked_convs x (Conv2d + ReLU)."""

    def __init__(self, key, input_channels, *, hidden_dim=32, kernel_size=3,
                 n_stacked_convs=3):
        assert kernel_size % 2 == 1, "same-padding head assumes an odd kernel size"
        self.kernel_size = kernel_size
        self.n_stacked_convs = n_stacked_convs
        self.n_out_channels = hidden_dim

        keys = jax.random.split(key, n_stacked_convs)
        weights, biases = [], []
        n_ch = input_channels
        for i in range(n_stacked_convs):
            # torch kaiming_normal_(mode='fan_out', nonlinearity='relu') on a
            # Conv2d weight (Cout,Cin,k,k): fan_out = Cout*k*k, std = sqrt(2/fan_out)
            std = float(np.sqrt(2.0 / (hidden_dim * kernel_size * kernel_size)))
            w = jax.random.normal(
                keys[i], (kernel_size, kernel_size, n_ch, hidden_dim), jnp.float32) * std
            b = jnp.zeros((1, hidden_dim), jnp.float32)  # nn.init.constant_(bias, 0)
            weights.append(w)
            biases.append(b)
            n_ch = hidden_dim

        # f32 per-layer copies kept only for the reference check.
        self.layer_weights = weights
        self.layer_biases = biases

        # Pack ONCE for the kernel: bf16 weights (MXU operands), f32 biases.
        k = kernel_size
        self.w0 = weights[0].reshape(
            k * k, input_channels, hidden_dim).astype(jnp.bfloat16)
        self.b0 = biases[0]
        if n_stacked_convs > 1:
            self.wr = jnp.stack(weights[1:], axis=0).reshape(
                n_stacked_convs - 1, k * k, hidden_dim, hidden_dim).astype(jnp.bfloat16)
            self.br = jnp.stack(biases[1:], axis=0)          # (L-1, 1, hidden) f32
        else:
            self.wr = None
            self.br = None

    def __call__(self, features_nchw):
        return _stacked_convx_forward(features_nchw, self.w0, self.b0,
                                      self.wr, self.br, ksize=self.kernel_size)


# ----------------------------------------------------------------------------
# Reference (numpy, mimicking the kernel's bf16 operand / f32 accum numerics)
# ----------------------------------------------------------------------------
def _bf16_round(a):
    return np.asarray(
        jnp.asarray(np.asarray(a, np.float32), jnp.bfloat16).astype(jnp.float32))


def _ref_forward(x_nchw, weights, biases, ksize):
    pad = ksize // 2
    out = _bf16_round(np.asarray(x_nchw, np.float32))
    L = len(weights)
    for li, (w, b) in enumerate(zip(weights, biases)):
        w = _bf16_round(np.asarray(w, np.float32))          # (k, k, Cin, Cout)
        b = np.asarray(b, np.float32).reshape(-1)           # (Cout,)
        N, _, H, W = out.shape
        Cout = w.shape[-1]
        xp = np.pad(out, ((0, 0), (0, 0), (pad, pad), (pad, pad)))
        res = np.zeros((N, Cout, H, W), np.float32)
        for dy in range(ksize):
            for dx in range(ksize):
                res += np.einsum("nchw,co->nohw",
                                 xp[:, :, dy:dy + H, dx:dx + W], w[dy, dx])
        res = np.maximum(res + b[None, :, None, None], 0.0)
        if li < L - 1:
            res = _bf16_round(res)   # intermediates stored as bf16 in VMEM
        out = res
    return out


if __name__ == "__main__":
    key = jax.random.PRNGKey(0)
    k_x, k_p = jax.random.split(key)

    # Small synthetic shapes consistent with the module (NCHW features).
    N, C_IN, H, W = 2, 4, 16, 16
    x = jax.random.normal(k_x, (N, C_IN, H, W), jnp.float32)

    head = DensePoseV1ConvXHeadPallas(k_p, input_channels=C_IN,
                                      hidden_dim=32, kernel_size=3,
                                      n_stacked_convs=3)
    out = jax.block_until_ready(head(x))

    assert out.shape == (N, head.n_out_channels, H, W)
    assert out.dtype == jnp.float32

    ref = _ref_forward(np.asarray(x), head.layer_weights, head.layer_biases,
                       head.kernel_size)
    np.testing.assert_allclose(np.asarray(out), ref, rtol=1e-2, atol=1e-2)

    print("KERNEL_OK")
</pallas_src>

<mosaic_0001>
module attributes {stable_mosaic.version = 11 : i64} {
  func.func @kernel(%arg0: i32, %arg1: i32, %arg2: memref<1x16x16x4xbf16, #tpu.memory_space<vmem>>, %arg3: memref<9x4x32xbf16, #tpu.memory_space<vmem>>, %arg4: memref<1x32xf32, #tpu.memory_space<vmem>>, %arg5: memref<1x9x32x32xbf16, #tpu.memory_space<vmem>>, %arg6: memref<1x1x32xf32, #tpu.memory_space<vmem>>, %arg7: memref<1x16x16x32xf32, #tpu.memory_space<vmem>>, %arg8: memref<18x18x4xbf16, #tpu.memory_space<vmem>>, %arg9: memref<18x18x32xbf16, #tpu.memory_space<vmem>>) attributes {dimension_semantics = [#tpu.dimension_semantics<parallel>, #tpu.dimension_semantics<arbitrary>], iteration_bounds = array<i64: 2, 3>, scalar_prefetch = 0 : i64, scratch_operands = 2 : i64, tpu.core_type = #tpu.core_type<tc>, window_params = [{transform_indices = @transform_0, window_bounds = array<i64: 1, 16, 16, 4>}, {pipeline_mode = #tpu.pipeline_mode<synchronous>, transform_indices = @transform_1, window_bounds = array<i64: 9, 4, 32>}, {pipeline_mode = #tpu.pipeline_mode<synchronous>, transform_indices = @transform_2, window_bounds = array<i64: 1, 32>}, {transform_indices = @transform_3, window_bounds = array<i64: 1, 9, 32, 32>}, {transform_indices = @transform_4, window_bounds = array<i64: 1, 1, 32>}, {transform_indices = @transform_5, window_bounds = array<i64: 1, 16, 16, 32>}]} {
    %c0_i32 = arith.constant 0 : i32
    %0 = arith.cmpi eq, %arg1, %c0_i32 : i32
    %1 = arith.extui %0 : i1 to i32
    %c0_i32_0 = arith.constant 0 : i32
    %2 = arith.cmpi ne, %1, %c0_i32_0 : i32
    scf.if %2 {
      %cst = arith.constant 0.000000e+00 : bf16
      %6 = vector.broadcast %cst : bf16 to vector<1x18x4xbf16>
      %cst_3 = arith.constant 0.000000e+00 : bf16
      %7 = vector.broadcast %cst_3 : bf16 to vector<18x1x4xbf16>
      %c0 = arith.constant 0 : index
      %c0_4 = arith.constant 0 : index
      %c0_5 = arith.constant 0 : index
      %8 = vector.load %arg8[%c0, %c0_4, %c0_5] : memref<18x18x4xbf16, #tpu.memory_space<vmem>>, vector<1x18x4xbf16>
      tpu.vector_store %arg8[%c0, %c0_4, %c0_5], %6 {strides = array<i32>} : memref<18x18x4xbf16, #tpu.memory_space<vmem>>, vector<1x18x4xbf16>,
      %c17 = arith.constant 17 : index
      %c0_6 = arith.constant 0 : index
      %c0_7 = arith.constant 0 : index
      %9 = vector.load %arg8[%c17, %c0_6, %c0_7] : memref<18x18x4xbf16, #tpu.memory_space<vmem>>, vector<1x18x4xbf16>
      tpu.vector_store %arg8[%c17, %c0_6, %c0_7], %6 {strides = array<i32>} : memref<18x18x4xbf16, #tpu.memory_space<vmem>>, vector<1x18x4xbf16>,
      %c0_8 = arith.constant 0 : index
      %c0_9 = arith.constant 0 : index
      %c0_10 = arith.constant 0 : index
      %10 = vector.load %arg8[%c0_8, %c0_9, %c0_10] : memref<18x18x4xbf16, #tpu.memory_space<vmem>>, vector<18x1x4xbf16>
      tpu.vector_store %arg8[%c0_8, %c0_9, %c0_10], %7 {strides = array<i32>} : memref<18x18x4xbf16, #tpu.memory_space<vmem>>, vector<18x1x4xbf16>,
      %c0_11 = arith.constant 0 : index
      %c17_12 = arith.constant 17 : index
      %c0_13 = arith.constant 0 : index
      %11 = vector.load %arg8[%c0_11, %c17_12, %c0_13] : memref<18x18x4xbf16, #tpu.memory_space<vmem>>, vector<18x1x4xbf16>
      tpu.vector_store %arg8[%c0_11, %c17_12, %c0_13], %7 {strides = array<i32>} : memref<18x18x4xbf16, #tpu.memory_space<vmem>>, vector<18x1x4xbf16>,
      %cst_14 = arith.constant 0.000000e+00 : bf16
      %12 = vector.broadcast %cst_14 : bf16 to vector<1x18x32xbf16>
      %cst_15 = arith.constant 0.000000e+00 : bf16
      %13 = vector.broadcast %cst_15 : bf16 to vector<18x1x32xbf16>
      %c0_16 = arith.constant 0 : index
      %c0_17 = arith.constant 0 : index
      %c0_18 = arith.constant 0 : index
      %14 = vector.load %arg9[%c0_16, %c0_17, %c0_18] : memref<18x18x32xbf16, #tpu.memory_space<vmem>>, vector<1x18x32xbf16>
      tpu.vector_store %arg9[%c0_16, %c0_17, %c0_18], %12 {strides = array<i32>} : memref<18x18x32xbf16, #tpu.memory_space<vmem>>, vector<1x18x32xbf16>,
      %c17_19 = arith.constant 17 : index
      %c0_20 = arith.constant 0 : index
      %c0_21 = arith.constant 0 : index
      %15 = vector.load %arg9[%c17_19, %c0_20, %c0_21] : memref<18x18x32xbf16, #tpu.memory_space<vmem>>, vector<1x18x32xbf16>
      tpu.vector_store %arg9[%c17_19, %c0_20, %c0_21], %12 {strides = array<i32>} : memref<18x18x32xbf16, #tpu.memory_space<vmem>>, vector<1x18x32xbf16>,
      %c0_22 = arith.constant 0 : index
      %c0_23 = arith.constant 0 : index
      %c0_24 = arith.constant 0 : index
      %16 = vector.load %arg9[%c0_22, %c0_23, %c0_24] : memref<18x18x32xbf16, #tpu.memory_space<vmem>>, vector<18x1x32xbf16>
      tpu.vector_store %arg9[%c0_22, %c0_23, %c0_24], %13 {strides = array<i32>} : memref<18x18x32xbf16, #tpu.memory_space<vmem>>, vector<18x1x32xbf16>,
      %c0_25 = arith.constant 0 : index
      %c17_26 = arith.constant 17 : index
      %c0_27 = arith.constant 0 : index
      %17 = vector.load %arg9[%c0_25, %c17_26, %c0_27] : memref<18x18x32xbf16, #tpu.memory_space<vmem>>, vector<18x1x32xbf16>
      tpu.vector_store %arg9[%c0_25, %c17_26, %c0_27], %13 {strides = array<i32>} : memref<18x18x32xbf16, #tpu.memory_space<vmem>>, vector<18x1x32xbf16>,
      %c0_28 = arith.constant 0 : index
      %c0_29 = arith.constant 0 : index
      %c0_30 = arith.constant 0 : index
      %c0_31 = arith.constant 0 : index
      %18 = vector.load %arg2[%c0_28, %c0_29, %c0_30, %c0_31] : memref<1x16x16x4xbf16, #tpu.memory_space<vmem>>, vector<1x16x16x4xbf16>
      %19 = vector.shape_cast %18 : vector<1x16x16x4xbf16> to vector<16x16x4xbf16>
      %c1 = arith.constant 1 : index
      %c1_32 = arith.constant 1 : index
      %c0_33 = arith.constant 0 : index
      %20 = vector.load %arg8[%c1, %c1_32, %c0_33] : memref<18x18x4xbf16, #tpu.memory_space<vmem>>, vector<16x16x4xbf16>
      tpu.vector_store %arg8[%c1, %c1_32, %c0_33], %19 {strides = array<i32>} : memref<18x18x4xbf16, #tpu.memory_space<vmem>>, vector<16x16x4xbf16>,
      %c0_34 = arith.constant 0 : index
      %c0_35 = arith.constant 0 : index
      %21 = vector.load %arg4[%c0_34, %c0_35] : memref<1x32xf32, #tpu.memory_space<vmem>>, vector<1x32xf32>
      %cst_36 = arith.constant 0.000000e+00 : f32
      %22 = vector.broadcast %cst_36 : f32 to vector<256x32xf32>
      %c0_37 = arith.constant 0 : index
      %c0_38 = arith.constant 0 : index
      %c0_39 = arith.constant 0 : index
      %23 = vector.load %arg8[%c0_37, %c0_38, %c0_39] : memref<18x18x4xbf16, #tpu.memory_space<vmem>>, vector<16x16x4xbf16>
      %24 = vector.shape_cast %23 : vector<16x16x4xbf16> to vector<256x4xbf16>
      %c0_40 = arith.constant 0 : index
      %c0_41 = arith.constant 0 : index
      %c0_42 = arith.constant 0 : index
      %25 = vector.load %arg3[%c0_40, %c0_41, %c0_42] : memref<9x4x32xbf16, #tpu.memory_space<vmem>>, vector<1x4x32xbf16>
      %26 = vector.shape_cast %25 : vector<1x4x32xbf16> to vector<4x32xbf16>
      %cst_43 = arith.constant dense<0.000000e+00> : vector<256x32xf32>
      %27 = tpu.matmul %24, %26, %cst_43 {dimension_numbers = #tpu.dot_dimension_numbers<[1], [0], [0], [1], [0, 0, 1, 1], [], []>} : vector<256x4xbf16>, vector<4x32xbf16>, vector<256x32xf32> -> vector<256x32xf32>
      %28 = arith.addf %22, %27 : vector<256x32xf32>
      %c0_44 = arith.constant 0 : index
      %c1_45 = arith.constant 1 : index
      %c0_46 = arith.constant 0 : index
      %29 = vector.load %arg8[%c0_44, %c1_45, %c0_46] : memref<18x18x4xbf16, #tpu.memory_space<vmem>>, vector<16x16x4xbf16>
      %30 = vector.shape_cast %29 : vector<16x16x4xbf16> to vector<256x4xbf16>
      %c1_47 = arith.constant 1 : index
      %c0_48 = arith.constant 0 : index
      %c0_49 = arith.constant 0 : index
      %31 = vector.load %arg3[%c1_47, %c0_48, %c0_49] : memref<9x4x32xbf16, #tpu.memory_space<vmem>>, vector<1x4x32xbf16>
      %32 = vector.shape_cast %31 : vector<1x4x32xbf16> to vector<4x32xbf16>
      %cst_50 = arith.constant dense<0.000000e+00> : vector<256x32xf32>
      %33 = tpu.matmul %30, %32, %cst_50 {dimension_numbers = #tpu.dot_dimension_numbers<[1], [0], [0], [1], [0, 0, 1, 1], [], []>} : vector<256x4xbf16>, vector<4x32xbf16>, vector<256x32xf32> -> vector<256x32xf32>
      %34 = arith.addf %28, %33 : vector<256x32xf32>
      %c0_51 = arith.constant 0 : index
      %c2 = arith.constant 2 : index
      %c0_52 = arith.constant 0 : index
      %35 = vector.load %arg8[%c0_51, %c2, %c0_52] : memref<18x18x4xbf16, #tpu.memory_space<vmem>>, vector<16x16x4xbf16>
      %36 = vector.shape_cast %35 : vector<16x16x4xbf16> to vector<256x4xbf16>
      %c2_53 = arith.constant 2 : index
      %c0_54 = arith.constant 0 : index
      %c0_55 = arith.constant 0 : index
      %37 = vector.load %arg3[%c2_53, %c0_54, %c0_55] : memref<9x4x32xbf16, #tpu.memory_space<vmem>>, vector<1x4x32xbf16>
      %38 = vector.shape_cast %37 : vector<1x4x32xbf16> to vector<4x32xbf16>
      %cst_56 = arith.constant dense<0.000000e+00> : vector<256x32xf32>
      %39 = tpu.matmul %36, %38, %cst_56 {dimension_numbers = #tpu.dot_dimension_numbers<[1], [0], [0], [1], [0, 0, 1, 1], [], []>} : vector<256x4xbf16>, vector<4x32xbf16>, vector<256x32xf32> -> vector<256x32xf32>
      %40 = arith.addf %34, %39 : vector<256x32xf32>
      %c1_57 = arith.constant 1 : index
      %c0_58 = arith.constant 0 : index
      %c0_59 = arith.constant 0 : index
      %41 = vector.load %arg8[%c1_57, %c0_58, %c0_59] : memref<18x18x4xbf16, #tpu.memory_space<vmem>>, vector<16x16x4xbf16>
      %42 = vector.shape_cast %41 : vector<16x16x4xbf16> to vector<256x4xbf16>
      %c3 = arith.constant 3 : index
      %c0_60 = arith.constant 0 : index
      %c0_61 = arith.constant 0 : index
      %43 = vector.load %arg3[%c3, %c0_60, %c0_61] : memref<9x4x32xbf16, #tpu.memory_space<vmem>>, vector<1x4x32xbf16>
      %44 = vector.shape_cast %43 : vector<1x4x32xbf16> to vector<4x32xbf16>
      %cst_62 = arith.constant dense<0.000000e+00> : vector<256x32xf32>
      %45 = tpu.matmul %42, %44, %cst_62 {dimension_numbers = #tpu.dot_dimension_numbers<[1], [0], [0], [1], [0, 0, 1, 1], [], []>} : vector<256x4xbf16>, vector<4x32xbf16>, vector<256x32xf32> -> vector<256x32xf32>
      %46 = arith.addf %40, %45 : vector<256x32xf32>
      %c1_63 = arith.constant 1 : index
      %c1_64 = arith.constant 1 : index
      %c0_65 = arith.constant 0 : index
      %47 = vector.load %arg8[%c1_63, %c1_64, %c0_65] : memref<18x18x4xbf16, #tpu.memory_space<vmem>>, vector<16x16x4xbf16>
      %48 = vector.shape_cast %47 : vector<16x16x4xbf16> to vector<256x4xbf16>
      %c4 = arith.constant 4 : index
      %c0_66 = arith.constant 0 : index
      %c0_67 = arith.constant 0 : index
      %49 = vector.load %arg3[%c4, %c0_66, %c0_67] : memref<9x4x32xbf16, #tpu.memory_space<vmem>>, vector<1x4x32xbf16>
      %50 = vector.shape_cast %49 : vector<1x4x32xbf16> to vector<4x32xbf16>
      %cst_68 = arith.constant dense<0.000000e+00> : vector<256x32xf32>
      %51 = tpu.matmul %48, %50, %cst_68 {dimension_numbers = #tpu.dot_dimension_numbers<[1], [0], [0], [1], [0, 0, 1, 1], [], []>} : vector<256x4xbf16>, vector<4x32xbf16>, vector<256x32xf32> -> vector<256x32xf32>
      %52 = arith.addf %46, %51 : vector<256x32xf32>
      %c1_69 = arith.constant 1 : index
      %c2_70 = arith.constant 2 : index
      %c0_71 = arith.constant 0 : index
      %53 = vector.load %arg8[%c1_69, %c2_70, %c0_71] : memref<18x18x4xbf16, #tpu.memory_space<vmem>>, vector<16x16x4xbf16>
      %54 = vector.shape_cast %53 : vector<16x16x4xbf16> to vector<256x4xbf16>
      %c5 = arith.constant 5 : index
      %c0_72 = arith.constant 0 : index
      %c0_73 = arith.constant 0 : index
      %55 = vector.load %arg3[%c5, %c0_72, %c0_73] : memref<9x4x32xbf16, #tpu.memory_space<vmem>>, vector<1x4x32xbf16>
      %56 = vector.shape_cast %55 : vector<1x4x32xbf16> to vector<4x32xbf16>
      %cst_74 = arith.constant dense<0.000000e+00> : vector<256x32xf32>
      %57 = tpu.matmul %54, %56, %cst_74 {dimension_numbers = #tpu.dot_dimension_numbers<[1], [0], [0], [1], [0, 0, 1, 1], [], []>} : vector<256x4xbf16>, vector<4x32xbf16>, vector<256x32xf32> -> vector<256x32xf32>
      %58 = arith.addf %52, %57 : vector<256x32xf32>
      %c2_75 = arith.constant 2 : index
      %c0_76 = arith.constant 0 : index
      %c0_77 = arith.constant 0 : index
      %59 = vector.load %arg8[%c2_75, %c0_76, %c0_77] : memref<18x18x4xbf16, #tpu.memory_space<vmem>>, vector<16x16x4xbf16>
      %60 = vector.shape_cast %59 : vector<16x16x4xbf16> to vector<256x4xbf16>
      %c6 = arith.constant 6 : index
      %c0_78 = arith.constant 0 : index
      %c0_79 = arith.constant 0 : index
      %61 = vector.load %arg3[%c6, %c0_78, %c0_79] : memref<9x4x32xbf16, #tpu.memory_space<vmem>>, vector<1x4x32xbf16>
      %62 = vector.shape_cast %61 : vector<1x4x32xbf16> to vector<4x32xbf16>
      %cst_80 = arith.constant dense<0.000000e+00> : vector<256x32xf32>
      %63 = tpu.matmul %60, %62, %cst_80 {dimension_numbers = #tpu.dot_dimension_numbers<[1], [0], [0], [1], [0, 0, 1, 1], [], []>} : vector<256x4xbf16>, vector<4x32xbf16>, vector<256x32xf32> -> vector<256x32xf32>
      %64 = arith.addf %58, %63 : vector<256x32xf32>
      %c2_81 = arith.constant 2 : index
      %c1_82 = arith.constant 1 : index
      %c0_83 = arith.constant 0 : index
      %65 = vector.load %arg8[%c2_81, %c1_82, %c0_83] : memref<18x18x4xbf16, #tpu.memory_space<vmem>>, vector<16x16x4xbf16>
      %66 = vector.shape_cast %65 : vector<16x16x4xbf16> to vector<256x4xbf16>
      %c7 = arith.constant 7 : index
      %c0_84 = arith.constant 0 : index
      %c0_85 = arith.constant 0 : index
      %67 = vector.load %arg3[%c7, %c0_84, %c0_85] : memref<9x4x32xbf16, #tpu.memory_space<vmem>>, vector<1x4x32xbf16>
      %68 = vector.shape_cast %67 : vector<1x4x32xbf16> to vector<4x32xbf16>
      %cst_86 = arith.constant dense<0.000000e+00> : vector<256x32xf32>
      %69 = tpu.matmul %66, %68, %cst_86 {dimension_numbers = #tpu.dot_dimension_numbers<[1], [0], [0], [1], [0, 0, 1, 1], [], []>} : vector<256x4xbf16>, vector<4x32xbf16>, vector<256x32xf32> -> vector<256x32xf32>
      %70 = arith.addf %64, %69 : vector<256x32xf32>
      %c2_87 = arith.constant 2 : index
      %c2_88 = arith.constant 2 : index
      %c0_89 = arith.constant 0 : index
      %71 = vector.load %arg8[%c2_87, %c2_88, %c0_89] : memref<18x18x4xbf16, #tpu.memory_space<vmem>>, vector<16x16x4xbf16>
      %72 = vector.shape_cast %71 : vector<16x16x4xbf16> to vector<256x4xbf16>
      %c8 = arith.constant 8 : index
      %c0_90 = arith.constant 0 : index
      %c0_91 = arith.constant 0 : index
      %73 = vector.load %arg3[%c8, %c0_90, %c0_91] : memref<9x4x32xbf16, #tpu.memory_space<vmem>>, vector<1x4x32xbf16>
      %74 = vector.shape_cast %73 : vector<1x4x32xbf16> to vector<4x32xbf16>
      %cst_92 = arith.constant dense<0.000000e+00> : vector<256x32xf32>
      %75 = tpu.matmul %72, %74, %cst_92 {dimension_numbers = #tpu.dot_dimension_numbers<[1], [0], [0], [1], [0, 0, 1, 1], [], []>} : vector<256x4xbf16>, vector<4x32xbf16>, vector<256x32xf32> -> vector<256x32xf32>
      %76 = arith.addf %70, %75 : vector<256x32xf32>
      %77 = vector.broadcast %21 : vector<1x32xf32> to vector<256x32xf32>
      %78 = arith.addf %76, %77 : vector<256x32xf32>
      %cst_93 = arith.constant 0.000000e+00 : f32
      %79 = vector.broadcast %cst_93 : f32 to vector<256x32xf32>
      %80 = arith.maximumf %78, %79 : vector<256x32xf32>
      %81 = vector.shape_cast %80 : vector<256x32xf32> to vector<16x16x32xf32>
      %82 = arith.truncf %81 : vector<16x16x32xf32> to vector<16x16x32xbf16>
      %c1_94 = arith.constant 1 : index
      %c1_95 = arith.constant 1 : index
      %c0_96 = arith.constant 0 : index
      %83 = vector.load %arg9[%c1_94, %c1_95, %c0_96] : memref<18x18x32xbf16, #tpu.memory_space<vmem>>, vector<16x16x32xbf16>
      tpu.vector_store %arg9[%c1_94, %c1_95, %c0_96], %82 {strides = array<i32>} : memref<18x18x32xbf16, #tpu.memory_space<vmem>>, vector<16x16x32xbf16>,
    } else {
    }
    %c0_i32_1 = arith.constant 0 : i32
    %3 = arith.cmpi sgt, %arg1, %c0_i32_1 : i32
    %4 = arith.extui %3 : i1 to i32
    %c0_i32_2 = arith.constant 0 : i32
    %5 = arith.cmpi ne, %4, %c0_i32_2 : i32
    scf.if %5 {
      %c0 = arith.constant 0 : index
      %c0_3 = arith.constant 0 : index
      %c0_4 = arith.constant 0 : index
      %6 = vector.load %arg6[%c0, %c0_3, %c0_4] : memref<1x1x32xf32, #tpu.memory_space<vmem>>, vector<1x1x32xf32>
      %7 = vector.shape_cast %6 : vector<1x1x32xf32> to vector<1x32xf32>
      %cst = arith.constant 0.000000e+00 : f32
      %8 = vector.broadcast %cst : f32 to vector<256x32xf32>
      %c0_5 = arith.constant 0 : index
      %c0_6 = arith.constant 0 : index
      %c0_7 = arith.constant 0 : index
      %9 = vector.load %arg9[%c0_5, %c0_6, %c0_7] : memref<18x18x32xbf16, #tpu.memory_space<vmem>>, vector<16x16x32xbf16>
      %10 = vector.shape_cast %9 : vector<16x16x32xbf16> to vector<256x32xbf16>
      %c0_8 = arith.constant 0 : index
      %c0_9 = arith.constant 0 : index
      %c0_10 = arith.constant 0 : index
      %c0_11 = arith.constant 0 : index
      %11 = vector.load %arg5[%c0_8, %c0_9, %c0_10, %c0_11] : memref<1x9x32x32xbf16, #tpu.memory_space<vmem>>, vector<1x1x32x32xbf16>
      %12 = vector.shape_cast %11 : vector<1x1x32x32xbf16> to vector<32x32xbf16>
      %cst_12 = arith.constant dense<0.000000e+00> : vector<256x32xf32>
      %13 = tpu.matmul %10, %12, %cst_12 {dimension_numbers = #tpu.dot_dimension_numbers<[1], [0], [0], [1], [0, 0, 1, 1], [], []>} : vector<256x32xbf16>, vector<32x32xbf16>, vector<256x32xf32> -> vector<256x32xf32>
      %14 = arith.addf %8, %13 : vector<256x32xf32>
      %c0_13 = arith.constant 0 : index
      %c1 = arith.constant 1 : index
      %c0_14 = arith.constant 0 : index
      %15 = vector.load %arg9[%c0_13, %c1, %c0_14] : memref<18x18x32xbf16, #tpu.memory_space<vmem>>, vector<16x16x32xbf16>
      %16 = vector.shape_cast %15 : vector<16x16x32xbf16> to vector<256x32xbf16>
      %c0_15 = arith.constant 0 : index
      %c1_16 = arith.constant 1 : index
      %c0_17 = arith.constant 0 : index
      %c0_18 = arith.constant 0 : index
      %17 = vector.load %arg5[%c0_15, %c1_16, %c0_17, %c0_18] : memref<1x9x32x32xbf16, #tpu.memory_space<vmem>>, vector<1x1x32x32xbf16>
      %18 = vector.shape_cast %17 : vector<1x1x32x32xbf16> to vector<32x32xbf16>
      %cst_19 = arith.constant dense<0.000000e+00> : vector<256x32xf32>
      %19 = tpu.matmul %16, %18, %cst_19 {dimension_numbers = #tpu.dot_dimension_numbers<[1], [0], [0], [1], [0, 0, 1, 1], [], []>} : vector<256x32xbf16>, vector<32x32xbf16>, vector<256x32xf32> -> vector<256x32xf32>
      %20 = arith.addf %14, %19 : vector<256x32xf32>
      %c0_20 = arith.constant 0 : index
      %c2 = arith.constant 2 : index
      %c0_21 = arith.constant 0 : index
      %21 = vector.load %arg9[%c0_20, %c2, %c0_21] : memref<18x18x32xbf16, #tpu.memory_space<vmem>>, vector<16x16x32xbf16>
      %22 = vector.shape_cast %21 : vector<16x16x32xbf16> to vector<256x32xbf16>
      %c0_22 = arith.constant 0 : index
      %c2_23 = arith.constant 2 : index
      %c0_24 = arith.constant 0 : index
      %c0_25 = arith.constant 0 : index
      %23 = vector.load %arg5[%c0_22, %c2_23, %c0_24, %c0_25] : memref<1x9x32x32xbf16, #tpu.memory_space<vmem>>, vector<1x1x32x32xbf16>
      %24 = vector.shape_cast %23 : vector<1x1x32x32xbf16> to vector<32x32xbf16>
      %cst_26 = arith.constant dense<0.000000e+00> : vector<256x32xf32>
      %25 = tpu.matmul %22, %24, %cst_26 {dimension_numbers = #tpu.dot_dimension_numbers<[1], [0], [0], [1], [0, 0, 1, 1], [], []>} : vector<256x32xbf16>, vector<32x32xbf16>, vector<256x32xf32> -> vector<256x32xf32>
      %26 = arith.addf %20, %25 : vector<256x32xf32>
      %c1_27 = arith.constant 1 : index
      %c0_28 = arith.constant 0 : index
      %c0_29 = arith.constant 0 : index
      %27 = vector.load %arg9[%c1_27, %c0_28, %c0_29] : memref<18x18x32xbf16, #tpu.memory_space<vmem>>, vector<16x16x32xbf16>
      %28 = vector.shape_cast %27 : vector<16x16x32xbf16> to vector<256x32xbf16>
      %c0_30 = arith.constant 0 : index
      %c3 = arith.constant 3 : index
      %c0_31 = arith.constant 0 : index
      %c0_32 = arith.constant 0 : index
      %29 = vector.load %arg5[%c0_30, %c3, %c0_31, %c0_32] : memref<1x9x32x32xbf16, #tpu.memory_space<vmem>>, vector<1x1x32x32xbf16>
      %30 = vector.shape_cast %29 : vector<1x1x32x32xbf16> to vector<32x32xbf16>
      %cst_33 = arith.constant dense<0.000000e+00> : vector<256x32xf32>
      %31 = tpu.matmul %28, %30, %cst_33 {dimension_numbers = #tpu.dot_dimension_numbers<[1], [0], [0], [1], [0, 0, 1, 1], [], []>} : vector<256x32xbf16>, vector<32x32xbf16>, vector<256x32xf32> -> vector<256x32xf32>
      %32 = arith.addf %26, %31 : vector<256x32xf32>
      %c1_34 = arith.constant 1 : index
      %c1_35 = arith.constant 1 : index
      %c0_36 = arith.constant 0 : index
      %33 = vector.load %arg9[%c1_34, %c1_35, %c0_36] : memref<18x18x32xbf16, #tpu.memory_space<vmem>>, vector<16x16x32xbf16>
      %34 = vector.shape_cast %33 : vector<16x16x32xbf16> to vector<256x32xbf16>
      %c0_37 = arith.constant 0 : index
      %c4 = arith.constant 4 : index
      %c0_38 = arith.constant 0 : index
      %c0_39 = arith.constant 0 : index
      %35 = vector.load %arg5[%c0_37, %c4, %c0_38, %c0_39] : memref<1x9x32x32xbf16, #tpu.memory_space<vmem>>, vector<1x1x32x32xbf16>
      %36 = vector.shape_cast %35 : vector<1x1x32x32xbf16> to vector<32x32xbf16>
      %cst_40 = arith.constant dense<0.000000e+00> : vector<256x32xf32>
      %37 = tpu.matmul %34, %36, %cst_40 {dimension_numbers = #tpu.dot_dimension_numbers<[1], [0], [0], [1], [0, 0, 1, 1], [], []>} : vector<256x32xbf16>, vector<32x32xbf16>, vector<256x32xf32> -> vector<256x32xf32>
      %38 = arith.addf %32, %37 : vector<256x32xf32>
      %c1_41 = arith.constant 1 : index
      %c2_42 = arith.constant 2 : index
      %c0_43 = arith.constant 0 : index
      %39 = vector.load %arg9[%c1_41, %c2_42, %c0_43] : memref<18x18x32xbf16, #tpu.memory_space<vmem>>, vector<16x16x32xbf16>
      %40 = vector.shape_cast %39 : vector<16x16x32xbf16> to vector<256x32xbf16>
      %c0_44 = arith.constant 0 : index
      %c5 = arith.constant 5 : index
      %c0_45 = arith.constant 0 : index
      %c0_46 = arith.constant 0 : index
      %41 = vector.load %arg5[%c0_44, %c5, %c0_45, %c0_46] : memref<1x9x32x32xbf16, #tpu.memory_space<vmem>>, vector<1x1x32x32xbf16>
      %42 = vector.shape_cast %41 : vector<1x1x32x32xbf16> to vector<32x32xbf16>
      %cst_47 = arith.constant dense<0.000000e+00> : vector<256x32xf32>
      %43 = tpu.matmul %40, %42, %cst_47 {dimension_numbers = #tpu.dot_dimension_numbers<[1], [0], [0], [1], [0, 0, 1, 1], [], []>} : vector<256x32xbf16>, vector<32x32xbf16>, vector<256x32xf32> -> vector<256x32xf32>
      %44 = arith.addf %38, %43 : vector<256x32xf32>
      %c2_48 = arith.constant 2 : index
      %c0_49 = arith.constant 0 : index
      %c0_50 = arith.constant 0 : index
      %45 = vector.load %arg9[%c2_48, %c0_49, %c0_50] : memref<18x18x32xbf16, #tpu.memory_space<vmem>>, vector<16x16x32xbf16>
      %46 = vector.shape_cast %45 : vector<16x16x32xbf16> to vector<256x32xbf16>
      %c0_51 = arith.constant 0 : index
      %c6 = arith.constant 6 : index
      %c0_52 = arith.constant 0 : index
      %c0_53 = arith.constant 0 : index
      %47 = vector.load %arg5[%c0_51, %c6, %c0_52, %c0_53] : memref<1x9x32x32xbf16, #tpu.memory_space<vmem>>, vector<1x1x32x32xbf16>
      %48 = vector.shape_cast %47 : vector<1x1x32x32xbf16> to vector<32x32xbf16>
      %cst_54 = arith.constant dense<0.000000e+00> : vector<256x32xf32>
      %49 = tpu.matmul %46, %48, %cst_54 {dimension_numbers = #tpu.dot_dimension_numbers<[1], [0], [0], [1], [0, 0, 1, 1], [], []>} : vector<256x32xbf16>, vector<32x32xbf16>, vector<256x32xf32> -> vector<256x32xf32>
      %50 = arith.addf %44, %49 : vector<256x32xf32>
      %c2_55 = arith.constant 2 : index
      %c1_56 = arith.constant 1 : index
      %c0_57 = arith.constant 0 : index
      %51 = vector.load %arg9[%c2_55, %c1_56, %c0_57] : memref<18x18x32xbf16, #tpu.memory_space<vmem>>, vector<16x16x32xbf16>
      %52 = vector.shape_cast %51 : vector<16x16x32xbf16> to vector<256x32xbf16>
      %c0_58 = arith.constant 0 : index
      %c7 = arith.constant 7 : index
      %c0_59 = arith.constant 0 : index
      %c0_60 = arith.constant 0 : index
      %53 = vector.load %arg5[%c0_58, %c7, %c0_59, %c0_60] : memref<1x9x32x32xbf16, #tpu.memory_space<vmem>>, vector<1x1x32x32xbf16>
      %54 = vector.shape_cast %53 : vector<1x1x32x32xbf16> to vector<32x32xbf16>
      %cst_61 = arith.constant dense<0.000000e+00> : vector<256x32xf32>
      %55 = tpu.matmul %52, %54, %cst_61 {dimension_numbers = #tpu.dot_dimension_numbers<[1], [0], [0], [1], [0, 0, 1, 1], [], []>} : vector<256x32xbf16>, vector<32x32xbf16>, vector<256x32xf32> -> vector<256x32xf32>
      %56 = arith.addf %50, %55 : vector<256x32xf32>
      %c2_62 = arith.constant 2 : index
      %c2_63 = arith.constant 2 : index
      %c0_64 = arith.constant 0 : index
      %57 = vector.load %arg9[%c2_62, %c2_63, %c0_64] : memref<18x18x32xbf16, #tpu.memory_space<vmem>>, vector<16x16x32xbf16>
      %58 = vector.shape_cast %57 : vector<16x16x32xbf16> to vector<256x32xbf16>
      %c0_65 = arith.constant 0 : index
      %c8 = arith.constant 8 : index
      %c0_66 = arith.constant 0 : index
      %c0_67 = arith.constant 0 : index
      %59 = vector.load %arg5[%c0_65, %c8, %c0_66, %c0_67] : memref<1x9x32x32xbf16, #tpu.memory_space<vmem>>, vector<1x1x32x32xbf16>
      %60 = vector.shape_cast %59 : vector<1x1x32x32xbf16> to vector<32x32xbf16>
      %cst_68 = arith.constant dense<0.000000e+00> : vector<256x32xf32>
      %61 = tpu.matmul %58, %60, %cst_68 {dimension_numbers = #tpu.dot_dimension_numbers<[1], [0], [0], [1], [0, 0, 1, 1], [], []>} : vector<256x32xbf16>, vector<32x32xbf16>, vector<256x32xf32> -> vector<256x32xf32>
      %62 = arith.addf %56, %61 : vector<256x32xf32>
      %63 = vector.broadcast %7 : vector<1x32xf32> to vector<256x32xf32>
      %64 = arith.addf %62, %63 : vector<256x32xf32>
      %cst_69 = arith.constant 0.000000e+00 : f32
      %65 = vector.broadcast %cst_69 : f32 to vector<256x32xf32>
      %66 = arith.maximumf %64, %65 : vector<256x32xf32>
      %67 = vector.shape_cast %66 : vector<256x32xf32> to vector<16x16x32xf32>
      %c2_i32 = arith.constant 2 : i32
      %68 = arith.cmpi eq, %arg1, %c2_i32 : i32
      %69 = arith.extui %68 : i1 to i32
      %c0_i32_70 = arith.constant 0 : i32
      %70 = arith.cmpi ne, %69, %c0_i32_70 : i32
      scf.if %70 {
        %c0_73 = arith.constant 0 : index
        %c0_74 = arith.constant 0 : index
        %c0_75 = arith.constant 0 : index
        %c0_76 = arith.constant 0 : index
        %74 = vector.load %arg7[%c0_73, %c0_74, %c0_75, %c0_76] : memref<1x16x16x32xf32, #tpu.memory_space<vmem>>, vector<1x16x16x32xf32>
        %75 = vector.shape_cast %74 : vector<1x16x16x32xf32> to vector<16x16x32xf32>
        %76 = vector.shape_cast %67 : vector<16x16x32xf32> to vector<1x16x16x32xf32>
        tpu.vector_store %arg7[%c0_73, %c0_74, %c0_75, %c0_76], %76 {strides = array<i32>} : memref<1x16x16x32xf32, #tpu.memory_space<vmem>>, vector<1x16x16x32xf32>,
      } else {
      }
      %c2_i32_71 = arith.constant 2 : i32
      %71 = arith.cmpi slt, %arg1, %c2_i32_71 : i32
      %72 = arith.extui %71 : i1 to i32
      %c0_i32_72 = arith.constant 0 : i32
      %73 = arith.cmpi ne, %72, %c0_i32_72 : i32
      scf.if %73 {
        %74 = arith.truncf %67 : vector<16x16x32xf32> to vector<16x16x32xbf16>
        %c1_73 = arith.constant 1 : index
        %c1_74 = arith.constant 1 : index
        %c0_75 = arith.constant 0 : index
        %75 = vector.load %arg9[%c1_73, %c1_74, %c0_75] : memref<18x18x32xbf16, #tpu.memory_space<vmem>>, vector<16x16x32xbf16>
        tpu.vector_store %arg9[%c1_73, %c1_74, %c0_75], %74 {strides = array<i32>} : memref<18x18x32xbf16, #tpu.memory_space<vmem>>, vector<16x16x32xbf16>,
      } else {
      }
    } else {
    }
    return
  }
  func.func @transform_0(%arg0: i32, %arg1: i32) -> (i32, i32, i32, i32) {
    %c0_i32 = arith.constant 0 : i32
    %c0_i32_0 = arith.constant 0 : i32
    %c0_i32_1 = arith.constant 0 : i32
    %c0_i32_2 = arith.constant 0 : i32
    return %arg0, %c0_i32, %c0_i32_0, %c0_i32_1 : i32, i32, i32, i32
  }
  func.func @transform_1(%arg0: i32, %arg1: i32) -> (i32, i32, i32) {
    %c0_i32 = arith.constant 0 : i32
    %c0_i32_0 = arith.constant 0 : i32
    %c0_i32_1 = arith.constant 0 : i32
    %c0_i32_2 = arith.constant 0 : i32
    return %c0_i32, %c0_i32_0, %c0_i32_1 : i32, i32, i32
  }
  func.func @transform_2(%arg0: i32, %arg1: i32) -> (i32, i32) {
    %c0_i32 = arith.constant 0 : i32
    %c0_i32_0 = arith.constant 0 : i32
    %c0_i32_1 = arith.constant 0 : i32
    return %c0_i32, %c0_i32_0 : i32, i32
  }
  func.func @transform_3(%arg0: i32, %arg1: i32) -> (i32, i32, i32, i32) {
    %c1_i32 = arith.constant 1 : i32
    %0 = arith.subi %arg1, %c1_i32 : i32
    %c0_i32 = arith.constant 0 : i32
    %1 = arith.maxsi %0, %c0_i32 : i32
    %c0_i32_0 = arith.constant 0 : i32
    %c0_i32_1 = arith.constant 0 : i32
    %c0_i32_2 = arith.constant 0 : i32
    %c0_i32_3 = arith.constant 0 : i32
    return %1, %c0_i32_0, %c0_i32_1, %c0_i32_2 : i32, i32, i32, i32
  }
  func.func @transform_4(%arg0: i32, %arg1: i32) -> (i32, i32, i32) {
    %c1_i32 = arith.constant 1 : i32
    %0 = arith.subi %arg1, %c1_i32 : i32
    %c0_i32 = arith.constant 0 : i32
    %1 = arith.maxsi %0, %c0_i32 : i32
    %c0_i32_0 = arith.constant 0 : i32
    %c0_i32_1 = arith.constant 0 : i32
    %c0_i32_2 = arith.constant 0 : i32
    return %1, %c0_i32_0, %c0_i32_1 : i32, i32, i32
  }
  func.func @transform_5(%arg0: i32, %arg1: i32) -> (i32, i32, i32, i32) {
    %c0_i32 = arith.constant 0 : i32
    %c0_i32_0 = arith.constant 0 : i32
    %c0_i32_1 = arith.constant 0 : i32
    %c0_i32_2 = arith.constant 0 : i32
    return %arg0, %c0_i32, %c0_i32_0, %c0_i32_1 : i32, i32, i32, i32
  }
}

</mosaic_0001>

<bundles_post_ra>
// kernel: _stacked_convx_forward.1
= control target key start
LH: loop header
LB: loop body
LE: loop exit
PB: predicated region body
PF: predicated region fallthrough
CT: control target
= control target key end

     0   :  { %10 = vsyncpa [#allocation5], 0  ;;  %s14681_s0 = inlined_call_operand.vmem [shape: bf16[2,16,16,4], index: 0, kind: input, shape index: {}]   ;;  %s14682_s1 = inlined_call_operand.vmem [shape: bf16[9,4,32], index: 1, kind: input, shape index: {}]   ;;  %s14683_s2 = inlined_call_operand.vmem [shape: f32[1,32], index: 2, kind: input, shape index: {}]   ;;  %s14684_s3 = inlined_call_operand.vmem [shape: bf16[2,9,32,32], index: 3, kind: input, shape index: {}]   ;;  %s14685_s4 = inlined_call_operand.vmem [shape: f32[2,1,32], index: 4, kind: input, shape index: {}]   ;;  %s14686_s5 = inlined_call_operand.hbm [shape: f32[2,16,16,32], index: 5, kind: output, shape index: {}]  }
   0x1   :  { %12 = vsyncpa [#allocation5 + $0x1], 0  ;;  %s11542_s18 = smov 0   ;;  %s11544_s19 = smov 0  }
   0x2   :  { %s11546_s20 = smov 0   ;;  %s11548_s21 = smov 0  }
   0x3   :  { %s11550_s22 = smov 0   ;;  %s11552_s23 = smov 0  }
   0x4   :  { %s11554_s24 = smov 0   ;;  %s11556_s25 = smov 0  }
   0x5 LB: > { %14695 = sst [smem:[#allocation7_spill]] %s11499_s23  ;;  %s10185_s26 = sadd.s32 4294967295, %s11507_s25   ;;  %s11507_s25 = sphi %s11556_s25, %s18_s25   ;;  %s11503_s24 = sphi %s11554_s24, %s14782_s24   ;;  %s11499_s23 = sphi %s11552_s23, %s14781_s23   ;;  %s11495_s22 = sphi %s11550_s22, %s14780_s22   ;;  %s11491_s21 = sphi %s11548_s21, %s14779_s21   ;;  %s11487_s20 = sphi %s11546_s20, %s14785_s20   ;;  %s11483_s19 = sphi %s11544_s19, %s14784_s19   ;;  %s11479_s18 = sphi %s11542_s18, %s14783_s18  }
   0x6   : > { %14696 = sst [smem:[#allocation8_spill]] %s11503_s24  ;;  %s10186_s27 = sadd.s32 4294967294, %s11507_s25  }
   0x7   : > { %s27_s28 = sadd.s32 1, %s11499_s23  ;;  %s30_s29 = sadd.s32 1, %s11503_s24 }
   0x8   : > { %p28_p0 = scmp.ge.s32.totalorder %s27_s28, 3  ;;  %p179_p1 = scmp.ne.s32.totalorder %s11487_s20, %s11483_s19 }
   0x9   : > { %p180_p2 = scmp.eq.s32.totalorder %s10185_s26, 5  ;;  %p185_p4 = scmp.ne.s32.totalorder %s11483_s19, %s11479_s18 }
   0xa   : > { %s14787_s28 = smov (%p28_p0, %s27_s28), 0  ;;  %s14789_s29 = smov (!%p28_p0, %s30_s29), %s11503_s24 }
   0xb   : > { %14697 = sst [smem:[#allocation9_spill]] %s14787_s28  ;;  %p11591_p3 = por %p180_p2, %p179_p1 }
   0xc   : > { %p32_p5 = scmp.ge.s32.totalorder %s14789_s29, 2  ;;  %p186_p6 = scmp.eq.s32.totalorder %s10186_s27, 5 }
   0xd   : > { %p10193_p7 = scmp.ge.s32.totalorder %s11507_s25, 1  ;;  %p244_p8 = scmp.lt.s32.totalorder %s11507_s25, 7 }
   0xe   : > { %s14791_s29 = smov (%p32_p5, %s14789_s29), 0  ;;  %p11601_p9 = por %p186_p6, %p185_p4 }
   0xf   : > { %14699 = sst [smem:[#allocation10_spill]] %s14791_s29  ;;  %p245_p10 = pnand %p10193_p7, %p244_p8 }
  0x10   : > { %s166_s7 = ssub.s32 %s11503_s24, %s14791_s29  ;;  %s169_s8 = sadd.s32 1, %s11487_s20 }
  0x11   : > { %p167_p11 = scmp.eq.s32.totalorder %s166_s7, 0  ;;  %248 = sbr.rel (%p245_p10) target bundleno = 1740 (0x6cc), region = 40 }
  0x12   : > { %s14688_s10 = sand.u32 (!%p245_p10), 1, %s11483_s19   ;;  %p286_p12 = scmp.lt.s32.totalorder (!%p245_p10), %s11495_s22, 1 }
  0x13   : > { %s11609_s9 = scalar_select %p167_p11, %s11487_s20, %s169_s8  }
  0x14   : > { %s10194_s11 = sshll.u32 (!%p245_p10), %s14688_s10, 8  ;;  %s10197_s12 = sadd.s32 (!%p245_p10), 4294967295, %s11491_s21 }
  0x15   : > { %p292_p13 = scmp.gt.s32.totalorder (!%p245_p10), %s10197_s12, 0  ;;  %p10198_p0 = scmp.lt.s32.totalorder (!%p245_p10), %s10197_s12, 1 }
  0x16   : > { %s287_s13 = scalar_select %p286_p12, %s11495_s22, 1 }
  0x17   : > { %s293_s14 = scalar_select %p292_p13, %s10197_s12, 0 }
  0x18   : > { %s11099_s15 = sshll.u32 %s287_s13, 7  ;;  %s11632_s23 = scalar_lea.vmem [#allocation4], %s10194_s11 }
  0x19   : > { %s11620_s26 = scalar_lea.vmem %s14681_s0, %s11099_s15  ;;  %s14793_s14 = smov (!%p10198_p0, %s293_s14), 1 }
  0x1a   : > { %s11228_s27 = smul.u32 144, %s14793_s14  ;;  %s11625_s29 = scalar_lea.vmem %s14685_s4, %s14793_s14 }
  0x1b   : > { %p10210_p1 = scmp.ne.s32.totalorder %s11491_s21, 0 }
  0x1c   : > { %s11630_s24 = scalar_lea.vmem %s14684_s3, %s11228_s27 }
  0x1d   : > { %315 = sbr.rel (%p10210_p1) target bundleno = 870 (0x366), region = 44 }
  0x22   : > { %v10211_v0 = vld [vmem:[%s14682_s1 + $0x2] sm:$0x3]  ;;  %vm1563_vm0 = vcmask 1041408   ;;  %vm319_vm1 = vcmask 24576   ;;  %vm326_vm2 = vsmask.f32 256 }
  0x23   : > { %v1565_v1 = vsel %vm1563_vm0, %v10211_v0, 0  ;;  %v340_v2 = vld [vmem:[#allocation2 + $0x30] sm:$0x1]  ;;  %vm11641_vm3 = vmand %vm319_vm1, %vm326_vm2  ;;  %vm382_vm4 = vsmask.f32 7938  ;;  %vm316_vm7 = vcmask 27648  }
  0x24   : > { %11219 = vmatpush.bf16.msra.mxu1 %v1565_v1  ;;  %11220 = vmatpush.bf16.msra.mxu2 %v1565_v1  ;;  %v396_v4 = vld [vmem:[#allocation2 + $0x38] sm:$0x1]  ;;  %v341_v6 = vsel %vm11641_vm3, 0, %v340_v2  ;;  %vm11650_vm5 = vmand %vm319_vm1, %vm382_vm4  ;;  %v565_v8 = vld [vmem:[%s11620_s26 + $0x1c] sm:$0xf]  ;;  %vm441_vm13 = vcmask 253952  }
  0x25   : > { %v564_v5 = vld [vmem:[%s11620_s26 + $0x18] sm:$0xf]  ;;  %11221 = vmatpush.bf16.msra.mxu3 %v1565_v1  ;;  %1574 = vmatpush.bf16.msra.mxu0 %v1565_v1  ;;  %vm590_vm6 = vsmask.f32 4368  ;;  %342 = vst [vmem:[#allocation2 + $0x30] sm:$0x1] %v341_v6  ;;  %vm11670_vm9 = vmand %vm316_vm7, %vm382_vm4 }
  0x26   : > { %v644_v9 = vshrl.u32 %v564_v5, 16  ;;  %v397_v10 = vsel %vm11650_vm5, 0, %v396_v4  ;;  %v647_v11 = vshll.u32 %v564_v5, 16  ;;  %v652_v12 = vshrl.u32 %v565_v8, 16  ;;  %v352_v16 = vld [vmem:[#allocation2 + $0x60] sm:$0x1]  ;;  %vm11658_vm8 = vmor %vm326_vm2, %vm590_vm6 }
  0x27   : > { %v655_v13 = vshll.u32 %v565_v8, 16  ;;  %398 = vst [vmem:[#allocation2 + $0x38] sm:$0x1] %v397_v10  ;;  %v353_v19 = vsel %vm11641_vm3, 0, %v352_v16  ;;  %v408_v20 = vld [vmem:[#allocation2 + $0x68] sm:$0x1]  ;;  %vm11756_vm6 = vmand %vm441_vm13, %vm326_vm2 }
  0x28   : > { %v646_v14 = vrot.slane %v644_v9, 7  ;;  %v654_v15 = vrot.slane %v652_v12, 7  ;;  %v572_v21 = vld [vmem:[%s11620_s26 + $0x38] sm:$0xf]  ;;  %354 = vst [vmem:[#allocation2 + $0x60] sm:$0x1] %v353_v19  ;;  %vm11770_vm2 = vmand %vm441_vm13, %vm382_vm4 }
  0x29   : > { %v409_v25 = vsel %vm11650_vm5, 0, %v408_v20  ;;  %v573_v26 = vld [vmem:[%s11620_s26 + $0x3c] sm:$0xf]  ;;  %v712_v28 = vshrl.u32 %v572_v21, 16  ;;  %v715_v29 = vshll.u32 %v572_v21, 16  ;;  %v11509_v8 = vmov 0  }
  0x2a   : > { %v650_v18 = vrot.slane %v646_v14, 4  ;;  %v649_v22 = vor.u32 %v647_v11, %v646_v14  ;;  %v657_v23 = vor.u32 %v655_v13, %v654_v15  ;;  %v659_v24 = vrot.slane %v654_v15, 4  ;;  %410 = vst [vmem:[#allocation2 + $0x68] sm:$0x1] %v409_v25  ;;  %v364_v33 = vld [vmem:[#allocation2 + $0x90] sm:$0x1] }
  0x2b   : > { %v720_v30 = vshrl.u32 %v573_v26, 16  ;;  %v723_v31 = vshll.u32 %v573_v26, 16  ;;  %v420_v34 = vld [vmem:[#allocation2 + $0x98] sm:$0x1]  ;;  %v714_v37 = vrot.slane %v712_v28, 7  ;;  %v365_v41 = vsel %vm11641_vm3, 0, %v364_v33 }
  0x2c   : > { %v658_v32 = vsel %vm11658_vm8, %v650_v18, %v657_v23  ;;  %v580_v35 = vld [vmem:[%s11620_s26 + $0x58] sm:$0xf]  ;;  %v936_v36 = vld [vmem:[#allocation2 + $0x30] sm:$0xf]  ;;  %v581_v42 = vld [vmem:[%s11620_s26 + $0x5c] sm:$0xf] }
  0x2d   : > { %939 = vst.msk [vmem:[#allocation2 + $0x34] sm:$0xf] %vm316_vm7, %v658_v32  ;;  %v722_v38 = vrot.slane %v720_v30, 7  ;;  %v937_v39 = vsel %vm11670_vm9, %v649_v22, %v936_v36  ;;  %vm1077_vm10 = vsmask.f32 3328  ;;  %v717_v44 = vor.u32 %v715_v29, %v714_v37 }
  0x2e   : > { %v940_v40 = vld [vmem:[#allocation2 + $0x38] sm:$0x1]  ;;  %938 = vst [vmem:[#allocation2 + $0x30] sm:$0xf] %v937_v39  ;;  %v718_v45 = vrot.slane %v714_v37, 4  ;;  %v421_v48 = vsel %vm11650_vm5, 0, %v420_v34 }
  0x2f   : > { %v941_v43 = vsel %vm11641_vm3, %v659_v24, %v940_v40  ;;  %v725_v46 = vor.u32 %v723_v31, %v722_v38  ;;  %v727_v47 = vrot.slane %v722_v38, 4  ;;  %v780_v49 = vshrl.u32 %v580_v35, 16  ;;  %v964_v52 = vld [vmem:[#allocation2 + $0x60] sm:$0xf]  ;;  %366 = vst [vmem:[#allocation2 + $0x90] sm:$0x1] %v365_v41 }
  0x30   : > { %942 = vst [vmem:[#allocation2 + $0x38] sm:$0x1] %v941_v43  ;;  %v788_v50 = vshrl.u32 %v581_v42, 16  ;;  %v783_v53 = vshll.u32 %v580_v35, 16  ;;  %v791_v54 = vshll.u32 %v581_v42, 16  ;;  %v965_v55 = vsel %vm11670_vm9, %v717_v44, %v964_v52 }
  0x31   : > { %v726_v51 = vsel %vm11658_vm8, %v718_v45, %v725_v46  ;;  %v968_v56 = vld [vmem:[#allocation2 + $0x68] sm:$0x1]  ;;  %v782_v57 = vrot.slane %v780_v49, 7  ;;  %966 = vst [vmem:[#allocation2 + $0x60] sm:$0xf] %v965_v55  ;;  %vm438_vm14 = vcmask 257024  }
  0x32   : > { %967 = vst.msk [vmem:[#allocation2 + $0x64] sm:$0xf] %vm316_vm7, %v726_v51  ;;  %v790_v58 = vrot.slane %v788_v50, 7  ;;  %v969_v59 = vsel %vm11641_vm3, %v727_v47, %v968_v56  ;;  %v10324_v60 = vld [vmem:[%s14682_s1 + $0x4] sm:$0x3]  ;;  %vm1514_vm15 = vcmask 31744  }
  0x33   : > { %970 = vst [vmem:[#allocation2 + $0x68] sm:$0x1] %v969_v59  ;;  %v786_v62 = vrot.slane %v782_v57, 4  ;;  %v785_v2 = vor.u32 %v783_v53, %v782_v57  ;;  %v2138_v4 = vsel %vm1563_vm0, %v10324_v60, 0  ;;  %vm1078_vm11 = vsmask.f32 7440 }
  0x34   : > { %v1037_v61 = vld [vmem:[#allocation2 + $0x34] sm:$0xf]  ;;  %v793_v63 = vor.u32 %v791_v54, %v790_v58  ;;  %422 = vst [vmem:[#allocation2 + $0x98] sm:$0x1] %v421_v48  ;;  %2147 = vmatpush.bf16.msrb.mxu2 %v2138_v4  ;;  %vm11709_vm12 = vmor %vm1077_vm10, %vm1078_vm11  ;;  %v795_v28 = vrot.slane %v790_v58, 4  ;;  %vm1925_vm10 = vcmask 1046532  }
  0x35   : > { %v1186_v0 = vshll.u32 %v1037_v61, 16  ;;  %v1190_v1 = vshrl.u32 %v1037_v61, 16  ;;  %v1036_v5 = vld [vmem:[#allocation2 + $0x30] sm:$0xf]  ;;  %317 = vst.msk [vmem:[#allocation2] sm:$0xf] %vm316_vm7, %v11509_v8 }
  0x36   : > { %v794_v6 = vsel %vm11658_vm8, %v786_v62, %v793_v63  ;;  %v1177_v10 = vshrl.u32 %v1036_v5, 16  ;;  %v1180_v11 = vshll.u32 %v1036_v5, 16  ;;  %v992_v15 = vld [vmem:[#allocation2 + $0x90] sm:$0xf]  ;;  %318 = vst.msk [vmem:[#allocation2 + $0x4] sm:$0xf] %vm316_vm7, %v11509_v8 }
  0x37   : > { %v1065_v9 = vld [vmem:[#allocation2 + $0x38] sm:$0x1]  ;;  %v1188_v12 = vrot.slane %v1186_v0, 5  ;;  %v1192_v13 = vrot.slane %v1190_v1, 4  ;;  %995 = vst.msk [vmem:[#allocation2 + $0x94] sm:$0xf] %vm316_vm7, %v794_v6  ;;  %v993_v21 = vsel %vm11670_vm9, %v785_v2, %v992_v15 }
  0x38   : > { %v1196_v14 = vshll.u32 %v1065_v9, 16  ;;  %v1179_v16 = vrot.slane %v1177_v10, 4  ;;  %v1182_v18 = vrot.slane %v1180_v11, 5  ;;  %v1044_v24 = vld [vmem:[#allocation2 + $0x60] sm:$0xf] }
  0x39   : > { %v1193_v19 = vor.u32 %v1192_v13, %v1188_v12  ;;  %v1045_v20 = vld [vmem:[#allocation2 + $0x64] sm:$0xf]  ;;  %v1273_v32 = vshrl.u32 %v1044_v24, 16  ;;  %v1276_v33 = vshll.u32 %v1044_v24, 16  ;;  %994 = vst [vmem:[#allocation2 + $0x90] sm:$0xf] %v993_v21 }
  0x3a   : > { %v1198_v23 = vrot.slane %v1196_v14, 5  ;;  %v1282_v25 = vshll.u32 %v1045_v20, 16  ;;  %v1286_v26 = vshrl.u32 %v1045_v20, 16  ;;  %v1183_v29 = vor.u32 %v1182_v18, %v1179_v16  ;;  %v1069_v31 = vld [vmem:[#allocation2 + $0x68] sm:$0x1] }
  0x3b   : > { %v1194_v30 = vrot.slane %v1193_v19, 4  ;;  %v1292_v36 = vshll.u32 %v1069_v31, 16  ;;  %v1275_v39 = vrot.slane %v1273_v32, 4  ;;  %v1278_v40 = vrot.slane %v1276_v33, 5  ;;  %v996_v41 = vld [vmem:[#allocation2 + $0x98] sm:$0x1] }
  0x3c   : > { %v1284_v34 = vrot.slane %v1282_v25, 5  ;;  %v1288_v35 = vrot.slane %v1286_v26, 4  ;;  %v1184_v37 = vrot.slane %v1183_v29, 4  ;;  %v997_v45 = vsel %vm11641_vm3, %v795_v28, %v996_v41  ;;  %320 = vst.msk [vmem:[#allocation2 + $0x8] sm:$0x1] %vm319_vm1, %v11509_v8 }
  0x3d   : > { %v1199_v38 = vsel %vm11709_vm12, %v1194_v30, %v1198_v23  ;;  %v1294_v44 = vrot.slane %v1292_v36, 5  ;;  %v328_v46 = vld [vmem:[#allocation2] sm:$0x1]  ;;  %v1279_v48 = vor.u32 %v1278_v40, %v1275_v39  ;;  %998 = vst [vmem:[#allocation2 + $0x98] sm:$0x1] %v997_v45  ;;  %v14711_v25 = vmov 0 }
  0x3e   : > { %v1475_v42 = vunpack.c.l.b16 %v1199_v38  ;;  %v1289_v43 = vor.u32 %v1288_v35, %v1284_v34  ;;  %v1189_v47 = vsel %vm11709_vm12, %v1184_v37, %v1188_v12  ;;  %v1053_v49 = vld [vmem:[#allocation2 + $0x94] sm:$0xf]  ;;  %v329_v50 = vsel %vm11641_vm3, 0, %v328_v46  ;;  %439 = vst.msk [vmem:[#allocation3] sm:$0xf] %vm438_vm14, %v11509_v8 }
  0x3f   : > { %v1474_v51 = vunpack.c.l.b16 %v1189_v47  ;;  %v1378_v53 = vshll.u32 %v1053_v49, 16  ;;  %v1382_v54 = vshrl.u32 %v1053_v49, 16  ;;  %330 = vst [vmem:[#allocation2] sm:$0x1] %v329_v50  ;;  %v1280_v55 = vrot.slane %v1279_v48, 4 }
  0x40   : > { %v1290_v52 = vrot.slane %v1289_v43, 4  ;;  %v1029_v56 = vld [vmem:[#allocation2 + $0x4] sm:$0xf]  ;;  %440 = vst.msk [vmem:[#allocation3 + $0x4] sm:$0xf] %vm438_vm14, %v11509_v8  ;;  %v14712_v25 = vsel %vm11756_vm6, 4294967295, %v14711_v25 }
  0x41   : > { %v1502_v57 = vpack.c.b16 %v1475_v42, %v1474_v51  ;;  %v1380_v59 = vrot.slane %v1378_v53, 5  ;;  %v1384_v60 = vrot.slane %v1382_v54, 4  ;;  %v1285_v61 = vsel %vm11709_vm12, %v1280_v55, %v1284_v34  ;;  %v1052_v63 = vld [vmem:[#allocation2 + $0x90] sm:$0xf]  ;;  %442 = vst.msk [vmem:[#allocation3 + $0x8] sm:$0x1] %vm441_vm13, %v11509_v8 }
  0x42   : > { %v1295_v58 = vsel %vm11709_vm12, %v1290_v52, %v1294_v44  ;;  %v1090_v0 = vshll.u32 %v1029_v56, 16  ;;  %v1094_v1 = vshrl.u32 %v1029_v56, 16  ;;  %v1482_v2 = vunpack.c.l.b16 %v1285_v61  ;;  %444 = vst.msk [vmem:[#allocation3 + $0xcc] sm:$0xf] %vm438_vm14, %v11509_v8  ;;  %v11736_v9 = vld [vmem:[#allocation2 + $0x3c] sm:$0x1] }
  0x43   : > { %v1483_v62 = vunpack.c.l.b16 %v1295_v58  ;;  %10216 = vmatmul.msk.bf16.vlgmr.msra.gmra.mxu1 %vm1514_vm15, %v1502_v57  ;;  %v1369_v4 = vshrl.u32 %v1052_v63, 16  ;;  %v1372_v5 = vshll.u32 %v1052_v63, 16  ;;  %v1385_v6 = vor.u32 %v1384_v60, %v1380_v59  ;;  %v384_v10 = vld [vmem:[#allocation2 + $0x8] sm:$0x1]  ;;  %445 = vst.msk [vmem:[#allocation3 + $0xd0] sm:$0xf] %vm438_vm14, %v11509_v8 }
  0x44   : > { %v11740_v11 = vrot.slane %v1090_v0, 5  ;;  %v11742_v12 = vld [vmem:[#allocation2 + $0x44] sm:$0x1]  ;;  %v1073_v14 = vld [vmem:[#allocation2 + $0x98] sm:$0x1]  ;;  %v1096_v18 = vrot.slane %v1094_v1, 4 }
  0x45   : > { %v1506_v13 = vpack.c.b16 %v1483_v62, %v1482_v2  ;;  %v1371_v15 = vrot.slane %v1369_v4, 4  ;;  %v1374_v16 = vrot.slane %v1372_v5, 5  ;;  %v1386_v19 = vrot.slane %v1385_v6, 4  ;;  %446 = vst.msk [vmem:[#allocation3 + $0xd4] sm:$0x1] %vm441_vm13, %v11509_v8 }
  0x46   : > { %v1388_v20 = vshll.u32 %v1073_v14, 16  ;;  %v385_v21 = vsel %vm11650_vm5, 0, %v384_v10  ;;  %v10341_v23 = vld [vmem:[%s14682_s1 + $0x6] sm:$0x3]  ;;  %v344_v24 = vsel %vm11641_vm3, 0, %v11736_v9  ;;  %14713 = vst [vmem:[#allocation11_spill] sm:$0xff] %v14712_v25  ;;  %v1097_v38 = vor.u32 %v1096_v18, %v11740_v11 }
  0x47   : > { %10220 = vmatmul.msk.bf16.vlgmr.msra.gmra.mxu2 %vm1514_vm15, %v1506_v13  ;;  %v1375_v26 = vor.u32 %v1374_v16, %v1371_v15  ;;  %386 = vst [vmem:[#allocation2 + $0x8] sm:$0x1] %v385_v21  ;;  %v449_v28 = vld [vmem:[#allocation3] sm:$0x1]  ;;  %v1028_v29 = vld [vmem:[#allocation2] sm:$0xf] }
  0x48   : > { %v1060_v30 = vld [vmem:[%s14682_s1] sm:$0x3]  ;;  %v1390_v31 = vrot.slane %v1388_v20, 5  ;;  %v450_v32 = vsel %vm11756_vm6, 0, %v449_v28  ;;  %v1081_v33 = vshrl.u32 %v1028_v29, 16  ;;  %v1084_v34 = vshll.u32 %v1028_v29, 16 }
  0x49   : > { %322 = vst.msk [vmem:[#allocation2 + $0xcc] sm:$0xf] %vm316_vm7, %v11509_v8  ;;  %v1376_v35 = vrot.slane %v1375_v26, 4  ;;  %v14714_v36 = vmov 0  ;;  %v504_v37 = vld [vmem:[#allocation3 + $0x8] sm:$0x1] }
  0x4a   : > { %451 = vst [vmem:[#allocation3] sm:$0x1] %v450_v32  ;;  %v14715_v36 = vsel %vm11770_vm2, 4294967295, %v14714_v36  ;;  %v400_v39 = vsel %vm11650_vm5, 0, %v11742_v12  ;;  %v1391_v40 = vsel %vm11709_vm12, %v1386_v19, %v1390_v31  ;;  %v500_v41 = vld [vmem:[#allocation3 + $0xcc] sm:$0x1] }
  0x4b   : > { %14716 = vst [vmem:[#allocation12_spill] sm:$0xff] %v14715_v36  ;;  %v505_v42 = vsel %vm11770_vm2, 0, %v504_v37  ;;  %v1083_v43 = vrot.slane %v1081_v33, 4  ;;  %v1086_v44 = vrot.slane %v1084_v34, 5  ;;  %v1381_v45 = vsel %vm11709_vm12, %v1376_v35, %v1380_v59  ;;  %v10422_v49 = vld [vmem:[%s14682_s1 + $0x8] sm:$0x3] }
  0x4c   : > { %v1491_v46 = vunpack.c.l.b16 %v1391_v40  ;;  %v501_v47 = vsel %vm11756_vm6, 0, %v500_v41  ;;  %506 = vst [vmem:[#allocation3 + $0x8] sm:$0x1] %v505_v42  ;;  %v2424_v48 = vsel %vm1563_vm0, %v10341_v23, 0  ;;  %v1490_v50 = vunpack.c.l.b16 %v1381_v45  ;;  %v566_v54 = vld [vmem:[%s11620_s26 + $0x20] sm:$0xf] }
  0x4d   : > { %502 = vst [vmem:[#allocation3 + $0xcc] sm:$0x1] %v501_v47  ;;  %v1087_v51 = vor.u32 %v1086_v44, %v1083_v43  ;;  %2433 = vmatpush.bf16.msrb.mxu3 %v2424_v48  ;;  %v1785_v52 = vsel %vm1563_vm0, %v1060_v30, 0  ;;  %v3078_v53 = vsel %vm1563_vm0, %v10422_v49, 0  ;;  %v555_v55 = vld [vmem:[#allocation3 + $0xd4] sm:$0x1] }
  0x4e   : > { %323 = vst.msk [vmem:[#allocation2 + $0xd0] sm:$0xf] %vm316_vm7, %v11509_v8  ;;  %1794 = vmatpush.bf16.msrb.mxu1 %v1785_v52  ;;  %3087 = vmatpush.bf16.msrb.mxu0 %v3078_v53  ;;  %v567_v56 = vld [vmem:[%s11620_s26 + $0x24] sm:$0xf]  ;;  %v1510_v57 = vpack.c.b16 %v1491_v46, %v1490_v50  ;;  %v556_v58 = vsel %vm11770_vm2, 0, %v555_v55  ;;  %v1098_v61 = vrot.slane %v1097_v38, 4 }
  0x4f   : > { %v1061_v59 = vld [vmem:[#allocation2 + $0x8] sm:$0x1]  ;;  %v1088_v60 = vrot.slane %v1087_v51, 4  ;;  %324 = vst.msk [vmem:[#allocation2 + $0xd4] sm:$0x1] %vm319_vm1, %v11509_v8  ;;  %v661_v63 = vshrl.u32 %v566_v54, 16 }
  0x50   : > { %557 = vst [vmem:[#allocation3 + $0xd4] sm:$0x1] %v556_v58  ;;  %v1100_v62 = vshll.u32 %v1061_v59, 16  ;;  %v664_v0 = vshll.u32 %v566_v54, 16  ;;  %10224 = vmatmul.msk.bf16.vlgmr.msra.gmra.mxu3 %vm1514_vm15, %v1510_v57  ;;  %v669_v2 = vshrl.u32 %v567_v56, 16  ;;  %v672_v4 = vshll.u32 %v567_v56, 16 }
  0x51   : > { %v1093_v1 = vsel %vm11709_vm12, %v1088_v60, %v11740_v11  ;;  %345 = vst [vmem:[#allocation2 + $0x3c] sm:$0x1] %v344_v24  ;;  %v355_v5 = vld [vmem:[#allocation2 + $0x6c] sm:$0x1]  ;;  %v663_v8 = vrot.slane %v661_v63, 7  ;;  %vm1924_vm1 = vcmask 1042432  }
  0x52   : > { %v1102_v6 = vrot.slane %v1100_v62, 5  ;;  %401 = vst [vmem:[#allocation2 + $0x44] sm:$0x1] %v400_v39  ;;  %v356_v9 = vsel %vm11641_vm3, 0, %v355_v5  ;;  %v1466_v10 = vunpack.c.l.b16 %v1093_v1  ;;  %v671_v12 = vrot.slane %v669_v2, 7  ;;  %vm12036_vm11 = vmor %vm1924_vm1, %vm1925_vm10 }
  0x53   : > { %357 = vst [vmem:[#allocation2 + $0x6c] sm:$0x1] %v356_v9  ;;  %v411_v13 = vld [vmem:[#allocation2 + $0x74] sm:$0x1]  ;;  %v666_v11 = vor.u32 %v664_v0, %v663_v8  ;;  %v667_v15 = vrot.slane %v663_v8, 4 }
  0x54   : > { %v1103_v14 = vsel %vm11709_vm12, %v1098_v61, %v1102_v6  ;;  %v412_v16 = vsel %vm11650_vm5, 0, %v411_v13  ;;  %v574_v18 = vld [vmem:[%s11620_s26 + $0x40] sm:$0xf]  ;;  %v575_v19 = vld [vmem:[%s11620_s26 + $0x44] sm:$0xf]  ;;  %v674_v21 = vor.u32 %v672_v4, %v671_v12  ;;  %v676_v23 = vrot.slane %v671_v12, 4 }
  0x55   : > { %v1467_v20 = vunpack.c.l.b16 %v1103_v14  ;;  %413 = vst [vmem:[#allocation2 + $0x74] sm:$0x1] %v412_v16  ;;  %v729_v24 = vshrl.u32 %v574_v18, 16  ;;  %v367_v26 = vld [vmem:[#allocation2 + $0x9c] sm:$0x1]  ;;  %v732_v28 = vshll.u32 %v574_v18, 16 }
  0x56   : > { %v737_v29 = vshrl.u32 %v575_v19, 16  ;;  %v740_v30 = vshll.u32 %v575_v19, 16  ;;  %v368_v31 = vsel %vm11641_vm3, 0, %v367_v26  ;;  %v423_v32 = vld [vmem:[#allocation2 + $0xa4] sm:$0x1]  ;;  %v675_v34 = vsel %vm11658_vm8, %v667_v15, %v674_v21 }
  0x57   : > { %v1498_v33 = vpack.c.b16 %v1467_v20, %v1466_v10  ;;  %v731_v35 = vrot.slane %v729_v24, 7  ;;  %369 = vst [vmem:[#allocation2 + $0x9c] sm:$0x1] %v368_v31  ;;  %v424_v37 = vsel %vm11650_vm5, 0, %v423_v32  ;;  %v582_v38 = vld [vmem:[%s11620_s26 + $0x60] sm:$0xf] }
  0x58   : > { %v943_v39 = vld [vmem:[#allocation2 + $0x3c] sm:$0xf]  ;;  %946 = vst.msk [vmem:[#allocation2 + $0x40] sm:$0xf] %vm316_vm7, %v675_v34  ;;  %v739_v40 = vrot.slane %v737_v29, 7  ;;  %v797_v41 = vshrl.u32 %v582_v38, 16 }
  0x59   : > { %10212 = vmatmul.msk.bf16.vlgmr.msra.gmra.mxu0 %vm1514_vm15, %v1498_v33  ;;  %v944_v42 = vsel %vm11670_vm9, %v666_v11, %v943_v39  ;;  %v947_v43 = vld [vmem:[#allocation2 + $0x44] sm:$0x1]  ;;  %v734_v44 = vor.u32 %v732_v28, %v731_v35  ;;  %v735_v45 = vrot.slane %v731_v35, 4  ;;  %425 = vst [vmem:[#allocation2 + $0xa4] sm:$0x1] %v424_v37  ;;  %v800_v46 = vshll.u32 %v582_v38, 16 }
  0x5a   : > { %945 = vst [vmem:[#allocation2 + $0x3c] sm:$0xf] %v944_v42  ;;  %v948_v47 = vsel %vm11641_vm3, %v676_v23, %v947_v43  ;;  %v742_v48 = vor.u32 %v740_v30, %v739_v40  ;;  %v744_v49 = vrot.slane %v739_v40, 4  ;;  %v971_v50 = vld [vmem:[#allocation2 + $0x6c] sm:$0xf]  ;;  %v799_v51 = vrot.slane %v797_v41, 7 }
  0x5b   : > { %949 = vst [vmem:[#allocation2 + $0x44] sm:$0x1] %v948_v47  ;;  %v972_v52 = vsel %vm11670_vm9, %v734_v44, %v971_v50  ;;  %v583_v53 = vld [vmem:[%s11620_s26 + $0x64] sm:$0xf]  ;;  %v331_v54 = vld [vmem:[#allocation2 + $0xc] sm:$0x1] }
  0x5c   : > { %v743_v55 = vsel %vm11658_vm8, %v735_v45, %v742_v48  ;;  %973 = vst [vmem:[#allocation2 + $0x6c] sm:$0xf] %v972_v52  ;;  %v975_v56 = vld [vmem:[#allocation2 + $0x74] sm:$0x1]  ;;  %v802_v57 = vor.u32 %v800_v46, %v799_v51  ;;  %v803_v58 = vrot.slane %v799_v51, 4  ;;  %v805_v59 = vshrl.u32 %v583_v53, 16 }
  0x5d   : > { %974 = vst.msk [vmem:[#allocation2 + $0x70] sm:$0xf] %vm316_vm7, %v743_v55  ;;  %v976_v60 = vsel %vm11641_vm3, %v744_v49, %v975_v56  ;;  %v808_v61 = vshll.u32 %v583_v53, 16  ;;  %v332_v62 = vsel %vm11641_vm3, 0, %v331_v54  ;;  %v387_v63 = vld [vmem:[#allocation2 + $0x14] sm:$0x1] }
  0x5e   : > { %977 = vst [vmem:[#allocation2 + $0x74] sm:$0x1] %v976_v60  ;;  %v807_v0 = vrot.slane %v805_v59, 7  ;;  %v999_v1 = vld [vmem:[#allocation2 + $0x9c] sm:$0xf]  ;;  %v388_v2 = vsel %vm11650_vm5, 0, %v387_v63 }
  0x5f   : > { %v1039_v4 = vld [vmem:[#allocation2 + $0x40] sm:$0xf]  ;;  %v1000_v5 = vsel %vm11670_vm9, %v802_v57, %v999_v1  ;;  %333 = vst [vmem:[#allocation2 + $0xc] sm:$0x1] %v332_v62  ;;  %v559_v55 = vld [vmem:[%s11620_s26 + $0x4] sm:$0xf] }
  0x60   : > { %v558_v6 = vld [vmem:[%s11620_s26] sm:$0xf]  ;;  %v1210_v8 = vshll.u32 %v1039_v4, 16  ;;  %v1214_v9 = vshrl.u32 %v1039_v4, 16  ;;  %v810_v10 = vor.u32 %v808_v61, %v807_v0  ;;  %v812_v12 = vrot.slane %v807_v0, 4 }
  0x61   : > { %1001 = vst [vmem:[#allocation2 + $0x9c] sm:$0xf] %v1000_v5  ;;  %v1038_v13 = vld [vmem:[#allocation2 + $0x3c] sm:$0xf]  ;;  %v1003_v14 = vld [vmem:[#allocation2 + $0xa4] sm:$0x1] }
  0x62   : > { %389 = vst [vmem:[#allocation2 + $0x14] sm:$0x1] %v388_v2  ;;  %v1066_v11 = vld [vmem:[#allocation2 + $0x44] sm:$0x1]  ;;  %v1201_v15 = vshrl.u32 %v1038_v13, 16  ;;  %v1204_v16 = vshll.u32 %v1038_v13, 16  ;;  %v811_v23 = vsel %vm11658_vm8, %v803_v58, %v810_v10  ;;  %v1004_v24 = vsel %vm11641_vm3, %v812_v12, %v1003_v14 }
  0x63   : > { %v1212_v18 = vrot.slane %v1210_v8, 5  ;;  %v1216_v19 = vrot.slane %v1214_v9, 4  ;;  %v1220_v20 = vshll.u32 %v1066_v11, 16  ;;  %v1046_v21 = vld [vmem:[#allocation2 + $0x6c] sm:$0xf]  ;;  %v593_v26 = vshrl.u32 %v558_v6, 16 }
  0x64   : > { %v1203_v28 = vrot.slane %v1201_v15, 4  ;;  %v1206_v29 = vrot.slane %v1204_v16, 5  ;;  %v1047_v31 = vld [vmem:[#allocation2 + $0x70] sm:$0xf]  ;;  %v1297_v32 = vshrl.u32 %v1046_v21, 16  ;;  %v1300_v35 = vshll.u32 %v1046_v21, 16 }
  0x65   : > { %v1217_v30 = vor.u32 %v1216_v19, %v1212_v18  ;;  %v1222_v33 = vrot.slane %v1220_v20, 5  ;;  %v1070_v34 = vld [vmem:[#allocation2 + $0x74] sm:$0x1]  ;;  %v1306_v37 = vshll.u32 %v1047_v31, 16  ;;  %v1310_v38 = vshrl.u32 %v1047_v31, 16 }
  0x66   : > { %v1207_v39 = vor.u32 %v1206_v29, %v1203_v28  ;;  %v1299_v41 = vrot.slane %v1297_v32, 4  ;;  %v1316_v42 = vshll.u32 %v1070_v34, 16  ;;  %1002 = vst.msk [vmem:[#allocation2 + $0xa0] sm:$0xf] %vm316_vm7, %v811_v23  ;;  %v1302_v43 = vrot.slane %v1300_v35, 5 }
  0x67   : > { %v1218_v40 = vrot.slane %v1217_v30, 4  ;;  %v1308_v44 = vrot.slane %v1306_v37, 5  ;;  %v1312_v45 = vrot.slane %v1310_v38, 4  ;;  %1005 = vst [vmem:[#allocation2 + $0xa4] sm:$0x1] %v1004_v24  ;;  %v595_v50 = vrot.slane %v593_v26, 7 }
  0x68   : > { %v1208_v46 = vrot.slane %v1207_v39, 4  ;;  %v1318_v48 = vrot.slane %v1316_v42, 5  ;;  %v1054_v49 = vld [vmem:[#allocation2 + $0x9c] sm:$0xf]  ;;  %v1303_v52 = vor.u32 %v1302_v43, %v1299_v41  ;;  %v596_v58 = vshll.u32 %v558_v6, 16 }
  0x69   : > { %v1223_v47 = vsel %vm11709_vm12, %v1218_v40, %v1222_v33  ;;  %v1313_v53 = vor.u32 %v1312_v45, %v1308_v44  ;;  %v1393_v54 = vshrl.u32 %v1054_v49, 16  ;;  %v1396_v57 = vshll.u32 %v1054_v49, 16  ;;  %v346_v59 = vld [vmem:[#allocation2 + $0x48] sm:$0x1]  ;;  %v915_v5 = vld [vmem:[#allocation2 + $0xc] sm:$0xf] }
  0x6a   : > { %v1477_v51 = vunpack.c.l.b16 %v1223_v47  ;;  %v1213_v56 = vsel %vm11709_vm12, %v1208_v46, %v1212_v18  ;;  %v1304_v61 = vrot.slane %v1303_v52, 4  ;;  %v598_v1 = vor.u32 %v596_v58, %v595_v50  ;;  %v402_v13 = vld [vmem:[#allocation2 + $0x50] sm:$0x1]  ;;  %v919_v19 = vld [vmem:[#allocation2 + $0x14] sm:$0x1] }
  0x6b   : > { %v1476_v60 = vunpack.c.l.b16 %v1213_v56  ;;  %v1314_v62 = vrot.slane %v1313_v53, 4  ;;  %v1395_v63 = vrot.slane %v1393_v54, 4  ;;  %v1398_v0 = vrot.slane %v1396_v57, 5  ;;  %v568_v26 = vld [vmem:[%s11620_s26 + $0x28] sm:$0xf] }
  0x6c   : > { %v601_v2 = vshrl.u32 %v559_v55, 16  ;;  %v604_v4 = vshll.u32 %v559_v55, 16  ;;  %v1309_v9 = vsel %vm11709_vm12, %v1304_v61, %v1308_v44  ;;  %v347_v6 = vsel %vm11641_vm3, 0, %v346_v59  ;;  %v569_v32 = vld [vmem:[%s11620_s26 + $0x2c] sm:$0xf] }
  0x6d   : > { %v1503_v8 = vpack.c.b16 %v1477_v51, %v1476_v60  ;;  %v1319_v10 = vsel %vm11709_vm12, %v1314_v62, %v1318_v48  ;;  %v1055_v12 = vld [vmem:[#allocation2 + $0xa0] sm:$0xf]  ;;  %v1484_v14 = vunpack.c.l.b16 %v1309_v9  ;;  %v1399_v16 = vor.u32 %v1398_v0, %v1395_v63  ;;  %348 = vst [vmem:[#allocation2 + $0x48] sm:$0x1] %v347_v6  ;;  %v358_v33 = vld [vmem:[#allocation2 + $0x78] sm:$0x1] }
  0x6e   : > { %v1485_v11 = vunpack.c.l.b16 %v1319_v10  ;;  %v1074_v15 = vld [vmem:[#allocation2 + $0xa4] sm:$0x1]  ;;  %v1402_v18 = vshll.u32 %v1055_v12, 16  ;;  %v1406_v20 = vshrl.u32 %v1055_v12, 16  ;;  %v599_v23 = vrot.slane %v595_v50, 4 }
  0x6f   : > { %10217 = vmatmul.msk.bf16.gmra.mxu1 %vm1514_vm15, %v1503_v8  ;;  %v1412_v21 = vshll.u32 %v1074_v15, 16  ;;  %v603_v24 = vrot.slane %v601_v2, 7  ;;  %v1400_v29 = vrot.slane %v1399_v16, 4  ;;  %v916_v31 = vsel %vm11670_vm9, %v598_v1, %v915_v5  ;;  %v414_v38 = vld [vmem:[#allocation2 + $0x80] sm:$0x1] }
  0x70   : > { %v1507_v28 = vpack.c.b16 %v1485_v11, %v1484_v14  ;;  %v1404_v30 = vrot.slane %v1402_v18, 5  ;;  %v1408_v34 = vrot.slane %v1406_v20, 4  ;;  %917 = vst [vmem:[#allocation2 + $0xc] sm:$0xf] %v916_v31  ;;  %v403_v40 = vsel %vm11650_vm5, 0, %v402_v13 }
  0x71   : > { %v606_v35 = vor.u32 %v604_v4, %v603_v24  ;;  %v608_v37 = vrot.slane %v603_v24, 4  ;;  %v678_v41 = vshrl.u32 %v568_v26, 16  ;;  %v681_v42 = vshll.u32 %v568_v26, 16  ;;  %v576_v43 = vld [vmem:[%s11620_s26 + $0x48] sm:$0xf] }
  0x72   : > { %10221 = vmatmul.msk.bf16.gmra.mxu2 %vm1514_vm15, %v1507_v28  ;;  %v1405_v39 = vsel %vm11709_vm12, %v1400_v29, %v1404_v30  ;;  %v1409_v44 = vor.u32 %v1408_v34, %v1404_v30  ;;  %v1414_v45 = vrot.slane %v1412_v21, 5  ;;  %404 = vst [vmem:[#allocation2 + $0x50] sm:$0x1] %v403_v40  ;;  %v577_v48 = vld [vmem:[%s11620_s26 + $0x4c] sm:$0xf]  ;;  %v686_v50 = vshrl.u32 %v569_v32, 16 }
  0x73   : > { %v607_v46 = vsel %vm11658_vm8, %v599_v23, %v606_v35  ;;  %v920_v47 = vsel %vm11641_vm3, %v608_v37, %v919_v19  ;;  %v680_v49 = vrot.slane %v678_v41, 7  ;;  %v689_v51 = vshll.u32 %v569_v32, 16  ;;  %v370_v57 = vld [vmem:[#allocation2 + $0xa8] sm:$0x1]  ;;  %v11877_v58 = vld [vmem:[#allocation2 + $0xb0] sm:$0x1] }
  0x74   : > { %918 = vst.msk [vmem:[#allocation2 + $0x10] sm:$0xf] %vm316_vm7, %v607_v46  ;;  %v359_v52 = vsel %vm11641_vm3, 0, %v358_v33  ;;  %v1410_v53 = vrot.slane %v1409_v44, 4  ;;  %v1492_v54 = vunpack.c.l.b16 %v1405_v39  ;;  %v950_v55 = vld [vmem:[#allocation2 + $0x48] sm:$0xf] }
  0x75   : > { %921 = vst [vmem:[#allocation2 + $0x14] sm:$0x1] %v920_v47  ;;  %v415_v56 = vsel %vm11650_vm5, 0, %v414_v38  ;;  %v683_v59 = vor.u32 %v681_v42, %v680_v49  ;;  %v684_v60 = vrot.slane %v680_v49, 4  ;;  %v688_v61 = vrot.slane %v686_v50, 7 }
  0x76   : > { %360 = vst [vmem:[#allocation2 + $0x78] sm:$0x1] %v359_v52  ;;  %v746_v62 = vshrl.u32 %v576_v43, 16  ;;  %v1415_v63 = vsel %vm11709_vm12, %v1410_v53, %v1414_v45  ;;  %v749_v0 = vshll.u32 %v576_v43, 16  ;;  %v754_v1 = vshrl.u32 %v577_v48, 16 }
  0x77   : > { %416 = vst [vmem:[#allocation2 + $0x80] sm:$0x1] %v415_v56  ;;  %v757_v2 = vshll.u32 %v577_v48, 16  ;;  %v1493_v4 = vunpack.c.l.b16 %v1415_v63  ;;  %v1030_v5 = vld [vmem:[#allocation2 + $0xc] sm:$0xf]  ;;  %v691_v8 = vor.u32 %v689_v51, %v688_v61  ;;  %v693_v9 = vrot.slane %v688_v61, 4 }
  0x78   : > { %v951_v10 = vsel %vm11670_vm9, %v683_v59, %v950_v55  ;;  %v1105_v12 = vshrl.u32 %v1030_v5, 16  ;;  %v1108_v6 = vshll.u32 %v1030_v5, 16  ;;  %v748_v13 = vrot.slane %v746_v62, 7  ;;  %v584_v28 = vld [vmem:[%s11620_s26 + $0x68] sm:$0xf] }
  0x79   : > { %952 = vst [vmem:[#allocation2 + $0x48] sm:$0xf] %v951_v10  ;;  %v756_v14 = vrot.slane %v754_v1, 7  ;;  %v1511_v11 = vpack.c.b16 %v1493_v4, %v1492_v54  ;;  %v692_v15 = vsel %vm11658_vm8, %v684_v60, %v691_v8  ;;  %v954_v16 = vld [vmem:[#allocation2 + $0x50] sm:$0x1]  ;;  %v371_v18 = vsel %vm11641_vm3, 0, %v370_v57 }
  0x7a   : > { %v427_v19 = vsel %vm11650_vm5, 0, %v11877_v58  ;;  %v1107_v21 = vrot.slane %v1105_v12, 4  ;;  %v1110_v23 = vrot.slane %v1108_v6, 5  ;;  %953 = vst.msk [vmem:[#allocation2 + $0x4c] sm:$0xf] %vm316_vm7, %v692_v15  ;;  %v955_v24 = vsel %vm11641_vm3, %v693_v9, %v954_v16 }
  0x7b   : > { %v11890_v20 = vld [vmem:[#allocation2 + $0x10] sm:$0xf]  ;;  %v751_v26 = vor.u32 %v749_v0, %v748_v13  ;;  %10225 = vmatmul.msk.bf16.gmra.mxu3 %vm1514_vm15, %v1511_v11  ;;  %956 = vst [vmem:[#allocation2 + $0x50] sm:$0x1] %v955_v24  ;;  %v759_v32 = vor.u32 %v757_v2, %v756_v14  ;;  %v585_v33 = vld [vmem:[%s11620_s26 + $0x6c] sm:$0xf] }
  0x7c   : > { %v11897_v29 = vld [vmem:[#allocation2 + $0x14] sm:$0x1]  ;;  %v1114_v30 = vshll.u32 %v11890_v20, 16  ;;  %v1118_v31 = vshrl.u32 %v11890_v20, 16  ;;  %v1111_v34 = vor.u32 %v1110_v23, %v1107_v21  ;;  %v752_v37 = vrot.slane %v748_v13, 4 }
  0x7d   : > { %v1124_v35 = vshll.u32 %v11897_v29, 16  ;;  %v761_v38 = vrot.slane %v756_v14, 4  ;;  %v978_v39 = vld [vmem:[#allocation2 + $0x78] sm:$0xf]  ;;  %372 = vst [vmem:[#allocation2 + $0xa8] sm:$0x1] %v371_v18 }
  0x7e   : > { %v1116_v40 = vrot.slane %v1114_v30, 5  ;;  %v1120_v41 = vrot.slane %v1118_v31, 4  ;;  %v979_v42 = vsel %vm11670_vm9, %v751_v26, %v978_v39  ;;  %v982_v43 = vld [vmem:[#allocation2 + $0x80] sm:$0x1]  ;;  %v1112_v44 = vrot.slane %v1111_v34, 4 }
  0x7f   : > { %v1126_v45 = vrot.slane %v1124_v35, 5  ;;  %v760_v46 = vsel %vm11658_vm8, %v752_v37, %v759_v32  ;;  %980 = vst [vmem:[#allocation2 + $0x78] sm:$0xf] %v979_v42  ;;  %v983_v47 = vsel %vm11641_vm3, %v761_v38, %v982_v43  ;;  %v814_v50 = vshrl.u32 %v584_v28, 16  ;;  %v334_v34 = vld [vmem:[#allocation2 + $0x18] sm:$0x1] }
  0x80   : > { %v1121_v48 = vor.u32 %v1120_v41, %v1116_v40  ;;  %v1040_v49 = vld [vmem:[#allocation2 + $0x48] sm:$0xf]  ;;  %981 = vst.msk [vmem:[#allocation2 + $0x7c] sm:$0xf] %vm316_vm7, %v760_v46  ;;  %v817_v51 = vshll.u32 %v584_v28, 16  ;;  %v1117_v52 = vsel %vm11709_vm12, %v1112_v44, %v1116_v40  ;;  %v822_v55 = vshrl.u32 %v585_v33, 16 }
  0x81   : > { %v1225_v53 = vshrl.u32 %v1040_v49, 16  ;;  %v1228_v54 = vshll.u32 %v1040_v49, 16  ;;  %984 = vst [vmem:[#allocation2 + $0x80] sm:$0x1] %v983_v47  ;;  %v1468_v57 = vunpack.c.l.b16 %v1117_v52  ;;  %v1041_v58 = vld [vmem:[#allocation2 + $0x4c] sm:$0xf] }
  0x82   : > { %v1122_v56 = vrot.slane %v1121_v48, 4  ;;  %428 = vst [vmem:[#allocation2 + $0xb0] sm:$0x1] %v427_v19  ;;  %v816_v59 = vrot.slane %v814_v50, 7  ;;  %v1067_v60 = vld [vmem:[#allocation2 + $0x50] sm:$0x1] }
  0x83   : > { %v1227_v61 = vrot.slane %v1225_v53, 4  ;;  %v1230_v62 = vrot.slane %v1228_v54, 5  ;;  %v1234_v63 = vshll.u32 %v1041_v58, 16  ;;  %v1238_v0 = vshrl.u32 %v1041_v58, 16  ;;  %v390_v39 = vld [vmem:[#allocation2 + $0x20] sm:$0x1] }
  0x84   : > { %v1127_v1 = vsel %vm11709_vm12, %v1122_v56, %v1126_v45  ;;  %v1244_v2 = vshll.u32 %v1067_v60, 16  ;;  %v819_v4 = vor.u32 %v817_v51, %v816_v59  ;;  %v820_v5 = vrot.slane %v816_v59, 4  ;;  %v1006_v6 = vld [vmem:[#allocation2 + $0xa8] sm:$0xf]  ;;  %v561_v49 = vld [vmem:[%s11620_s26 + $0xc] sm:$0xf] }
  0x85   : > { %v1469_v8 = vunpack.c.l.b16 %v1127_v1  ;;  %v1231_v9 = vor.u32 %v1230_v62, %v1227_v61  ;;  %v1236_v10 = vrot.slane %v1234_v63, 5  ;;  %v1240_v12 = vrot.slane %v1238_v0, 4  ;;  %v560_v44 = vld [vmem:[%s11620_s26 + $0x8] sm:$0xf]  ;;  %v349_v54 = vld [vmem:[#allocation2 + $0x54] sm:$0x1] }
  0x86   : > { %v1246_v13 = vrot.slane %v1244_v2, 5  ;;  %v1048_v14 = vld [vmem:[#allocation2 + $0x78] sm:$0xf]  ;;  %v824_v11 = vrot.slane %v822_v55, 7  ;;  %v825_v15 = vshll.u32 %v585_v33, 16  ;;  %v1007_v16 = vsel %vm11670_vm9, %v819_v4, %v1006_v6 }
  0x87   : > { %v1499_v18 = vpack.c.b16 %v1469_v8, %v1468_v57  ;;  %v1232_v19 = vrot.slane %v1231_v9, 4  ;;  %v1241_v21 = vor.u32 %v1240_v12, %v1236_v10  ;;  %v1049_v23 = vld [vmem:[#allocation2 + $0x7c] sm:$0xf]  ;;  %v1321_v24 = vshrl.u32 %v1048_v14, 16  ;;  %1008 = vst [vmem:[#allocation2 + $0xa8] sm:$0xf] %v1007_v16 }
  0x88   : > { %v1071_v26 = vld [vmem:[#allocation2 + $0x80] sm:$0x1]  ;;  %v1324_v28 = vshll.u32 %v1048_v14, 16  ;;  %v1330_v30 = vshll.u32 %v1049_v23, 16  ;;  %v1334_v31 = vshrl.u32 %v1049_v23, 16  ;;  %v827_v32 = vor.u32 %v825_v15, %v824_v11 }
  0x89   : > { %10213 = vmatmul.msk.bf16.gmra.mxu0 %vm1514_vm15, %v1499_v18  ;;  %v1237_v33 = vsel %vm11709_vm12, %v1232_v19, %v1236_v10  ;;  %v1242_v35 = vrot.slane %v1241_v21, 4  ;;  %v1323_v37 = vrot.slane %v1321_v24, 4  ;;  %v1340_v38 = vshll.u32 %v1071_v26, 16  ;;  %v1010_v48 = vld [vmem:[#allocation2 + $0xb0] sm:$0x1] }
  0x8a   : > { %v1478_v40 = vunpack.c.l.b16 %v1237_v33  ;;  %v1326_v41 = vrot.slane %v1324_v28, 5  ;;  %v1332_v42 = vrot.slane %v1330_v30, 5  ;;  %v1336_v43 = vrot.slane %v1334_v31, 4  ;;  %v405_v59 = vld [vmem:[#allocation2 + $0x5c] sm:$0x1] }
  0x8b   : > { %v1247_v45 = vsel %vm11709_vm12, %v1242_v35, %v1246_v13  ;;  %v1342_v46 = vrot.slane %v1340_v38, 5  ;;  %v828_v47 = vsel %vm11658_vm8, %v820_v5, %v827_v32  ;;  %v829_v53 = vrot.slane %v824_v11, 4  ;;  %v570_v6 = vld [vmem:[%s11620_s26 + $0x30] sm:$0xf]  ;;  %v571_v23 = vld [vmem:[%s11620_s26 + $0x34] sm:$0xf] }
  0x8c   : > { %v1479_v50 = vunpack.c.l.b16 %v1247_v45  ;;  %v1327_v51 = vor.u32 %v1326_v41, %v1323_v37  ;;  %v1337_v52 = vor.u32 %v1336_v43, %v1332_v42  ;;  %1009 = vst.msk [vmem:[#allocation2 + $0xac] sm:$0xf] %vm316_vm7, %v828_v47  ;;  %v335_v55 = vsel %vm11641_vm3, 0, %v334_v34  ;;  %v361_v41 = vld [vmem:[#allocation2 + $0x84] sm:$0x1] }
  0x8d   : > { %v391_v56 = vsel %vm11650_vm5, 0, %v390_v39  ;;  %v610_v57 = vshrl.u32 %v560_v44, 16  ;;  %v613_v58 = vshll.u32 %v560_v44, 16  ;;  %v1011_v63 = vsel %vm11641_vm3, %v829_v53, %v1010_v48  ;;  %336 = vst [vmem:[#allocation2 + $0x18] sm:$0x1] %v335_v55 }
  0x8e   : > { %v1504_v60 = vpack.c.b16 %v1479_v50, %v1478_v40  ;;  %v1328_v61 = vrot.slane %v1327_v51, 4  ;;  %v1338_v62 = vrot.slane %v1337_v52, 4  ;;  %v1056_v0 = vld [vmem:[#allocation2 + $0xa8] sm:$0xf]  ;;  %1012 = vst [vmem:[#allocation2 + $0xb0] sm:$0x1] %v1011_v63 }
  0x8f   : > { %v1417_v1 = vshrl.u32 %v1056_v0, 16  ;;  %v1420_v2 = vshll.u32 %v1056_v0, 16  ;;  %v612_v4 = vrot.slane %v610_v57, 7  ;;  %v618_v5 = vshrl.u32 %v561_v49, 16  ;;  %392 = vst [vmem:[#allocation2 + $0x20] sm:$0x1] %v391_v56 }
  0x90   : > { %10218 = vmatmul.msk.bf16.gmra.mxu1 %vm1514_vm15, %v1504_v60  ;;  %v1333_v8 = vsel %vm11709_vm12, %v1328_v61, %v1332_v42  ;;  %v1343_v9 = vsel %vm11709_vm12, %v1338_v62, %v1342_v46  ;;  %v621_v10 = vshll.u32 %v561_v49, 16  ;;  %v350_v12 = vsel %vm11641_vm3, 0, %v349_v54  ;;  %v417_v47 = vld [vmem:[#allocation2 + $0x8c] sm:$0x1]  ;;  %v578_v48 = vld [vmem:[%s11620_s26 + $0x50] sm:$0xf] }
  0x91   : > { %v1486_v13 = vunpack.c.l.b16 %v1333_v8  ;;  %v1487_v14 = vunpack.c.l.b16 %v1343_v9  ;;  %v1419_v11 = vrot.slane %v1417_v1, 4  ;;  %v1422_v15 = vrot.slane %v1420_v2, 5  ;;  %351 = vst [vmem:[#allocation2 + $0x54] sm:$0x1] %v350_v12  ;;  %v579_v57 = vld [vmem:[%s11620_s26 + $0x54] sm:$0xf] }
  0x92   : > { %v615_v16 = vor.u32 %v613_v58, %v612_v4  ;;  %v616_v18 = vrot.slane %v612_v4, 4  ;;  %v620_v19 = vrot.slane %v618_v5, 7  ;;  %v406_v21 = vsel %vm11650_vm5, 0, %v405_v59  ;;  %v373_v62 = vld [vmem:[#allocation2 + $0xb4] sm:$0x1] }
  0x93   : > { %v1508_v24 = vpack.c.b16 %v1487_v14, %v1486_v13  ;;  %v1057_v26 = vld [vmem:[#allocation2 + $0xac] sm:$0xf]  ;;  %v1423_v28 = vor.u32 %v1422_v15, %v1419_v11  ;;  %407 = vst [vmem:[#allocation2 + $0x5c] sm:$0x1] %v406_v21  ;;  %v695_v30 = vshrl.u32 %v570_v6, 16  ;;  %v698_v31 = vshll.u32 %v570_v6, 16 }
  0x94   : > { %v1426_v32 = vshll.u32 %v1057_v26, 16  ;;  %v1430_v34 = vshrl.u32 %v1057_v26, 16  ;;  %v623_v33 = vor.u32 %v621_v10, %v620_v19  ;;  %v625_v35 = vrot.slane %v620_v19, 4  ;;  %v922_v38 = vld [vmem:[#allocation2 + $0x18] sm:$0xf]  ;;  %v11118_v27 = vld [vmem:[#allocation2 + $0xa8] sm:$0xff] }
  0x95   : > { %10222 = vmatmul.msk.bf16.gmra.mxu2 %vm1514_vm15, %v1508_v24  ;;  %v1424_v37 = vrot.slane %v1423_v28, 4  ;;  %v697_v39 = vrot.slane %v695_v30, 7  ;;  %v703_v40 = vshrl.u32 %v571_v23, 16  ;;  %v1075_v42 = vld [vmem:[#allocation2 + $0xb0] sm:$0x1]  ;;  %v923_v46 = vsel %vm11670_vm9, %v615_v16, %v922_v38 }
  0x96   : > { %v1428_v43 = vrot.slane %v1426_v32, 5  ;;  %v1432_v44 = vrot.slane %v1430_v34, 4  ;;  %v624_v45 = vsel %vm11658_vm8, %v616_v18, %v623_v33  ;;  %v1436_v49 = vshll.u32 %v1075_v42, 16  ;;  %924 = vst [vmem:[#allocation2 + $0x18] sm:$0xf] %v923_v46 }
  0x97   : > { %v926_v50 = vld [vmem:[#allocation2 + $0x20] sm:$0x1]  ;;  %v700_v51 = vor.u32 %v698_v31, %v697_v39  ;;  %v706_v52 = vshll.u32 %v571_v23, 16  ;;  %925 = vst.msk [vmem:[#allocation2 + $0x1c] sm:$0xf] %vm316_vm7, %v624_v45  ;;  %v701_v59 = vrot.slane %v697_v39, 4 }
  0x98   : > { %v1429_v53 = vsel %vm11709_vm12, %v1424_v37, %v1428_v43  ;;  %v1433_v54 = vor.u32 %v1432_v44, %v1428_v43  ;;  %v927_v55 = vsel %vm11641_vm3, %v625_v35, %v926_v50  ;;  %v957_v56 = vld [vmem:[#allocation2 + $0x54] sm:$0xf]  ;;  %v1438_v58 = vrot.slane %v1436_v49, 5  ;;  %v429_v37 = vld [vmem:[#allocation2 + $0xbc] sm:$0x1] }
  0x99   : > { %928 = vst [vmem:[#allocation2 + $0x20] sm:$0x1] %v927_v55  ;;  %v705_v60 = vrot.slane %v703_v40, 7  ;;  %v958_v61 = vsel %vm11670_vm9, %v700_v51, %v957_v56  ;;  %v1494_v0 = vunpack.c.l.b16 %v1429_v53  ;;  %v362_v2 = vsel %vm11641_vm3, 0, %v361_v41 }
  0x9a   : > { %v1434_v63 = vrot.slane %v1433_v54, 4  ;;  %959 = vst [vmem:[#allocation2 + $0x54] sm:$0xf] %v958_v61  ;;  %v961_v1 = vld [vmem:[#allocation2 + $0x5c] sm:$0x1]  ;;  %v418_v8 = vsel %vm11650_vm5, 0, %v417_v47 }
  0x9b   : > { %v708_v4 = vor.u32 %v706_v52, %v705_v60  ;;  %v710_v5 = vrot.slane %v705_v60, 4  ;;  %363 = vst [vmem:[#allocation2 + $0x84] sm:$0x1] %v362_v2  ;;  %v763_v9 = vshrl.u32 %v578_v48, 16  ;;  %v766_v12 = vshll.u32 %v578_v48, 16 }
  0x9c   : > { %v1439_v10 = vsel %vm11709_vm12, %v1434_v63, %v1438_v58  ;;  %419 = vst [vmem:[#allocation2 + $0x8c] sm:$0x1] %v418_v8  ;;  %v771_v6 = vshrl.u32 %v579_v57, 16  ;;  %v774_v13 = vshll.u32 %v579_v57, 16  ;;  %v374_v21 = vsel %vm11641_vm3, 0, %v373_v62 }
  0x9d   : > { %v1495_v14 = vunpack.c.l.b16 %v1439_v10  ;;  %v709_v11 = vsel %vm11658_vm8, %v701_v59, %v708_v4  ;;  %v962_v15 = vsel %vm11641_vm3, %v710_v5, %v961_v1  ;;  %v765_v16 = vrot.slane %v763_v9, 7  ;;  %v1032_v18 = vld [vmem:[#allocation2 + $0x18] sm:$0xf]  ;;  %375 = vst [vmem:[#allocation2 + $0xb4] sm:$0x1] %v374_v21 }
  0x9e   : > { %960 = vst.msk [vmem:[#allocation2 + $0x58] sm:$0xf] %vm316_vm7, %v709_v11  ;;  %v773_v19 = vrot.slane %v771_v6, 7  ;;  %v11970_v24 = vld [vmem:[#allocation2 + $0x1c] sm:$0xf]  ;;  %v1129_v26 = vshrl.u32 %v1032_v18, 16 }
  0x9f   : > { %v1512_v23 = vpack.c.b16 %v1495_v14, %v1494_v0  ;;  %v1132_v28 = vshll.u32 %v1032_v18, 16  ;;  %963 = vst [vmem:[#allocation2 + $0x5c] sm:$0x1] %v962_v15  ;;  %v768_v30 = vor.u32 %v766_v12, %v765_v16  ;;  %v1138_v32 = vshll.u32 %v11970_v24, 16  ;;  %v586_v57 = vld [vmem:[%s11620_s26 + $0x70] sm:$0xf] }
  0xa0   : > { %v11972_v31 = vld [vmem:[#allocation2 + $0x20] sm:$0x1]  ;;  %v1142_v34 = vshrl.u32 %v11970_v24, 16  ;;  %v769_v33 = vrot.slane %v765_v16, 4  ;;  %v776_v35 = vor.u32 %v774_v13, %v773_v19  ;;  %v1131_v38 = vrot.slane %v1129_v26, 4 }
  0xa1   : > { %10226 = vmatmul.msk.bf16.gmra.mxu3 %vm1514_vm15, %v1512_v23  ;;  %v1134_v39 = vrot.slane %v1132_v28, 5  ;;  %v1148_v40 = vshll.u32 %v11972_v31, 16  ;;  %v1042_v41 = vld [vmem:[#allocation2 + $0x54] sm:$0xf]  ;;  %v778_v42 = vrot.slane %v773_v19, 4  ;;  %v1140_v43 = vrot.slane %v1138_v32, 5 }
  0xa2   : > { %v1144_v44 = vrot.slane %v1142_v34, 4  ;;  %v1249_v45 = vshrl.u32 %v1042_v41, 16  ;;  %v1252_v46 = vshll.u32 %v1042_v41, 16  ;;  %v985_v47 = vld [vmem:[#allocation2 + $0x84] sm:$0xf]  ;;  %v777_v50 = vsel %vm11658_vm8, %v769_v33, %v776_v35 }
  0xa3   : > { %v1135_v48 = vor.u32 %v1134_v39, %v1131_v38  ;;  %v1150_v49 = vrot.slane %v1148_v40, 5  ;;  %v986_v51 = vsel %vm11670_vm9, %v768_v30, %v985_v47  ;;  %v989_v52 = vld [vmem:[#allocation2 + $0x8c] sm:$0x1]  ;;  %988 = vst.msk [vmem:[#allocation2 + $0x88] sm:$0xf] %vm316_vm7, %v777_v50  ;;  %v430_v60 = vsel %vm11650_vm5, 0, %v429_v37 }
  0xa4   : > { %v1145_v53 = vor.u32 %v1144_v44, %v1140_v43  ;;  %v1251_v54 = vrot.slane %v1249_v45, 4  ;;  %v1254_v55 = vrot.slane %v1252_v46, 5  ;;  %987 = vst [vmem:[#allocation2 + $0x84] sm:$0xf] %v986_v51  ;;  %v990_v56 = vsel %vm11641_vm3, %v778_v42, %v989_v52  ;;  %v587_v61 = vld [vmem:[%s11620_s26 + $0x74] sm:$0xf] }
  0xa5   : > { %v1136_v58 = vrot.slane %v1135_v48, 4  ;;  %v11985_v59 = vld [vmem:[#allocation2 + $0x58] sm:$0xf]  ;;  %v337_v62 = vld [vmem:[#allocation2 + $0x24] sm:$0x1]  ;;  %v831_v9 = vshrl.u32 %v586_v57, 16 }
  0xa6   : > { %v1146_v63 = vrot.slane %v1145_v53, 4  ;;  %v11991_v0 = vld [vmem:[#allocation2 + $0x5c] sm:$0x1]  ;;  %v1255_v1 = vor.u32 %v1254_v55, %v1251_v54  ;;  %v1258_v2 = vshll.u32 %v11985_v59, 16  ;;  %v1262_v4 = vshrl.u32 %v11985_v59, 16 }
  0xa7   : > { %v1141_v5 = vsel %vm11709_vm12, %v1136_v58, %v1140_v43  ;;  %v1268_v8 = vshll.u32 %v11991_v0, 16  ;;  %991 = vst [vmem:[#allocation2 + $0x8c] sm:$0x1] %v990_v56  ;;  %v834_v10 = vshll.u32 %v586_v57, 16  ;;  %v833_v18 = vrot.slane %v831_v9, 7 }
  0xa8   : > { %v1151_v12 = vsel %vm11709_vm12, %v1146_v63, %v1150_v49  ;;  %v1470_v6 = vunpack.c.l.b16 %v1141_v5  ;;  %v1256_v13 = vrot.slane %v1255_v1, 4  ;;  %v1260_v14 = vrot.slane %v1258_v2, 5  ;;  %431 = vst [vmem:[#allocation2 + $0xbc] sm:$0x1] %v430_v60  ;;  %v1013_v26 = vld [vmem:[#allocation2 + $0xb4] sm:$0xf] }
  0xa9   : > { %v1471_v11 = vunpack.c.l.b16 %v1151_v12  ;;  %v1264_v15 = vrot.slane %v1262_v4, 4  ;;  %v1270_v16 = vrot.slane %v1268_v8, 5  ;;  %v839_v21 = vshrl.u32 %v587_v61, 16  ;;  %v393_v42 = vld [vmem:[#allocation2 + $0x2c] sm:$0x1] }
  0xaa   : > { %v1261_v19 = vsel %vm11709_vm12, %v1256_v13, %v1260_v14  ;;  %v842_v23 = vshll.u32 %v587_v61, 16  ;;  %v338_v28 = vsel %vm11641_vm3, 0, %v337_v62  ;;  %v836_v35 = vor.u32 %v834_v10, %v833_v18  ;;  %v1051_v37 = vld [vmem:[#allocation2 + $0x88] sm:$0xf]  ;;  %v562_v47 = vld [vmem:[%s11620_s26 + $0x10] sm:$0xf] }
  0xab   : > { %v1500_v30 = vpack.c.b16 %v1471_v11, %v1470_v6  ;;  %v1265_v32 = vor.u32 %v1264_v15, %v1260_v14  ;;  %v1480_v34 = vunpack.c.l.b16 %v1261_v19  ;;  %v1050_v33 = vld [vmem:[#allocation2 + $0x84] sm:$0xf]  ;;  %339 = vst [vmem:[#allocation2 + $0x24] sm:$0x1] %v338_v28  ;;  %v837_v40 = vrot.slane %v833_v18, 4 }
  0xac   : > { %v1345_v38 = vshrl.u32 %v1050_v33, 16  ;;  %v1348_v39 = vshll.u32 %v1050_v33, 16  ;;  %v841_v41 = vrot.slane %v839_v21, 7  ;;  %v1354_v44 = vshll.u32 %v1051_v37, 16  ;;  %v563_v62 = vld [vmem:[%s11620_s26 + $0x14] sm:$0xf] }
  0xad   : > { %10214 = vmatmul.msk.bf16.gmra.mxu0 %vm1514_vm15, %v1500_v30  ;;  %v1266_v43 = vrot.slane %v1265_v32, 4  ;;  %v1358_v45 = vshrl.u32 %v1051_v37, 16  ;;  %v1014_v46 = vsel %vm11670_vm9, %v836_v35, %v1013_v26  ;;  %v394_v4 = vsel %vm11650_vm5, 0, %v393_v42  ;;  %v11304_v14 = vld [vmem:[#allocation2 + $0x8] sm:$0x1] }
  0xae   : > { %v1072_v48 = vld [vmem:[#allocation2 + $0x8c] sm:$0x1]  ;;  %v1347_v49 = vrot.slane %v1345_v38, 4  ;;  %v1350_v50 = vrot.slane %v1348_v39, 5  ;;  %v844_v51 = vor.u32 %v842_v23, %v841_v41  ;;  %v846_v52 = vrot.slane %v841_v41, 4 }
  0xaf   : > { %v1271_v53 = vsel %vm11709_vm12, %v1266_v43, %v1270_v16  ;;  %v1356_v54 = vrot.slane %v1354_v44, 5  ;;  %v1360_v55 = vrot.slane %v1358_v45, 4  ;;  %v1364_v56 = vshll.u32 %v1072_v48, 16  ;;  %1015 = vst [vmem:[#allocation2 + $0xb4] sm:$0xf] %v1014_v46 }
  0xb0   : > { %v1481_v57 = vunpack.c.l.b16 %v1271_v53  ;;  %v1351_v58 = vor.u32 %v1350_v50, %v1347_v49  ;;  %v845_v60 = vsel %vm11658_vm8, %v837_v40, %v844_v51  ;;  %v1017_v61 = vld [vmem:[#allocation2 + $0xbc] sm:$0x1]  ;;  %v627_v9 = vshrl.u32 %v562_v47, 16  ;;  %395 = vst [vmem:[#allocation2 + $0x2c] sm:$0x1] %v394_v4 }
  0xb1   : > { %v1361_v63 = vor.u32 %v1360_v55, %v1356_v54  ;;  %v1366_v1 = vrot.slane %v1364_v56, 5  ;;  %1016 = vst.msk [vmem:[#allocation2 + $0xb8] sm:$0xf] %vm316_vm7, %v845_v60  ;;  %v1018_v2 = vsel %vm11641_vm3, %v846_v52, %v1017_v61  ;;  %v630_v10 = vshll.u32 %v562_v47, 16  ;;  %v1876_v26 = vld [vmem:[#allocation2] sm:$0xe] }
  0xb2   : > { %v1505_v5 = vpack.c.b16 %v1481_v57, %v1480_v34  ;;  %v1352_v8 = vrot.slane %v1351_v58, 4  ;;  %1019 = vst [vmem:[#allocation2 + $0xbc] sm:$0x1] %v1018_v2  ;;  %v635_v6 = vshrl.u32 %v563_v62, 16  ;;  %v638_v13 = vshll.u32 %v563_v62, 16 }
  0xb3   : > { %v1362_v12 = vrot.slane %v1361_v63, 4  ;;  %v1932_v11 = vrot.slane %v11304_v14, 5  ;;  %v629_v16 = vrot.slane %v627_v9, 7  ;;  %v929_v23 = vld [vmem:[#allocation2 + $0x24] sm:$0xf]  ;;  %v10308_v44 = vrot.slane %v1876_v26, 9 }
  0xb4   : > { %10219 = vmatmul.msk.bf16.gmra.mxu1 %vm1514_vm15, %v1505_v5  ;;  %v1357_v15 = vsel %vm11709_vm12, %v1352_v8, %v1356_v54  ;;  %v637_v21 = vrot.slane %v635_v6, 7  ;;  %v11305_v33 = vld [vmem:[#allocation2 + $0x4] sm:$0xf]  ;;  %v10472_v45 = vld [vmem:[%s14682_s1 + $0xc] sm:$0x3] }
  0xb5   : > { %v1367_v18 = vsel %vm11709_vm12, %v1362_v12, %v1366_v1  ;;  %v1488_v19 = vunpack.c.l.b16 %v1357_v15  ;;  %v632_v32 = vor.u32 %v630_v10, %v629_v16  ;;  %v633_v34 = vrot.slane %v629_v16, 4  ;;  %v2547_v4 = vld [vmem:[#allocation2 + $0xc] sm:$0xf]  ;;  %v11104_v12 = vld [vmem:[#allocation2] sm:$0xff]  ;;  %v2548_v15 = vld [vmem:[#allocation2 + $0x10] sm:$0xf] }
  0xb6   : > { %v1489_v28 = vunpack.c.l.b16 %v1367_v18  ;;  %v1058_v30 = vld [vmem:[#allocation2 + $0xb4] sm:$0xf]  ;;  %v1929_v35 = vrot.slane %v11305_v33, 5  ;;  %v640_v39 = vor.u32 %v638_v13, %v637_v21  ;;  %v642_v40 = vrot.slane %v637_v21, 4  ;;  %v10455_v33 = vld [vmem:[%s14682_s1 + $0xa] sm:$0x3] }
  0xb7   : > { %v1441_v37 = vshrl.u32 %v1058_v30, 16  ;;  %v1444_v38 = vshll.u32 %v1058_v30, 16  ;;  %v930_v43 = vsel %vm11670_vm9, %v632_v32, %v929_v23  ;;  %v933_v53 = vld [vmem:[#allocation2 + $0x2c] sm:$0x1]  ;;  %v3763_v61 = vsel %vm1563_vm0, %v10472_v45, 0 }
  0xb8   : > { %v1509_v41 = vpack.c.b16 %v1489_v28, %v1488_v19  ;;  %v1059_v42 = vld [vmem:[#allocation2 + $0xb8] sm:$0xf]  ;;  %v641_v52 = vsel %vm11658_vm8, %v633_v34, %v640_v39  ;;  %931 = vst [vmem:[#allocation2 + $0x24] sm:$0xf] %v930_v43  ;;  %v1931_v54 = vrot.slane %v1929_v35, 4  ;;  %v934_v58 = vsel %vm11641_vm3, %v642_v40, %v933_v53  ;;  %3772 = vmatpush.bf16.msra.mxu2 %v3763_v61 }
  0xb9   : > { %v1076_v46 = vld [vmem:[#allocation2 + $0xbc] sm:$0x1]  ;;  %v1443_v47 = vrot.slane %v1441_v37, 4  ;;  %v1446_v48 = vrot.slane %v1444_v38, 5  ;;  %v1450_v49 = vshll.u32 %v1059_v42, 16  ;;  %v1454_v50 = vshrl.u32 %v1059_v42, 16 }
  0xba   : > { %10223 = vmatmul.msk.bf16.gmra.mxu2 %vm1514_vm15, %v1509_v41  ;;  %v1460_v51 = vshll.u32 %v1076_v46, 16  ;;  %932 = vst.msk [vmem:[#allocation2 + $0x28] sm:$0xf] %vm316_vm7, %v641_v52  ;;  %v1930_v2 = vsel %vm12036_vm11, %v10308_v44, %v1929_v35  ;;  %v1933_v9 = vsel %vm12036_vm11, %v1931_v54, %v1932_v11  ;;  %v2596_v16 = vshrl.u32 %v2547_v4, 16  ;;  %v10553_v11 = vld [vmem:[%s14682_s1 + $0xe] sm:$0x3] }
  0xbb   : > { %v1447_v55 = vor.u32 %v1446_v48, %v1443_v47  ;;  %v1452_v56 = vrot.slane %v1450_v49, 5  ;;  %v1456_v57 = vrot.slane %v1454_v50, 4  ;;  %935 = vst [vmem:[#allocation2 + $0x2c] sm:$0x1] %v934_v58  ;;  %v2041_v14 = vunpack.c.l.b16 %v1930_v2  ;;  %v10586_v40 = vld [vmem:[%s14682_s1 + $0x10] sm:$0x3] }
  0xbc   : > { %v1462_v1 = vrot.slane %v1460_v51, 5  ;;  %v2599_v18 = vshll.u32 %v2547_v4, 16  ;;  %v2042_v28 = vunpack.c.l.b16 %v1933_v9  ;;  %v2605_v43 = vshll.u32 %v2548_v15, 16  ;;  %v1877_v52 = vld [vmem:[#allocation2 + $0xc] sm:$0xe] }
  0xbd   : > { %v1448_v62 = vrot.slane %v1447_v55, 4  ;;  %v1457_v63 = vor.u32 %v1456_v57, %v1452_v56  ;;  %v2609_v44 = vshrl.u32 %v2548_v15, 16  ;;  %v4417_v47 = vsel %vm1563_vm0, %v10553_v11, 0  ;;  %v11105_v15 = vld [vmem:[#allocation2 + $0xc] sm:$0xff]  ;;  %v2551_v11 = vld [vmem:[#allocation2 + $0x1c] sm:$0xf] }
  0xbe   : > { %v2073_v46 = vpack.c.b16 %v2042_v28, %v2041_v14  ;;  %4426 = vmatpush.bf16.msra.mxu3 %v4417_v47  ;;  %v3476_v50 = vsel %vm1563_vm0, %v10455_v33, 0  ;;  %v4815_v51 = vsel %vm1563_vm0, %v10586_v40, 0  ;;  %v2598_v54 = vrot.slane %v2596_v16, 4  ;;  %vm12776_vm0 = vmand %vm438_vm14, %vm382_vm4 }
  0xbf   : > { %v1453_v5 = vsel %vm11709_vm12, %v1448_v62, %v1452_v56  ;;  %v1458_v8 = vrot.slane %v1457_v63, 4  ;;  %v1034_v13 = vld [vmem:[#allocation2 + $0x24] sm:$0xf]  ;;  %3485 = vmatpush.bf16.msra.mxu1 %v3476_v50  ;;  %4824 = vmatpush.bf16.msra.mxu0 %v4815_v51  ;;  %v1936_v55 = vrot.slane %v11890_v20, 5  ;;  %v2601_v57 = vrot.slane %v2599_v18, 5 }
  0xc0   : > { %v1496_v10 = vunpack.c.l.b16 %v1453_v5  ;;  %v1153_v23 = vshrl.u32 %v1034_v13, 16  ;;  %v1156_v26 = vshll.u32 %v1034_v13, 16  ;;  %v2607_v58 = vrot.slane %v2605_v43, 5  ;;  %v2549_v63 = vld [vmem:[#allocation2 + $0x14] sm:$0x1] }
  0xc1   : > { %v1463_v6 = vsel %vm11709_vm12, %v1458_v8, %v1462_v1  ;;  %v12049_v21 = vld [vmem:[#allocation2 + $0x28] sm:$0xf]  ;;  %v2611_v61 = vrot.slane %v2609_v44, 4  ;;  %v10309_v1 = vrot.slane %v1877_v52, 9  ;;  %v1938_v5 = vrot.slane %v1936_v55, 4 }
  0xc2   : > { %v1497_v19 = vunpack.c.l.b16 %v1463_v6  ;;  %v12054_v30 = vld [vmem:[#allocation2 + $0x2c] sm:$0x1]  ;;  %v1162_v32 = vshll.u32 %v12049_v21, 16  ;;  %v1166_v34 = vshrl.u32 %v12049_v21, 16  ;;  %v1155_v37 = vrot.slane %v1153_v23, 4 }
  0xc3   : > { %v1158_v38 = vrot.slane %v1156_v26, 5  ;;  %v1172_v39 = vshll.u32 %v12054_v30, 16  ;;  %v1939_v8 = vrot.slane %v11897_v29, 5  ;;  %v2602_v20 = vor.u32 %v2601_v57, %v2598_v54  ;;  %v2550_v23 = vld [vmem:[#allocation2 + $0x18] sm:$0xf]  ;;  %v11120_v26 = vld [vmem:[#allocation2 + $0xc] sm:$0xff] }
  0xc4   : > { %v1513_v35 = vpack.c.b16 %v1497_v19, %v1496_v10  ;;  %10292 = vmatmul.msk.bf16.vlgmr.msrb.gmra.mxu1 %vm1514_vm15, %v11104_v12  ;;  %v1164_v41 = vrot.slane %v1162_v32, 5  ;;  %v1168_v42 = vrot.slane %v1166_v34, 4  ;;  %v2612_v10 = vor.u32 %v2611_v61, %v2607_v58  ;;  %v2553_v61 = vld [vmem:[#allocation2 + $0x24] sm:$0xf] }
  0xc5   : > { %v1159_v45 = vor.u32 %v1158_v38, %v1155_v37  ;;  %v1174_v49 = vrot.slane %v1172_v39, 5  ;;  %v2615_v12 = vshll.u32 %v2549_v63, 16  ;;  %v1937_v13 = vsel %vm12036_vm11, %v10309_v1, %v1936_v55  ;;  %v2554_v1 = vld [vmem:[#allocation2 + $0x28] sm:$0xf] }
  0xc6   : > { %10227 = vmatmul.msk.bf16.gmra.mxu3 %vm1514_vm15, %v1513_v35  ;;  %v1169_v48 = vor.u32 %v1168_v42, %v1164_v41  ;;  %v1940_v14 = vsel %vm12036_vm11, %v1938_v5, %v1939_v8  ;;  %v2603_v16 = vrot.slane %v2602_v20, 4  ;;  %v2613_v18 = vrot.slane %v2612_v10, 4 }
  0xc7   : > { %v1160_v53 = vrot.slane %v1159_v45, 4  ;;  %v2617_v19 = vrot.slane %v2615_v12, 5  ;;  %v2043_v29 = vunpack.c.l.b16 %v1937_v13  ;;  %v2044_v28 = vunpack.c.l.b16 %v1940_v14  ;;  %v1878_v45 = vld [vmem:[#allocation2 + $0x18] sm:$0xe] }
  0xc8   : > { %v1170_v56 = vrot.slane %v1169_v48, 4  ;;  %v2620_v32 = vshrl.u32 %v2550_v23, 16  ;;  %v2623_v34 = vshll.u32 %v2550_v23, 16  ;;  %v2608_v33 = vsel %vm11709_vm12, %v2603_v16, %v2607_v58  ;;  %v2552_v48 = vld [vmem:[#allocation2 + $0x20] sm:$0x1]  ;;  %v11106_v58 = vld [vmem:[#allocation2 + $0x18] sm:$0xff] }
  0xc9   : > { %v1165_v62 = vsel %vm11709_vm12, %v1160_v53, %v1164_v41  ;;  %v2618_v35 = vsel %vm11709_vm12, %v2613_v18, %v2617_v19  ;;  %v2629_v37 = vshll.u32 %v2551_v11, 16  ;;  %v2633_v38 = vshrl.u32 %v2551_v11, 16 }
  0xca   : > { %10325 = vmatmul.msk.bf16.vlgmr.msrb.gmra.mxu2 %vm1514_vm15, %v2073_v46  ;;  %v1175_v2 = vsel %vm11709_vm12, %v1170_v56, %v1174_v49  ;;  %v1472_v4 = vunpack.c.l.b16 %v1165_v62  ;;  %v2074_v39 = vpack.c.b16 %v2044_v28, %v2043_v29  ;;  %v1943_v40 = vrot.slane %v11970_v24, 5  ;;  %v2555_v29 = vld [vmem:[#allocation2 + $0x2c] sm:$0x1] }
  0xcb   : > { %v1473_v9 = vunpack.c.l.b16 %v1175_v2  ;;  %v2981_v41 = vunpack.c.l.b16 %v2608_v33  ;;  %v2982_v42 = vunpack.c.l.b16 %v2618_v35  ;;  %v2622_v43 = vrot.slane %v2620_v32, 4  ;;  %v11121_v2 = vld [vmem:[#allocation2 + $0x18] sm:$0xff] }
  0xcc   : > { %v2625_v44 = vrot.slane %v2623_v34, 5  ;;  %v2631_v46 = vrot.slane %v2629_v37, 5  ;;  %v2635_v47 = vrot.slane %v2633_v38, 4  ;;  %v10310_v49 = vrot.slane %v1878_v45, 9 }
  0xcd   : > { %v1501_v6 = vpack.c.b16 %v1473_v9, %v1472_v4  ;;  %v1945_v50 = vrot.slane %v1943_v40, 4  ;;  %v1946_v51 = vrot.slane %v11972_v31, 5  ;;  %v3013_v52 = vpack.c.b16 %v2982_v42, %v2981_v41  ;;  %v11107_v42 = vld [vmem:[#allocation2 + $0x24] sm:$0xff] }
  0xce   : > { %v2626_v53 = vor.u32 %v2625_v44, %v2622_v43  ;;  %v2636_v54 = vor.u32 %v2635_v47, %v2631_v46  ;;  %v2639_v55 = vshll.u32 %v2552_v48, 16  ;;  %v1944_v24 = vsel %vm12036_vm11, %v10310_v49, %v1943_v40  ;;  %v11122_v43 = vld [vmem:[#allocation2 + $0x24] sm:$0xff] }
  0xcf   : > { %10215 = vmatmul.msk.bf16.gmra.mxu0 %vm1514_vm15, %v1501_v6  ;;  %v1947_v56 = vsel %vm12036_vm11, %v1945_v50, %v1946_v51  ;;  %v2045_v31 = vunpack.c.l.b16 %v1944_v24  ;;  %v2644_v5 = vshrl.u32 %v2553_v61, 16  ;;  %v2647_v9 = vshll.u32 %v2553_v61, 16 }
  0xd0   : > { %v2627_v57 = vrot.slane %v2626_v53, 4  ;;  %v2637_v62 = vrot.slane %v2636_v54, 4  ;;  %v2641_v63 = vrot.slane %v2639_v55, 5  ;;  %v2046_v4 = vunpack.c.l.b16 %v1947_v56  ;;  %v12116_v54 = vpop.f32.mrf.mxu1  ;;  %v11306_v55 = vld [vmem:[#allocation2 + $0x34] sm:$0xf] }
  0xd1   : > { %v2653_v20 = vshll.u32 %v2554_v1, 16  ;;  %v2657_v10 = vshrl.u32 %v2554_v1, 16  ;;  %v2646_v14 = vrot.slane %v2644_v5, 4  ;;  %v2649_v18 = vrot.slane %v2647_v9, 5  ;;  %v11307_v5 = vld [vmem:[#allocation2 + $0x38] sm:$0x1] }
  0xd2   : > { %v2632_v8 = vsel %vm11709_vm12, %v2627_v57, %v2631_v46  ;;  %v2642_v12 = vsel %vm11709_vm12, %v2637_v62, %v2641_v63  ;;  %v2075_v6 = vpack.c.b16 %v2046_v4, %v2045_v31  ;;  %v1953_v32 = vrot.slane %v12054_v30, 5  ;;  %v2556_v30 = vld [vmem:[#allocation2 + $0x30] sm:$0xf]  ;;  %v2557_v46 = vld [vmem:[#allocation2 + $0x34] sm:$0xf] }
  0xd3   : > { %v2983_v13 = vunpack.c.l.b16 %v2632_v8  ;;  %v2984_v16 = vunpack.c.l.b16 %v2642_v12  ;;  %v2655_v19 = vrot.slane %v2653_v20, 5  ;;  %v2659_v23 = vrot.slane %v2657_v10, 4 }
  0xd4   : > { %10293 = vmatmul.msk.bf16.gmra.mxu1 %vm1514_vm15, %v11105_v15  ;;  %v1950_v15 = vrot.slane %v12049_v21, 5  ;;  %v2650_v33 = vor.u32 %v2649_v18, %v2646_v14  ;;  %v2663_v37 = vshll.u32 %v2555_v29, 16  ;;  %v2668_v49 = vshrl.u32 %v2556_v30, 16  ;;  %v2559_v14 = vld [vmem:[#allocation2 + $0x3c] sm:$0xf] }
  0xd5   : > { %v3014_v34 = vpack.c.b16 %v2984_v16, %v2983_v13  ;;  %v2660_v35 = vor.u32 %v2659_v23, %v2655_v19  ;;  %v2671_v50 = vshll.u32 %v2556_v30, 16  ;;  %v2677_v51 = vshll.u32 %v2557_v46, 16  ;;  %v2560_v16 = vld [vmem:[#allocation2 + $0x40] sm:$0xf] }
  0xd6   : > { %10406 = vmatmul.msk.bf16.vlgmr.msrb.gmra.mxu3 %vm1514_vm15, %v11120_v26  ;;  %v1879_v26 = vld [vmem:[#allocation2 + $0x24] sm:$0xe]  ;;  %v1952_v11 = vrot.slane %v1950_v15, 4  ;;  %v2665_v41 = vrot.slane %v2663_v37, 5  ;;  %v1957_v24 = vrot.slane %v11306_v55, 5  ;;  %v2670_v61 = vrot.slane %v2668_v49, 4 }
  0xd7   : > { %v10311_v28 = vrot.slane %v1879_v26, 9  ;;  %v2661_v40 = vrot.slane %v2660_v35, 4  ;;  %v2673_v62 = vrot.slane %v2671_v50, 5  ;;  %v2679_v63 = vrot.slane %v2677_v51, 5  ;;  %v12124_v26 = vpop.f32.mrf.mxu2 }
  0xd8   : > { %v1954_v21 = vsel %vm12036_vm11, %v1952_v11, %v1953_v32  ;;  %v1959_v4 = vrot.slane %v1957_v24, 4  ;;  %v1960_v8 = vrot.slane %v11307_v5, 5  ;;  %v12126_v29 = vpop.f32.mrf.mxu1  ;;  %v2701_v35 = vshll.u32 %v2560_v16, 16  ;;  %v12146_v5 = vpop.f32.mrf.mxu0 }
  0xd9   : > { %v1951_v38 = vsel %vm12036_vm11, %v10311_v28, %v1950_v15  ;;  %v2048_v45 = vunpack.c.l.b16 %v1954_v21  ;;  %v2666_v48 = vsel %vm11709_vm12, %v2661_v40, %v2665_v41  ;;  %v2674_v20 = vor.u32 %v2673_v62, %v2670_v61  ;;  %v11108_v15 = vld [vmem:[#allocation2 + $0x30] sm:$0xff]  ;;  %v12139_v61 = vpop.f32.mrf.mxu3 }
  0xda   : > { %10326 = vmatmul.msk.bf16.gmra.mxu2 %vm1514_vm15, %v2074_v39  ;;  %v2651_v39 = vrot.slane %v2650_v33, 4  ;;  %v2047_v44 = vunpack.c.l.b16 %v1951_v38  ;;  %v2986_v57 = vunpack.c.l.b16 %v2666_v48  ;;  %v1961_v13 = vsel %vm12036_vm11, %v1959_v4, %v1960_v8  ;;  %v11123_v28 = vld [vmem:[#allocation2 + $0x30] sm:$0xff]  ;;  %v1881_v48 = vld [vmem:[#allocation2 + $0x3c] sm:$0xe]  ;;  %v2562_v8 = vld [vmem:[#allocation2 + $0x48] sm:$0xf] }
  0xdb   : > { %v2675_v18 = vrot.slane %v2674_v20, 4  ;;  %v2050_v32 = vunpack.c.l.b16 %v1961_v13  ;;  %v2695_v33 = vshll.u32 %v2559_v14, 16  ;;  %v2705_v37 = vshrl.u32 %v2560_v16, 16  ;;  %v11109_v4 = vld [vmem:[#allocation2 + $0x3c] sm:$0xff] }
  0xdc   : > { %v2656_v47 = vsel %vm11709_vm12, %v2651_v39, %v2655_v19  ;;  %v2076_v53 = vpack.c.b16 %v2048_v45, %v2047_v44  ;;  %v11308_v45 = vld [vmem:[#allocation2 + $0x40] sm:$0xf]  ;;  %v10313_v55 = vrot.slane %v1881_v48, 9  ;;  %v2719_v16 = vshll.u32 %v2562_v8, 16 }
  0xdd   : > { %v2985_v56 = vunpack.c.l.b16 %v2656_v47  ;;  %v2680_v38 = vsel %vm11709_vm12, %v2675_v18, %v2679_v63  ;;  %v2697_v41 = vrot.slane %v2695_v33, 5  ;;  %v2707_v44 = vrot.slane %v2705_v37, 4  ;;  %v11124_v20 = vld [vmem:[#allocation2 + $0x3c] sm:$0xff]  ;;  %v11310_v33 = vld [vmem:[#allocation2 + $0x4c] sm:$0xf] }
  0xde   : > { %v1964_v30 = vrot.slane %v11308_v45, 5  ;;  %v11311_v45 = vld [vmem:[#allocation2 + $0x50] sm:$0x1] }
  0xdf   : > { %10423 = vmatmul.msk.bf16.vlgmr.msrb.gmra.mxu0 %vm1514_vm15, %v3013_v52  ;;  %v2681_v52 = vshrl.u32 %v2557_v46, 16  ;;  %v3015_v9 = vpack.c.b16 %v2986_v57, %v2985_v56  ;;  %v2987_v46 = vunpack.c.l.b16 %v2680_v38  ;;  %v11309_v56 = vld [vmem:[#allocation2 + $0x44] sm:$0x1]  ;;  %v2721_v38 = vrot.slane %v2719_v16, 5 }
  0xe0   : > { %v1967_v57 = vrot.slane %v11309_v56, 5 }
  0xe1   : > { %v2683_v1 = vrot.slane %v2681_v52, 4 }
  0xe3   : > { %v2684_v10 = vor.u32 %v2683_v1, %v2679_v63 }
  0xe4   : > { %10294 = vmatmul.msk.bf16.gmra.mxu1 %vm1514_vm15, %v11106_v58  ;;  %v1880_v58 = vld [vmem:[#allocation2 + $0x30] sm:$0xe] }
  0xe5   : > { %v10312_v31 = vrot.slane %v1880_v58, 9  ;;  %v2685_v19 = vrot.slane %v2684_v10, 4 }
  0xe6   : > { %10407 = vmatmul.msk.bf16.gmra.mxu3 %vm1514_vm15, %v11121_v2  ;;  %v2558_v2 = vld [vmem:[#allocation2 + $0x38] sm:$0x1] }
  0xe7   : > { %v2687_v12 = vshll.u32 %v2558_v2, 16  ;;  %v1965_v2 = vsel %vm12036_vm11, %v10313_v55, %v1964_v30 }
  0xe8   : > { %v2051_v10 = vunpack.c.l.b16 %v1965_v2 }
  0xe9   : > { %v2689_v23 = vrot.slane %v2687_v12, 5 }
  0xea   : > { %10327 = vmatmul.msk.bf16.gmra.mxu2 %vm1514_vm15, %v2075_v6  ;;  %v1958_v6 = vsel %vm12036_vm11, %v10312_v31, %v1957_v24  ;;  %v1966_v24 = vrot.slane %v1964_v30, 4  ;;  %v1974_v30 = vrot.slane %v11311_v45, 5 }
  0xeb   : > { %v2049_v11 = vunpack.c.l.b16 %v1958_v6  ;;  %v2690_v21 = vsel %vm11709_vm12, %v2685_v19, %v2689_v23 }
  0xec   : > { %v2988_v47 = vunpack.c.l.b16 %v2690_v21  ;;  %v12134_v49 = vpop.f32.mrf.mxu1  ;;  %v1968_v31 = vsel %vm12036_vm11, %v1966_v24, %v1967_v57 }
  0xed   : > { %v2077_v39 = vpack.c.b16 %v2050_v32, %v2049_v11  ;;  %v2052_v12 = vunpack.c.l.b16 %v1968_v31 }
  0xee   : > { %v3016_v58 = vpack.c.b16 %v2988_v47, %v2987_v46 }
  0xef   : > { %10424 = vmatmul.msk.bf16.gmra.mxu0 %vm1514_vm15, %v3014_v34  ;;  %v2692_v34 = vshrl.u32 %v2559_v14, 16 }
  0xf1   : > { %v2694_v40 = vrot.slane %v2692_v34, 4  ;;  %v12158_v34 = vpop.f32.mrf.mxu3 }
  0xf3   : > { %v2698_v50 = vor.u32 %v2697_v41, %v2694_v40  ;;  %v1882_v40 = vld [vmem:[#allocation2 + $0x48] sm:$0xe]  ;;  %v2564_v41 = vld [vmem:[#allocation2 + $0x50] sm:$0x1] }
  0xf4   : > { %10295 = vmatmul.msk.bf16.gmra.mxu1 %vm1514_vm15, %v11107_v42  ;;  %v2561_v42 = vld [vmem:[#allocation2 + $0x44] sm:$0x1]  ;;  %v12152_v14 = vpop.f32.mrf.mxu1 }
  0xf5   : > { %v2711_v51 = vshll.u32 %v2561_v42, 16  ;;  %v2699_v62 = vrot.slane %v2698_v50, 4  ;;  %v12161_v42 = vpop.f32.mrf.mxu0  ;;  %v2735_v50 = vshll.u32 %v2564_v41, 16 }
  0xf6   : > { %10408 = vmatmul.msk.bf16.gmra.mxu3 %vm1514_vm15, %v11122_v43  ;;  %v2703_v43 = vrot.slane %v2701_v35, 5  ;;  %v1971_v35 = vrot.slane %v11310_v33, 5 }
  0xf7   : > { %v2713_v1 = vrot.slane %v2711_v51, 5 }
  0xf8   : > { %v2708_v52 = vor.u32 %v2707_v44, %v2703_v43  ;;  %v2704_v6 = vsel %vm11709_vm12, %v2699_v62, %v2703_v43  ;;  %v10314_v43 = vrot.slane %v1882_v40, 9  ;;  %v1973_v44 = vrot.slane %v1971_v35, 4  ;;  %v11110_v62 = vld [vmem:[#allocation2 + $0x48] sm:$0xff] }
  0xf9   : > { %v2989_v11 = vunpack.c.l.b16 %v2704_v6 }
  0xfa   : > { %10328 = vmatmul.msk.bf16.gmra.mxu2 %vm1514_vm15, %v2076_v53  ;;  %v12137_v53 = vpop.f32.mrf.mxu2  ;;  %v2709_v63 = vrot.slane %v2708_v52, 4  ;;  %v1972_v55 = vsel %vm12036_vm11, %v10314_v43, %v1971_v35  ;;  %v1975_v24 = vsel %vm12036_vm11, %v1973_v44, %v1974_v30  ;;  %v1981_v44 = vrot.slane %v11991_v0, 5 }
  0xfb   : > { %v2053_v2 = vunpack.c.l.b16 %v1972_v55  ;;  %v2054_v31 = vunpack.c.l.b16 %v1975_v24  ;;  %v2568_v55 = vld [vmem:[#allocation2 + $0x60] sm:$0xf]  ;;  %v11111_v24 = vld [vmem:[#allocation2 + $0x54] sm:$0xff] }
  0xfc   : > { %v2714_v13 = vsel %vm11709_vm12, %v2709_v63, %v2713_v1  ;;  %v11125_v1 = vld [vmem:[#allocation2 + $0x48] sm:$0xff] }
  0xfd   : > { %v2990_v32 = vunpack.c.l.b16 %v2714_v13  ;;  %v2079_v16 = vpack.c.b16 %v2054_v31, %v2053_v2 }
  0xfe   : > { %v12172_v63 = vpop.f32.mrf.mxu3 }
  0xff   : > { %10425 = vmatmul.msk.bf16.gmra.mxu0 %vm1514_vm15, %v3015_v9  ;;  %v2563_v9 = vld [vmem:[#allocation2 + $0x4c] sm:$0xf]  ;;  %v3017_v46 = vpack.c.b16 %v2990_v32, %v2989_v11  ;;  %v1883_v32 = vld [vmem:[#allocation2 + $0x54] sm:$0xe] }
 0x100   : > { %v2725_v18 = vshll.u32 %v2563_v9, 16  ;;  %v2729_v19 = vshrl.u32 %v2563_v9, 16  ;;  %v10315_v41 = vrot.slane %v1883_v32, 9 }
 0x102   : > { %v12155_v23 = vpop.f32.mrf.mxu2  ;;  %v2727_v21 = vrot.slane %v2725_v18, 5 }
 0x104   : > { %10296 = vmatmul.msk.bf16.gmra.mxu1 %vm1514_vm15, %v11108_v15  ;;  %v2716_v15 = vshrl.u32 %v2562_v8, 16  ;;  %v2566_v8 = vld [vmem:[#allocation2 + $0x58] sm:$0xf] }
 0x105   : > { %v2749_v13 = vshll.u32 %v2566_v8, 16 }
 0x106   : > { %10409 = vmatmul.msk.bf16.gmra.mxu3 %vm1514_vm15, %v11123_v28  ;;  %v2078_v28 = vpack.c.b16 %v2052_v12, %v2051_v10  ;;  %v2718_v37 = vrot.slane %v2716_v15, 4  ;;  %v12179_v10 = vpop.f32.mrf.mxu0  ;;  %v2753_v15 = vshrl.u32 %v2566_v8, 16  ;;  %v12188_v40 = vpop.f32.mrf.mxu3  ;;  %v2767_v8 = vshll.u32 %v2568_v55, 16 }
 0x108   : > { %v2722_v47 = vor.u32 %v2721_v38, %v2718_v37  ;;  %v2751_v37 = vrot.slane %v2749_v13, 5  ;;  %v2755_v38 = vrot.slane %v2753_v15, 4 }
 0x10a   : > { %10329 = vmatmul.msk.bf16.gmra.mxu2 %vm1514_vm15, %v2077_v39  ;;  %v2731_v39 = vrot.slane %v2729_v19, 4  ;;  %v12165_v52 = vpop.f32.mrf.mxu2  ;;  %v2723_v56 = vrot.slane %v2722_v47, 4  ;;  %v1978_v19 = vrot.slane %v11985_v59, 5  ;;  %v2756_v30 = vor.u32 %v2755_v38, %v2751_v37 }
 0x10c   : > { %v2732_v48 = vor.u32 %v2731_v39, %v2727_v21  ;;  %v2728_v9 = vsel %vm11709_vm12, %v2723_v56, %v2727_v21  ;;  %v2567_v39 = vld [vmem:[#allocation2 + $0x5c] sm:$0x1]  ;;  %v1980_v43 = vrot.slane %v1978_v19, 4  ;;  %v2569_v56 = vld [vmem:[#allocation2 + $0x64] sm:$0xf] }
 0x10d   : > { %v12163_v51 = vpop.f32.mrf.mxu1 }
 0x10e   : > { %v2733_v57 = vrot.slane %v2732_v48, 4  ;;  %v12191_v47 = vpop.f32.mrf.mxu0  ;;  %v1979_v48 = vsel %vm12036_vm11, %v10315_v41, %v1978_v19  ;;  %v2570_v41 = vld [vmem:[#allocation2 + $0x68] sm:$0x1] }
 0x10f   : > { %10426 = vmatmul.msk.bf16.gmra.mxu0 %vm1514_vm15, %v3016_v58  ;;  %v2737_v58 = vrot.slane %v2735_v50, 5  ;;  %v1982_v50 = vsel %vm12036_vm11, %v1980_v43, %v1981_v44  ;;  %v2055_v2 = vunpack.c.l.b16 %v1979_v48  ;;  %v1884_v43 = vld [vmem:[#allocation2 + $0x60] sm:$0xe]  ;;  %v2783_v48 = vshll.u32 %v2570_v41, 16 }
 0x110   : > { %v2056_v31 = vunpack.c.l.b16 %v1982_v50  ;;  %v10316_v50 = vrot.slane %v1884_v43, 9 }
 0x114   : > { %10297 = vmatmul.msk.bf16.gmra.mxu1 %vm1514_vm15, %v11109_v4  ;;  %v2565_v4 = vld [vmem:[#allocation2 + $0x54] sm:$0xf] }
 0x115   : > { %v2740_v12 = vshrl.u32 %v2565_v4, 16  ;;  %v2743_v6 = vshll.u32 %v2565_v4, 16  ;;  %v12182_v18 = vpop.f32.mrf.mxu1  ;;  %v2764_v4 = vshrl.u32 %v2568_v55, 16 }
 0x116   : > { %10410 = vmatmul.msk.bf16.gmra.mxu3 %vm1514_vm15, %v11124_v20  ;;  %v2738_v20 = vsel %vm11709_vm12, %v2733_v57, %v2737_v58  ;;  %v2757_v58 = vrot.slane %v2756_v30, 4 }
 0x117   : > { %v2992_v11 = vunpack.c.l.b16 %v2738_v20  ;;  %v2742_v33 = vrot.slane %v2740_v12, 4  ;;  %v2745_v35 = vrot.slane %v2743_v6, 5  ;;  %v2773_v20 = vshll.u32 %v2569_v56, 16 }
 0x118   : > { %v12185_v21 = vpop.f32.mrf.mxu2  ;;  %v2777_v12 = vshrl.u32 %v2569_v56, 16  ;;  %v2766_v19 = vrot.slane %v2764_v4, 4  ;;  %v11112_v4 = vld [vmem:[#allocation2 + $0x60] sm:$0xff] }
 0x119   : > { %v2746_v59 = vor.u32 %v2745_v35, %v2742_v33  ;;  %v11312_v33 = vld [vmem:[#allocation2 + $0x64] sm:$0xf] }
 0x11a   : > { %10330 = vmatmul.msk.bf16.gmra.mxu2 %vm1514_vm15, %v2078_v28  ;;  %v2991_v28 = vunpack.c.l.b16 %v2728_v9  ;;  %v2779_v32 = vrot.slane %v2777_v12, 4  ;;  %v1985_v35 = vrot.slane %v11312_v33, 5  ;;  %v2572_v12 = vld [vmem:[#allocation2 + $0x70] sm:$0xf] }
 0x11b   : > { %v2747_v57 = vrot.slane %v2746_v59, 4 }
 0x11c   : > { %v3018_v45 = vpack.c.b16 %v2992_v11, %v2991_v28  ;;  %v2769_v28 = vrot.slane %v2767_v8, 5  ;;  %v2775_v11 = vrot.slane %v2773_v20, 5  ;;  %v1987_v55 = vrot.slane %v1985_v35, 4  ;;  %v2571_v20 = vld [vmem:[#allocation2 + $0x6c] sm:$0xf] }
 0x11d   : > { %v2752_v6 = vsel %vm11709_vm12, %v2747_v57, %v2751_v37  ;;  %v2788_v33 = vshrl.u32 %v2571_v20, 16 }
 0x11e   : > { %v2993_v38 = vunpack.c.l.b16 %v2752_v6  ;;  %v2770_v30 = vor.u32 %v2769_v28, %v2766_v19  ;;  %v11127_v6 = vld [vmem:[#allocation2 + $0x60] sm:$0xff] }
 0x11f   : > { %10427 = vmatmul.msk.bf16.gmra.mxu0 %vm1514_vm15, %v3017_v46  ;;  %v2759_v46 = vshll.u32 %v2567_v39, 16 }
 0x120   : > { %v12200_v9 = vpop.f32.mrf.mxu2  ;;  %v2771_v57 = vrot.slane %v2770_v30, 4  ;;  %v11314_v30 = vld [vmem:[#allocation2 + $0x70] sm:$0xf] }
 0x121   : > { %v2761_v0 = vrot.slane %v2759_v46, 5  ;;  %v2780_v46 = vor.u32 %v2779_v32, %v2775_v11 }
 0x122   : > { %v2776_v28 = vsel %vm11709_vm12, %v2771_v57, %v2775_v11 }
 0x123   : > { %v2762_v13 = vsel %vm11709_vm12, %v2757_v58, %v2761_v0  ;;  %v2781_v0 = vrot.slane %v2780_v46, 4  ;;  %v1992_v46 = vrot.slane %v11314_v30, 5  ;;  %v11113_v30 = vld [vmem:[#allocation2 + $0x6c] sm:$0xff] }
 0x124   : > { %10298 = vmatmul.msk.bf16.gmra.mxu1 %vm1514_vm15, %v11110_v62  ;;  %v12207_v15 = vpop.f32.mrf.mxu3  ;;  %v2994_v39 = vunpack.c.l.b16 %v2762_v13 }
 0x126   : > { %10411 = vmatmul.msk.bf16.gmra.mxu3 %vm1514_vm15, %v11125_v1  ;;  %v11126_v1 = vld [vmem:[#allocation2 + $0x54] sm:$0xff] }
 0x12a   : > { %10331 = vmatmul.msk.bf16.gmra.mxu2 %vm1514_vm15, %v2079_v16  ;;  %v2080_v16 = vpack.c.b16 %v2056_v31, %v2055_v2  ;;  %v12210_v44 = vpop.f32.mrf.mxu0  ;;  %v1986_v2 = vsel %vm12036_vm11, %v10316_v50, %v1985_v35  ;;  %v2791_v35 = vshll.u32 %v2571_v20, 16 }
 0x12b   : > { %v2057_v13 = vunpack.c.l.b16 %v1986_v2  ;;  %v11315_v2 = vld [vmem:[#allocation2 + $0x74] sm:$0x1] }
 0x12c   : > { %v12217_v58 = vpop.f32.mrf.mxu3  ;;  %v2793_v11 = vrot.slane %v2791_v35, 5 }
 0x12f   : > { %10428 = vmatmul.msk.bf16.gmra.mxu0 %vm1514_vm15, %v3018_v45  ;;  %v11313_v45 = vld [vmem:[#allocation2 + $0x68] sm:$0x1] }
 0x130   : > { %v1988_v59 = vrot.slane %v11313_v45, 5  ;;  %v2995_v45 = vunpack.c.l.b16 %v2776_v28 }
 0x131   : > { %v12198_v62 = vpop.f32.mrf.mxu1 }
 0x132   : > { %v1989_v31 = vsel %vm12036_vm11, %v1987_v55, %v1988_v59  ;;  %v12224_v19 = vpop.f32.mrf.mxu0 }
 0x134   : > { %10299 = vmatmul.msk.bf16.gmra.mxu1 %vm1514_vm15, %v11111_v24  ;;  %v3019_v24 = vpack.c.b16 %v2994_v39, %v2993_v38  ;;  %v2797_v38 = vshll.u32 %v2572_v12, 16  ;;  %v2801_v39 = vshrl.u32 %v2572_v12, 16  ;;  %v1994_v12 = vrot.slane %v1992_v46, 4 }
 0x136   : > { %10412 = vmatmul.msk.bf16.gmra.mxu3 %vm1514_vm15, %v11126_v1  ;;  %v2785_v1 = vrot.slane %v2783_v48, 5  ;;  %v2790_v48 = vrot.slane %v2788_v33, 4  ;;  %v2799_v50 = vrot.slane %v2797_v38, 5  ;;  %v2803_v55 = vrot.slane %v2801_v39, 4 }
 0x138   : > { %v2786_v32 = vsel %vm11709_vm12, %v2781_v0, %v2785_v1  ;;  %v2573_v0 = vld [vmem:[#allocation2 + $0x74] sm:$0x1] }
 0x139   : > { %v12212_v37 = vpop.f32.mrf.mxu1  ;;  %v2996_v59 = vunpack.c.l.b16 %v2786_v32  ;;  %v2807_v28 = vshll.u32 %v2573_v0, 16  ;;  %v2575_v0 = vld [vmem:[#allocation2 + $0x7c] sm:$0xf] }
 0x13a   : > { %10332 = vmatmul.msk.bf16.gmra.mxu2 %vm1514_vm15, %v2080_v16  ;;  %v2058_v16 = vunpack.c.l.b16 %v1989_v31  ;;  %v1995_v31 = vrot.slane %v11315_v2, 5 }
 0x13c   : > { %v2081_v43 = vpack.c.b16 %v2058_v16, %v2057_v13  ;;  %v2794_v13 = vor.u32 %v2793_v11, %v2790_v48  ;;  %v2804_v16 = vor.u32 %v2803_v55, %v2799_v50  ;;  %v1996_v39 = vsel %vm12036_vm11, %v1994_v12, %v1995_v31  ;;  %v11128_v48 = vld [vmem:[#allocation2 + $0x6c] sm:$0xff] }
 0x13d   : > { %v12215_v56 = vpop.f32.mrf.mxu2  ;;  %v2060_v55 = vunpack.c.l.b16 %v1996_v39 }
 0x13f   : > { %10429 = vmatmul.msk.bf16.gmra.mxu0 %vm1514_vm15, %v3019_v24  ;;  %v1885_v24 = vld [vmem:[#allocation2 + $0x6c] sm:$0xe] }
 0x140   : > { %v10317_v20 = vrot.slane %v1885_v24, 9  ;;  %v2574_v24 = vld [vmem:[#allocation2 + $0x78] sm:$0xf] }
 0x141   : > { %v1796_v8 = vpop.f32.mrf.mxu1  ;;  %v2812_v12 = vshrl.u32 %v2574_v24, 16 }
 0x142   : > { %v1993_v38 = vsel %vm12036_vm11, %v10317_v20, %v1992_v46 }
 0x143   : > { %v2059_v11 = vunpack.c.l.b16 %v1993_v38  ;;  %v11316_v38 = vld [vmem:[#allocation2 + $0x7c] sm:$0xf] }
 0x144   : > { %10300 = vmatmul.msk.bf16.gmra.mxu1 %vm1514_vm15, %v11112_v4  ;;  %v3020_v4 = vpack.c.b16 %v2996_v59, %v2995_v45  ;;  %v2805_v45 = vrot.slane %v2804_v16, 4  ;;  %v2809_v59 = vrot.slane %v2807_v28, 5  ;;  %v2825_v16 = vshrl.u32 %v2575_v0, 16 }
 0x145   : > { %v12231_v41 = vpop.f32.mrf.mxu2 }
 0x146   : > { %10413 = vmatmul.msk.bf16.gmra.mxu3 %vm1514_vm15, %v11127_v6  ;;  %v1797_v6 = vadd.f32 %v1796_v8, %v12146_v5  ;;  %v2810_v2 = vsel %vm11709_vm12, %v2805_v45, %v2809_v59  ;;  %v1886_v45 = vld [vmem:[#allocation2 + $0x78] sm:$0xe]  ;;  %v2827_v36 = vrot.slane %v2825_v16, 4 }
 0x149   : > { %v12234_v57 = vpop.f32.mrf.mxu3  ;;  %v1798_v1 = vpop.f32.mrf.mxu1 }
 0x14a   : > { %14719 = vst [vmem:[#allocation13_spill] sm:$0xff] %v12234_v57  ;;  %10333 = vmatmul.msk.bf16.gmra.mxu2 %vm1514_vm15, %v2081_v43  ;;  %v2795_v43 = vrot.slane %v2794_v13, 4  ;;  %v1799_v31 = vadd.f32 %v1798_v1, %v12161_v42  ;;  %v2821_v13 = vshll.u32 %v2575_v0, 16  ;;  %v2814_v42 = vrot.slane %v2812_v12, 4  ;;  %v11317_v0 = vld [vmem:[#allocation2 + $0x80] sm:$0x1] }
 0x14b   : > { %v2002_v57 = vrot.slane %v11317_v0, 5  ;;  %v2578_v0 = vld [vmem:[#allocation2 + $0x88] sm:$0xf] }
 0x14c   : > { %v12238_v32 = vpop.f32.mrf.mxu0  ;;  %v2800_v46 = vsel %vm11709_vm12, %v2795_v43, %v2799_v50  ;;  %v1999_v50 = vrot.slane %v11316_v38, 5  ;;  %v2998_v43 = vunpack.c.l.b16 %v2810_v2 }
 0x14d   : > { %v2149_v33 = vpop.f32.mrf.mxu2  ;;  %v2997_v39 = vunpack.c.l.b16 %v2800_v46 }
 0x14e   : > { %v2229_v35 = vadd.f32 %v2149_v33, %v1797_v6  ;;  %v2815_v6 = vshll.u32 %v2574_v24, 16  ;;  %v2082_v33 = vpack.c.b16 %v2060_v55, %v2059_v11  ;;  %v2576_v24 = vld [vmem:[#allocation2 + $0x80] sm:$0x1] }
 0x14f   : > { %10430 = vmatmul.msk.bf16.gmra.mxu0 %vm1514_vm15, %v3020_v4  ;;  %v3021_v11 = vpack.c.b16 %v2998_v43, %v2997_v39  ;;  %v2831_v38 = vshll.u32 %v2576_v24, 16 }
 0x150   : > { %v2817_v1 = vrot.slane %v2815_v6, 5 }
 0x151   : > { %v12245_v5 = vpop.f32.mrf.mxu3  ;;  %v1801_v8 = vpop.f32.mrf.mxu1 }
 0x152   : > { %14720 = vst [vmem:[#allocation14_spill] sm:$0xff] %v12245_v5  ;;  %v1802_v55 = vadd.f32 %v1801_v8, %v12179_v10  ;;  %v2818_v2 = vor.u32 %v2817_v1, %v2814_v42  ;;  %v2833_v8 = vrot.slane %v2831_v38, 5  ;;  %v11129_v42 = vld [vmem:[#allocation2 + $0x78] sm:$0xff] }
 0x154   : > { %10301 = vmatmul.msk.bf16.gmra.mxu1 %vm1514_vm15, %v11113_v30  ;;  %v12253_v4 = vpop.f32.mrf.mxu0  ;;  %v2823_v30 = vrot.slane %v2821_v13, 5  ;;  %v2819_v43 = vrot.slane %v2818_v2, 4  ;;  %v2849_v2 = vshrl.u32 %v2578_v0, 16 }
 0x155   : > { %v2151_v20 = vpop.f32.mrf.mxu2 }
 0x156   : > { %10414 = vmatmul.msk.bf16.gmra.mxu3 %vm1514_vm15, %v11128_v48  ;;  %v2230_v28 = vadd.f32 %v2151_v20, %v1799_v31  ;;  %v10318_v48 = vrot.slane %v1886_v45, 9  ;;  %v2001_v31 = vrot.slane %v1999_v50, 4  ;;  %v2828_v20 = vor.u32 %v2827_v36, %v2823_v30  ;;  %v2577_v36 = vld [vmem:[#allocation2 + $0x84] sm:$0xf] }
 0x158   : > { %v2003_v16 = vsel %vm12036_vm11, %v2001_v31, %v2002_v57  ;;  %v2829_v10 = vrot.slane %v2828_v20, 4  ;;  %v2836_v57 = vshrl.u32 %v2577_v36, 16 }
 0x159   : > { %v2435_v59 = vpop.f32.mrf.mxu3  ;;  %v1803_v5 = vpop.f32.mrf.mxu1  ;;  %v2062_v24 = vunpack.c.l.b16 %v2003_v16 }
 0x15a   : > { %v2515_v25 = vadd.f32 %v2435_v59, %v2229_v35  ;;  %10334 = vmatmul.msk.bf16.gmra.mxu2 %vm1514_vm15, %v2082_v33  ;;  %v2000_v35 = vsel %vm12036_vm11, %v10318_v48, %v1999_v50  ;;  %v11114_v33 = vld [vmem:[#allocation2 + $0x78] sm:$0xff]  ;;  %v1804_v50 = vadd.f32 %v1803_v5, %v12191_v47  ;;  %v2839_v48 = vshll.u32 %v2577_v36, 16  ;;  %v11318_v47 = vld [vmem:[#allocation2 + $0x88] sm:$0xf]  ;;  %v2579_v36 = vld [vmem:[#allocation2 + $0x8c] sm:$0x1] }
 0x15b   : > { %v2061_v1 = vunpack.c.l.b16 %v2000_v35  ;;  %v2006_v5 = vrot.slane %v11318_v47, 5  ;;  %v2838_v16 = vrot.slane %v2836_v57, 4  ;;  %v11115_v47 = vld [vmem:[#allocation2 + $0x84] sm:$0xff] }
 0x15c   : > { %v3089_v46 = vpop.f32.mrf.mxu0 }
 0x15d   : > { %v2154_v12 = vpop.f32.mrf.mxu2  ;;  %v12258_v13 = vadd.f32 %v3089_v46, %v2515_v25  ;;  %v2845_v46 = vshll.u32 %v2578_v0, 16  ;;  %v2083_v20 = vpack.c.b16 %v2062_v24, %v2061_v1  ;;  %v11319_v1 = vld [vmem:[#allocation2 + $0x8c] sm:$0x1]  ;;  %v2008_v0 = vrot.slane %v2006_v5, 4 }
 0x15e   : > { %v2231_v6 = vadd.f32 %v2154_v12, %v1802_v55  ;;  %v2834_v55 = vsel %vm11709_vm12, %v2829_v10, %v2833_v8 }
 0x15f   : > { %10431 = vmatmul.msk.bf16.gmra.mxu0 %vm1514_vm15, %v3021_v11  ;;  %v2824_v11 = vsel %vm11709_vm12, %v2819_v43, %v2823_v30  ;;  %v3000_v35 = vunpack.c.l.b16 %v2834_v55  ;;  %v2847_v43 = vrot.slane %v2845_v46, 5  ;;  %v2580_v46 = vld [vmem:[#allocation2 + $0x90] sm:$0xf] }
 0x160   : > { %v2999_v12 = vunpack.c.l.b16 %v2824_v11 }
 0x161   : > { %v2437_v39 = vpop.f32.mrf.mxu3  ;;  %v1806_v45 = vpop.f32.mrf.mxu1 }
 0x162   : > { %v2516_v59 = vadd.f32 %v2437_v39, %v2230_v28  ;;  %v1807_v25 = vadd.f32 %v1806_v45, %v12210_v44  ;;  %v1887_v39 = vld [vmem:[#allocation2 + $0x84] sm:$0xe]  ;;  %v2851_v45 = vrot.slane %v2849_v2, 4 }
 0x163   : > { %v10319_v24 = vrot.slane %v1887_v39, 9 }
 0x164   : > { %10302 = vmatmul.msk.bf16.gmra.mxu1 %vm1514_vm15, %v11114_v33  ;;  %v3091_v31 = vpop.f32.mrf.mxu0  ;;  %v2841_v33 = vrot.slane %v2839_v48, 5  ;;  %v2852_v57 = vor.u32 %v2851_v45, %v2847_v43  ;;  %v2855_v48 = vshll.u32 %v2579_v36, 16 }
 0x165   : > { %v2156_v28 = vpop.f32.mrf.mxu2  ;;  %v12273_v38 = vadd.f32 %v3091_v31, %v2516_v59  ;;  %v2009_v59 = vrot.slane %v11319_v1, 5 }
 0x166   : > { %10415 = vmatmul.msk.bf16.gmra.mxu3 %vm1514_vm15, %v11129_v42  ;;  %v2232_v44 = vadd.f32 %v2156_v28, %v1804_v50  ;;  %v3022_v50 = vpack.c.b16 %v3000_v35, %v2999_v12  ;;  %v2842_v31 = vor.u32 %v2841_v33, %v2838_v16  ;;  %v2581_v12 = vld [vmem:[#allocation2 + $0x94] sm:$0xf]  ;;  %v2853_v16 = vrot.slane %v2852_v57, 4 }
 0x167   : > { %v2857_v33 = vrot.slane %v2855_v48, 5  ;;  %v2869_v1 = vshll.u32 %v2581_v12, 16 }
 0x169   : > { %v2440_v30 = vpop.f32.mrf.mxu3  ;;  %v1808_v10 = vpop.f32.mrf.mxu1 }
 0x16a   : > { %v2517_v8 = vadd.f32 %v2440_v30, %v2231_v6  ;;  %10335 = vmatmul.msk.bf16.gmra.mxu2 %vm1514_vm15, %v2083_v20  ;;  %v1809_v42 = vadd.f32 %v1808_v10, %v12224_v19  ;;  %v2007_v6 = vsel %vm12036_vm11, %v10319_v24, %v2006_v5  ;;  %v2010_v19 = vsel %vm12036_vm11, %v2008_v0, %v2009_v59  ;;  %v11130_v10 = vld [vmem:[#allocation2 + $0x84] sm:$0xff] }
 0x16b   : > { %v2843_v20 = vrot.slane %v2842_v31, 4  ;;  %v2860_v30 = vshrl.u32 %v2580_v46, 16  ;;  %v2063_v36 = vunpack.c.l.b16 %v2007_v6  ;;  %v2064_v5 = vunpack.c.l.b16 %v2010_v19  ;;  %v11320_v6 = vld [vmem:[#allocation2 + $0x94] sm:$0xf] }
 0x16c   : > { %v3094_v11 = vpop.f32.mrf.mxu0  ;;  %v2873_v24 = vshrl.u32 %v2581_v12, 16  ;;  %v2013_v19 = vrot.slane %v11320_v6, 5 }
 0x16d   : > { %v2159_v55 = vpop.f32.mrf.mxu2  ;;  %v12277_v2 = vadd.f32 %v3094_v11, %v2517_v8  ;;  %v2848_v0 = vsel %vm11709_vm12, %v2843_v20, %v2847_v43  ;;  %v2862_v11 = vrot.slane %v2860_v30, 4  ;;  %v2084_v57 = vpack.c.b16 %v2064_v5, %v2063_v36  ;;  %v1888_v43 = vld [vmem:[#allocation2 + $0x90] sm:$0xe] }
 0x16e   : > { %v2233_v28 = vadd.f32 %v2159_v55, %v1807_v25  ;;  %v2863_v25 = vshll.u32 %v2580_v46, 16  ;;  %v2871_v55 = vrot.slane %v2869_v1, 5  ;;  %v2875_v46 = vrot.slane %v2873_v24, 4 }
 0x16f   : > { %14721 = vst [vmem:[#allocation15_spill] sm:$0xff] %v12277_v2  ;;  %10432 = vmatmul.msk.bf16.gmra.mxu0 %vm1514_vm15, %v3022_v50  ;;  %v2858_v50 = vsel %vm11709_vm12, %v2853_v16, %v2857_v33  ;;  %v11321_v16 = vld [vmem:[#allocation2 + $0x98] sm:$0x1]  ;;  %v10320_v36 = vrot.slane %v1888_v43, 9  ;;  %v2015_v5 = vrot.slane %v2013_v19, 4 }
 0x170   : > { %v3002_v12 = vunpack.c.l.b16 %v2858_v50  ;;  %v2016_v33 = vrot.slane %v11321_v16, 5  ;;  %v2584_v50 = vld [vmem:[#allocation2 + $0xa0] sm:$0xf] }
 0x171   : > { %v2442_v35 = vpop.f32.mrf.mxu3  ;;  %v1811_v39 = vpop.f32.mrf.mxu1 }
 0x172   : > { %v2518_v45 = vadd.f32 %v2442_v35, %v2232_v44  ;;  %v1812_v8 = vadd.f32 %v1811_v39, %v12238_v32  ;;  %v2865_v32 = vrot.slane %v2863_v25, 5  ;;  %v2582_v35 = vld [vmem:[#allocation2 + $0x98] sm:$0x1] }
 0x174   : > { %10303 = vmatmul.msk.bf16.gmra.mxu1 %vm1514_vm15, %v11115_v47  ;;  %v3096_v59 = vpop.f32.mrf.mxu0  ;;  %v3001_v47 = vunpack.c.l.b16 %v2848_v0  ;;  %v2583_v0 = vld [vmem:[#allocation2 + $0x9c] sm:$0xf] }
 0x175   : > { %v2161_v31 = vpop.f32.mrf.mxu2  ;;  %v12291_v48 = vadd.f32 %v3096_v59, %v2518_v45  ;;  %v2876_v45 = vor.u32 %v2875_v46, %v2871_v55  ;;  %v2887_v46 = vshll.u32 %v2583_v0, 16 }
 0x176   : > { %10416 = vmatmul.msk.bf16.gmra.mxu3 %vm1514_vm15, %v11130_v10  ;;  %v2234_v44 = vadd.f32 %v2161_v31, %v1809_v42  ;;  %v2866_v42 = vor.u32 %v2865_v32, %v2862_v11  ;;  %v2879_v10 = vshll.u32 %v2582_v35, 16  ;;  %v3023_v1 = vpack.c.b16 %v3002_v12, %v3001_v47 }
 0x177   : > { %14722 = vst [vmem:[#allocation16_spill] sm:$0xff] %v12291_v48  ;;  %v2877_v16 = vrot.slane %v2876_v45, 4  ;;  %v2014_v11 = vsel %vm12036_vm11, %v10320_v36, %v2013_v19  ;;  %v2884_v32 = vshrl.u32 %v2583_v0, 16  ;;  %v2893_v47 = vshll.u32 %v2584_v50, 16 }
 0x178   : > { %v2867_v31 = vrot.slane %v2866_v42, 4  ;;  %v2897_v12 = vshrl.u32 %v2584_v50, 16  ;;  %v2889_v45 = vrot.slane %v2887_v46, 5 }
 0x179   : > { %v2445_v20 = vpop.f32.mrf.mxu3  ;;  %v1813_v39 = vpop.f32.mrf.mxu1 }
 0x17a   : > { %v2519_v30 = vadd.f32 %v2445_v20, %v2233_v28  ;;  %10336 = vmatmul.msk.bf16.gmra.mxu2 %vm1514_vm15, %v2084_v57  ;;  %v1814_v25 = vadd.f32 %v1813_v39, %v12253_v4  ;;  %v2881_v28 = vrot.slane %v2879_v10, 5  ;;  %v2017_v4 = vsel %vm12036_vm11, %v2015_v5, %v2016_v33  ;;  %v11116_v57 = vld [vmem:[#allocation2 + $0x90] sm:$0xff] }
 0x17b   : > { %v11131_v20 = vld [vmem:[#allocation2 + $0x90] sm:$0xff]  ;;  %v2065_v39 = vunpack.c.l.b16 %v2014_v11  ;;  %v2872_v42 = vsel %vm11709_vm12, %v2867_v31, %v2871_v55  ;;  %v2886_v33 = vrot.slane %v2884_v32, 4  ;;  %v2895_v10 = vrot.slane %v2893_v47, 5  ;;  %v11322_v31 = vld [vmem:[#allocation2 + $0xa0] sm:$0xf] }
 0x17c   : > { %v3099_v24 = vpop.f32.mrf.mxu0  ;;  %v2882_v19 = vsel %vm11709_vm12, %v2877_v16, %v2881_v28  ;;  %v2899_v36 = vrot.slane %v2897_v12, 4  ;;  %v3003_v50 = vunpack.c.l.b16 %v2872_v42  ;;  %v2020_v11 = vrot.slane %v11322_v31, 5  ;;  %v11323_v12 = vld [vmem:[#allocation2 + $0xa4] sm:$0x1] }
 0x17d   : > { %v2164_v59 = vpop.f32.mrf.mxu2  ;;  %v12295_v48 = vadd.f32 %v3099_v24, %v2519_v30  ;;  %v2066_v30 = vunpack.c.l.b16 %v2017_v4  ;;  %v2585_v24 = vld [vmem:[#allocation2 + $0xa4] sm:$0x1]  ;;  %v3004_v55 = vunpack.c.l.b16 %v2882_v19  ;;  %v2890_v16 = vor.u32 %v2889_v45, %v2886_v33 }
 0x17e   : > { %v2235_v6 = vadd.f32 %v2164_v59, %v1812_v8  ;;  %v2900_v28 = vor.u32 %v2899_v36, %v2895_v10  ;;  %v2903_v4 = vshll.u32 %v2585_v24, 16  ;;  %v2586_v36 = vld [vmem:[#allocation2 + $0xa8] sm:$0xf] }
 0x17f   : > { %14723 = vst [vmem:[#allocation17_spill] sm:$0xff] %v12295_v48  ;;  %10433 = vmatmul.msk.bf16.gmra.mxu0 %vm1514_vm15, %v3023_v1  ;;  %v2085_v59 = vpack.c.b16 %v2066_v30, %v2065_v39  ;;  %v2022_v39 = vrot.slane %v2020_v11, 4  ;;  %v2891_v30 = vrot.slane %v2890_v16, 4  ;;  %v432_v48 = vld [vmem:[#allocation2 + $0xc8] sm:$0x1] }
 0x180   : > { %v2901_v42 = vrot.slane %v2900_v28, 4  ;;  %v2905_v19 = vrot.slane %v2903_v4, 5  ;;  %v2908_v28 = vshrl.u32 %v2586_v36, 16  ;;  %v2911_v4 = vshll.u32 %v2586_v36, 16 }
 0x181   : > { %v2447_v35 = vpop.f32.mrf.mxu3  ;;  %v1816_v43 = vpop.f32.mrf.mxu1 }
 0x182   : > { %v2520_v8 = vadd.f32 %v2447_v35, %v2234_v44  ;;  %v2023_v35 = vrot.slane %v11323_v12, 5 }
 0x184   : > { %10304 = vmatmul.msk.bf16.gmra.mxu1 %vm1514_vm15, %v11116_v57  ;;  %v3101_v5 = vpop.f32.mrf.mxu0  ;;  %v1889_v57 = vld [vmem:[#allocation2 + $0x9c] sm:$0xe] }
 0x185   : > { %v2166_v1 = vpop.f32.mrf.mxu2  ;;  %v12308_v0 = vadd.f32 %v3101_v5, %v2520_v8  ;;  %v1817_v8 = vadd.f32 %v1816_v43, %v12116_v54  ;;  %v2896_v54 = vsel %vm11709_vm12, %v2891_v30, %v2895_v10  ;;  %v2906_v43 = vsel %vm11709_vm12, %v2901_v42, %v2905_v19 }
 0x186   : > { %10417 = vmatmul.msk.bf16.gmra.mxu3 %vm1514_vm15, %v11131_v20  ;;  %v2236_v44 = vadd.f32 %v2166_v1, %v1814_v25  ;;  %v3024_v20 = vpack.c.b16 %v3004_v55, %v3003_v50  ;;  %v10321_v25 = vrot.slane %v1889_v57, 9  ;;  %v2587_v1 = vld [vmem:[#allocation2 + $0xac] sm:$0xf]  ;;  %v11117_v50 = vld [vmem:[#allocation2 + $0x9c] sm:$0xff]  ;;  %v3006_v42 = vunpack.c.l.b16 %v2906_v43 }
 0x187   : > { %14724 = vst [vmem:[#allocation18_spill] sm:$0xff] %v12308_v0  ;;  %v376_v55 = vld [vmem:[#allocation2 + $0xc0] sm:$0x1]  ;;  %v2917_v57 = vshll.u32 %v2587_v1, 16  ;;  %v2921_v10 = vshrl.u32 %v2587_v1, 16 }
 0x189   : > { %v2450_v32 = vpop.f32.mrf.mxu3  ;;  %v1818_v46 = vpop.f32.mrf.mxu1  ;;  %v12328_v36 = vrot.slane %v2917_v57, 5 }
 0x18a   : > { %v2521_v47 = vadd.f32 %v2450_v32, %v2235_v6  ;;  %10337 = vmatmul.msk.bf16.gmra.mxu2 %vm1514_vm15, %v2085_v59  ;;  %v2021_v6 = vsel %vm12036_vm11, %v10321_v25, %v2020_v11  ;;  %v2024_v59 = vsel %vm12036_vm11, %v2022_v39, %v2023_v35  ;;  %v377_v11 = vsel %vm11641_vm3, 0, %v376_v55 }
 0x18b   : > { %v2067_v12 = vunpack.c.l.b16 %v2021_v6  ;;  %v2068_v35 = vunpack.c.l.b16 %v2024_v59  ;;  %378 = vst [vmem:[#allocation2 + $0xc0] sm:$0x1] %v377_v11  ;;  %v3005_v25 = vunpack.c.l.b16 %v2896_v54  ;;  %v1819_v39 = vadd.f32 %v1818_v46, %v12126_v29  ;;  %v2588_v54 = vld [vmem:[#allocation2 + $0xb0] sm:$0x1]  ;;  %v11324_v29 = vld [vmem:[#allocation2 + $0xac] sm:$0xf] }
 0x18c   : > { %v3104_v5 = vpop.f32.mrf.mxu0  ;;  %v2923_v59 = vrot.slane %v2921_v10, 4  ;;  %v2027_v46 = vrot.slane %v11324_v29, 5  ;;  %v2589_v29 = vld [vmem:[#allocation2 + $0xb4] sm:$0xf] }
 0x18d   : > { %v2169_v33 = vpop.f32.mrf.mxu2  ;;  %v12312_v24 = vadd.f32 %v3104_v5, %v2521_v47  ;;  %v11132_v47 = vld [vmem:[#allocation2 + $0x9c] sm:$0xff]  ;;  %v2910_v5 = vrot.slane %v2908_v28, 4  ;;  %v2086_v1 = vpack.c.b16 %v2068_v35, %v2067_v12  ;;  %v2927_v12 = vshll.u32 %v2588_v54, 16 }
 0x18e   : > { %v2237_v45 = vadd.f32 %v2169_v33, %v1817_v8  ;;  %v2913_v33 = vrot.slane %v2911_v4, 5  ;;  %v3025_v4 = vpack.c.b16 %v3006_v42, %v3005_v25  ;;  %v433_v25 = vsel %vm11650_vm5, 0, %v432_v48 }
 0x18f   : > { %14725 = vst [vmem:[#allocation19_spill] sm:$0xff] %v12312_v24  ;;  %10434 = vmatmul.msk.bf16.gmra.mxu0 %vm1514_vm15, %v3024_v20  ;;  %v588_v20 = vld [vmem:[%s11620_s26 + $0x78] sm:$0xf]  ;;  %v11325_v24 = vld [vmem:[#allocation2 + $0xb0] sm:$0x1] }
 0x190   : > { %v848_v8 = vshrl.u32 %v588_v20, 16  ;;  %v851_v11 = vshll.u32 %v588_v20, 16  ;;  %v2030_v28 = vrot.slane %v11325_v24, 5  ;;  %434 = vst [vmem:[#allocation2 + $0xc8] sm:$0x1] %v433_v25 }
 0x191   : > { %v2452_v31 = vpop.f32.mrf.mxu3  ;;  %v1821_v16 = vpop.f32.mrf.mxu1 }
 0x192   : > { %v2522_v32 = vadd.f32 %v2452_v31, %v2236_v44  ;;  %v589_v44 = vld [vmem:[%s11620_s26 + $0x7c] sm:$0xf]  ;;  %v1890_v31 = vld [vmem:[#allocation2 + $0xa8] sm:$0xe]  ;;  %v1020_v35 = vld [vmem:[#allocation2 + $0xc0] sm:$0xf]  ;;  %v1822_v20 = vadd.f32 %v1821_v16, %v12134_v49 }
 0x193   : > { %v856_v43 = vshrl.u32 %v589_v44, 16  ;;  %v10322_v10 = vrot.slane %v1890_v31, 9  ;;  %v859_v24 = vshll.u32 %v589_v44, 16  ;;  %v2929_v44 = vrot.slane %v2927_v12, 5 }
 0x194   : > { %10305 = vmatmul.msk.bf16.gmra.mxu1 %vm1514_vm15, %v11117_v50  ;;  %v3106_v30 = vpop.f32.mrf.mxu0  ;;  %v850_v50 = vrot.slane %v848_v8, 7 }
 0x195   : > { %v2171_v19 = vpop.f32.mrf.mxu2  ;;  %v12332_v55 = vadd.f32 %v3106_v30, %v2522_v32  ;;  %v2924_v32 = vor.u32 %v2923_v59, %v12328_v36  ;;  %v858_v30 = vrot.slane %v856_v43, 7  ;;  %v2028_v49 = vsel %vm12036_vm11, %v10322_v10, %v2027_v46  ;;  %v11133_v10 = vld [vmem:[#allocation2 + $0xa8] sm:$0xff] }
 0x196   : > { %10418 = vmatmul.msk.bf16.gmra.mxu3 %vm1514_vm15, %v11132_v47  ;;  %v2238_v6 = vadd.f32 %v2171_v19, %v1819_v39  ;;  %v2914_v47 = vor.u32 %v2913_v33, %v2910_v5  ;;  %v2029_v39 = vrot.slane %v2027_v46, 4  ;;  %v853_v8 = vor.u32 %v851_v11, %v850_v50 }
 0x197   : > { %v854_v19 = vrot.slane %v850_v50, 4  ;;  %v861_v59 = vor.u32 %v859_v24, %v858_v30  ;;  %v2925_v16 = vrot.slane %v2924_v32, 4  ;;  %v2932_v50 = vshrl.u32 %v2589_v29, 16 }
 0x198   : > { %v1021_v5 = vsel %vm11670_vm9, %v853_v8, %v1020_v35  ;;  %v2915_v31 = vrot.slane %v2914_v47, 4  ;;  %v2031_v48 = vsel %vm12036_vm11, %v2029_v39, %v2030_v28  ;;  %v863_v8 = vrot.slane %v858_v30, 4 }
 0x199   : > { %v2455_v57 = vpop.f32.mrf.mxu3  ;;  %v1823_v0 = vpop.f32.mrf.mxu1  ;;  %1022 = vst [vmem:[#allocation2 + $0xc0] sm:$0xf] %v1021_v5  ;;  %v862_v11 = vsel %vm11658_vm8, %v854_v19, %v861_v59  ;;  %v2069_v28 = vunpack.c.l.b16 %v2028_v49  ;;  %v2070_v39 = vunpack.c.l.b16 %v2031_v48  ;;  %v2930_v32 = vsel %vm11709_vm12, %v2925_v16, %v2929_v44  ;;  %v1024_v19 = vld [vmem:[#allocation2 + $0xc8] sm:$0x1]  ;;  %v2591_v5 = vld [vmem:[#allocation2 + $0xbc] sm:$0x1] }
 0x19a   : > { %v2523_v2 = vadd.f32 %v2455_v57, %v2237_v45  ;;  %10338 = vmatmul.msk.bf16.gmra.mxu2 %vm1514_vm15, %v2086_v1  ;;  %v2590_v1 = vld [vmem:[#allocation2 + $0xb8] sm:$0xf]  ;;  %1023 = vst.msk [vmem:[#allocation2 + $0xc4] sm:$0xf] %vm316_vm7, %v862_v11  ;;  %v1824_v12 = vadd.f32 %v1823_v0, %v12152_v14  ;;  %v1891_v49 = vld [vmem:[#allocation2 + $0xb4] sm:$0xe] }
 0x19b   : > { %v2941_v35 = vshll.u32 %v2590_v1, 16  ;;  %v2945_v47 = vshrl.u32 %v2590_v1, 16  ;;  %v11326_v14 = vld [vmem:[#allocation2 + $0xb8] sm:$0xf] }
 0x19c   : > { %v3109_v42 = vpop.f32.mrf.mxu0  ;;  %v2034_v0 = vrot.slane %v11326_v14, 5 }
 0x19d   : > { %v2174_v45 = vpop.f32.mrf.mxu2  ;;  %v12341_v54 = vadd.f32 %v3109_v42, %v2523_v2  ;;  %v2935_v2 = vshll.u32 %v2589_v29, 16  ;;  %v2947_v42 = vrot.slane %v2945_v47, 4  ;;  %v2087_v29 = vpack.c.b16 %v2070_v39, %v2069_v28 }
 0x19e   : > { %v2239_v33 = vadd.f32 %v2174_v45, %v1822_v20  ;;  %v2934_v20 = vrot.slane %v2932_v50, 4  ;;  %v1025_v45 = vsel %vm11641_vm3, %v863_v8, %v1024_v19  ;;  %v2036_v47 = vrot.slane %v2034_v0, 4 }
 0x19f   : > { %10435 = vmatmul.msk.bf16.gmra.mxu0 %vm1514_vm15, %v3025_v4  ;;  %v2920_v4 = vsel %vm11709_vm12, %v2915_v31, %v12328_v36  ;;  %v2937_v25 = vrot.slane %v2935_v2, 5  ;;  %1026 = vst [vmem:[#allocation2 + $0xc8] sm:$0x1] %v1025_v45  ;;  %v3008_v31 = vunpack.c.l.b16 %v2930_v32 }
 0x1a0   : > { %v3007_v59 = vunpack.c.l.b16 %v2920_v4 }
 0x1a1   : > { %v2457_v43 = vpop.f32.mrf.mxu3  ;;  %v1826_v57 = vpop.f32.mrf.mxu1  ;;  %v2938_v16 = vor.u32 %v2937_v25, %v2934_v20  ;;  %v2593_v25 = vld [vmem:[#allocation2 + $0xc4] sm:$0xf] }
 0x1a2   : > { %v2524_v46 = vadd.f32 %v2457_v43, %v2238_v6  ;;  %v2943_v6 = vrot.slane %v2941_v35, 5  ;;  %v11327_v43 = vld [vmem:[#allocation2 + $0xbc] sm:$0x1]  ;;  %v10323_v35 = vrot.slane %v1891_v49, 9  ;;  %v3026_v8 = vpack.c.b16 %v3008_v31, %v3007_v59 }
 0x1a3   : > { %v2037_v2 = vrot.slane %v11327_v43, 5  ;;  %v2939_v28 = vrot.slane %v2938_v16, 4  ;;  %v2965_v16 = vshll.u32 %v2593_v25, 16  ;;  %v11329_v43 = vld [vmem:[#allocation2 + $0x14] sm:$0x1] }
 0x1a4   : > { %10306 = vmatmul.msk.bf16.gmra.mxu1 %vm1514_vm15, %v11118_v27  ;;  %v3111_v30 = vpop.f32.mrf.mxu0  ;;  %v2948_v44 = vor.u32 %v2947_v42, %v2943_v6  ;;  %v2951_v27 = vshll.u32 %v2591_v5, 16 }
 0x1a5   : > { %v2176_v24 = vpop.f32.mrf.mxu2  ;;  %v12361_v1 = vadd.f32 %v3111_v30, %v2524_v46  ;;  %v1827_v46 = vadd.f32 %v1826_v57, %v12163_v51  ;;  %v2038_v19 = vsel %vm12036_vm11, %v2036_v47, %v2037_v2  ;;  %v2592_v30 = vld [vmem:[#allocation2 + $0xc0] sm:$0xf]  ;;  %v11328_v51 = vld [vmem:[#allocation2 + $0x10] sm:$0xf]  ;;  %v2944_v45 = vsel %vm11709_vm12, %v2939_v28, %v2943_v6 }
 0x1a6   : > { %10419 = vmatmul.msk.bf16.gmra.mxu3 %vm1514_vm15, %v11133_v10  ;;  %v2240_v36 = vadd.f32 %v2176_v24, %v1824_v12  ;;  %v2949_v39 = vrot.slane %v2948_v44, 4  ;;  %v2953_v4 = vrot.slane %v2951_v27, 5  ;;  %v11119_v24 = vld [vmem:[#allocation2 + $0xb4] sm:$0xff]  ;;  %v3267_v57 = vrot.slane %v11328_v51, 5 }
 0x1a7   : > { %v2072_v31 = vunpack.c.l.b16 %v2038_v19  ;;  %v2956_v49 = vshrl.u32 %v2592_v30, 16  ;;  %v2969_v44 = vshrl.u32 %v2593_v25, 16  ;;  %v3270_v2 = vrot.slane %v11329_v43, 5 }
 0x1a9   : > { %v2460_v48 = vpop.f32.mrf.mxu3  ;;  %v1828_v50 = vpop.f32.mrf.mxu1  ;;  %v2958_v28 = vrot.slane %v2956_v49, 4 }
 0x1aa   : > { %v2525_v11 = vadd.f32 %v2460_v48, %v2239_v33  ;;  %10339 = vmatmul.msk.bf16.gmra.mxu2 %vm1514_vm15, %v2087_v29  ;;  %v2035_v33 = vsel %vm12036_vm11, %v10323_v35, %v2034_v0  ;;  %v2954_v29 = vsel %vm11709_vm12, %v2949_v39, %v2953_v4  ;;  %v11134_v0 = vld [vmem:[#allocation2 + $0xb4] sm:$0xff]  ;;  %v2959_v48 = vshll.u32 %v2592_v30, 16  ;;  %v3201_v39 = vld [vmem:[#allocation2 + $0xc] sm:$0xe]  ;;  %v12379_v4 = vld [vmem:[#allocation2 + $0x1c] sm:$0xf] }
 0x1ab   : > { %v2071_v59 = vunpack.c.l.b16 %v2035_v33  ;;  %v1829_v27 = vadd.f32 %v1828_v50, %v12182_v18  ;;  %v3009_v35 = vunpack.c.l.b16 %v2944_v45  ;;  %v3010_v47 = vunpack.c.l.b16 %v2954_v29  ;;  %v2594_v30 = vld [vmem:[#allocation2 + $0xc8] sm:$0x1] }
 0x1ac   : > { %v3114_v10 = vpop.f32.mrf.mxu0  ;;  %v2961_v18 = vrot.slane %v2959_v48, 5  ;;  %v2967_v50 = vrot.slane %v2965_v16, 5  ;;  %v2971_v33 = vrot.slane %v2969_v44, 4  ;;  %v10439_v19 = vrot.slane %v3201_v39, 9  ;;  %v12391_v39 = vld [vmem:[#allocation2 + $0x20] sm:$0x1] }
 0x1ad   : > { %v2179_v32 = vpop.f32.mrf.mxu2  ;;  %v12365_v20 = vadd.f32 %v3114_v10, %v2525_v11  ;;  %v3269_v11 = vrot.slane %v3267_v57, 4  ;;  %v2088_v10 = vpack.c.b16 %v2072_v31, %v2071_v59  ;;  %v3948_v49 = vshrl.u32 %v12379_v4, 16 }
 0x1ae   : > { %v2241_v12 = vadd.f32 %v2179_v32, %v1827_v46  ;;  %v3886_v46 = vld [vmem:[#allocation2 + $0x18] sm:$0xf]  ;;  %v3268_v45 = vsel %vm12036_vm11, %v10439_v19, %v3267_v57  ;;  %v3027_v48 = vpack.c.b16 %v3010_v47, %v3009_v35  ;;  %v2962_v16 = vor.u32 %v2961_v18, %v2958_v28 }
 0x1af   : > { %10436 = vmatmul.msk.bf16.gmra.mxu0 %vm1514_vm15, %v3026_v8  ;;  %v3938_v25 = vshll.u32 %v3886_v46, 16  ;;  %v3271_v29 = vsel %vm12036_vm11, %v3269_v11, %v3270_v2  ;;  %v2972_v44 = vor.u32 %v2971_v33, %v2967_v50 }
 0x1b0   : > { %v3380_v31 = vunpack.c.l.b16 %v3271_v29  ;;  %v2963_v35 = vrot.slane %v2962_v16, 4  ;;  %v11331_v16 = vld [vmem:[#allocation2 + $0x1c] sm:$0xf] }
 0x1b1   : > { %v2462_v42 = vpop.f32.mrf.mxu3  ;;  %v1831_v5 = vpop.f32.mrf.mxu1  ;;  %v2973_v47 = vrot.slane %v2972_v44, 4 }
 0x1b2   : > { %v2526_v14 = vadd.f32 %v2462_v42, %v2240_v36  ;;  %v1832_v43 = vadd.f32 %v1831_v5, %v12198_v62  ;;  %v3954_v5 = vshll.u32 %v12391_v39, 16 }
 0x1b4   : > { %10307 = vmatmul.msk.bf16.gmra.mxu1 %vm1514_vm15, %v11119_v24  ;;  %v3116_v6 = vpop.f32.mrf.mxu0  ;;  %v3935_v24 = vshrl.u32 %v3886_v46, 16 }
 0x1b5   : > { %v2181_v8 = vpop.f32.mrf.mxu2  ;;  %v12381_v32 = vadd.f32 %v3116_v6, %v2526_v14  ;;  %v3379_v14 = vunpack.c.l.b16 %v3268_v45 }
 0x1b6   : > { %10420 = vmatmul.msk.bf16.gmra.mxu3 %vm1514_vm15, %v11134_v0  ;;  %v2242_v36 = vadd.f32 %v2181_v8, %v1829_v27  ;;  %v3944_v0 = vshll.u32 %v12379_v4, 16  ;;  %v2975_v27 = vshll.u32 %v2594_v30, 16  ;;  %v3937_v57 = vrot.slane %v3935_v24, 4  ;;  %v11135_v24 = vld [vmem:[#allocation2 + $0xc0] sm:$0xff] }
 0x1b7   : > { %v3411_v6 = vpack.c.b16 %v3380_v31, %v3379_v14  ;;  %v3940_v8 = vrot.slane %v3938_v25, 5 }
 0x1b8   : > { %v2977_v28 = vrot.slane %v2975_v27, 5  ;;  %v11136_v27 = vld [vmem:[#allocation2 + $0x18] sm:$0xff] }
 0x1b9   : > { %v2465_v51 = vpop.f32.mrf.mxu3  ;;  %v1833_v42 = vpop.f32.mrf.mxu1  ;;  %v3941_v18 = vor.u32 %v3940_v8, %v3937_v57  ;;  %v3889_v57 = vld [vmem:[#allocation2 + $0x24] sm:$0xf] }
 0x1ba   : > { %v2527_v59 = vadd.f32 %v2465_v51, %v2241_v12  ;;  %10340 = vmatmul.msk.bf16.gmra.mxu2 %vm1514_vm15, %v2088_v10  ;;  %v3946_v12 = vrot.slane %v3944_v0, 5  ;;  %v3950_v10 = vrot.slane %v3948_v49, 4  ;;  %v2968_v51 = vsel %vm11709_vm12, %v2963_v35, %v2967_v50 }
 0x1bb   : > { %v2978_v45 = vsel %vm11709_vm12, %v2973_v47, %v2977_v28  ;;  %v1834_v29 = vadd.f32 %v1833_v42, %v12212_v37  ;;  %v3942_v0 = vrot.slane %v3941_v18, 4  ;;  %v3011_v37 = vunpack.c.l.b16 %v2968_v51 }
 0x1bc   : > { %v3119_v46 = vpop.f32.mrf.mxu0  ;;  %v3951_v25 = vor.u32 %v3950_v10, %v3946_v12  ;;  %v3012_v42 = vunpack.c.l.b16 %v2978_v45 }
 0x1bd   : > { %v2184_v11 = vpop.f32.mrf.mxu2  ;;  %v12393_v19 = vadd.f32 %v3119_v46, %v2527_v59  ;;  %v11330_v59 = vld [vmem:[#allocation2 + $0x20] sm:$0x1]  ;;  %v3947_v10 = vsel %vm11709_vm12, %v3942_v0, %v3946_v12 }
 0x1be   : > { %v2243_v2 = vadd.f32 %v2184_v11, %v1832_v43  ;;  %v3277_v14 = vrot.slane %v11330_v59, 5  ;;  %v3952_v50 = vrot.slane %v3951_v25, 4  ;;  %v3202_v43 = vld [vmem:[#allocation2 + $0x18] sm:$0xe]  ;;  %v12406_v11 = vld [vmem:[#allocation2 + $0x28] sm:$0xf]  ;;  %v3028_v51 = vpack.c.b16 %v3012_v42, %v3011_v37 }
 0x1bf   : > { %10437 = vmatmul.msk.bf16.gmra.mxu0 %vm1514_vm15, %v3027_v48  ;;  %v3956_v48 = vrot.slane %v3954_v5, 5  ;;  %v3962_v5 = vshll.u32 %v3889_v57, 16  ;;  %v3968_v25 = vshll.u32 %v12406_v11, 16  ;;  %v3972_v12 = vshrl.u32 %v12406_v11, 16 }
 0x1c1   : > { %v2467_v33 = vpop.f32.mrf.mxu3  ;;  %v1836_v62 = vpop.f32.mrf.mxu1 }
 0x1c2   : > { %v2528_v30 = vadd.f32 %v2467_v33, %v2242_v36  ;;  %v3274_v36 = vrot.slane %v11331_v16, 5  ;;  %v3959_v33 = vshrl.u32 %v3889_v57, 16  ;;  %v1837_v45 = vadd.f32 %v1836_v62, %v12124_v26 }
 0x1c3   : > { %v4609_v62 = vrot.slane %v12391_v39, 5  ;;  %v11332_v39 = vld [vmem:[#allocation2 + $0x2c] sm:$0x1] }
 0x1c4   : > { %10456 = vmatmul.msk.bf16.vlgmr.msra.gmra.mxu1 %vm1514_vm15, %v3411_v6  ;;  %v3121_v31 = vpop.f32.mrf.mxu0  ;;  %v10440_v6 = vrot.slane %v3202_v43, 9  ;;  %v3276_v46 = vrot.slane %v3274_v36, 4 }
 0x1c5   : > { %v2186_v49 = vpop.f32.mrf.mxu2  ;;  %v12404_v8 = vadd.f32 %v3121_v31, %v2528_v30  ;;  %v4320_v31 = vunpack.c.l.b16 %v3947_v10 }
 0x1c6   : > { %10421 = vmatmul.msk.bf16.gmra.mxu3 %vm1514_vm15, %v11135_v24  ;;  %v2244_v44 = vadd.f32 %v2186_v49, %v1834_v29  ;;  %v3275_v28 = vsel %vm12036_vm11, %v10440_v6, %v3274_v36  ;;  %v3278_v18 = vsel %vm12036_vm11, %v3276_v46, %v3277_v14  ;;  %v3957_v24 = vsel %vm11709_vm12, %v3952_v50, %v3956_v48  ;;  %v12423_v6 = vld [vmem:[#allocation2 + $0x2c] sm:$0x1] }
 0x1c7   : > { %v4606_v29 = vrot.slane %v12379_v4, 5  ;;  %v3381_v0 = vunpack.c.l.b16 %v3275_v28  ;;  %v3382_v59 = vunpack.c.l.b16 %v3278_v18  ;;  %v4321_v49 = vunpack.c.l.b16 %v3957_v24 }
 0x1c8   : > { %v3961_v36 = vrot.slane %v3959_v33, 4  ;;  %v3970_v48 = vrot.slane %v3968_v25, 5  ;;  %v3974_v50 = vrot.slane %v3972_v12, 4  ;;  %v3978_v33 = vshll.u32 %v12423_v6, 16 }
 0x1c9   : > { %v2470_v35 = vpop.f32.mrf.mxu3  ;;  %v1838_v47 = vpop.f32.mrf.mxu1  ;;  %v4608_v4 = vrot.slane %v4606_v29, 4  ;;  %v3412_v37 = vpack.c.b16 %v3382_v59, %v3381_v0  ;;  %v4352_v28 = vpack.c.b16 %v4321_v49, %v4320_v31  ;;  %v3284_v25 = vrot.slane %v11332_v39, 5  ;;  %v3892_v59 = vld [vmem:[#allocation2 + $0x30] sm:$0xf]  ;;  %v11137_v31 = vld [vmem:[#allocation2 + $0x24] sm:$0xff] }
 0x1ca   : > { %v2529_v30 = vadd.f32 %v2470_v35, %v2243_v2  ;;  %10537 = vmatmul.msk.bf16.vlgmr.msra.gmra.mxu2 %vm1514_vm15, %v11136_v27  ;;  %v4540_v2 = vld [vmem:[#allocation2 + $0x18] sm:$0xe]  ;;  %v3964_v27 = vrot.slane %v3962_v5, 5  ;;  %v3975_v18 = vor.u32 %v3974_v50, %v3970_v48  ;;  %v1839_v24 = vadd.f32 %v1838_v47, %v12137_v53  ;;  %v12437_v50 = vld [vmem:[#allocation2 + $0x34] sm:$0xf] }
 0x1cb   : > { %v10570_v26 = vrot.slane %v4540_v2, 9  ;;  %v3980_v49 = vrot.slane %v3978_v33, 5  ;;  %v3203_v2 = vld [vmem:[#allocation2 + $0x24] sm:$0xe]  ;;  %v3992_v33 = vshll.u32 %v12437_v50, 16 }
 0x1cc   : > { %v3124_v14 = vpop.f32.mrf.mxu0  ;;  %v3965_v10 = vor.u32 %v3964_v27, %v3961_v36  ;;  %v10441_v36 = vrot.slane %v3203_v2, 9  ;;  %v4541_v39 = vld [vmem:[#allocation2 + $0x24] sm:$0xe] }
 0x1cd   : > { %v2189_v16 = vpop.f32.mrf.mxu2  ;;  %v12421_v57 = vadd.f32 %v3124_v14, %v2529_v30  ;;  %v4607_v5 = vsel %vm12036_vm11, %v10570_v26, %v4606_v29  ;;  %v4610_v30 = vsel %vm12036_vm11, %v4608_v4, %v4609_v62  ;;  %v3976_v29 = vrot.slane %v3975_v18, 4 }
 0x1ce   : > { %v2245_v43 = vadd.f32 %v2189_v16, %v1837_v45  ;;  %v3966_v45 = vrot.slane %v3965_v10, 4  ;;  %v4718_v53 = vunpack.c.l.b16 %v4607_v5  ;;  %v4719_v47 = vunpack.c.l.b16 %v4610_v30 }
 0x1cf   : > { %10438 = vmatmul.msk.bf16.gmra.mxu0 %vm1514_vm15, %v3028_v51  ;;  %v3983_v26 = vshrl.u32 %v3892_v59, 16  ;;  %v3986_v4 = vshll.u32 %v3892_v59, 16  ;;  %v3981_v18 = vsel %vm11709_vm12, %v3976_v29, %v3980_v49  ;;  %v3996_v5 = vshrl.u32 %v12437_v50, 16  ;;  %v12452_v29 = vld [vmem:[#allocation2 + $0x38] sm:$0x1] }
 0x1d0   : > { %v4750_v30 = vpack.c.b16 %v4719_v47, %v4718_v53  ;;  %v3994_v49 = vrot.slane %v3992_v33, 5  ;;  %v10571_v53 = vrot.slane %v4541_v39, 9  ;;  %v11334_v33 = vld [vmem:[#allocation2 + $0x38] sm:$0x1] }
 0x1d1   : > { %v2472_v42 = vpop.f32.mrf.mxu3  ;;  %v1841_v46 = vpop.f32.mrf.mxu1  ;;  %v3998_v2 = vrot.slane %v3996_v5, 4  ;;  %v3291_v5 = vrot.slane %v11334_v33, 5 }
 0x1d2   : > { %v2530_v35 = vadd.f32 %v2472_v42, %v2244_v44  ;;  %v11333_v44 = vld [vmem:[#allocation2 + $0x28] sm:$0xf] }
 0x1d3   : > { %v3281_v0 = vrot.slane %v11333_v44, 5 }
 0x1d4   : > { %10457 = vmatmul.msk.bf16.gmra.mxu1 %vm1514_vm15, %v3412_v37  ;;  %v3126_v12 = vpop.f32.mrf.mxu0  ;;  %v3971_v37 = vsel %vm11709_vm12, %v3966_v45, %v3970_v48  ;;  %v1842_v48 = vadd.f32 %v1841_v46, %v12155_v23  ;;  %v3985_v45 = vrot.slane %v3983_v26, 4 }
 0x1d5   : > { %v2191_v51 = vpop.f32.mrf.mxu2  ;;  %v12435_v16 = vadd.f32 %v3126_v12, %v2530_v35  ;;  %v3283_v27 = vrot.slane %v3281_v0, 4  ;;  %v3282_v10 = vsel %vm12036_vm11, %v10441_v36, %v3281_v0  ;;  %v4322_v44 = vunpack.c.l.b16 %v3971_v37 }
 0x1d6   : > { %10554 = vmatmul.msk.bf16.vlgmr.msra.gmra.mxu3 %vm1514_vm15, %v4352_v28  ;;  %v2246_v14 = vadd.f32 %v2191_v51, %v1839_v24  ;;  %v4613_v24 = vrot.slane %v12406_v11, 5  ;;  %v3383_v12 = vunpack.c.l.b16 %v3282_v10  ;;  %v4323_v0 = vunpack.c.l.b16 %v3981_v18 }
 0x1d7   : > { %v3285_v35 = vsel %vm12036_vm11, %v3283_v27, %v3284_v25  ;;  %v3988_v25 = vrot.slane %v3986_v4, 5  ;;  %v4616_v11 = vrot.slane %v12423_v6, 5  ;;  %v4002_v4 = vshll.u32 %v12452_v29, 16 }
 0x1d8   : > { %v3384_v51 = vunpack.c.l.b16 %v3285_v35  ;;  %v4615_v23 = vrot.slane %v4613_v24, 4  ;;  %v4353_v37 = vpack.c.b16 %v4323_v0, %v4322_v44  ;;  %v3999_v10 = vor.u32 %v3998_v2, %v3994_v49  ;;  %v12468_v2 = vld [vmem:[#allocation2 + $0x40] sm:$0xf] }
 0x1d9   : > { %v2475_v62 = vpop.f32.mrf.mxu3  ;;  %v1843_v42 = vpop.f32.mrf.mxu1  ;;  %v3989_v47 = vor.u32 %v3988_v25, %v3985_v45  ;;  %v4614_v35 = vsel %vm12036_vm11, %v10571_v53, %v4613_v24  ;;  %v4004_v39 = vrot.slane %v4002_v4, 5  ;;  %v11138_v45 = vld [vmem:[#allocation2 + $0x30] sm:$0xff] }
 0x1da   : > { %v2531_v28 = vadd.f32 %v2475_v62, %v2245_v43  ;;  %10538 = vmatmul.msk.bf16.gmra.mxu2 %vm1514_vm15, %v11137_v31  ;;  %v3413_v46 = vpack.c.b16 %v3384_v51, %v3383_v12  ;;  %v1844_v18 = vadd.f32 %v1843_v42, %v12165_v52  ;;  %v11335_v12 = vld [vmem:[#allocation2 + $0x34] sm:$0xf]  ;;  %v4000_v24 = vrot.slane %v3999_v10, 4  ;;  %v3204_v25 = vld [vmem:[#allocation2 + $0x30] sm:$0xe] }
 0x1db   : > { %v3990_v6 = vrot.slane %v3989_v47, 4  ;;  %v4720_v52 = vunpack.c.l.b16 %v4614_v35  ;;  %v10442_v0 = vrot.slane %v3204_v25, 9  ;;  %v4016_v10 = vshll.u32 %v12468_v2, 16 }
 0x1dc   : > { %v3129_v43 = vpop.f32.mrf.mxu0 }
 0x1dd   : > { %v2194_v59 = vpop.f32.mrf.mxu2  ;;  %v12454_v36 = vadd.f32 %v3129_v43, %v2531_v28  ;;  %v4617_v28 = vsel %vm12036_vm11, %v4615_v23, %v4616_v11  ;;  %v3895_v43 = vld [vmem:[#allocation2 + $0x3c] sm:$0xf]  ;;  %v3995_v53 = vsel %vm11709_vm12, %v3990_v6, %v3994_v49  ;;  %v4020_v49 = vshrl.u32 %v12468_v2, 16 }
 0x1de   : > { %v2247_v31 = vadd.f32 %v2194_v59, %v1842_v48  ;;  %v4721_v42 = vunpack.c.l.b16 %v4617_v28  ;;  %v4010_v4 = vshll.u32 %v3895_v43, 16 }
 0x1df   : > { %10587 = vmatmul.msk.bf16.vlgmr.msra.gmra.mxu0 %vm1514_vm15, %v4750_v30 }
 0x1e0   : > { %v4751_v35 = vpack.c.b16 %v4721_v42, %v4720_v52 }
 0x1e1   : > { %v2477_v27 = vpop.f32.mrf.mxu3  ;;  %v1846_v26 = vpop.f32.mrf.mxu1 }
 0x1e2   : > { %v2532_v62 = vadd.f32 %v2477_v27, %v2246_v14  ;;  %v3288_v14 = vrot.slane %v11335_v12, 5  ;;  %v4007_v27 = vshrl.u32 %v3895_v43, 16  ;;  %v1847_v28 = vadd.f32 %v1846_v26, %v12185_v21 }
 0x1e3   : > { %v4623_v26 = vrot.slane %v12452_v29, 5  ;;  %v11336_v29 = vld [vmem:[#allocation2 + $0x44] sm:$0x1] }
 0x1e4   : > { %10458 = vmatmul.msk.bf16.gmra.mxu1 %vm1514_vm15, %v3413_v46  ;;  %v3131_v30 = vpop.f32.mrf.mxu0  ;;  %v3290_v59 = vrot.slane %v3288_v14, 4  ;;  %v3289_v46 = vsel %vm12036_vm11, %v10442_v0, %v3288_v14  ;;  %v4009_v14 = vrot.slane %v4007_v27, 4  ;;  %v12485_v0 = vld [vmem:[#allocation2 + $0x44] sm:$0x1] }
 0x1e5   : > { %v2196_v48 = vpop.f32.mrf.mxu2  ;;  %v12466_v44 = vadd.f32 %v3131_v30, %v2532_v62  ;;  %v3385_v6 = vunpack.c.l.b16 %v3289_v46  ;;  %v4324_v30 = vunpack.c.l.b16 %v3995_v53  ;;  %v4026_v27 = vshll.u32 %v12485_v0, 16 }
 0x1e6   : > { %10555 = vmatmul.msk.bf16.gmra.mxu3 %vm1514_vm15, %v4353_v37  ;;  %v2248_v51 = vadd.f32 %v2196_v48, %v1844_v18  ;;  %v3292_v47 = vsel %vm12036_vm11, %v3290_v59, %v3291_v5  ;;  %v4005_v37 = vsel %vm11709_vm12, %v4000_v24, %v4004_v39  ;;  %v4620_v18 = vrot.slane %v12437_v50, 5 }
 0x1e7   : > { %v3386_v33 = vunpack.c.l.b16 %v3292_v47  ;;  %v4325_v48 = vunpack.c.l.b16 %v4005_v37  ;;  %v4018_v39 = vrot.slane %v4016_v10, 5  ;;  %v4022_v24 = vrot.slane %v4020_v49, 4 }
 0x1e8   : > { %v4622_v50 = vrot.slane %v4620_v18, 4  ;;  %v3298_v10 = vrot.slane %v11336_v29, 5  ;;  %v4543_v29 = vld [vmem:[#allocation2 + $0x3c] sm:$0xe] }
 0x1e9   : > { %v2480_v23 = vpop.f32.mrf.mxu3  ;;  %v1848_v11 = vpop.f32.mrf.mxu1  ;;  %v3414_v52 = vpack.c.b16 %v3386_v33, %v3385_v6  ;;  %v4354_v46 = vpack.c.b16 %v4325_v48, %v4324_v30  ;;  %v4023_v47 = vor.u32 %v4022_v24, %v4018_v39  ;;  %v3898_v33 = vld [vmem:[#allocation2 + $0x48] sm:$0xf]  ;;  %v11139_v30 = vld [vmem:[#allocation2 + $0x3c] sm:$0xff]  ;;  %v4028_v48 = vrot.slane %v4026_v27, 5  ;;  %v12499_v24 = vld [vmem:[#allocation2 + $0x4c] sm:$0xf] }
 0x1ea   : > { %v2533_v62 = vadd.f32 %v2480_v23, %v2247_v31  ;;  %10539 = vmatmul.msk.bf16.gmra.mxu2 %vm1514_vm15, %v11138_v45  ;;  %v4542_v31 = vld [vmem:[#allocation2 + $0x30] sm:$0xe]  ;;  %v4012_v45 = vrot.slane %v4010_v4, 5  ;;  %v1849_v37 = vadd.f32 %v1848_v11, %v12200_v9  ;;  %v4040_v27 = vshll.u32 %v12499_v24, 16 }
 0x1eb   : > { %v10572_v21 = vrot.slane %v4542_v31, 9  ;;  %v3205_v31 = vld [vmem:[#allocation2 + $0x3c] sm:$0xe] }
 0x1ec   : > { %v3134_v5 = vpop.f32.mrf.mxu0  ;;  %v4013_v53 = vor.u32 %v4012_v45, %v4009_v14  ;;  %v10443_v14 = vrot.slane %v3205_v31, 9 }
 0x1ed   : > { %v2199_v12 = vpop.f32.mrf.mxu2  ;;  %v12483_v43 = vadd.f32 %v3134_v5, %v2533_v62  ;;  %v4621_v4 = vsel %vm12036_vm11, %v10572_v21, %v4620_v18  ;;  %v4624_v62 = vsel %vm12036_vm11, %v4622_v50, %v4623_v26  ;;  %v4024_v18 = vrot.slane %v4023_v47, 4 }
 0x1ee   : > { %v2249_v25 = vadd.f32 %v2199_v12, %v1847_v28  ;;  %v4014_v28 = vrot.slane %v4013_v53, 4  ;;  %v4722_v9 = vunpack.c.l.b16 %v4621_v4  ;;  %v4723_v11 = vunpack.c.l.b16 %v4624_v62 }
 0x1ef   : > { %10588 = vmatmul.msk.bf16.gmra.mxu0 %vm1514_vm15, %v4751_v35  ;;  %v4031_v21 = vshrl.u32 %v3898_v33, 16  ;;  %v4034_v50 = vshll.u32 %v3898_v33, 16  ;;  %v4029_v47 = vsel %vm11709_vm12, %v4024_v18, %v4028_v48  ;;  %v4044_v4 = vshrl.u32 %v12499_v24, 16  ;;  %v12514_v18 = vld [vmem:[#allocation2 + $0x50] sm:$0x1] }
 0x1f0   : > { %v4752_v62 = vpack.c.b16 %v4723_v11, %v4722_v9  ;;  %v4042_v48 = vrot.slane %v4040_v27, 5  ;;  %v10573_v9 = vrot.slane %v4543_v29, 9  ;;  %v11338_v27 = vld [vmem:[#allocation2 + $0x50] sm:$0x1] }
 0x1f1   : > { %v2482_v42 = vpop.f32.mrf.mxu3  ;;  %v1851_v59 = vpop.f32.mrf.mxu1  ;;  %v4046_v31 = vrot.slane %v4044_v4, 4  ;;  %v3305_v4 = vrot.slane %v11338_v27, 5 }
 0x1f2   : > { %v2534_v23 = vadd.f32 %v2482_v42, %v2248_v51  ;;  %v11337_v51 = vld [vmem:[#allocation2 + $0x40] sm:$0xf] }
 0x1f3   : > { %v3295_v6 = vrot.slane %v11337_v51, 5 }
 0x1f4   : > { %10459 = vmatmul.msk.bf16.gmra.mxu1 %vm1514_vm15, %v3414_v52  ;;  %v3136_v49 = vpop.f32.mrf.mxu0  ;;  %v4019_v52 = vsel %vm11709_vm12, %v4014_v28, %v4018_v39  ;;  %v1852_v39 = vadd.f32 %v1851_v59, %v12215_v56  ;;  %v4033_v28 = vrot.slane %v4031_v21, 4 }
 0x1f5   : > { %v2201_v35 = vpop.f32.mrf.mxu2  ;;  %v12497_v12 = vadd.f32 %v3136_v49, %v2534_v23  ;;  %v3297_v45 = vrot.slane %v3295_v6, 4  ;;  %v3296_v53 = vsel %vm12036_vm11, %v10443_v14, %v3295_v6  ;;  %v4326_v51 = vunpack.c.l.b16 %v4019_v52 }
 0x1f6   : > { %10556 = vmatmul.msk.bf16.gmra.mxu3 %vm1514_vm15, %v4354_v46  ;;  %v2250_v5 = vadd.f32 %v2201_v35, %v1849_v37  ;;  %v4627_v37 = vrot.slane %v12468_v2, 5  ;;  %v3387_v49 = vunpack.c.l.b16 %v3296_v53  ;;  %v4327_v6 = vunpack.c.l.b16 %v4029_v47 }
 0x1f7   : > { %v3299_v23 = vsel %vm12036_vm11, %v3297_v45, %v3298_v10  ;;  %v4036_v10 = vrot.slane %v4034_v50, 5  ;;  %v4630_v2 = vrot.slane %v12485_v0, 5  ;;  %v4050_v50 = vshll.u32 %v12514_v18, 16 }
 0x1f8   : > { %v3388_v35 = vunpack.c.l.b16 %v3299_v23  ;;  %v4629_v56 = vrot.slane %v4627_v37, 4  ;;  %v4355_v52 = vpack.c.b16 %v4327_v6, %v4326_v51  ;;  %v4047_v53 = vor.u32 %v4046_v31, %v4042_v48  ;;  %v12530_v31 = vld [vmem:[#allocation2 + $0x58] sm:$0xf] }
 0x1f9   : > { %v2485_v26 = vpop.f32.mrf.mxu3  ;;  %v1853_v42 = vpop.f32.mrf.mxu1  ;;  %v4037_v11 = vor.u32 %v4036_v10, %v4033_v28  ;;  %v4628_v23 = vsel %vm12036_vm11, %v10573_v9, %v4627_v37  ;;  %v4052_v29 = vrot.slane %v4050_v50, 5  ;;  %v11140_v28 = vld [vmem:[#allocation2 + $0x48] sm:$0xff] }
 0x1fa   : > { %v2535_v46 = vadd.f32 %v2485_v26, %v2249_v25  ;;  %10540 = vmatmul.msk.bf16.gmra.mxu2 %vm1514_vm15, %v11139_v30  ;;  %v3415_v59 = vpack.c.b16 %v3388_v35, %v3387_v49  ;;  %v1854_v47 = vadd.f32 %v1853_v42, %v12231_v41  ;;  %v11339_v49 = vld [vmem:[#allocation2 + $0x4c] sm:$0xf]  ;;  %v4048_v37 = vrot.slane %v4047_v53, 4  ;;  %v3206_v10 = vld [vmem:[#allocation2 + $0x48] sm:$0xe] }
 0x1fb   : > { %v4038_v0 = vrot.slane %v4037_v11, 4  ;;  %v4724_v41 = vunpack.c.l.b16 %v4628_v23  ;;  %v10444_v6 = vrot.slane %v3206_v10, 9  ;;  %v4064_v53 = vshll.u32 %v12530_v31, 16 }
 0x1fc   : > { %v3139_v25 = vpop.f32.mrf.mxu0 }
 0x1fd   : > { %v2204_v33 = vpop.f32.mrf.mxu2  ;;  %v12516_v14 = vadd.f32 %v3139_v25, %v2535_v46  ;;  %v4631_v46 = vsel %vm12036_vm11, %v4629_v56, %v4630_v2  ;;  %v3901_v25 = vld [vmem:[#allocation2 + $0x54] sm:$0xf]  ;;  %v4043_v9 = vsel %vm11709_vm12, %v4038_v0, %v4042_v48  ;;  %v4068_v48 = vshrl.u32 %v12530_v31, 16 }
 0x1fe   : > { %v2251_v30 = vadd.f32 %v2204_v33, %v1852_v39  ;;  %v4725_v42 = vunpack.c.l.b16 %v4631_v46  ;;  %v4058_v50 = vshll.u32 %v3901_v25, 16 }
 0x1ff   : > { %10589 = vmatmul.msk.bf16.gmra.mxu0 %vm1514_vm15, %v4752_v62 }
 0x200   : > { %v4753_v23 = vpack.c.b16 %v4725_v42, %v4724_v41 }
 0x201   : > { %v2487_v45 = vpop.f32.mrf.mxu3  ;;  %v1856_v21 = vpop.f32.mrf.mxu1 }
 0x202   : > { %v2536_v26 = vadd.f32 %v2487_v45, %v2250_v5  ;;  %v3302_v5 = vrot.slane %v11339_v49, 5  ;;  %v4055_v45 = vshrl.u32 %v3901_v25, 16  ;;  %v1857_v46 = vadd.f32 %v1856_v21, %v12139_v61 }
 0x203   : > { %v4637_v21 = vrot.slane %v12514_v18, 5  ;;  %v11340_v18 = vld [vmem:[#allocation2 + $0x5c] sm:$0x1] }
 0x204   : > { %10460 = vmatmul.msk.bf16.gmra.mxu1 %vm1514_vm15, %v3415_v59  ;;  %v3141_v62 = vpop.f32.mrf.mxu0  ;;  %v3304_v33 = vrot.slane %v3302_v5, 4  ;;  %v3303_v59 = vsel %vm12036_vm11, %v10444_v6, %v3302_v5  ;;  %v4057_v5 = vrot.slane %v4055_v45, 4  ;;  %v12547_v6 = vld [vmem:[#allocation2 + $0x5c] sm:$0x1] }
 0x205   : > { %v2206_v39 = vpop.f32.mrf.mxu2  ;;  %v12528_v51 = vadd.f32 %v3141_v62, %v2536_v26  ;;  %v3389_v0 = vunpack.c.l.b16 %v3303_v59  ;;  %v4328_v62 = vunpack.c.l.b16 %v4043_v9  ;;  %v4074_v45 = vshll.u32 %v12547_v6, 16 }
 0x206   : > { %10557 = vmatmul.msk.bf16.gmra.mxu3 %vm1514_vm15, %v4355_v52  ;;  %v2252_v35 = vadd.f32 %v2206_v39, %v1854_v47  ;;  %v3306_v11 = vsel %vm12036_vm11, %v3304_v33, %v3305_v4  ;;  %v4053_v52 = vsel %vm11709_vm12, %v4048_v37, %v4052_v29  ;;  %v4634_v47 = vrot.slane %v12499_v24, 5 }
 0x207   : > { %v3390_v27 = vunpack.c.l.b16 %v3306_v11  ;;  %v4329_v39 = vunpack.c.l.b16 %v4053_v52  ;;  %v4066_v29 = vrot.slane %v4064_v53, 5  ;;  %v4070_v37 = vrot.slane %v4068_v48, 4 }
 0x208   : > { %v4636_v24 = vrot.slane %v4634_v47, 4  ;;  %v3312_v53 = vrot.slane %v11340_v18, 5  ;;  %v4545_v18 = vld [vmem:[#allocation2 + $0x54] sm:$0xe] }
 0x209   : > { %v2490_v56 = vpop.f32.mrf.mxu3  ;;  %v1858_v2 = vpop.f32.mrf.mxu1  ;;  %v3416_v41 = vpack.c.b16 %v3390_v27, %v3389_v0  ;;  %v4356_v59 = vpack.c.b16 %v4329_v39, %v4328_v62  ;;  %v4071_v11 = vor.u32 %v4070_v37, %v4066_v29  ;;  %v3904_v27 = vld [vmem:[#allocation2 + $0x60] sm:$0xf]  ;;  %v11141_v62 = vld [vmem:[#allocation2 + $0x54] sm:$0xff]  ;;  %v4076_v39 = vrot.slane %v4074_v45, 5  ;;  %v12561_v37 = vld [vmem:[#allocation2 + $0x64] sm:$0xf] }
 0x20a   : > { %v2537_v26 = vadd.f32 %v2490_v56, %v2251_v30  ;;  %10541 = vmatmul.msk.bf16.gmra.mxu2 %vm1514_vm15, %v11140_v28  ;;  %v4544_v30 = vld [vmem:[#allocation2 + $0x48] sm:$0xe]  ;;  %v4060_v28 = vrot.slane %v4058_v50, 5  ;;  %v1859_v52 = vadd.f32 %v1858_v2, %v12158_v34  ;;  %v4088_v45 = vshll.u32 %v12561_v37, 16 }
 0x20b   : > { %v10574_v61 = vrot.slane %v4544_v30, 9  ;;  %v3207_v30 = vld [vmem:[#allocation2 + $0x54] sm:$0xe] }
 0x20c   : > { %v3144_v4 = vpop.f32.mrf.mxu0  ;;  %v4061_v9 = vor.u32 %v4060_v28, %v4057_v5  ;;  %v10445_v5 = vrot.slane %v3207_v30, 9 }
 0x20d   : > { %v2209_v49 = vpop.f32.mrf.mxu2  ;;  %v12545_v25 = vadd.f32 %v3144_v4, %v2537_v26  ;;  %v4635_v50 = vsel %vm12036_vm11, %v10574_v61, %v4634_v47  ;;  %v4638_v26 = vsel %vm12036_vm11, %v4636_v24, %v4637_v21  ;;  %v4072_v47 = vrot.slane %v4071_v11, 4 }
 0x20e   : > { %v2253_v10 = vadd.f32 %v2209_v49, %v1857_v46  ;;  %v4062_v46 = vrot.slane %v4061_v9, 4  ;;  %v4726_v34 = vunpack.c.l.b16 %v4635_v50  ;;  %v4727_v2 = vunpack.c.l.b16 %v4638_v26 }
 0x20f   : > { %10590 = vmatmul.msk.bf16.gmra.mxu0 %vm1514_vm15, %v4753_v23  ;;  %v4079_v61 = vshrl.u32 %v3904_v27, 16  ;;  %v4082_v24 = vshll.u32 %v3904_v27, 16  ;;  %v4077_v11 = vsel %vm11709_vm12, %v4072_v47, %v4076_v39  ;;  %v4092_v50 = vshrl.u32 %v12561_v37, 16  ;;  %v12576_v47 = vld [vmem:[#allocation2 + $0x68] sm:$0x1] }
 0x210   : > { %v4754_v26 = vpack.c.b16 %v4727_v2, %v4726_v34  ;;  %v4090_v39 = vrot.slane %v4088_v45, 5  ;;  %v10575_v34 = vrot.slane %v4545_v18, 9  ;;  %v11342_v45 = vld [vmem:[#allocation2 + $0x68] sm:$0x1] }
 0x211   : > { %v2492_v42 = vpop.f32.mrf.mxu3  ;;  %v1861_v33 = vpop.f32.mrf.mxu1  ;;  %v4094_v30 = vrot.slane %v4092_v50, 4  ;;  %v3319_v50 = vrot.slane %v11342_v45, 5 }
 0x212   : > { %v2538_v56 = vadd.f32 %v2492_v42, %v2252_v35  ;;  %v11341_v35 = vld [vmem:[#allocation2 + $0x58] sm:$0xf] }
 0x213   : > { %v3309_v0 = vrot.slane %v11341_v35, 5 }
 0x214   : > { %10461 = vmatmul.msk.bf16.gmra.mxu1 %vm1514_vm15, %v3416_v41  ;;  %v3146_v48 = vpop.f32.mrf.mxu0  ;;  %v4067_v41 = vsel %vm11709_vm12, %v4062_v46, %v4066_v29  ;;  %v1862_v29 = vadd.f32 %v1861_v33, %v12172_v63  ;;  %v4081_v46 = vrot.slane %v4079_v61, 4 }
 0x215   : > { %v2211_v23 = vpop.f32.mrf.mxu2  ;;  %v12559_v49 = vadd.f32 %v3146_v48, %v2538_v56  ;;  %v3311_v28 = vrot.slane %v3309_v0, 4  ;;  %v3310_v9 = vsel %vm12036_vm11, %v10445_v5, %v3309_v0  ;;  %v4330_v35 = vunpack.c.l.b16 %v4067_v41 }
 0x216   : > { %10558 = vmatmul.msk.bf16.gmra.mxu3 %vm1514_vm15, %v4356_v59  ;;  %v2254_v4 = vadd.f32 %v2211_v23, %v1859_v52  ;;  %v4641_v52 = vrot.slane %v12530_v31, 5  ;;  %v3391_v48 = vunpack.c.l.b16 %v3310_v9  ;;  %v4331_v0 = vunpack.c.l.b16 %v4077_v11 }
 0x217   : > { %v3313_v56 = vsel %vm12036_vm11, %v3311_v28, %v3312_v53  ;;  %v4084_v53 = vrot.slane %v4082_v24, 5  ;;  %v4644_v31 = vrot.slane %v12547_v6, 5  ;;  %v4098_v24 = vshll.u32 %v12576_v47, 16 }
 0x218   : > { %v3392_v23 = vunpack.c.l.b16 %v3313_v56  ;;  %v4643_v63 = vrot.slane %v4641_v52, 4  ;;  %v4357_v41 = vpack.c.b16 %v4331_v0, %v4330_v35  ;;  %v4095_v9 = vor.u32 %v4094_v30, %v4090_v39  ;;  %v12592_v30 = vld [vmem:[#allocation2 + $0x70] sm:$0xf] }
 0x219   : > { %v2495_v21 = vpop.f32.mrf.mxu3  ;;  %v1863_v42 = vpop.f32.mrf.mxu1  ;;  %v4085_v2 = vor.u32 %v4084_v53, %v4081_v46  ;;  %v4642_v56 = vsel %vm12036_vm11, %v10575_v34, %v4641_v52  ;;  %v4100_v18 = vrot.slane %v4098_v24, 5  ;;  %v11142_v46 = vld [vmem:[#allocation2 + $0x60] sm:$0xff] }
 0x21a   : > { %v2539_v59 = vadd.f32 %v2495_v21, %v2253_v10  ;;  %10542 = vmatmul.msk.bf16.gmra.mxu2 %vm1514_vm15, %v11141_v62  ;;  %v3417_v33 = vpack.c.b16 %v3392_v23, %v3391_v48  ;;  %v1864_v11 = vadd.f32 %v1863_v42, %v12188_v40  ;;  %v11343_v48 = vld [vmem:[#allocation2 + $0x64] sm:$0xf]  ;;  %v4096_v52 = vrot.slane %v4095_v9, 4  ;;  %v3208_v53 = vld [vmem:[#allocation2 + $0x60] sm:$0xe] }
 0x21b   : > { %v4086_v6 = vrot.slane %v4085_v2, 4  ;;  %v4728_v40 = vunpack.c.l.b16 %v4642_v56  ;;  %v10446_v0 = vrot.slane %v3208_v53, 9  ;;  %v4112_v56 = vshll.u32 %v12592_v30, 16 }
 0x21c   : > { %v3149_v10 = vpop.f32.mrf.mxu0  ;;  %v4101_v9 = vsel %vm11709_vm12, %v4096_v52, %v4100_v18  ;;  %v12607_v18 = vld [vmem:[#allocation2 + $0x74] sm:$0x1] }
 0x21d   : > { %v2214_v27 = vpop.f32.mrf.mxu2  ;;  %v12578_v5 = vadd.f32 %v3149_v10, %v2539_v59  ;;  %v4645_v59 = vsel %vm12036_vm11, %v4643_v63, %v4644_v31  ;;  %v3907_v10 = vld [vmem:[#allocation2 + $0x6c] sm:$0xf]  ;;  %v4091_v34 = vsel %vm11709_vm12, %v4086_v6, %v4090_v39  ;;  %v4546_v31 = vld [vmem:[#allocation2 + $0x60] sm:$0xe]  ;;  %v4116_v39 = vshrl.u32 %v12592_v30, 16 }
 0x21e   : > { %v2255_v62 = vadd.f32 %v2214_v27, %v1862_v29  ;;  %v4729_v42 = vunpack.c.l.b16 %v4645_v59  ;;  %v4103_v24 = vshrl.u32 %v3907_v10, 16  ;;  %v10576_v45 = vrot.slane %v4546_v31, 9 }
 0x21f   : > { %14726 = vst [vmem:[#allocation20_spill] sm:$0xff] %v12578_v5  ;;  %10591 = vmatmul.msk.bf16.gmra.mxu0 %vm1514_vm15, %v4754_v26  ;;  %v12609_v52 = vrot.slane %v4112_v56, 5 }
 0x220   : > { %v4755_v59 = vpack.c.b16 %v4729_v42, %v4728_v40 }
 0x221   : > { %v2497_v28 = vpop.f32.mrf.mxu3  ;;  %v1866_v61 = vpop.f32.mrf.mxu1 }
 0x222   : > { %v2540_v21 = vadd.f32 %v2497_v28, %v2254_v4  ;;  %v3316_v4 = vrot.slane %v11343_v48, 5  ;;  %v1867_v6 = vadd.f32 %v1866_v61, %v12207_v15  ;;  %v4332_v48 = vunpack.c.l.b16 %v4091_v34 }
 0x223   : > { %v4651_v15 = vrot.slane %v12576_v47, 5 }
 0x224   : > { %10462 = vmatmul.msk.bf16.gmra.mxu1 %vm1514_vm15, %v3417_v33  ;;  %v3151_v26 = vpop.f32.mrf.mxu0  ;;  %v3318_v27 = vrot.slane %v3316_v4, 4  ;;  %v3317_v2 = vsel %vm12036_vm11, %v10446_v0, %v3316_v4  ;;  %v4118_v0 = vrot.slane %v4116_v39, 4 }
 0x225   : > { %v2216_v29 = vpop.f32.mrf.mxu2  ;;  %v12590_v35 = vadd.f32 %v3151_v26, %v2540_v21  ;;  %v4106_v21 = vshll.u32 %v3907_v10, 16  ;;  %v3393_v26 = vunpack.c.l.b16 %v3317_v2 }
 0x226   : > { %10559 = vmatmul.msk.bf16.gmra.mxu3 %vm1514_vm15, %v4357_v41  ;;  %v2256_v23 = vadd.f32 %v2216_v29, %v1864_v11  ;;  %v3320_v28 = vsel %vm12036_vm11, %v3318_v27, %v3319_v50  ;;  %v4648_v11 = vrot.slane %v12561_v37, 5 }
 0x227   : > { %14727 = vst [vmem:[#allocation21_spill] sm:$0xff] %v12590_v35  ;;  %v3394_v50 = vunpack.c.l.b16 %v3320_v28  ;;  %v4108_v53 = vrot.slane %v4106_v21, 5 }
 0x228   : > { %v4650_v37 = vrot.slane %v4648_v11, 4  ;;  %v4649_v28 = vsel %vm12036_vm11, %v10576_v45, %v4648_v11 }
 0x229   : > { %v2500_v63 = vpop.f32.mrf.mxu3  ;;  %v1868_v33 = vpop.f32.mrf.mxu1  ;;  %v3418_v61 = vpack.c.b16 %v3394_v50, %v3393_v26  ;;  %v3910_v26 = vld [vmem:[#allocation2 + $0x78] sm:$0xf]  ;;  %v11143_v50 = vld [vmem:[#allocation2 + $0x6c] sm:$0xff] }
 0x22a   : > { %v2541_v41 = vadd.f32 %v2500_v63, %v2255_v62  ;;  %10543 = vmatmul.msk.bf16.gmra.mxu2 %vm1514_vm15, %v11142_v46  ;;  %v4333_v62 = vunpack.c.l.b16 %v4101_v9  ;;  %v4105_v46 = vrot.slane %v4103_v24, 4  ;;  %v4122_v63 = vshll.u32 %v12607_v18, 16 }
 0x22b   : > { %v4119_v24 = vor.u32 %v4118_v0, %v12609_v52  ;;  %v4652_v21 = vsel %vm12036_vm11, %v4650_v37, %v4651_v15  ;;  %v1869_v47 = vadd.f32 %v1868_v33, %v12217_v58  ;;  %v4730_v9 = vunpack.c.l.b16 %v4649_v28  ;;  %v4547_v37 = vld [vmem:[#allocation2 + $0x6c] sm:$0xe] }
 0x22c   : > { %v3154_v29 = vpop.f32.mrf.mxu0  ;;  %v4109_v34 = vor.u32 %v4108_v53, %v4105_v46  ;;  %v4358_v2 = vpack.c.b16 %v4333_v62, %v4332_v48  ;;  %v4731_v11 = vunpack.c.l.b16 %v4652_v21  ;;  %v3209_v48 = vld [vmem:[#allocation2 + $0x6c] sm:$0xe]  ;;  %v12624_v62 = vld [vmem:[#allocation2 + $0x7c] sm:$0xf]  ;;  %v4655_v33 = vrot.slane %v12592_v30, 5 }
 0x22d   : > { %v2219_v4 = vpop.f32.mrf.mxu2  ;;  %v12611_v40 = vadd.f32 %v3154_v29, %v2541_v41  ;;  %v4120_v29 = vrot.slane %v4119_v24, 4  ;;  %v11345_v53 = vld [vmem:[#allocation2 + $0x74] sm:$0x1]  ;;  %v4127_v15 = vshrl.u32 %v3910_v26, 16  ;;  %v4140_v28 = vshrl.u32 %v12624_v62, 16 }
 0x22e   : > { %v2257_v10 = vadd.f32 %v2219_v4, %v1867_v6  ;;  %v4110_v39 = vrot.slane %v4109_v34, 4  ;;  %v11344_v6 = vld [vmem:[#allocation2 + $0x70] sm:$0xf]  ;;  %v10447_v4 = vrot.slane %v3209_v48, 9  ;;  %v3326_v0 = vrot.slane %v11345_v53, 5 }
 0x22f   : > { %14728 = vst [vmem:[#allocation22_spill] sm:$0xff] %v12611_v40  ;;  %10592 = vmatmul.msk.bf16.gmra.mxu0 %vm1514_vm15, %v4755_v59  ;;  %v4124_v59 = vrot.slane %v4122_v63, 5  ;;  %v4756_v30 = vpack.c.b16 %v4731_v11, %v4730_v9  ;;  %v4142_v53 = vrot.slane %v4140_v28, 4 }
 0x230   : > { %v4115_v21 = vsel %vm11709_vm12, %v4110_v39, %v12609_v52 }
 0x231   : > { %v2502_v42 = vpop.f32.mrf.mxu3  ;;  %v1871_v27 = vpop.f32.mrf.mxu1 }
 0x232   : > { %v2542_v31 = vadd.f32 %v2502_v42, %v2256_v23  ;;  %v3323_v23 = vrot.slane %v11344_v6, 5  ;;  %v14730_v6 = vld [vmem:[#allocation13_spill] sm:$0xff] }
 0x234   : > { %10463 = vmatmul.msk.bf16.gmra.mxu1 %vm1514_vm15, %v3418_v61  ;;  %v3156_v41 = vpop.f32.mrf.mxu0  ;;  %v3325_v46 = vrot.slane %v3323_v23, 4  ;;  %v4130_v61 = vshll.u32 %v3910_v26, 16  ;;  %v3324_v63 = vsel %vm12036_vm11, %v10447_v4, %v3323_v23  ;;  %v1872_v23 = vadd.f32 %v1871_v27, %v14730_v6 }
 0x235   : > { %v2221_v56 = vpop.f32.mrf.mxu2  ;;  %v12626_v58 = vadd.f32 %v3156_v41, %v2542_v31  ;;  %v4136_v31 = vshll.u32 %v12624_v62, 16  ;;  %v10577_v41 = vrot.slane %v4547_v37, 9  ;;  %v4658_v26 = vrot.slane %v12607_v18, 5  ;;  %v452_v37 = vld [vmem:[#allocation3 + $0xc] sm:$0x1] }
 0x236   : > { %10560 = vmatmul.msk.bf16.gmra.mxu3 %vm1514_vm15, %v4358_v2  ;;  %v2258_v45 = vadd.f32 %v2221_v56, %v1869_v47  ;;  %v3327_v2 = vsel %vm12036_vm11, %v3325_v46, %v3326_v0  ;;  %v4125_v47 = vsel %vm11709_vm12, %v4120_v29, %v4124_v59  ;;  %v4657_v56 = vrot.slane %v4655_v33, 4 }
 0x237   : > { %14729 = vst [vmem:[#allocation23_spill] sm:$0xff] %v12626_v58  ;;  %v3395_v48 = vunpack.c.l.b16 %v3324_v63  ;;  %v3396_v4 = vunpack.c.l.b16 %v3327_v2  ;;  %v4132_v11 = vrot.slane %v4130_v61, 5  ;;  %v4334_v0 = vunpack.c.l.b16 %v4115_v21 }
 0x238   : > { %v4335_v52 = vunpack.c.l.b16 %v4125_v47  ;;  %v4656_v18 = vsel %vm12036_vm11, %v10577_v41, %v4655_v33  ;;  %v4659_v27 = vsel %vm12036_vm11, %v4657_v56, %v4658_v26  ;;  %v3913_v33 = vld [vmem:[#allocation2 + $0x84] sm:$0xf]  ;;  %v14733_v56 = vld [vmem:[#allocation14_spill] sm:$0xff] }
 0x239   : > { %v2505_v42 = vpop.f32.mrf.mxu3  ;;  %v1873_v34 = vpop.f32.mrf.mxu1  ;;  %v3419_v29 = vpack.c.b16 %v3396_v4, %v3395_v48  ;;  %v4732_v47 = vunpack.c.l.b16 %v4656_v18  ;;  %v4733_v41 = vunpack.c.l.b16 %v4659_v27  ;;  %v4151_v18 = vshrl.u32 %v3913_v33, 16  ;;  %v4548_v27 = vld [vmem:[#allocation2 + $0x78] sm:$0xe] }
 0x23a   : > { %v2543_v24 = vadd.f32 %v2505_v42, %v2257_v10  ;;  %10544 = vmatmul.msk.bf16.gmra.mxu2 %vm1514_vm15, %v11143_v50  ;;  %v4129_v10 = vrot.slane %v4127_v15, 4  ;;  %v12643_v50 = vrot.slane %v4136_v31, 5  ;;  %v12645_v42 = vld [vmem:[#allocation2 + $0x80] sm:$0x1]  ;;  %v4359_v21 = vpack.c.b16 %v4335_v52, %v4334_v0  ;;  %v3210_v52 = vld [vmem:[#allocation2 + $0x78] sm:$0xe] }
 0x23b   : > { %v4146_v31 = vshll.u32 %v12645_v42, 16  ;;  %v1874_v6 = vadd.f32 %v1873_v34, %v14733_v56  ;;  %v4662_v0 = vrot.slane %v12624_v62, 5  ;;  %v4757_v56 = vpack.c.b16 %v4733_v41, %v4732_v47 }
 0x23c   : > { %v3159_v46 = vpop.f32.mrf.mxu0  ;;  %v4133_v63 = vor.u32 %v4132_v11, %v4129_v10  ;;  %v4143_v2 = vor.u32 %v4142_v53, %v12643_v50  ;;  %v12662_v11 = vld [vmem:[#allocation2 + $0x88] sm:$0xf]  ;;  %v11144_v53 = vld [vmem:[#allocation2 + $0x78] sm:$0xff]  ;;  %v10578_v47 = vrot.slane %v4548_v27, 9 }
 0x23d   : > { %v2224_v9 = vpop.f32.mrf.mxu2  ;;  %v12647_v59 = vadd.f32 %v3159_v46, %v2543_v24  ;;  %v453_v24 = vsel %vm11756_vm6, 0, %v452_v37  ;;  %v4148_v46 = vrot.slane %v4146_v31, 5  ;;  %v4160_v31 = vshll.u32 %v12662_v11, 16 }
 0x23e   : > { %v2259_v39 = vadd.f32 %v2224_v9, %v1872_v23  ;;  %454 = vst [vmem:[#allocation3 + $0xc] sm:$0x1] %v453_v24  ;;  %v4134_v48 = vrot.slane %v4133_v63, 4  ;;  %v4144_v4 = vrot.slane %v4143_v2, 4  ;;  %v11346_v9 = vld [vmem:[#allocation2 + $0x7c] sm:$0xf] }
 0x23f   : > { %14731 = vst [vmem:[#allocation13_spill] sm:$0xff] %v12647_v59  ;;  %10593 = vmatmul.msk.bf16.gmra.mxu0 %vm1514_vm15, %v4756_v30  ;;  %v3330_v10 = vrot.slane %v11346_v9, 5  ;;  %v4154_v2 = vshll.u32 %v3913_v33, 16  ;;  %v4164_v24 = vshrl.u32 %v12662_v11, 16  ;;  %v4664_v41 = vrot.slane %v4662_v0, 4 }
 0x240   : > { %v4139_v33 = vsel %vm11709_vm12, %v4134_v48, %v12643_v50  ;;  %v4665_v9 = vrot.slane %v12645_v42, 5  ;;  %v4663_v42 = vsel %vm12036_vm11, %v10578_v47, %v4662_v0  ;;  %v4669_v0 = vrot.slane %v12662_v11, 5 }
 0x241   : > { %v2507_v15 = vpop.f32.mrf.mxu3  ;;  %v12654_v61 = vpop.f32.mrf.mxu1  ;;  %v3332_v37 = vrot.slane %v3330_v10, 4  ;;  %v4336_v50 = vunpack.c.l.b16 %v4139_v33 }
 0x242   : > { %v2544_v30 = vadd.f32 %v2507_v15, %v2258_v45  ;;  %v11347_v15 = vld [vmem:[#allocation2 + $0x80] sm:$0x1]  ;;  %v4666_v27 = vsel %vm12036_vm11, %v4664_v41, %v4665_v9  ;;  %v3567_v41 = vadd.f32 %v12654_v61, %v12258_v13  ;;  %v4734_v9 = vunpack.c.l.b16 %v4663_v42  ;;  %v455_v42 = vld [vmem:[#allocation3 + $0x18] sm:$0x1] }
 0x243   : > { %v3333_v63 = vrot.slane %v11347_v15, 5  ;;  %v4156_v15 = vrot.slane %v4154_v2, 5 }
 0x244   : > { %10464 = vmatmul.msk.bf16.gmra.mxu1 %vm1514_vm15, %v3419_v29  ;;  %v3161_v23 = vpop.f32.mrf.mxu0  ;;  %v10448_v29 = vrot.slane %v3210_v52, 9  ;;  %v4153_v52 = vrot.slane %v4151_v18, 4 }
 0x245   : > { %v2226_v26 = vpop.f32.mrf.mxu2  ;;  %v12666_v34 = vadd.f32 %v3161_v23, %v2544_v30  ;;  %v3334_v30 = vsel %vm12036_vm11, %v3332_v37, %v3333_v63  ;;  %v507_v63 = vld [vmem:[#allocation3 + $0x14] sm:$0x1] }
 0x246   : > { %10561 = vmatmul.msk.bf16.gmra.mxu3 %vm1514_vm15, %v4359_v21  ;;  %v2260_v45 = vadd.f32 %v2226_v26, %v1874_v6  ;;  %v3331_v62 = vsel %vm12036_vm11, %v10448_v29, %v3330_v10  ;;  %v4149_v26 = vsel %vm11709_vm12, %v4144_v4, %v4148_v46  ;;  %v3398_v29 = vunpack.c.l.b16 %v3334_v30 }
 0x247   : > { %14734 = vst [vmem:[#allocation11_spill] sm:$0xff] %v12666_v34  ;;  %v3397_v10 = vunpack.c.l.b16 %v3331_v62  ;;  %v12683_v34 = vrot.slane %v4160_v31, 5  ;;  %v4337_v48 = vunpack.c.l.b16 %v4149_v26  ;;  %v508_v4 = vsel %vm11770_vm2, 0, %v507_v63  ;;  %v3916_v62 = vld [vmem:[#allocation2 + $0x90] sm:$0xf] }
 0x248   : > { %509 = vst [vmem:[#allocation3 + $0x14] sm:$0x1] %v508_v4  ;;  %v4157_v46 = vor.u32 %v4156_v15, %v4153_v52  ;;  %v12701_v26 = vld [vmem:[#allocation2 + $0x94] sm:$0xf]  ;;  %v4549_v52 = vld [vmem:[#allocation2 + $0x84] sm:$0xe] }
 0x249   : > { %v2510_v21 = vpop.f32.mrf.mxu3  ;;  %v12670_v6 = vpop.f32.mrf.mxu1  ;;  %v3420_v2 = vpack.c.b16 %v3398_v29, %v3397_v10  ;;  %v4360_v47 = vpack.c.b16 %v4337_v48, %v4336_v50  ;;  %v4178_v15 = vshll.u32 %v3916_v62, 16  ;;  %v4735_v10 = vunpack.c.l.b16 %v4666_v27  ;;  %v11145_v50 = vld [vmem:[#allocation2 + $0x84] sm:$0xff] }
 0x24a   : > { %v2545_v23 = vadd.f32 %v2510_v21, %v2259_v39  ;;  %10545 = vmatmul.msk.bf16.gmra.mxu2 %vm1514_vm15, %v11144_v53  ;;  %v4166_v39 = vrot.slane %v4164_v24, 4  ;;  %v12685_v21 = vld [vmem:[#allocation2 + $0x8c] sm:$0x1]  ;;  %v4158_v29 = vrot.slane %v4157_v46, 4  ;;  %v4184_v63 = vshll.u32 %v12701_v26, 16 }
 0x24b   : > { %v4170_v24 = vshll.u32 %v12685_v21, 16  ;;  %v4188_v11 = vshrl.u32 %v12701_v26, 16  ;;  %v10579_v48 = vrot.slane %v4549_v52, 9  ;;  %v3211_v46 = vld [vmem:[#allocation2 + $0x84] sm:$0xe] }
 0x24c   : > { %v3164_v37 = vpop.f32.mrf.mxu0  ;;  %v4167_v31 = vor.u32 %v4166_v39, %v12683_v34  ;;  %v10449_v58 = vrot.slane %v3211_v46, 9  ;;  %v11349_v52 = vld [vmem:[#allocation2 + $0x8c] sm:$0x1] }
 0x24d   : > { %v3774_v53 = vpop.f32.mrf.mxu2  ;;  %v12691_v18 = vadd.f32 %v3164_v37, %v2545_v23  ;;  %v4172_v37 = vrot.slane %v4170_v24, 5  ;;  %v456_v24 = vsel %vm11756_vm6, 0, %v455_v42  ;;  %v3340_v35 = vrot.slane %v11349_v52, 5 }
 0x24e   : > { %v4168_v39 = vrot.slane %v4167_v31, 4  ;;  %v3854_v61 = vadd.f32 %v3774_v53, %v3567_v41  ;;  %457 = vst [vmem:[#allocation3 + $0x18] sm:$0x1] %v456_v24  ;;  %v4758_v42 = vpack.c.b16 %v4735_v10, %v4734_v9 }
 0x24f   : > { %14736 = vst [vmem:[#allocation14_spill] sm:$0xff] %v12691_v18  ;;  %10594 = vmatmul.msk.bf16.gmra.mxu0 %vm1514_vm15, %v4757_v56  ;;  %v4175_v56 = vshrl.u32 %v3916_v62, 16  ;;  %v4672_v62 = vrot.slane %v12685_v21, 5  ;;  %v11348_v18 = vld [vmem:[#allocation2 + $0x88] sm:$0xf]  ;;  %v4163_v21 = vsel %vm11709_vm12, %v4158_v29, %v12683_v34  ;;  %v3568_v34 = vadd.f32 %v12670_v6, %v12273_v38 }
 0x250   : > { %v3337_v13 = vrot.slane %v11348_v18, 5  ;;  %v4173_v53 = vsel %vm11709_vm12, %v4168_v39, %v4172_v37  ;;  %v12719_v18 = vrot.slane %v4184_v63, 5  ;;  %v4670_v29 = vsel %vm12036_vm11, %v10579_v48, %v4669_v0 }
 0x251   : > { %v2512_v30 = vpop.f32.mrf.mxu3  ;;  %v12698_v33 = vpop.f32.mrf.mxu1  ;;  %v4177_v27 = vrot.slane %v4175_v56, 4  ;;  %v4338_v39 = vunpack.c.l.b16 %v4163_v21  ;;  %v4339_v37 = vunpack.c.l.b16 %v4173_v53  ;;  %v3919_v53 = vld [vmem:[#allocation2 + $0x9c] sm:$0xf] }
 0x252   : > { %v2546_v23 = vadd.f32 %v2512_v30, %v2260_v45  ;;  %v4671_v30 = vrot.slane %v4669_v0, 4  ;;  %v3339_v40 = vrot.slane %v3337_v13, 4 }
 0x254   : > { %10465 = vmatmul.msk.bf16.gmra.mxu1 %vm1514_vm15, %v3420_v2  ;;  %v3166_v4 = vpop.f32.mrf.mxu0  ;;  %v4180_v2 = vrot.slane %v4178_v15, 5  ;;  %v3338_v15 = vsel %vm12036_vm11, %v10449_v58, %v3337_v13  ;;  %v3341_v41 = vsel %vm12036_vm11, %v3339_v40, %v3340_v35  ;;  %v4673_v58 = vsel %vm12036_vm11, %v4671_v30, %v4672_v62  ;;  %v12737_v35 = vld [vmem:[%s14683_s2] ss:$0 sm:$0xff] }
 0x255   : > { %v3776_v45 = vpop.f32.mrf.mxu2  ;;  %v12710_v31 = vadd.f32 %v3166_v4, %v2546_v23  ;;  %v12725_v4 = vld [vmem:[#allocation2 + $0x98] sm:$0x1]  ;;  %v3399_v40 = vunpack.c.l.b16 %v3338_v15  ;;  %v3400_v9 = vunpack.c.l.b16 %v3341_v41  ;;  %v4361_v62 = vpack.c.b16 %v4339_v37, %v4338_v39  ;;  %v4550_v37 = vld [vmem:[#allocation2 + $0x90] sm:$0xe] }
 0x256   : > { %10562 = vmatmul.msk.bf16.gmra.mxu3 %vm1514_vm15, %v4360_v47  ;;  %v4190_v47 = vrot.slane %v4188_v11, 4  ;;  %v4181_v63 = vor.u32 %v4180_v2, %v4177_v27  ;;  %v4194_v6 = vshll.u32 %v12725_v4, 16  ;;  %v4736_v11 = vunpack.c.l.b16 %v4670_v29 }
 0x257   : > { %14737 = vst [vmem:[#allocation12_spill] sm:$0xff] %v12710_v31  ;;  %v3855_v13 = vadd.f32 %v3776_v45, %v3568_v34  ;;  %v3421_v24 = vpack.c.b16 %v3400_v9, %v3399_v40  ;;  %v4676_v45 = vrot.slane %v12701_v26, 5  ;;  %v4199_v41 = vshrl.u32 %v3919_v53, 16  ;;  %v14739_v26 = vld [vmem:[#allocation16_spill] sm:$0xff] }
 0x258   : > { %v4191_v38 = vor.u32 %v4190_v47, %v12719_v18  ;;  %v4182_v27 = vrot.slane %v4181_v63, 4  ;;  %v4196_v21 = vrot.slane %v4194_v6, 5  ;;  %v12745_v47 = vld [vmem:[#allocation2 + $0xa0] sm:$0xf]  ;;  %v14738_v63 = vld [vmem:[#allocation15_spill] sm:$0xff]  ;;  %v4679_v9 = vrot.slane %v12725_v4, 5 }
 0x259   : > { %v4428_v23 = vpop.f32.mrf.mxu3  ;;  %v3494_v56 = vpop.f32.mrf.mxu1  ;;  %v4208_v34 = vshll.u32 %v12745_v47, 16  ;;  %v3569_v40 = vadd.f32 %v12698_v33, %v14738_v63  ;;  %v10580_v33 = vrot.slane %v4550_v37, 9  ;;  %v11350_v4 = vld [vmem:[#allocation2 + $0x94] sm:$0xf]  ;;  %v11351_v37 = vld [vmem:[#allocation2 + $0x98] sm:$0x1] }
 0x25a   : > { %v4508_v46 = vadd.f32 %v4428_v23, %v3854_v61  ;;  %10546 = vmatmul.msk.bf16.gmra.mxu2 %vm1514_vm15, %v11145_v50  ;;  %v510_v50 = vld [vmem:[#allocation3 + $0x20] sm:$0x1]  ;;  %v4737_v61 = vunpack.c.l.b16 %v4673_v58  ;;  %v4192_v52 = vrot.slane %v4191_v38, 4  ;;  %v4212_v58 = vshrl.u32 %v12745_v47, 16 }
 0x25b   : > { %v511_v30 = vsel %vm11770_vm2, 0, %v510_v50  ;;  %v4201_v38 = vrot.slane %v4199_v41, 4  ;;  %v3570_v50 = vadd.f32 %v3494_v56, %v14739_v26  ;;  %v3347_v63 = vrot.slane %v11351_v37, 5 }
 0x25c   : > { %v4826_v10 = vpop.f32.mrf.mxu0  ;;  %512 = vst [vmem:[#allocation3 + $0x20] sm:$0x1] %v511_v30  ;;  %v11146_v30 = vld [vmem:[#allocation2 + $0x90] sm:$0xff] }
 0x25d   : > { %v3779_v0 = vpop.f32.mrf.mxu2  ;;  %v4906_v48 = vadd.f32 %v4826_v10, %v4508_v46  ;;  %v4202_v46 = vshll.u32 %v3919_v53, 16  ;;  %v3344_v53 = vrot.slane %v11350_v4, 5 }
 0x25f   : > { %10595 = vmatmul.msk.bf16.gmra.mxu0 %vm1514_vm15, %v4758_v42  ;;  %v4941_v2 = vadd.f32 %v12737_v35, %v4906_v48  ;;  %v12751_v42 = vpack.c.b16 %v4737_v61, %v4736_v11  ;;  %v4204_v6 = vrot.slane %v4202_v46, 5  ;;  %v4187_v11 = vsel %vm11709_vm12, %v4182_v27, %v12719_v18  ;;  %v458_v46 = vld [vmem:[#allocation3 + $0x24] sm:$0x1] }
 0x260   : > { %v4197_v48 = vsel %vm11709_vm12, %v4192_v52, %v4196_v21  ;;  %v4214_v18 = vrot.slane %v4212_v58, 4  ;;  %v459_v27 = vsel %vm11756_vm6, 0, %v458_v46  ;;  %v3212_v52 = vld [vmem:[#allocation2 + $0x90] sm:$0xe]  ;;  %v3346_v21 = vrot.slane %v3344_v53, 4 }
 0x261   : > { %v4430_v23 = vpop.f32.mrf.mxu3  ;;  %v12747_v15 = vpop.f32.mrf.mxu1  ;;  %v4973_v29 = vmax.f32 %v4941_v2, 0.0  ;;  %v4678_v2 = vrot.slane %v4676_v45, 4  ;;  %v4205_v26 = vor.u32 %v4204_v6, %v4201_v38  ;;  %460 = vst [vmem:[#allocation3 + $0x24] sm:$0x1] %v459_v27  ;;  %v5360_v58 = vld [vmem:[#allocation3 + $0xc] sm:$0xf]  ;;  %v12782_v46 = vunpack.c.l.b16 %v4197_v48 }
 0x262   : > { %v4509_v39 = vadd.f32 %v4430_v23, %v3855_v13  ;;  %v12764_v23 = vrot.slane %v4208_v34, 5  ;;  %v4677_v38 = vsel %vm12036_vm11, %v10580_v33, %v4676_v45 }
 0x263   : > { %v5005_v10 = vpack.c.bf16 %v4973_v29, %v4973_v29  ;;  %v12767_v29 = vld [vmem:[#allocation2 + $0xa4] sm:$0x1]  ;;  %v4206_v48 = vrot.slane %v4205_v26, 4 }
 0x264   : > { %10466 = vmatmul.msk.bf16.gmra.mxu1 %vm1514_vm15, %v3421_v24  ;;  %v4828_v13 = vpop.f32.mrf.mxu0  ;;  %v3856_v24 = vadd.f32 %v3779_v0, %v3569_v40  ;;  %v4215_v37 = vor.u32 %v4214_v18, %v12764_v23  ;;  %v4218_v45 = vshll.u32 %v12767_v29, 16 }
 0x265   : > { %v3781_v61 = vpop.f32.mrf.mxu2  ;;  %v5038_v41 = vshrl.u32 %v5005_v10, 16  ;;  %v4907_v56 = vadd.f32 %v4828_v13, %v4509_v39  ;;  %v5041_v34 = vshll.u32 %v5005_v10, 16  ;;  %v12780_v13 = vunpack.c.l.b16 %v4187_v11 }
 0x266   : > { %10563 = vmatmul.msk.bf16.gmra.mxu3 %vm1514_vm15, %v4361_v62  ;;  %v10450_v62 = vrot.slane %v3212_v52, 9  ;;  %v3348_v10 = vsel %vm12036_vm11, %v3346_v21, %v3347_v63  ;;  %v4680_v52 = vsel %vm12036_vm11, %v4678_v2, %v4679_v9  ;;  %v513_v9 = vld [vmem:[#allocation3 + $0x2c] sm:$0x1] }
 0x267   : > { %v12771_v4 = vrot.slane %v5038_v41, 7  ;;  %v4942_v39 = vadd.f32 %v12737_v35, %v4907_v56  ;;  %v4362_v18 = vpack.c.b16 %v12782_v46, %v12780_v13  ;;  %v514_v26 = vsel %vm11770_vm2, 0, %v513_v9  ;;  %v5364_v46 = vld [vmem:[#allocation3 + $0x14] sm:$0x1] }
 0x268   : > { %v3345_v11 = vsel %vm12036_vm11, %v10450_v62, %v3344_v53  ;;  %v3857_v53 = vadd.f32 %v3781_v61, %v3570_v50  ;;  %v4211_v62 = vsel %vm11709_vm12, %v4206_v48, %v12764_v23  ;;  %515 = vst [vmem:[#allocation3 + $0x2c] sm:$0x1] %v514_v26  ;;  %v4551_v61 = vld [vmem:[#allocation2 + $0x9c] sm:$0xe] }
 0x269   : > { %v4433_v40 = vpop.f32.mrf.mxu3  ;;  %v3499_v6 = vpop.f32.mrf.mxu1  ;;  %v5043_v41 = vor.u32 %v5041_v34, %v12771_v4  ;;  %v4974_v56 = vmax.f32 %v4942_v39, 0.0  ;;  %v3401_v63 = vunpack.c.l.b16 %v3345_v11  ;;  %v3402_v34 = vunpack.c.l.b16 %v3348_v10 }
 0x26a   : > { %v4510_v27 = vadd.f32 %v4433_v40, %v3856_v24  ;;  %10547 = vmatmul.msk.bf16.gmra.mxu2 %vm1514_vm15, %v11146_v30  ;;  %v4738_v30 = vunpack.c.l.b16 %v4677_v38  ;;  %v4739_v39 = vunpack.c.l.b16 %v4680_v52  ;;  %v4220_v10 = vrot.slane %v4218_v45, 5  ;;  %v14742_v52 = vld [vmem:[#allocation17_spill] sm:$0xff] }
 0x26b   : > { %v5361_v33 = vsel %vm12776_vm0, %v5043_v41, %v5360_v58  ;;  %v5006_v21 = vpack.c.bf16 %v4974_v56, %v4974_v56  ;;  %v4216_v58 = vrot.slane %v4215_v37, 4  ;;  %v3422_v50 = vpack.c.b16 %v3402_v34, %v3401_v63  ;;  %v14743_v63 = vld [vmem:[#allocation18_spill] sm:$0xff] }
 0x26c   : > { %5362 = vst [vmem:[#allocation3 + $0xc] sm:$0xf] %v5361_v33  ;;  %v4831_v24 = vpop.f32.mrf.mxu0  ;;  %v5044_v13 = vrot.slane %v12771_v4, 4  ;;  %v3571_v11 = vadd.f32 %v12747_v15, %v14742_v52  ;;  %v12811_v23 = vpack.c.b16 %v4739_v39, %v4738_v30  ;;  %v4683_v37 = vrot.slane %v12745_v47, 5  ;;  %v12823_v30 = vld [vmem:[#allocation2 + $0xac] sm:$0xf] }
 0x26d   : > { %v3784_v40 = vpop.f32.mrf.mxu2  ;;  %v5046_v2 = vshrl.u32 %v5006_v21, 16  ;;  %v4908_v31 = vadd.f32 %v4831_v24, %v4510_v27  ;;  %v5049_v38 = vshll.u32 %v5006_v21, 16  ;;  %v3922_v21 = vld [vmem:[#allocation2 + $0xa8] sm:$0xf]  ;;  %v12817_v34 = vadd.f32 %v3499_v6, %v14743_v63  ;;  %v3213_v52 = vld [vmem:[#allocation2 + $0x9c] sm:$0xe] }
 0x26e   : > { %v4221_v4 = vsel %vm11709_vm12, %v4216_v58, %v4220_v10  ;;  %v12821_v24 = vunpack.c.l.b16 %v4211_v62  ;;  %v10581_v15 = vrot.slane %v4551_v61, 9  ;;  %v4686_v6 = vrot.slane %v12767_v29, 5  ;;  %v11352_v58 = vld [vmem:[#allocation2 + $0xa0] sm:$0xf]  ;;  %v11353_v63 = vld [vmem:[#allocation2 + $0xa4] sm:$0x1] }
 0x26f   : > { %v5048_v41 = vrot.slane %v5046_v2, 7  ;;  %10596 = vmatmul.msk.bf16.gmra.mxu0 %vm1514_vm15, %v12751_v42  ;;  %v4943_v56 = vadd.f32 %v12737_v35, %v4908_v31  ;;  %v11147_v2 = vld [vmem:[#allocation2 + $0x9c] sm:$0xff]  ;;  %v4685_v62 = vrot.slane %v4683_v37, 4  ;;  %v3351_v10 = vrot.slane %v11352_v58, 5 }
 0x271   : > { %v4435_v27 = vpop.f32.mrf.mxu3  ;;  %v12813_v48 = vpop.f32.mrf.mxu1  ;;  %v5051_v45 = vor.u32 %v5049_v38, %v5048_v41  ;;  %v5053_v42 = vrot.slane %v5048_v41, 4  ;;  %v4975_v33 = vmax.f32 %v4943_v56, 0.0  ;;  %v4223_v41 = vshrl.u32 %v3922_v21, 16 }
 0x272   : > { %v4511_v31 = vadd.f32 %v4435_v27, %v3857_v53  ;;  %v4226_v38 = vshll.u32 %v3922_v21, 16 }
 0x273   : > { %v5052_v39 = vsel %vm11658_vm8, %v5044_v13, %v5051_v45  ;;  %v5365_v47 = vsel %vm11756_vm6, %v5053_v42, %v5364_v46  ;;  %v5007_v9 = vpack.c.bf16 %v4975_v33, %v4975_v33  ;;  %v3858_v13 = vadd.f32 %v3784_v40, %v3571_v11  ;;  %v461_v46 = vld [vmem:[#allocation3 + $0x30] sm:$0x1]  ;;  %v5367_v40 = vld [vmem:[#allocation3 + $0x18] sm:$0xf] }
 0x274   : > { %10467 = vmatmul.msk.bf16.gmra.mxu1 %vm1514_vm15, %v3422_v50  ;;  %5363 = vst.msk [vmem:[#allocation3 + $0x10] sm:$0xf] %vm438_vm14, %v5052_v39  ;;  %v4833_v53 = vpop.f32.mrf.mxu0  ;;  %v4232_v50 = vshll.u32 %v12823_v30, 16  ;;  %v462_v29 = vsel %vm11756_vm6, 0, %v461_v46  ;;  %v3353_v45 = vrot.slane %v3351_v10, 4  ;;  %v4236_v42 = vshrl.u32 %v12823_v30, 16 }
 0x275   : > { %v3786_v26 = vpop.f32.mrf.mxu2  ;;  %5366 = vst [vmem:[#allocation3 + $0x14] sm:$0x1] %v5365_v47  ;;  %v5055_v56 = vshrl.u32 %v5007_v9, 16  ;;  %v4909_v61 = vadd.f32 %v4833_v53, %v4511_v31  ;;  %v5058_v27 = vshll.u32 %v5007_v9, 16  ;;  %v10451_v31 = vrot.slane %v3213_v52, 9 }
 0x276   : > { %10564 = vmatmul.msk.bf16.gmra.mxu3 %vm1514_vm15, %v4362_v18  ;;  %463 = vst [vmem:[#allocation3 + $0x30] sm:$0x1] %v462_v29  ;;  %v3354_v18 = vrot.slane %v11353_v63, 5  ;;  %v12840_v39 = vunpack.c.l.b16 %v4221_v4  ;;  %v4684_v47 = vsel %vm12036_vm11, %v10581_v15, %v4683_v37  ;;  %v4225_v53 = vrot.slane %v4223_v41, 4  ;;  %v12858_v52 = vld [vmem:[#allocation2 + $0xb0] sm:$0x1] }
 0x277   : > { %v12837_v33 = vrot.slane %v5055_v56, 7  ;;  %v4944_v21 = vadd.f32 %v12737_v35, %v4909_v61  ;;  %v4228_v58 = vrot.slane %v4226_v38, 5  ;;  %v4687_v61 = vsel %vm12036_vm11, %v4685_v62, %v4686_v6 }
 0x278   : > { %v3352_v4 = vsel %vm12036_vm11, %v10451_v31, %v3351_v10  ;;  %v3355_v29 = vsel %vm12036_vm11, %v3353_v45, %v3354_v18  ;;  %v12854_v37 = vrot.slane %v4232_v50, 5  ;;  %v4238_v15 = vrot.slane %v4236_v42, 4  ;;  %v516_v10 = vld [vmem:[#allocation3 + $0x38] sm:$0x1] }
 0x279   : > { %v4438_v11 = vpop.f32.mrf.mxu3  ;;  %v12844_v9 = vpop.f32.mrf.mxu1  ;;  %v5060_v56 = vor.u32 %v5058_v27, %v12837_v33  ;;  %v4976_v46 = vmax.f32 %v4944_v21, 0.0  ;;  %v3403_v27 = vunpack.c.l.b16 %v3352_v4  ;;  %v4740_v6 = vunpack.c.l.b16 %v4684_v47  ;;  %v14744_v18 = vld [vmem:[#allocation19_spill] sm:$0xff] }
 0x27a   : > { %v4512_v5 = vadd.f32 %v4438_v11, %v3858_v13  ;;  %10548 = vmatmul.msk.bf16.gmra.mxu2 %vm1514_vm15, %v11147_v2  ;;  %v3404_v13 = vunpack.c.l.b16 %v3355_v29  ;;  %v4741_v62 = vunpack.c.l.b16 %v4687_v61  ;;  %v4229_v31 = vor.u32 %v4228_v58, %v4225_v53 }
 0x27b   : > { %v5368_v41 = vsel %vm12776_vm0, %v5060_v56, %v5367_v40  ;;  %v5008_v38 = vpack.c.bf16 %v4976_v46, %v4976_v46  ;;  %v3859_v50 = vadd.f32 %v3786_v26, %v12817_v34  ;;  %v4363_v42 = vpack.c.b16 %v12840_v39, %v12821_v24  ;;  %v4552_v46 = vld [vmem:[#allocation2 + $0xa8] sm:$0xe]  ;;  %v3925_v24 = vld [vmem:[#allocation2 + $0xb4] sm:$0xf]  ;;  %v5371_v26 = vld [vmem:[#allocation3 + $0x20] sm:$0x1] }
 0x27c   : > { %5369 = vst [vmem:[#allocation3 + $0x18] sm:$0xf] %v5368_v41  ;;  %v4836_v2 = vpop.f32.mrf.mxu0  ;;  %v3573_v40 = vadd.f32 %v12813_v48, %v14744_v18  ;;  %v517_v11 = vsel %vm11770_vm2, 0, %v516_v10  ;;  %v4239_v56 = vor.u32 %v4238_v15, %v12854_v37  ;;  %v4242_v47 = vshll.u32 %v12858_v52, 16 }
 0x27d   : > { %v3789_v21 = vpop.f32.mrf.mxu2  ;;  %v5063_v63 = vshrl.u32 %v5008_v38, 16  ;;  %v4910_v45 = vadd.f32 %v4836_v2, %v4512_v5  ;;  %v5066_v53 = vshll.u32 %v5008_v38, 16  ;;  %518 = vst [vmem:[#allocation3 + $0x38] sm:$0x1] %v517_v11  ;;  %v3423_v34 = vpack.c.b16 %v3404_v13, %v3403_v27 }
 0x27e   : > { %v5061_v48 = vrot.slane %v12837_v33, 4  ;;  %v12873_v58 = vpack.c.b16 %v4741_v62, %v4740_v6  ;;  %v12877_v29 = vrot.slane %v4229_v31, 4  ;;  %v4690_v15 = vrot.slane %v12823_v30, 5  ;;  %v11148_v31 = vld [vmem:[#allocation2 + $0xa8] sm:$0xff] }
 0x27f   : > { %v5065_v61 = vrot.slane %v5063_v63, 7  ;;  %10597 = vmatmul.msk.bf16.gmra.mxu0 %vm1514_vm15, %v12811_v23  ;;  %v4945_v5 = vadd.f32 %v12737_v35, %v4910_v45  ;;  %v4240_v10 = vrot.slane %v4239_v56, 4  ;;  %v4244_v63 = vrot.slane %v4242_v47, 5  ;;  %v11354_v56 = vld [vmem:[#allocation2 + $0xac] sm:$0xf] }
 0x280   : > { %v10582_v27 = vrot.slane %v4552_v46, 9  ;;  %v4247_v13 = vshrl.u32 %v3925_v24, 16  ;;  %v4693_v30 = vrot.slane %v12858_v52, 5  ;;  %v4235_v11 = vsel %vm11709_vm12, %v12877_v29, %v12854_v37  ;;  %v12893_v46 = vld [vmem:[#allocation2 + $0xb8] sm:$0xf] }
 0x281   : > { %v4440_v39 = vpop.f32.mrf.mxu3  ;;  %v12875_v4 = vpop.f32.mrf.mxu1  ;;  %v5068_v41 = vor.u32 %v5066_v53, %v5065_v61  ;;  %v5070_v38 = vrot.slane %v5065_v61, 4  ;;  %v4977_v23 = vmax.f32 %v4945_v5, 0.0  ;;  %v3358_v47 = vrot.slane %v11354_v56, 5 }
 0x282   : > { %v4513_v2 = vadd.f32 %v4440_v39, %v3859_v50  ;;  %v3574_v50 = vadd.f32 %v12844_v9, %v12332_v55  ;;  %v4250_v61 = vshll.u32 %v3925_v24, 16  ;;  %v3860_v5 = vadd.f32 %v3789_v21, %v3573_v40 }
 0x283   : > { %v5069_v33 = vsel %vm11658_vm8, %v5061_v48, %v5068_v41  ;;  %v5372_v6 = vsel %vm11756_vm6, %v5070_v38, %v5371_v26  ;;  %v5009_v62 = vpack.c.bf16 %v4977_v23, %v4977_v23  ;;  %v464_v48 = vld [vmem:[#allocation3 + $0x3c] sm:$0x1]  ;;  %v3214_v26 = vld [vmem:[#allocation2 + $0xa8] sm:$0xe]  ;;  %v3360_v39 = vrot.slane %v3358_v47, 4 }
 0x284   : > { %10468 = vmatmul.msk.bf16.gmra.mxu1 %vm1514_vm15, %v3423_v34  ;;  %5370 = vst.msk [vmem:[#allocation3 + $0x1c] sm:$0xf] %vm438_vm14, %v5069_v33  ;;  %v4838_v45 = vpop.f32.mrf.mxu0  ;;  %v4692_v34 = vrot.slane %v4690_v15, 4  ;;  %v465_v9 = vsel %vm11756_vm6, 0, %v464_v48  ;;  %v4249_v37 = vrot.slane %v4247_v13, 4  ;;  %v10452_v24 = vrot.slane %v3214_v26, 9 }
 0x285   : > { %v3791_v18 = vpop.f32.mrf.mxu2  ;;  %5373 = vst [vmem:[#allocation3 + $0x20] sm:$0x1] %v5372_v6  ;;  %v5072_v53 = vshrl.u32 %v5009_v62, 16  ;;  %v4911_v52 = vadd.f32 %v4838_v45, %v4513_v2  ;;  %v5075_v55 = vshll.u32 %v5009_v62, 16  ;;  %v11355_v38 = vld [vmem:[#allocation2 + $0xb0] sm:$0x1]  ;;  %v4245_v21 = vsel %vm11709_vm12, %v4240_v10, %v4244_v63 }
 0x286   : > { %10565 = vmatmul.msk.bf16.gmra.mxu3 %vm1514_vm15, %v4363_v42  ;;  %466 = vst [vmem:[#allocation3 + $0x3c] sm:$0x1] %v465_v9  ;;  %v3361_v23 = vrot.slane %v11355_v38, 5  ;;  %v5374_v2 = vld [vmem:[#allocation3 + $0x24] sm:$0xf]  ;;  %v4691_v40 = vsel %vm12036_vm11, %v10582_v27, %v4690_v15  ;;  %v4252_v6 = vrot.slane %v4250_v61, 5  ;;  %v4345_v9 = vunpack.c.l.b16 %v4245_v21 }
 0x287   : > { %v12898_v29 = vrot.slane %v5072_v53, 7  ;;  %v4946_v41 = vadd.f32 %v12737_v35, %v4911_v52  ;;  %v4256_v13 = vshll.u32 %v12893_v46, 16  ;;  %v4694_v53 = vsel %vm12036_vm11, %v4692_v34, %v4693_v30  ;;  %v519_v34 = vld [vmem:[#allocation3 + $0x44] sm:$0x1] }
 0x288   : > { %v3359_v52 = vsel %vm12036_vm11, %v10452_v24, %v3358_v47  ;;  %v3362_v10 = vsel %vm12036_vm11, %v3360_v39, %v3361_v23  ;;  %v4253_v15 = vor.u32 %v4252_v6, %v4249_v37  ;;  %v4260_v63 = vshrl.u32 %v12893_v46, 16  ;;  %v12917_v37 = vld [vmem:[#allocation2 + $0xbc] sm:$0x1] }
 0x289   : > { %v4443_v42 = vpop.f32.mrf.mxu3  ;;  %v3509_v33 = vpop.f32.mrf.mxu1  ;;  %v5077_v62 = vor.u32 %v5075_v55, %v12898_v29  ;;  %v4978_v45 = vmax.f32 %v4946_v41, 0.0  ;;  %v3405_v48 = vunpack.c.l.b16 %v3359_v52  ;;  %v4344_v55 = vunpack.c.l.b16 %v4235_v11 }
 0x28a   : > { %v4514_v56 = vadd.f32 %v4443_v42, %v3860_v5  ;;  %10549 = vmatmul.msk.bf16.gmra.mxu2 %vm1514_vm15, %v11148_v31  ;;  %v3406_v5 = vunpack.c.l.b16 %v3362_v10  ;;  %v4258_v26 = vrot.slane %v4256_v13, 5  ;;  %v3861_v24 = vadd.f32 %v3791_v18, %v3574_v50  ;;  %v5378_v18 = vld [vmem:[#allocation3 + $0x2c] sm:$0x1] }
 0x28b   : > { %v5375_v27 = vsel %vm12776_vm0, %v5077_v62, %v5374_v2  ;;  %v5010_v61 = vpack.c.bf16 %v4978_v45, %v4978_v45  ;;  %v4742_v39 = vunpack.c.l.b16 %v4691_v40  ;;  %v4743_v38 = vunpack.c.l.b16 %v4694_v53 }
 0x28c   : > { %5376 = vst [vmem:[#allocation3 + $0x24] sm:$0xf] %v5375_v27  ;;  %v4841_v31 = vpop.f32.mrf.mxu0  ;;  %v520_v23 = vsel %vm11770_vm2, 0, %v519_v34  ;;  %v4254_v2 = vrot.slane %v4253_v15, 4  ;;  %v4262_v42 = vrot.slane %v4260_v63, 4  ;;  %v3424_v21 = vpack.c.b16 %v3406_v5, %v3405_v48 }
 0x28d   : > { %v3794_v30 = vpop.f32.mrf.mxu2  ;;  %v5080_v47 = vshrl.u32 %v5010_v61, 16  ;;  %v4912_v41 = vadd.f32 %v4841_v31, %v4514_v56  ;;  %v5083_v62 = vshll.u32 %v5010_v61, 16  ;;  %521 = vst [vmem:[#allocation3 + $0x44] sm:$0x1] %v520_v23  ;;  %v5078_v50 = vrot.slane %v12898_v29, 4 }
 0x28e   : > { %v4364_v13 = vpack.c.b16 %v4345_v9, %v4344_v55  ;;  %v4263_v56 = vor.u32 %v4262_v42, %v4258_v26  ;;  %v4266_v53 = vshll.u32 %v12917_v37, 16  ;;  %v12930_v27 = vpack.c.b16 %v4743_v38, %v4742_v39  ;;  %v4553_v55 = vld [vmem:[#allocation2 + $0xb4] sm:$0xe]  ;;  %v3928_v9 = vld [vmem:[#allocation2 + $0xc0] sm:$0xf] }
 0x28f   : > { %v5082_v6 = vrot.slane %v5080_v47, 7  ;;  %10598 = vmatmul.msk.bf16.gmra.mxu0 %vm1514_vm15, %v12873_v58  ;;  %v4947_v11 = vadd.f32 %v12737_v35, %v4912_v41  ;;  %v3575_v58 = vadd.f32 %v12875_v4, %v12341_v54  ;;  %v4259_v29 = vsel %vm11709_vm12, %v4254_v2, %v4258_v26  ;;  %v11149_v47 = vld [vmem:[#allocation2 + $0xb4] sm:$0xff]  ;;  %v467_v2 = vld [vmem:[#allocation3 + $0x48] sm:$0x1] }
 0x290   : > { %v3576_v31 = vadd.f32 %v3509_v33, %v12361_v1  ;;  %v4268_v26 = vrot.slane %v4266_v53, 5  ;;  %v4697_v41 = vrot.slane %v12893_v46, 5  ;;  %v4264_v1 = vrot.slane %v4263_v56, 4 }
 0x291   : > { %v4445_v40 = vpop.f32.mrf.mxu3  ;;  %v12925_v45 = vpop.f32.mrf.mxu1  ;;  %v5085_v52 = vor.u32 %v5083_v62, %v5082_v6  ;;  %v5087_v10 = vrot.slane %v5082_v6, 4  ;;  %v4979_v15 = vmax.f32 %v4947_v11, 0.0  ;;  %v3862_v4 = vadd.f32 %v3794_v30, %v3575_v58  ;;  %v3215_v6 = vld [vmem:[#allocation2 + $0xb4] sm:$0xe] }
 0x292   : > { %v4515_v63 = vadd.f32 %v4445_v40, %v3861_v24  ;;  %v11356_v24 = vld [vmem:[#allocation2 + $0xb8] sm:$0xf]  ;;  %v12943_v33 = vunpack.c.l.b16 %v4259_v29  ;;  %v468_v30 = vsel %vm11756_vm6, 0, %v467_v2  ;;  %v4271_v11 = vshrl.u32 %v3928_v9, 16 }
 0x293   : > { %v5086_v61 = vsel %vm11658_vm8, %v5078_v50, %v5085_v52  ;;  %v5379_v48 = vsel %vm11756_vm6, %v5087_v10, %v5378_v18  ;;  %v5011_v5 = vpack.c.bf16 %v4979_v15, %v4979_v15  ;;  %v3365_v39 = vrot.slane %v11356_v24, 5  ;;  %469 = vst [vmem:[#allocation3 + $0x48] sm:$0x1] %v468_v30  ;;  %v11357_v18 = vld [vmem:[#allocation2 + $0xbc] sm:$0x1] }
 0x294   : > { %10469 = vmatmul.msk.bf16.gmra.mxu1 %vm1514_vm15, %v3424_v21  ;;  %5377 = vst.msk [vmem:[#allocation3 + $0x28] sm:$0xf] %vm438_vm14, %v5086_v61  ;;  %v4843_v54 = vpop.f32.mrf.mxu0  ;;  %v10453_v50 = vrot.slane %v3215_v6, 9  ;;  %v3368_v40 = vrot.slane %v11357_v18, 5  ;;  %v10583_v53 = vrot.slane %v4553_v55, 9  ;;  %v4699_v52 = vrot.slane %v4697_v41, 4 }
 0x295   : > { %v3796_v34 = vpop.f32.mrf.mxu2  ;;  %5380 = vst [vmem:[#allocation3 + $0x2c] sm:$0x1] %v5379_v48  ;;  %v5089_v38 = vshrl.u32 %v5011_v5, 16  ;;  %v4913_v23 = vadd.f32 %v4843_v54, %v4515_v63  ;;  %v5092_v42 = vshll.u32 %v5011_v5, 16  ;;  %v3367_v62 = vrot.slane %v3365_v39, 4 }
 0x296   : > { %10566 = vmatmul.msk.bf16.gmra.mxu3 %vm1514_vm15, %v4364_v13  ;;  %v5381_v13 = vld [vmem:[#allocation3 + $0x30] sm:$0xf]  ;;  %v4700_v10 = vrot.slane %v12917_v37, 5  ;;  %v4274_v63 = vshll.u32 %v3928_v9, 16  ;;  %v4269_v48 = vsel %vm11709_vm12, %v4264_v1, %v4268_v26  ;;  %v12957_v5 = vld [vmem:[#allocation2 + $0xc4] sm:$0xf]  ;;  %v3366_v55 = vsel %vm12036_vm11, %v10453_v50, %v3365_v39 }
 0x297   : > { %v12947_v21 = vrot.slane %v5089_v38, 7  ;;  %v4948_v46 = vadd.f32 %v12737_v35, %v4913_v23  ;;  %v3369_v37 = vsel %vm12036_vm11, %v3367_v62, %v3368_v40  ;;  %v4273_v54 = vrot.slane %v4271_v11, 4  ;;  %v12971_v50 = vld [vmem:[#allocation2 + $0xc8] sm:$0x1] }
 0x298   : > { %v4276_v24 = vrot.slane %v4274_v63, 5  ;;  %v3408_v23 = vunpack.c.l.b16 %v3369_v37  ;;  %v4347_v2 = vunpack.c.l.b16 %v4269_v48  ;;  %v4698_v26 = vsel %vm12036_vm11, %v10583_v53, %v4697_v41 }
 0x299   : > { %v4448_v56 = vpop.f32.mrf.mxu3  ;;  %v12951_v15 = vpop.f32.mrf.mxu1  ;;  %v5094_v58 = vor.u32 %v5092_v42, %v12947_v21  ;;  %v4980_v29 = vmax.f32 %v4948_v46, 0.0  ;;  %v522_v42 = vld [vmem:[#allocation3 + $0x50] sm:$0x1]  ;;  %v4280_v39 = vshll.u32 %v12957_v5, 16  ;;  %v4284_v30 = vshrl.u32 %v12957_v5, 16 }
 0x29a   : > { %v4516_v61 = vadd.f32 %v4448_v56, %v3862_v4  ;;  %10550 = vmatmul.msk.bf16.gmra.mxu2 %vm1514_vm15, %v11149_v47  ;;  %v3407_v4 = vunpack.c.l.b16 %v3366_v55  ;;  %v3863_v11 = vadd.f32 %v3796_v34, %v3576_v31  ;;  %v4701_v46 = vsel %vm12036_vm11, %v4699_v52, %v4700_v10  ;;  %v5385_v10 = vld [vmem:[#allocation3 + $0x38] sm:$0x1] }
 0x29b   : > { %v5382_v9 = vsel %vm12776_vm0, %v5094_v58, %v5381_v13  ;;  %v5012_v38 = vpack.c.bf16 %v4980_v29, %v4980_v29  ;;  %v523_v40 = vsel %vm11770_vm2, 0, %v522_v42  ;;  %v4277_v13 = vor.u32 %v4276_v24, %v4273_v54 }
 0x29c   : > { %5383 = vst [vmem:[#allocation3 + $0x30] sm:$0xf] %v5382_v9  ;;  %v4846_v47 = vpop.f32.mrf.mxu0  ;;  %v12975_v41 = vrot.slane %v4280_v39, 5  ;;  %v3425_v31 = vpack.c.b16 %v3408_v23, %v3407_v4  ;;  %v4286_v34 = vrot.slane %v4284_v30, 4  ;;  %v5095_v52 = vrot.slane %v12947_v21, 4  ;;  %v11150_v39 = vld [vmem:[#allocation2 + $0xc0] sm:$0xff] }
 0x29d   : > { %v3799_v1 = vpop.f32.mrf.mxu2  ;;  %v5097_v6 = vshrl.u32 %v5012_v38, 16  ;;  %v4914_v62 = vadd.f32 %v4846_v47, %v4516_v61  ;;  %v5100_v18 = vshll.u32 %v5012_v38, 16  ;;  %524 = vst [vmem:[#allocation3 + $0x50] sm:$0x1] %v523_v40  ;;  %v4365_v58 = vpack.c.b16 %v4347_v2, %v12943_v33  ;;  %v379_v47 = vld [vmem:[#allocation2 + $0xcc] sm:$0x1] }
 0x29e   : > { %v4290_v61 = vshll.u32 %v12971_v50, 16  ;;  %v4745_v24 = vunpack.c.l.b16 %v4701_v46  ;;  %v4278_v9 = vrot.slane %v4277_v13, 4  ;;  %v4287_v38 = vor.u32 %v4286_v34, %v12975_v41  ;;  %v435_v2 = vld [vmem:[#allocation2 + $0xd4] sm:$0x1]  ;;  %v3216_v34 = vld [vmem:[#allocation2 + $0xc0] sm:$0xe] }
 0x29f   : > { %v5099_v56 = vrot.slane %v5097_v6, 7  ;;  %10599 = vmatmul.msk.bf16.gmra.mxu0 %vm1514_vm15, %v12930_v27  ;;  %v4949_v53 = vadd.f32 %v12737_v35, %v4914_v62  ;;  %v4744_v27 = vunpack.c.l.b16 %v4698_v26  ;;  %v3577_v23 = vadd.f32 %v12925_v45, %v12365_v20  ;;  %v11358_v6 = vld [vmem:[#allocation2 + $0xc4] sm:$0xf]  ;;  %v470_v20 = vld [vmem:[#allocation3 + $0x54] sm:$0x1] }
 0x2a0   : > { %v4292_v30 = vrot.slane %v4290_v61, 5  ;;  %v3372_v62 = vrot.slane %v11358_v6, 5  ;;  %v4288_v40 = vrot.slane %v4287_v38, 4  ;;  %v3578_v13 = vadd.f32 %v12951_v15, %v12381_v32  ;;  %v13017_v38 = vld [vmem:[#allocation2 + $0xd0] sm:$0xf] }
 0x2a1   : > { %v4450_v63 = vpop.f32.mrf.mxu3  ;;  %v12982_v29 = vpop.f32.mrf.mxu1  ;;  %v5102_v48 = vor.u32 %v5100_v18, %v5099_v56  ;;  %v5104_v55 = vrot.slane %v5099_v56, 4  ;;  %v4981_v37 = vmax.f32 %v4949_v53, 0.0  ;;  %v3864_v18 = vadd.f32 %v3799_v1, %v3577_v23  ;;  %v13000_v53 = vld [vmem:[#allocation2 + $0xc0] sm:$0xe]  ;;  %v525_v6 = vld [vmem:[#allocation3 + $0x5c] sm:$0x1] }
 0x2a2   : > { %v4517_v54 = vadd.f32 %v4450_v63, %v3863_v11  ;;  %v4763_v45 = vpack.c.b16 %v4745_v24, %v4744_v27  ;;  %v4283_v56 = vsel %vm11709_vm12, %v4278_v9, %v12975_v41  ;;  %v3374_v63 = vrot.slane %v3372_v62, 4 }
 0x2a3   : > { %v5103_v21 = vsel %vm11658_vm8, %v5095_v52, %v5102_v48  ;;  %v5386_v4 = vsel %vm11756_vm6, %v5104_v55, %v5385_v10  ;;  %v5013_v33 = vpack.c.bf16 %v4981_v37, %v4981_v37  ;;  %v10454_v15 = vrot.slane %v3216_v34, 9  ;;  %v11359_v48 = vld [vmem:[#allocation2 + $0xc8] sm:$0x1] }
 0x2a4   : > { %10470 = vmatmul.msk.bf16.gmra.mxu1 %vm1514_vm15, %v3425_v31  ;;  %5384 = vst.msk [vmem:[#allocation3 + $0x34] sm:$0xf] %vm438_vm14, %v5103_v21  ;;  %v4848_v26 = vpop.f32.mrf.mxu0  ;;  %v471_v31 = vsel %vm11756_vm6, 0, %v470_v20  ;;  %v3375_v41 = vrot.slane %v11359_v48, 5  ;;  %v380_v55 = vsel %vm11641_vm3, 0, %v379_v47  ;;  %v436_v37 = vsel %vm11650_vm5, 0, %v435_v2 }
 0x2a5   : > { %v3801_v42 = vpop.f32.mrf.mxu2  ;;  %5387 = vst [vmem:[#allocation3 + $0x38] sm:$0x1] %v5386_v4  ;;  %v5106_v11 = vshrl.u32 %v5013_v33, 16  ;;  %v4915_v46 = vadd.f32 %v4848_v26, %v4517_v54  ;;  %v5109_v10 = vshll.u32 %v5013_v33, 16  ;;  %v4293_v9 = vsel %vm11709_vm12, %v4288_v40, %v4292_v30 }
 0x2a6   : > { %10567 = vmatmul.msk.bf16.gmra.mxu3 %vm1514_vm15, %v4365_v58  ;;  %472 = vst [vmem:[#allocation3 + $0x54] sm:$0x1] %v471_v31  ;;  %v5388_v58 = vld [vmem:[#allocation3 + $0x3c] sm:$0xf]  ;;  %v13019_v21 = vunpack.c.l.b16 %v4283_v56  ;;  %v10584_v3 = vrot.slane %v13000_v53, 9  ;;  %v4704_v4 = vrot.slane %v12957_v5, 5  ;;  %v3373_v7 = vsel %vm12036_vm11, %v10454_v15, %v3372_v62 }
 0x2a7   : > { %v13004_v52 = vrot.slane %v5106_v11, 7  ;;  %v4950_v1 = vadd.f32 %v12737_v35, %v4915_v46  ;;  %381 = vst [vmem:[#allocation2 + $0xcc] sm:$0x1] %v380_v55  ;;  %v3376_v47 = vsel %vm12036_vm11, %v3374_v63, %v3375_v41  ;;  %v3409_v2 = vunpack.c.l.b16 %v3373_v7 }
 0x2a8   : > { %437 = vst [vmem:[#allocation2 + $0xd4] sm:$0x1] %v436_v37  ;;  %v3410_v11 = vunpack.c.l.b16 %v3376_v47  ;;  %v4304_v5 = vshll.u32 %v13017_v38, 16  ;;  %v4308_v46 = vshrl.u32 %v13017_v38, 16  ;;  %v3865_v40 = vadd.f32 %v3801_v42, %v3578_v13  ;;  %v5392_v42 = vld [vmem:[#allocation3 + $0x44] sm:$0x1] }
 0x2a9   : > { %v4453_v61 = vpop.f32.mrf.mxu3  ;;  %v13007_v32 = vpop.f32.mrf.mxu1  ;;  %v5111_v54 = vor.u32 %v5109_v10, %v13004_v52  ;;  %v4982_v27 = vmax.f32 %v4950_v1, 0.0  ;;  %v4707_v20 = vrot.slane %v12971_v50, 5  ;;  %v4706_v56 = vrot.slane %v4704_v4, 4 }
 0x2aa   : > { %v4518_v24 = vadd.f32 %v4453_v61, %v3864_v18  ;;  %10551 = vmatmul.msk.bf16.gmra.mxu2 %vm1514_vm15, %v11150_v39  ;;  %v4349_v39 = vunpack.c.l.b16 %v4293_v9  ;;  %v526_v53 = vsel %vm11770_vm2, 0, %v525_v6  ;;  %v13034_v31 = vrot.slane %v4304_v5, 5 }
 0x2ab   : > { %v5389_v33 = vsel %vm12776_vm0, %v5111_v54, %v5388_v58  ;;  %v5014_v23 = vpack.c.bf16 %v4982_v27, %v4982_v27  ;;  %v4310_v34 = vrot.slane %v4308_v46, 4  ;;  %527 = vst [vmem:[#allocation3 + $0x5c] sm:$0x1] %v526_v53  ;;  %v3426_v58 = vpack.c.b16 %v3410_v11, %v3409_v2  ;;  %v473_v46 = vld [vmem:[#allocation3 + $0x60] sm:$0x1] }
 0x2ac   : > { %5390 = vst [vmem:[#allocation3 + $0x3c] sm:$0xf] %v5389_v33  ;;  %v4851_v26 = vpop.f32.mrf.mxu0  ;;  %v5112_v61 = vrot.slane %v13004_v52, 4  ;;  %v3579_v50 = vadd.f32 %v12982_v29, %v12393_v19  ;;  %v4366_v15 = vpack.c.b16 %v4349_v39, %v13019_v21  ;;  %v4705_v52 = vsel %vm12036_vm11, %v10584_v3, %v4704_v4 }
 0x2ad   : > { %v3804_v30 = vpop.f32.mrf.mxu2  ;;  %v5114_v62 = vshrl.u32 %v5014_v23, 16  ;;  %v4916_v18 = vadd.f32 %v4851_v26, %v4518_v24  ;;  %v5117_v1 = vshll.u32 %v5014_v23, 16  ;;  %v4311_v55 = vor.u32 %v4310_v34, %v13034_v31  ;;  %v5402_v60 = vld [vmem:[#allocation3 + $0x54] sm:$0xf] }
 0x2ae   : > { %v3931_v41 = vld [vmem:[#allocation2 + $0xcc] sm:$0xf]  ;;  %v4708_v9 = vsel %vm12036_vm11, %v4706_v56, %v4707_v20  ;;  %v3866_v11 = vadd.f32 %v3804_v30, %v3579_v50 }
 0x2af   : > { %v5116_v10 = vrot.slane %v5114_v62, 7  ;;  %10600 = vmatmul.msk.bf16.gmra.mxu0 %vm1514_vm15, %v4763_v45  ;;  %v4951_v63 = vadd.f32 %v12737_v35, %v4916_v18  ;;  %v13045_v24 = vld [vmem:[#allocation2 + $0xd4] sm:$0x1]  ;;  %v4295_v19 = vshrl.u32 %v3931_v41, 16  ;;  %v4298_v29 = vshll.u32 %v3931_v41, 16  ;;  %v11151_v4 = vld [vmem:[#allocation2 + $0xcc] sm:$0xff] }
 0x2b0   : > { %v4314_v23 = vshll.u32 %v13045_v24, 16  ;;  %v4312_v5 = vrot.slane %v4311_v55, 4  ;;  %v4746_v62 = vunpack.c.l.b16 %v4705_v52  ;;  %v4747_v18 = vunpack.c.l.b16 %v4708_v9 }
 0x2b1   : > { %v4455_v13 = vpop.f32.mrf.mxu3  ;;  %v13042_v48 = vpop.f32.mrf.mxu1  ;;  %v5119_v37 = vor.u32 %v5117_v1, %v5116_v10  ;;  %v5121_v45 = vrot.slane %v5116_v10, 4  ;;  %v4983_v54 = vmax.f32 %v4951_v63, 0.0  ;;  %v4297_v2 = vrot.slane %v4295_v19, 4  ;;  %v5395_v1 = vld [vmem:[#allocation3 + $0x48] sm:$0xf] }
 0x2b2   : > { %v4519_v27 = vadd.f32 %v4455_v13, %v3865_v40  ;;  %v4300_v26 = vrot.slane %v4298_v29, 5  ;;  %v4316_v20 = vrot.slane %v4314_v23, 5  ;;  %v474_v10 = vsel %vm11756_vm6, 0, %v473_v46  ;;  %v528_v29 = vld [vmem:[#allocation3 + $0x68] sm:$0x1] }
 0x2b3   : > { %v5120_v21 = vsel %vm11658_vm8, %v5112_v61, %v5119_v37  ;;  %v5393_v7 = vsel %vm11756_vm6, %v5121_v45, %v5392_v42  ;;  %v5015_v33 = vpack.c.bf16 %v4983_v54, %v4983_v54  ;;  %475 = vst [vmem:[#allocation3 + $0x60] sm:$0x1] %v474_v10  ;;  %v4764_v55 = vpack.c.b16 %v4747_v18, %v4746_v62  ;;  %v4555_v45 = vld [vmem:[#allocation2 + $0xcc] sm:$0xe] }
 0x2b4   : > { %10471 = vmatmul.msk.bf16.gmra.mxu1 %vm1514_vm15, %v3426_v58  ;;  %5391 = vst.msk [vmem:[#allocation3 + $0x40] sm:$0xf] %vm438_vm14, %v5120_v21  ;;  %v4853_v47 = vpop.f32.mrf.mxu0  ;;  %v4301_v40 = vor.u32 %v4300_v26, %v4297_v2  ;;  %v4317_v50 = vsel %vm11709_vm12, %v4312_v5, %v4316_v20  ;;  %v3580_v37 = vadd.f32 %v13007_v32, %v12404_v8  ;;  %v4711_v9 = vrot.slane %v13017_v38, 5  ;;  %v13081_v8 = vld [vmem:[%s14683_s2] ss:$0 sm:$0xff] }
 0x2b5   : > { %v3806_v3 = vpop.f32.mrf.mxu2  ;;  %5394 = vst [vmem:[#allocation3 + $0x44] sm:$0x1] %v5393_v7  ;;  %v5123_v39 = vshrl.u32 %v5015_v33, 16  ;;  %v4917_v6 = vadd.f32 %v4853_v47, %v4519_v27  ;;  %v5126_v53 = vshll.u32 %v5015_v33, 16  ;;  %v4351_v52 = vunpack.c.l.b16 %v4317_v50 }
 0x2b6   : > { %10568 = vmatmul.msk.bf16.gmra.mxu3 %vm1514_vm15, %v4366_v15  ;;  %v4302_v58 = vrot.slane %v4301_v40, 4  ;;  %v529_v7 = vsel %vm11770_vm2, 0, %v528_v29  ;;  %v10585_v38 = vrot.slane %v4555_v45, 9  ;;  %v4713_v26 = vrot.slane %v4711_v9, 4 }
 0x2b7   : > { %v5125_v56 = vrot.slane %v5123_v39, 7  ;;  %v4952_v34 = vadd.f32 %v12737_v35, %v4917_v6  ;;  %530 = vst [vmem:[#allocation3 + $0x68] sm:$0x1] %v529_v7  ;;  %v4714_v39 = vrot.slane %v13045_v24, 5  ;;  %v3581_v18 = vadd.f32 %v13042_v48, %v12421_v57 }
 0x2b8   : > { %v4307_v35 = vsel %vm11709_vm12, %v4302_v58, %v13034_v31  ;;  %v3867_v31 = vadd.f32 %v3806_v3, %v3580_v37 }
 0x2b9   : > { %v4458_v63 = vpop.f32.mrf.mxu3  ;;  %v13062_v61 = vpop.f32.mrf.mxu1  ;;  %v5128_v30 = vor.u32 %v5126_v53, %v5125_v56  ;;  %v4984_v42 = vmax.f32 %v4952_v34, 0.0  ;;  %v4350_v27 = vunpack.c.l.b16 %v4307_v35  ;;  %v5129_v47 = vrot.slane %v5125_v56, 4 }
 0x2ba   : > { %v4520_v13 = vadd.f32 %v4458_v63, %v3866_v11  ;;  %10552 = vmatmul.msk.bf16.gmra.mxu2 %vm1514_vm15, %v11151_v4  ;;  %v5399_v4 = vld [vmem:[#allocation3 + $0x50] sm:$0x1]  ;;  %v4712_v53 = vsel %vm12036_vm11, %v10585_v38, %v4711_v9  ;;  %v4715_v34 = vsel %vm12036_vm11, %v4713_v26, %v4714_v39  ;;  %v476_v63 = vld [vmem:[#allocation3 + $0x6c] sm:$0x1]  ;;  %v3582_v9 = vadd.f32 %v13062_v61, %v12435_v16 }
 0x2bb   : > { %v5396_v15 = vsel %vm12776_vm0, %v5128_v30, %v5395_v1  ;;  %v5016_v41 = vpack.c.bf16 %v4984_v42, %v4984_v42  ;;  %v4367_v3 = vpack.c.b16 %v4351_v52, %v4350_v27  ;;  %v4748_v58 = vunpack.c.l.b16 %v4712_v53 }
 0x2bc   : > { %5397 = vst [vmem:[#allocation3 + $0x48] sm:$0xf] %v5396_v15  ;;  %v4856_v54 = vpop.f32.mrf.mxu0  ;;  %v477_v30 = vsel %vm11756_vm6, 0, %v476_v63  ;;  %v4749_v35 = vunpack.c.l.b16 %v4715_v34 }
 0x2bd   : > { %v3809_v19 = vpop.f32.mrf.mxu2  ;;  %v5131_v21 = vshrl.u32 %v5016_v41, 16  ;;  %v4918_v22 = vadd.f32 %v4856_v54, %v4520_v13  ;;  %v5134_v23 = vshll.u32 %v5016_v41, 16  ;;  %478 = vst [vmem:[#allocation3 + $0x6c] sm:$0x1] %v477_v30 }
 0x2be   : > { %v3868_v48 = vadd.f32 %v3809_v19, %v3581_v18  ;;  %v4765_v52 = vpack.c.b16 %v4749_v35, %v4748_v58 }
 0x2bf   : > { %v5133_v33 = vrot.slane %v5131_v21, 7  ;;  %10601 = vmatmul.msk.bf16.gmra.mxu0 %vm1514_vm15, %v4764_v55  ;;  %v4953_v32 = vadd.f32 %v13081_v8, %v4918_v22  ;;  %v531_v21 = vld [vmem:[#allocation3 + $0x74] sm:$0x1] }
 0x2c1   : > { %v4460_v2 = vpop.f32.mrf.mxu3  ;;  %v3527_v6 = vpop.f32.mrf.mxu1  ;;  %v5136_v11 = vor.u32 %v5134_v23, %v5133_v33  ;;  %v5138_v5 = vrot.slane %v5133_v33, 4  ;;  %v4985_v46 = vmax.f32 %v4953_v32, 0.0  ;;  %v532_v33 = vsel %vm11770_vm2, 0, %v531_v21 }
 0x2c2   : > { %v4521_v62 = vadd.f32 %v4460_v2, %v3867_v31  ;;  %533 = vst [vmem:[#allocation3 + $0x74] sm:$0x1] %v532_v33 }
 0x2c3   : > { %v5137_v40 = vsel %vm11658_vm8, %v5129_v47, %v5136_v11  ;;  %v5400_v20 = vsel %vm11756_vm6, %v5138_v5, %v5399_v4  ;;  %v5017_v56 = vpack.c.bf16 %v4985_v46, %v4985_v46  ;;  %v5406_v4 = vld [vmem:[#allocation3 + $0x5c] sm:$0x1] }
 0x2c4   : > { %5398 = vst.msk [vmem:[#allocation3 + $0x4c] sm:$0xf] %vm438_vm14, %v5137_v40  ;;  %v4858_v24 = vpop.f32.mrf.mxu0 }
 0x2c5   : > { %v3811_v10 = vpop.f32.mrf.mxu2  ;;  %5401 = vst [vmem:[#allocation3 + $0x50] sm:$0x1] %v5400_v20  ;;  %v5140_v1 = vshrl.u32 %v5017_v56, 16  ;;  %v4919_v57 = vadd.f32 %v4858_v24, %v4521_v62  ;;  %v5143_v13 = vshll.u32 %v5017_v56, 16  ;;  %v3583_v62 = vadd.f32 %v3527_v6, %v12454_v36  ;;  %v479_v24 = vld [vmem:[#allocation3 + $0x78] sm:$0x1] }
 0x2c6   : > { %10569 = vmatmul.msk.bf16.gmra.mxu3 %vm1514_vm15, %v4367_v3  ;;  %v3869_v7 = vadd.f32 %v3811_v10, %v3582_v9  ;;  %v480_v34 = vsel %vm11756_vm6, 0, %v479_v24 }
 0x2c7   : > { %v5142_v42 = vrot.slane %v5140_v1, 7  ;;  %v4954_v50 = vadd.f32 %v13081_v8, %v4919_v57  ;;  %481 = vst [vmem:[#allocation3 + $0x78] sm:$0x1] %v480_v34 }
 0x2c9   : > { %v4463_v15 = vpop.f32.mrf.mxu3  ;;  %v3529_v41 = vpop.f32.mrf.mxu1  ;;  %v5145_v55 = vor.u32 %v5143_v13, %v5142_v42  ;;  %v4986_v37 = vmax.f32 %v4954_v50, 0.0  ;;  %v5146_v47 = vrot.slane %v5142_v42, 4 }
 0x2ca   : > { %v4522_v45 = vadd.f32 %v4463_v15, %v3868_v48  ;;  %v5409_v48 = vld [vmem:[#allocation3 + $0x60] sm:$0xf]  ;;  %v3584_v50 = vadd.f32 %v3529_v41, %v12466_v44 }
 0x2cb   : > { %v5403_v54 = vsel %vm12776_vm0, %v5145_v55, %v5402_v60  ;;  %v5018_v27 = vpack.c.bf16 %v4986_v37, %v4986_v37  ;;  %v534_v15 = vld [vmem:[#allocation3 + $0x80] sm:$0x1] }
 0x2cc   : > { %5404 = vst [vmem:[#allocation3 + $0x54] sm:$0xf] %v5403_v54  ;;  %v4861_v19 = vpop.f32.mrf.mxu0  ;;  %v535_v54 = vsel %vm11770_vm2, 0, %v534_v15 }
 0x2cd   : > { %v3814_v29 = vpop.f32.mrf.mxu2  ;;  %v5148_v22 = vshrl.u32 %v5018_v27, 16  ;;  %v4920_v31 = vadd.f32 %v4861_v19, %v4522_v45  ;;  %v5151_v32 = vshll.u32 %v5018_v27, 16  ;;  %536 = vst [vmem:[#allocation3 + $0x80] sm:$0x1] %v535_v54 }
 0x2ce   : > { %v3870_v53 = vadd.f32 %v3814_v29, %v3583_v62  ;;  %v5413_v29 = vld [vmem:[#allocation3 + $0x68] sm:$0x1]  ;;  %v5416_v62 = vld [vmem:[#allocation3 + $0x6c] sm:$0xf] }
 0x2cf   : > { %v5150_v23 = vrot.slane %v5148_v22, 7  ;;  %10602 = vmatmul.msk.bf16.gmra.mxu0 %vm1514_vm15, %v4765_v52  ;;  %v4955_v38 = vadd.f32 %v13081_v8, %v4920_v31 }
 0x2d1   : > { %v4465_v16 = vpop.f32.mrf.mxu3  ;;  %v3532_v61 = vpop.f32.mrf.mxu1  ;;  %v5153_v2 = vor.u32 %v5151_v32, %v5150_v23  ;;  %v5155_v3 = vrot.slane %v5150_v23, 4  ;;  %v4987_v26 = vmax.f32 %v4955_v38, 0.0 }
 0x2d2   : > { %v4523_v39 = vadd.f32 %v4465_v16, %v3869_v7  ;;  %v3585_v38 = vadd.f32 %v3532_v61, %v12483_v43 }
 0x2d3   : > { %v5154_v11 = vsel %vm11658_vm8, %v5146_v47, %v5153_v2  ;;  %v5407_v5 = vsel %vm11756_vm6, %v5155_v3, %v5406_v4  ;;  %v5019_v46 = vpack.c.bf16 %v4987_v26, %v4987_v26  ;;  %v482_v26 = vld [vmem:[#allocation3 + $0x84] sm:$0x1] }
 0x2d4   : > { %5405 = vst.msk [vmem:[#allocation3 + $0x58] sm:$0xf] %vm438_vm14, %v5154_v11  ;;  %v4863_v18 = vpop.f32.mrf.mxu0 }
 0x2d5   : > { %v3816_v40 = vpop.f32.mrf.mxu2  ;;  %5408 = vst [vmem:[#allocation3 + $0x5c] sm:$0x1] %v5407_v5  ;;  %v5157_v20 = vshrl.u32 %v5019_v46, 16  ;;  %v4921_v56 = vadd.f32 %v4863_v18, %v4523_v39  ;;  %v5160_v1 = vshll.u32 %v5019_v46, 16  ;;  %v483_v39 = vsel %vm11756_vm6, 0, %v482_v26 }
 0x2d6   : > { %v3871_v45 = vadd.f32 %v3816_v40, %v3584_v50  ;;  %484 = vst [vmem:[#allocation3 + $0x84] sm:$0x1] %v483_v39  ;;  %v5420_v50 = vld [vmem:[#allocation3 + $0x74] sm:$0x1]  ;;  %v540_v39 = vld [vmem:[#allocation3 + $0x98] sm:$0x1] }
 0x2d7   : > { %v5159_v10 = vrot.slane %v5157_v20, 7  ;;  %v4956_v57 = vadd.f32 %v13081_v8, %v4921_v56 }
 0x2d9   : > { %v4468_v63 = vpop.f32.mrf.mxu3  ;;  %v3534_v36 = vpop.f32.mrf.mxu1  ;;  %v5162_v6 = vor.u32 %v5160_v1, %v5159_v10  ;;  %v4988_v58 = vmax.f32 %v4956_v57, 0.0  ;;  %v5163_v19 = vrot.slane %v5159_v10, 4  ;;  %v537_v1 = vld [vmem:[#allocation3 + $0x8c] sm:$0x1] }
 0x2da   : > { %v4524_v30 = vadd.f32 %v4468_v63, %v3870_v53  ;;  %v3586_v24 = vadd.f32 %v3534_v36, %v12497_v12 }
 0x2db   : > { %v5410_v42 = vsel %vm12776_vm0, %v5162_v6, %v5409_v48  ;;  %v5020_v13 = vpack.c.bf16 %v4988_v58, %v4988_v58  ;;  %v538_v6 = vsel %vm11770_vm2, 0, %v537_v1 }
 0x2dc   : > { %5411 = vst [vmem:[#allocation3 + $0x60] sm:$0xf] %v5410_v42  ;;  %v4866_v35 = vpop.f32.mrf.mxu0 }
 0x2dd   : > { %v3819_v60 = vpop.f32.mrf.mxu2  ;;  %v5165_v55 = vshrl.u32 %v5020_v13, 16  ;;  %v4922_v37 = vadd.f32 %v4866_v35, %v4524_v30  ;;  %v5168_v52 = vshll.u32 %v5020_v13, 16  ;;  %539 = vst [vmem:[#allocation3 + $0x8c] sm:$0x1] %v538_v6 }
 0x2de   : > { %v3872_v3 = vadd.f32 %v3819_v60, %v3585_v38 }
 0x2df   : > { %v5167_v27 = vrot.slane %v5165_v55, 7  ;;  %v4957_v9 = vadd.f32 %v13081_v8, %v4922_v37 }
 0x2e1   : > { %v4470_v21 = vpop.f32.mrf.mxu3  ;;  %v3537_v22 = vpop.f32.mrf.mxu1  ;;  %v5170_v44 = vor.u32 %v5168_v52, %v5167_v27  ;;  %v5172_v41 = vrot.slane %v5167_v27, 4  ;;  %v4989_v31 = vmax.f32 %v4957_v9, 0.0 }
 0x2e2   : > { %v4525_v7 = vadd.f32 %v4470_v21, %v3871_v45  ;;  %v3587_v27 = vadd.f32 %v3537_v22, %v12516_v14 }
 0x2e3   : > { %v5171_v33 = vsel %vm11658_vm8, %v5163_v19, %v5170_v44  ;;  %v5414_v23 = vsel %vm11756_vm6, %v5172_v41, %v5413_v29  ;;  %v5021_v32 = vpack.c.bf16 %v4989_v31, %v4989_v31  ;;  %v485_v44 = vld [vmem:[#allocation3 + $0x90] sm:$0x1] }
 0x2e4   : > { %5412 = vst.msk [vmem:[#allocation3 + $0x64] sm:$0xf] %vm438_vm14, %v5171_v33  ;;  %v4868_v47 = vpop.f32.mrf.mxu0  ;;  %v486_v41 = vsel %vm11756_vm6, 0, %v485_v44 }
 0x2e5   : > { %v3821_v4 = vpop.f32.mrf.mxu2  ;;  %5415 = vst [vmem:[#allocation3 + $0x68] sm:$0x1] %v5414_v23  ;;  %v5174_v16 = vshrl.u32 %v5021_v32, 16  ;;  %v4923_v2 = vadd.f32 %v4868_v47, %v4525_v7  ;;  %v5177_v5 = vshll.u32 %v5021_v32, 16  ;;  %v5423_v23 = vld [vmem:[#allocation3 + $0x78] sm:$0xf] }
 0x2e6   : > { %v3873_v63 = vadd.f32 %v3821_v4, %v3586_v24  ;;  %487 = vst [vmem:[#allocation3 + $0x90] sm:$0x1] %v486_v41 }
 0x2e7   : > { %v5176_v11 = vrot.slane %v5174_v16, 7  ;;  %v4958_v46 = vadd.f32 %v13081_v8, %v4923_v2 }
 0x2e9   : > { %v4473_v18 = vpop.f32.mrf.mxu3  ;;  %v3539_v43 = vpop.f32.mrf.mxu1  ;;  %v5179_v61 = vor.u32 %v5177_v5, %v5176_v11  ;;  %v4990_v40 = vmax.f32 %v4958_v46, 0.0  ;;  %v5180_v13 = vrot.slane %v5176_v11, 4 }
 0x2ea   : > { %v4526_v20 = vadd.f32 %v4473_v18, %v3872_v3  ;;  %v3588_v2 = vadd.f32 %v3539_v43, %v12528_v51 }
 0x2eb   : > { %v5417_v56 = vsel %vm12776_vm0, %v5179_v61, %v5416_v62  ;;  %v5022_v53 = vpack.c.bf16 %v4990_v40, %v4990_v40  ;;  %v541_v62 = vsel %vm11770_vm2, 0, %v540_v39  ;;  %v14745_v39 = vld [vmem:[#allocation20_spill] sm:$0xff] }
 0x2ec   : > { %5418 = vst [vmem:[#allocation3 + $0x6c] sm:$0xf] %v5417_v56  ;;  %v4871_v34 = vpop.f32.mrf.mxu0  ;;  %v5427_v56 = vld [vmem:[#allocation3 + $0x80] sm:$0x1] }
 0x2ed   : > { %v3824_v10 = vpop.f32.mrf.mxu2  ;;  %v5182_v57 = vshrl.u32 %v5022_v53, 16  ;;  %v4924_v48 = vadd.f32 %v4871_v34, %v4526_v20  ;;  %v5185_v30 = vshll.u32 %v5022_v53, 16  ;;  %542 = vst [vmem:[#allocation3 + $0x98] sm:$0x1] %v541_v62 }
 0x2ee   : > { %v3874_v21 = vadd.f32 %v3824_v10, %v3587_v27 }
 0x2ef   : > { %v5184_v58 = vrot.slane %v5182_v57, 7  ;;  %v4959_v42 = vadd.f32 %v13081_v8, %v4924_v48 }
 0x2f1   : > { %v4475_v35 = vpop.f32.mrf.mxu3  ;;  %v3542_v60 = vpop.f32.mrf.mxu1  ;;  %v5187_v12 = vor.u32 %v5185_v30, %v5184_v58  ;;  %v5189_v36 = vrot.slane %v5184_v58, 4  ;;  %v4991_v15 = vmax.f32 %v4959_v42, 0.0 }
 0x2f2   : > { %v4527_v55 = vadd.f32 %v4475_v35, %v3873_v63  ;;  %v3589_v63 = vadd.f32 %v3542_v60, %v12545_v25 }
 0x2f3   : > { %v5188_v37 = vsel %vm11658_vm8, %v5180_v13, %v5187_v12  ;;  %v5421_v45 = vsel %vm11756_vm6, %v5189_v36, %v5420_v50  ;;  %v5023_v54 = vpack.c.bf16 %v4991_v15, %v4991_v15  ;;  %v488_v50 = vld [vmem:[#allocation3 + $0x9c] sm:$0x1] }
 0x2f4   : > { %5419 = vst.msk [vmem:[#allocation3 + $0x70] sm:$0xf] %vm438_vm14, %v5188_v37  ;;  %v4873_v52 = vpop.f32.mrf.mxu0  ;;  %v489_v35 = vsel %vm11756_vm6, 0, %v488_v50 }
 0x2f5   : > { %v3826_v9 = vpop.f32.mrf.mxu2  ;;  %5422 = vst [vmem:[#allocation3 + $0x74] sm:$0x1] %v5421_v45  ;;  %v5191_v19 = vshrl.u32 %v5023_v54, 16  ;;  %v4925_v29 = vadd.f32 %v4873_v52, %v4527_v55  ;;  %v5194_v7 = vshll.u32 %v5023_v54, 16  ;;  %v5430_v55 = vld [vmem:[#allocation3 + $0x84] sm:$0xf] }
 0x2f6   : > { %v3875_v46 = vadd.f32 %v3826_v9, %v3588_v2  ;;  %490 = vst [vmem:[#allocation3 + $0x9c] sm:$0x1] %v489_v35 }
 0x2f7   : > { %v5193_v31 = vrot.slane %v5191_v19, 7  ;;  %v4960_v33 = vadd.f32 %v13081_v8, %v4925_v29 }
 0x2f9   : > { %v4478_v32 = vpop.f32.mrf.mxu3  ;;  %v3544_v14 = vpop.f32.mrf.mxu1  ;;  %v5196_v22 = vor.u32 %v5194_v7, %v5193_v31  ;;  %v4992_v38 = vmax.f32 %v4960_v33, 0.0  ;;  %v5197_v20 = vrot.slane %v5193_v31, 4 }
 0x2fa   : > { %v4528_v47 = vadd.f32 %v4478_v32, %v3874_v21  ;;  %v3590_v52 = vadd.f32 %v3544_v14, %v12559_v49  ;;  %v543_v21 = vld [vmem:[#allocation3 + $0xa4] sm:$0x1] }
 0x2fb   : > { %v5424_v4 = vsel %vm12776_vm0, %v5196_v22, %v5423_v23  ;;  %v5024_v16 = vpack.c.bf16 %v4992_v38, %v4992_v38  ;;  %v544_v7 = vsel %vm11770_vm2, 0, %v543_v21  ;;  %v5434_v38 = vld [vmem:[#allocation3 + $0x8c] sm:$0x1] }
 0x2fc   : > { %5425 = vst [vmem:[#allocation3 + $0x78] sm:$0xf] %v5424_v4  ;;  %v4876_v3 = vpop.f32.mrf.mxu0 }
 0x2fd   : > { %v3829_v26 = vpop.f32.mrf.mxu2  ;;  %v5199_v11 = vshrl.u32 %v5024_v16, 16  ;;  %v4926_v5 = vadd.f32 %v4876_v3, %v4528_v47  ;;  %v5202_v61 = vshll.u32 %v5024_v16, 16  ;;  %545 = vst [vmem:[#allocation3 + $0xa4] sm:$0x1] %v544_v7 }
 0x2fe   : > { %v3876_v13 = vadd.f32 %v3829_v26, %v3589_v63 }
 0x2ff   : > { %v5201_v18 = vrot.slane %v5199_v11, 7  ;;  %v4961_v40 = vadd.f32 %v13081_v8, %v4926_v5 }
 0x301   : > { %v4480_v53 = vpop.f32.mrf.mxu3  ;;  %v5204_v24 = vor.u32 %v5202_v61, %v5201_v18  ;;  %v5206_v51 = vrot.slane %v5201_v18, 4  ;;  %v4993_v43 = vmax.f32 %v4961_v40, 0.0  ;;  %v3547_v10 = vpop.f32.mrf.mxu1  ;;  %v491_v40 = vld [vmem:[#allocation3 + $0xa8] sm:$0x1] }
 0x302   : > { %v4529_v34 = vadd.f32 %v4480_v53, %v3875_v46  ;;  %v3591_v11 = vadd.f32 %v3547_v10, %v14745_v39 }
 0x303   : > { %v5205_v1 = vsel %vm11658_vm8, %v5197_v20, %v5204_v24  ;;  %v5428_v57 = vsel %vm11756_vm6, %v5206_v51, %v5427_v56  ;;  %v5025_v48 = vpack.c.bf16 %v4993_v43, %v4993_v43  ;;  %v492_v56 = vsel %vm11756_vm6, 0, %v491_v40  ;;  %v5437_v43 = vld [vmem:[#allocation3 + $0x90] sm:$0xf] }
 0x304   : > { %5426 = vst.msk [vmem:[#allocation3 + $0x7c] sm:$0xf] %vm438_vm14, %v5205_v1  ;;  %v4878_v6 = vpop.f32.mrf.mxu0 }
 0x305   : > { %v3831_v58 = vpop.f32.mrf.mxu2  ;;  %5429 = vst [vmem:[#allocation3 + $0x80] sm:$0x1] %v5428_v57  ;;  %v5208_v30 = vshrl.u32 %v5025_v48, 16  ;;  %v4927_v42 = vadd.f32 %v4878_v6, %v4529_v34  ;;  %v5211_v36 = vshll.u32 %v5025_v48, 16  ;;  %v14746_v6 = vld [vmem:[#allocation21_spill] sm:$0xff] }
 0x306   : > { %v3877_v31 = vadd.f32 %v3831_v58, %v3590_v52  ;;  %493 = vst [vmem:[#allocation3 + $0xa8] sm:$0x1] %v492_v56 }
 0x307   : > { %v5210_v12 = vrot.slane %v5208_v30, 7  ;;  %v4962_v15 = vadd.f32 %v13081_v8, %v4927_v42 }
 0x309   : > { %v4483_v37 = vpop.f32.mrf.mxu3  ;;  %v5213_v25 = vor.u32 %v5211_v36, %v5210_v12  ;;  %v4994_v60 = vmax.f32 %v4962_v15, 0.0  ;;  %v3549_v9 = vpop.f32.mrf.mxu1  ;;  %v5214_v22 = vrot.slane %v5210_v12, 4 }
 0x30a   : > { %v4530_v45 = vadd.f32 %v4483_v37, %v3876_v13  ;;  %v3592_v58 = vadd.f32 %v3549_v9, %v14746_v6  ;;  %v546_v13 = vld [vmem:[#allocation3 + $0xb0] sm:$0x1] }
 0x30b   : > { %v5431_v54 = vsel %vm12776_vm0, %v5213_v25, %v5430_v55  ;;  %v5026_v27 = vpack.c.bf16 %v4994_v60, %v4994_v60  ;;  %v547_v36 = vsel %vm11770_vm2, 0, %v546_v13  ;;  %v5441_v60 = vld [vmem:[#allocation3 + $0x98] sm:$0x1] }
 0x30c   : > { %5432 = vst [vmem:[#allocation3 + $0x84] sm:$0xf] %v5431_v54  ;;  %v4881_v19 = vpop.f32.mrf.mxu0 }
 0x30d   : > { %v3834_v29 = vpop.f32.mrf.mxu2  ;;  %v5216_v44 = vshrl.u32 %v5026_v27, 16  ;;  %v4928_v41 = vadd.f32 %v4881_v19, %v4530_v45  ;;  %v5219_v23 = vshll.u32 %v5026_v27, 16  ;;  %548 = vst [vmem:[#allocation3 + $0xb0] sm:$0x1] %v547_v36 }
 0x30e   : > { %v3878_v61 = vadd.f32 %v3834_v29, %v3591_v11 }
 0x30f   : > { %v5218_v33 = vrot.slane %v5216_v44, 7  ;;  %v4963_v32 = vadd.f32 %v13081_v8, %v4928_v41  ;;  %v14747_v41 = vld [vmem:[#allocation22_spill] sm:$0xff] }
 0x311   : > { %v4485_v47 = vpop.f32.mrf.mxu3  ;;  %v5221_v49 = vor.u32 %v5219_v23, %v5218_v33  ;;  %v5223_v14 = vrot.slane %v5218_v33, 4  ;;  %v4995_v4 = vmax.f32 %v4963_v32, 0.0  ;;  %v3552_v20 = vpop.f32.mrf.mxu1 }
 0x312   : > { %v4531_v16 = vadd.f32 %v4485_v47, %v3877_v31  ;;  %v3593_v31 = vadd.f32 %v3552_v20, %v14747_v41  ;;  %v549_v20 = vld [vmem:[#allocation3 + $0xbc] sm:$0x1] }
 0x313   : > { %v5222_v2 = vsel %vm11658_vm8, %v5214_v22, %v5221_v49  ;;  %v5435_v3 = vsel %vm11756_vm6, %v5223_v14, %v5434_v38  ;;  %v5027_v26 = vpack.c.bf16 %v4995_v4, %v4995_v4  ;;  %v494_v38 = vld [vmem:[#allocation3 + $0xb4] sm:$0x1] }
 0x314   : > { %5433 = vst.msk [vmem:[#allocation3 + $0x88] sm:$0xf] %vm438_vm14, %v5222_v2  ;;  %v4883_v5 = vpop.f32.mrf.mxu0  ;;  %v495_v47 = vsel %vm11756_vm6, 0, %v494_v38 }
 0x315   : > { %v3836_v46 = vpop.f32.mrf.mxu2  ;;  %5436 = vst [vmem:[#allocation3 + $0x8c] sm:$0x1] %v5435_v3  ;;  %v5225_v62 = vshrl.u32 %v5027_v26, 16  ;;  %v4929_v18 = vadd.f32 %v4883_v5, %v4531_v16  ;;  %v5228_v24 = vshll.u32 %v5027_v26, 16  ;;  %v5444_v16 = vld [vmem:[#allocation3 + $0x9c] sm:$0xf] }
 0x316   : > { %v3879_v12 = vadd.f32 %v3836_v46, %v3592_v58  ;;  %496 = vst [vmem:[#allocation3 + $0xb4] sm:$0x1] %v495_v47 }
 0x317   : > { %v5227_v53 = vrot.slane %v5225_v62, 7  ;;  %v4964_v51 = vadd.f32 %v13081_v8, %v4929_v18  ;;  %v14748_v62 = vld [vmem:[#allocation23_spill] sm:$0xff] }
 0x319   : > { %v4488_v34 = vpop.f32.mrf.mxu3  ;;  %v5230_v10 = vor.u32 %v5228_v24, %v5227_v53  ;;  %v4996_v1 = vmax.f32 %v4964_v51, 0.0  ;;  %v5231_v25 = vrot.slane %v5227_v53, 4  ;;  %v3554_v54 = vpop.f32.mrf.mxu1  ;;  %v550_v51 = vsel %vm11770_vm2, 0, %v549_v20 }
 0x31a   : > { %v4532_v57 = vadd.f32 %v4488_v34, %v3878_v61  ;;  %v3594_v18 = vadd.f32 %v3554_v54, %v14748_v62  ;;  %551 = vst [vmem:[#allocation3 + $0xbc] sm:$0x1] %v550_v51 }
 0x31b   : > { %v5438_v48 = vsel %vm12776_vm0, %v5230_v10, %v5437_v43  ;;  %v5028_v63 = vpack.c.bf16 %v4996_v1, %v4996_v1 }
 0x31c   : > { %5439 = vst [vmem:[#allocation3 + $0x90] sm:$0xf] %v5438_v48  ;;  %v4886_v30 = vpop.f32.mrf.mxu0 }
 0x31d   : > { %v3839_v42 = vpop.f32.mrf.mxu2  ;;  %v5233_v50 = vshrl.u32 %v5028_v63, 16  ;;  %v4930_v35 = vadd.f32 %v4886_v30, %v4532_v57  ;;  %v5236_v55 = vshll.u32 %v5028_v63, 16  ;;  %v5448_v57 = vld [vmem:[#allocation3 + $0xa4] sm:$0x1] }
 0x31e   : > { %v3880_v22 = vadd.f32 %v3839_v42, %v3593_v31 }
 0x31f   : > { %v5235_v15 = vrot.slane %v5233_v50, 7  ;;  %v4965_v37 = vadd.f32 %v13081_v8, %v4930_v35  ;;  %v14749_v35 = vld [vmem:[#allocation13_spill] sm:$0xff] }
 0x321   : > { %v4490_v45 = vpop.f32.mrf.mxu3  ;;  %v5238_v27 = vor.u32 %v5236_v55, %v5235_v15  ;;  %v5240_v52 = vrot.slane %v5235_v15, 4  ;;  %v4997_v9 = vmax.f32 %v4965_v37, 0.0  ;;  %v3557_v11 = vpop.f32.mrf.mxu1 }
 0x322   : > { %v4533_v19 = vadd.f32 %v4490_v45, %v3879_v12  ;;  %v3595_v12 = vadd.f32 %v3557_v11, %v14749_v35 }
 0x323   : > { %v5239_v29 = vsel %vm11658_vm8, %v5231_v25, %v5238_v27  ;;  %v5442_v21 = vsel %vm11756_vm6, %v5240_v52, %v5441_v60  ;;  %v5029_v44 = vpack.c.bf16 %v4997_v9, %v4997_v9  ;;  %v497_v60 = vld [vmem:[#allocation3 + $0xc0] sm:$0x1] }
 0x324   : > { %5440 = vst.msk [vmem:[#allocation3 + $0x94] sm:$0xf] %vm438_vm14, %v5239_v29  ;;  %v4888_v7 = vpop.f32.mrf.mxu0  ;;  %v498_v54 = vsel %vm11756_vm6, 0, %v497_v60 }
 0x325   : > { %v3841_v33 = vpop.f32.mrf.mxu2  ;;  %5443 = vst [vmem:[#allocation3 + $0x98] sm:$0x1] %v5442_v21  ;;  %v5242_v23 = vshrl.u32 %v5029_v44, 16  ;;  %v4931_v32 = vadd.f32 %v4888_v7, %v4533_v19  ;;  %v5245_v14 = vshll.u32 %v5029_v44, 16  ;;  %v5451_v19 = vld [vmem:[#allocation3 + $0xa8] sm:$0xf] }
 0x326   : > { %v3881_v24 = vadd.f32 %v3841_v33, %v3594_v18  ;;  %499 = vst [vmem:[#allocation3 + $0xc0] sm:$0x1] %v498_v54  ;;  %v14750_v33 = vld [vmem:[#allocation11_spill] sm:$0xff] }
 0x327   : > { %v5244_v49 = vrot.slane %v5242_v23, 7  ;;  %v4966_v4 = vadd.f32 %v13081_v8, %v4931_v32 }
 0x329   : > { %v4493_v2 = vpop.f32.mrf.mxu3  ;;  %v5247_v3 = vor.u32 %v5245_v14, %v5244_v49  ;;  %v4998_v26 = vmax.f32 %v4966_v4, 0.0  ;;  %v5248_v1 = vrot.slane %v5244_v49, 4  ;;  %v3559_v15 = vpop.f32.mrf.mxu1 }
 0x32a   : > { %v4534_v39 = vadd.f32 %v4493_v2, %v3880_v22  ;;  %v3596_v23 = vadd.f32 %v3559_v15, %v14750_v33  ;;  %v552_v22 = vld [vmem:[#allocation3 + $0xc8] sm:$0x1] }
 0x32b   : > { %v5445_v5 = vsel %vm12776_vm0, %v5247_v3, %v5444_v16  ;;  %v5030_v46 = vpack.c.bf16 %v4998_v26, %v4998_v26  ;;  %v553_v4 = vsel %vm11770_vm2, 0, %v552_v22 }
 0x32c   : > { %5446 = vst [vmem:[#allocation3 + $0x9c] sm:$0xf] %v5445_v5  ;;  %v4891_v61 = vpop.f32.mrf.mxu0 }
 0x32d   : > { %v3844_v40 = vpop.f32.mrf.mxu2  ;;  %v5250_v56 = vshrl.u32 %v5030_v46, 16  ;;  %v4932_v53 = vadd.f32 %v4891_v61, %v4534_v39  ;;  %v5253_v34 = vshll.u32 %v5030_v46, 16  ;;  %554 = vst [vmem:[#allocation3 + $0xc8] sm:$0x1] %v553_v4  ;;  %v5455_v39 = vld [vmem:[#allocation3 + $0xb0] sm:$0x1] }
 0x32e   : > { %v3882_v25 = vadd.f32 %v3844_v40, %v3595_v12  ;;  %v14752_v12 = vld [vmem:[#allocation12_spill] sm:$0xff] }
 0x32f   : > { %v5252_v43 = vrot.slane %v5250_v56, 7  ;;  %v4967_v10 = vadd.f32 %v13081_v8, %v4932_v53  ;;  %v14751_v56 = vld [vmem:[#allocation14_spill] sm:$0xff] }
 0x331   : > { %v4495_v48 = vpop.f32.mrf.mxu3  ;;  %v5255_v63 = vor.u32 %v5253_v34, %v5252_v43  ;;  %v5257_v6 = vrot.slane %v5252_v43, 4  ;;  %v4999_v58 = vmax.f32 %v4967_v10, 0.0  ;;  %v3562_v14 = vpop.f32.mrf.mxu1 }
 0x332   : > { %v4535_v30 = vadd.f32 %v4495_v48, %v3881_v24  ;;  %v3597_v53 = vadd.f32 %v3562_v14, %v14751_v56  ;;  %v5458_v48 = vld [vmem:[#allocation3 + $0xb4] sm:$0xf] }
 0x333   : > { %v5256_v42 = vsel %vm11658_vm8, %v5248_v1, %v5255_v63  ;;  %v5449_v13 = vsel %vm11756_vm6, %v5257_v6, %v5448_v57  ;;  %v5031_v50 = vpack.c.bf16 %v4999_v58, %v4999_v58 }
 0x334   : > { %5447 = vst.msk [vmem:[#allocation3 + $0xa0] sm:$0xf] %vm438_vm14, %v5256_v42  ;;  %v4893_v36 = vpop.f32.mrf.mxu0 }
 0x335   : > { %5450 = vst [vmem:[#allocation3 + $0xa4] sm:$0x1] %v5449_v13  ;;  %v5259_v55 = vshrl.u32 %v5031_v50, 16  ;;  %v4933_v37 = vadd.f32 %v4893_v36, %v4535_v30  ;;  %v3846_v45 = vpop.f32.mrf.mxu2  ;;  %v5262_v52 = vshll.u32 %v5031_v50, 16 }
 0x336   : > { %v3883_v49 = vadd.f32 %v3846_v45, %v3596_v23 }
 0x337   : > { %v5261_v27 = vrot.slane %v5259_v55, 7  ;;  %v4968_v9 = vadd.f32 %v13081_v8, %v4933_v37 }
 0x339   : > { %v4498_v29 = vpop.f32.mrf.mxu3  ;;  %v5264_v21 = vor.u32 %v5262_v52, %v5261_v27  ;;  %v5000_v44 = vmax.f32 %v4968_v9, 0.0  ;;  %v5265_v26 = vrot.slane %v5261_v27, 4  ;;  %v3564_v6 = vpop.f32.mrf.mxu1  ;;  %v5462_v52 = vld [vmem:[#allocation3 + $0xbc] sm:$0x1] }
 0x33a   : > { %v4536_v41 = vadd.f32 %v4498_v29, %v3882_v25  ;;  %v3598_v36 = vadd.f32 %v3564_v6, %v14752_v12 }
 0x33b   : > { %v5452_v31 = vsel %vm12776_vm0, %v5264_v21, %v5451_v19  ;;  %v5032_v7 = vpack.c.bf16 %v5000_v44, %v5000_v44 }
 0x33c   : > { %5453 = vst [vmem:[#allocation3 + $0xa8] sm:$0xf] %v5452_v31  ;;  %v4896_v32 = vpop.f32.mrf.mxu0 }
 0x33d   : > { %v5267_v38 = vshrl.u32 %v5032_v7, 16  ;;  %v4934_v47 = vadd.f32 %v4896_v32, %v4536_v41  ;;  %v5270_v2 = vshll.u32 %v5032_v7, 16  ;;  %v3849_v5 = vpop.f32.mrf.mxu2 }
 0x33e   : > { %v3884_v34 = vadd.f32 %v3849_v5, %v3597_v53 }
 0x33f   : > { %v5269_v16 = vrot.slane %v5267_v38, 7  ;;  %v4969_v3 = vadd.f32 %v13081_v8, %v4934_v47 }
 0x341   : > { %v4500_v11 = vpop.f32.mrf.mxu3  ;;  %v5272_v46 = vor.u32 %v5270_v2, %v5269_v16  ;;  %v5274_v62 = vrot.slane %v5269_v16, 4  ;;  %v5001_v18 = vmax.f32 %v4969_v3, 0.0 }
 0x342   : > { %v4537_v61 = vadd.f32 %v4500_v11, %v3883_v49  ;;  %v5465_v49 = vld [vmem:[#allocation3 + $0xc0] sm:$0xf]  ;;  %v5469_v11 = vld [vmem:[#allocation3 + $0xc8] sm:$0x1] }
 0x343   : > { %v5273_v40 = vsel %vm11658_vm8, %v5265_v26, %v5272_v46  ;;  %v5456_v59 = vsel %vm11756_vm6, %v5274_v62, %v5455_v39  ;;  %v5033_v20 = vpack.c.bf16 %v5001_v18, %v5001_v18 }
 0x344   : > { %5454 = vst.msk [vmem:[#allocation3 + $0xac] sm:$0xf] %vm438_vm14, %v5273_v40  ;;  %v4898_v24 = vpop.f32.mrf.mxu0 }
 0x345   : > { %5457 = vst [vmem:[#allocation3 + $0xb0] sm:$0x1] %v5456_v59  ;;  %v5276_v51 = vshrl.u32 %v5033_v20, 16  ;;  %v4935_v43 = vadd.f32 %v4898_v24, %v4537_v61  ;;  %v5279_v1 = vshll.u32 %v5033_v20, 16  ;;  %v3851_v13 = vpop.f32.mrf.mxu2 }
 0x346   : > { %v3885_v25 = vadd.f32 %v3851_v13, %v3598_v36 }
 0x347   : > { %v5278_v10 = vrot.slane %v5276_v51, 7  ;;  %v4970_v57 = vadd.f32 %v13081_v8, %v4935_v43 }
 0x349   : > { %v4503_v63 = vpop.f32.mrf.mxu3  ;;  %v5281_v58 = vor.u32 %v5279_v1, %v5278_v10  ;;  %v5002_v30 = vmax.f32 %v4970_v57, 0.0  ;;  %v5282_v27 = vrot.slane %v5278_v10, 4 }
 0x34a   : > { %v4538_v42 = vadd.f32 %v4503_v63, %v3884_v34 }
 0x34b   : > { %v5459_v50 = vsel %vm12776_vm0, %v5281_v58, %v5458_v48  ;;  %v5034_v35 = vpack.c.bf16 %v5002_v30, %v5002_v30 }
 0x34c   : > { %5460 = vst [vmem:[#allocation3 + $0xb4] sm:$0xf] %v5459_v50  ;;  %v4901_v15 = vpop.f32.mrf.mxu0 }
 0x34d   : > { %v5284_v55 = vshrl.u32 %v5034_v35, 16  ;;  %v4936_v37 = vadd.f32 %v4901_v15, %v4538_v42  ;;  %v5287_v45 = vshll.u32 %v5034_v35, 16 }
 0x34f   : > { %v5286_v60 = vrot.slane %v5284_v55, 7  ;;  %v4971_v54 = vadd.f32 %v13081_v8, %v4936_v37 }
 0x351   : > { %v4505_v9 = vpop.f32.mrf.mxu3  ;;  %v5289_v19 = vor.u32 %v5287_v45, %v5286_v60  ;;  %v5291_v29 = vrot.slane %v5286_v60, 4  ;;  %v5003_v21 = vmax.f32 %v4971_v54, 0.0 }
 0x352   : > { %v4539_v44 = vadd.f32 %v4505_v9, %v3885_v25 }
 0x353   : > { %v5290_v41 = vsel %vm11658_vm8, %v5282_v27, %v5289_v19  ;;  %v5463_v31 = vsel %vm11756_vm6, %v5291_v29, %v5462_v52  ;;  %v5035_v7 = vpack.c.bf16 %v5003_v21, %v5003_v21 }
 0x354   : > { %5461 = vst.msk [vmem:[#allocation3 + $0xb8] sm:$0xf] %vm438_vm14, %v5290_v41  ;;  %v4903_v33 = vpop.f32.mrf.mxu0 }
 0x355   : > { %5464 = vst [vmem:[#allocation3 + $0xbc] sm:$0x1] %v5463_v31  ;;  %v5293_v23 = vshrl.u32 %v5035_v7, 16  ;;  %v4937_v32 = vadd.f32 %v4903_v33, %v4539_v44  ;;  %v5296_v38 = vshll.u32 %v5035_v7, 16 }
 0x357   : > { %v5295_v22 = vrot.slane %v5293_v23, 7  ;;  %v4972_v47 = vadd.f32 %v13081_v8, %v4937_v32 }
 0x359   : > { %v5298_v14 = vor.u32 %v5296_v38, %v5295_v22  ;;  %v5004_v4 = vmax.f32 %v4972_v47, 0.0  ;;  %v5299_v5 = vrot.slane %v5295_v22, 4 }
 0x35b   : > { %v5466_v16 = vsel %vm12776_vm0, %v5298_v14, %v5465_v49  ;;  %v5036_v2 = vpack.c.bf16 %v5004_v4, %v5004_v4 }
 0x35c   : > { %5467 = vst [vmem:[#allocation3 + $0xc0] sm:$0xf] %v5466_v16 }
 0x35d   : > { %v5301_v3 = vshrl.u32 %v5036_v2, 16  ;;  %v5304_v39 = vshll.u32 %v5036_v2, 16 }
 0x35f   : > { %v5303_v26 = vrot.slane %v5301_v3, 7 }
 0x361   : > { %v5306_v46 = vor.u32 %v5304_v39, %v5303_v26  ;;  %v5308_v62 = vrot.slane %v5303_v26, 4 }
 0x363   : > { %v5307_v18 = vsel %vm11658_vm8, %v5299_v5, %v5306_v46  ;;  %v5470_v8 = vsel %vm11756_vm6, %v5308_v62, %v5469_v11 }
 0x364   : > { %5468 = vst.msk [vmem:[#allocation3 + $0xc4] sm:$0xf] %vm438_vm14, %v5307_v18 }
 0x365   : > { %5471 = vst [vmem:[#allocation3 + $0xc8] sm:$0x1] %v5470_v8 }
 0x366 PF: > { %p10603_p2 = scmp.le.s32.totalorder %s11491_s21, 0 }
 0x368   : > { %5475 = sbr.rel (%p10603_p2) target bundleno = 1724 (0x6bc), region = 48 }
 0x36d   : > { %v11171_v0 = vld [vmem:[%s11630_s24 + $0x18] sm:$0xff]  ;;  %v11170_v61 = vld [vmem:[%s11630_s24 + $0x10] sm:$0xff]  ;;  %v5485_v40 = vld [vmem:[#allocation3 + $0x30] sm:$0xf]  ;;  %vm5529_vm3 = vsmask.f32 3328 }
 0x36e   : > { %v5486_v59 = vld [vmem:[#allocation3 + $0x34] sm:$0xf]  ;;  %v5517_v20 = vld [vmem:[#allocation3 + $0x38] sm:$0x1]  ;;  %vm5530_vm4 = vsmask.f32 7440  ;;  %11222 = vmatpush.bf16.msra.mxu1 %v11171_v0  ;;  %11223 = vmatpush.bf16.msra.mxu2 %v11171_v0 }
 0x36f   : > { %v5629_v17 = vshrl.u32 %v5485_v40, 16  ;;  %v5632_v28 = vshll.u32 %v5485_v40, 16  ;;  %v5638_v56 = vshll.u32 %v5486_v59, 16  ;;  %v5642_v53 = vshrl.u32 %v5486_v59, 16  ;;  %v5493_v24 = vld [vmem:[#allocation3 + $0x60] sm:$0xf]  ;;  %11224 = vmatpush.bf16.msra.mxu3 %v11171_v0  ;;  %6036 = vmatpush.bf16.msra.mxu0 %v11171_v0  ;;  %vm13244_vm5 = vmor %vm5529_vm3, %vm5530_vm4 }
 0x370   : > { %v5648_v51 = vshll.u32 %v5517_v20, 16  ;;  %v5494_v43 = vld [vmem:[#allocation3 + $0x64] sm:$0xf]  ;;  %v5521_v34 = vld [vmem:[#allocation3 + $0x68] sm:$0x1]  ;;  %v5725_v6 = vshrl.u32 %v5493_v24, 16 }
 0x371   : > { %v5631_v10 = vrot.slane %v5629_v17, 4  ;;  %v5634_v1 = vrot.slane %v5632_v28, 5  ;;  %v5640_v57 = vrot.slane %v5638_v56, 5  ;;  %v5644_v48 = vrot.slane %v5642_v53, 4  ;;  %v5501_v42 = vld [vmem:[#allocation3 + $0x90] sm:$0xf] }
 0x372   : > { %v5650_v63 = vrot.slane %v5648_v51, 5  ;;  %v5728_v58 = vshll.u32 %v5493_v24, 16  ;;  %v5734_v30 = vshll.u32 %v5494_v43, 16  ;;  %11225 = vmatpush.bf16.msra.mxu1 %v11170_v61  ;;  %11226 = vmatpush.bf16.msra.mxu2 %v11170_v61  ;;  %v5738_v35 = vshrl.u32 %v5494_v43, 16  ;;  %v5502_v36 = vld [vmem:[#allocation3 + $0x94] sm:$0xf] }
 0x373   : > { %v5635_v13 = vor.u32 %v5634_v1, %v5631_v10  ;;  %v5645_v50 = vor.u32 %v5644_v48, %v5640_v57  ;;  %v5744_v12 = vshll.u32 %v5521_v34, 16  ;;  %v11173_v15 = vld [vmem:[%s11630_s24 + $0x28] sm:$0xff]  ;;  %v11191_v55 = vld [vmem:[%s11630_s24 + $0x38] sm:$0xff]  ;;  %11227 = vmatpush.bf16.msra.mxu3 %v11170_v61  ;;  %6037 = vmatpush.bf16.msra.mxu0 %v11170_v61  ;;  %vm5981_vm7 = vcmask 261120   ;;  %v5525_v23 = vld [vmem:[#allocation3 + $0x98] sm:$0x1] }
 0x374   : > { %v5727_v25 = vrot.slane %v5725_v6, 4  ;;  %v5730_v60 = vrot.slane %v5728_v58, 5  ;;  %v5736_v45 = vrot.slane %v5734_v30, 5  ;;  %v5740_v52 = vrot.slane %v5738_v35, 4  ;;  %v11169_v41 = vld [vmem:[%s11630_s24 + $0x8] sm:$0xff]  ;;  %p11092_p4 = scmp.ne.s32.totalorder %s11491_s21, 2 }
 0x375   : > { %v5636_v54 = vrot.slane %v5635_v13, 4  ;;  %v5646_v27 = vrot.slane %v5645_v50, 4  ;;  %v5746_v9 = vrot.slane %v5744_v12, 5  ;;  %v5821_v29 = vshrl.u32 %v5501_v42, 16  ;;  %v11193_v22 = vld [vmem:[%s11630_s24 + $0x48] sm:$0xff] }
 0x376   : > { %6630 = vmatpush.bf16.msrb.mxu2 %v11173_v15  ;;  %v5731_v19 = vor.u32 %v5730_v60, %v5727_v25  ;;  %v5824_v21 = vshll.u32 %v5501_v42, 16  ;;  %v5830_v44 = vshll.u32 %v5502_v36, 16  ;;  %v5741_v33 = vor.u32 %v5740_v52, %v5736_v45  ;;  %6265 = vmatpush.bf16.msrb.mxu1 %v11169_v41  ;;  %v5477_v26 = vld [vmem:[#allocation3] sm:$0xf]  ;;  %v13256_v46 = vld [vmem:[#allocation3 + $0x4] sm:$0xf] }
 0x377   : > { %6929 = vmatpush.bf16.msrb.mxu3 %v11191_v55  ;;  %v5641_v31 = vsel %vm13244_vm5, %v5636_v54, %v5640_v57  ;;  %v5651_v7 = vsel %vm13244_vm5, %v5646_v27, %v5650_v63  ;;  %v5834_v32 = vshrl.u32 %v5502_v36, 16  ;;  %v5823_v14 = vrot.slane %v5821_v29, 4  ;;  %7595 = vmatpush.bf16.msrb.mxu0 %v11193_v22  ;;  %v13260_v61 = vld [vmem:[#allocation3 + $0x8] sm:$0x1]  ;;  %v5487_v1 = vld [vmem:[#allocation3 + $0x3c] sm:$0xf] }
 0x378   : > { %v5929_v38 = vunpack.c.l.b16 %v5641_v31  ;;  %v5930_v47 = vunpack.c.l.b16 %v5651_v7  ;;  %v5732_v49 = vrot.slane %v5731_v19, 4  ;;  %v5742_v4 = vrot.slane %v5741_v33, 4  ;;  %v13270_v58 = vld [vmem:[#allocation3 + $0x40] sm:$0xf]  ;;  %v13273_v50 = vld [vmem:[#allocation3 + $0x44] sm:$0x1] }
 0x379   : > { %v5826_v16 = vrot.slane %v5824_v21, 5  ;;  %v5832_v2 = vrot.slane %v5830_v44, 5  ;;  %v5836_v3 = vrot.slane %v5834_v32, 4  ;;  %v5840_v5 = vshll.u32 %v5525_v23, 16  ;;  %v5495_v55 = vld [vmem:[#allocation3 + $0x6c] sm:$0xf] }
 0x37a   : > { %v5957_v39 = vpack.c.b16 %v5930_v47, %v5929_v38  ;;  %v5737_v11 = vsel %vm13244_vm5, %v5732_v49, %v5736_v45  ;;  %v5747_v62 = vsel %vm13244_vm5, %v5742_v4, %v5746_v9  ;;  %v5533_v20 = vshrl.u32 %v5477_v26, 16  ;;  %v5496_v29 = vld [vmem:[#allocation3 + $0x70] sm:$0xf]  ;;  %v5522_v31 = vld [vmem:[#allocation3 + $0x74] sm:$0x1] }
 0x37b   : > { %v5937_v18 = vunpack.c.l.b16 %v5737_v11  ;;  %v5827_v8 = vor.u32 %v5826_v16, %v5823_v14  ;;  %v5837_v0 = vor.u32 %v5836_v3, %v5832_v2  ;;  %v5938_v40 = vunpack.c.l.b16 %v5747_v62  ;;  %v5504_v62 = vld [vmem:[#allocation3 + $0xa0] sm:$0xf] }
 0x37c   : > { %10620 = vmatmul.msk.bf16.vlgmr.msra.gmra.mxu1 %vm5981_vm7, %v5957_v39  ;;  %v5842_v59 = vrot.slane %v5840_v5, 5  ;;  %v5536_v17 = vshll.u32 %v5477_v26, 16  ;;  %v5542_v53 = vshll.u32 %v13256_v46, 16  ;;  %v5546_v24 = vshrl.u32 %v13256_v46, 16  ;;  %v5503_v26 = vld [vmem:[#allocation3 + $0x9c] sm:$0xf] }
 0x37d   : > { %v5828_v28 = vrot.slane %v5827_v8, 4  ;;  %v5838_v56 = vrot.slane %v5837_v0, 4  ;;  %v5961_v51 = vpack.c.b16 %v5938_v40, %v5937_v18  ;;  %v5535_v43 = vrot.slane %v5533_v20, 4 }
 0x37e   : > { %v5538_v34 = vrot.slane %v5536_v17, 5  ;;  %v5552_v10 = vshll.u32 %v13260_v61, 16  ;;  %v5544_v63 = vrot.slane %v5542_v53, 5  ;;  %v5548_v6 = vrot.slane %v5546_v24, 4 }
 0x37f   : > { %v5833_v57 = vsel %vm13244_vm5, %v5828_v28, %v5832_v2  ;;  %v5843_v48 = vsel %vm13244_vm5, %v5838_v56, %v5842_v59  ;;  %10624 = vmatmul.msk.bf16.vlgmr.msra.gmra.mxu2 %vm5981_vm7, %v5961_v51  ;;  %v5653_v36 = vshrl.u32 %v5487_v1, 16  ;;  %v5656_v15 = vshll.u32 %v5487_v1, 16  ;;  %v5526_v59 = vld [vmem:[#allocation3 + $0xa4] sm:$0x1] }
 0x380   : > { %v5945_v30 = vunpack.c.l.b16 %v5833_v57  ;;  %v5946_v42 = vunpack.c.l.b16 %v5843_v48  ;;  %v5539_v13 = vor.u32 %v5538_v34, %v5535_v43  ;;  %v5549_v35 = vor.u32 %v5548_v6, %v5544_v63  ;;  %v5479_v34 = vld [vmem:[#allocation3 + $0xc] sm:$0xf] }
 0x381   : > { %v5554_v12 = vrot.slane %v5552_v10, 5  ;;  %v5662_v45 = vshll.u32 %v13270_v58, 16  ;;  %v5666_v54 = vshrl.u32 %v13270_v58, 16  ;;  %v5655_v52 = vrot.slane %v5653_v36, 4 }
 0x382   : > { %v5965_v25 = vpack.c.b16 %v5946_v42, %v5945_v30  ;;  %v5540_v60 = vrot.slane %v5539_v13, 4  ;;  %v5550_v27 = vrot.slane %v5549_v35, 4  ;;  %v5658_v9 = vrot.slane %v5656_v15, 5  ;;  %v13289_v35 = vld [vmem:[#allocation3 + $0x10] sm:$0xf] }
 0x383   : > { %v5672_v19 = vshll.u32 %v13273_v50, 16  ;;  %v5664_v44 = vrot.slane %v5662_v45, 5  ;;  %v5668_v41 = vrot.slane %v5666_v54, 4  ;;  %v5749_v7 = vshrl.u32 %v5495_v55, 16 }
 0x384   : > { %10628 = vmatmul.msk.bf16.vlgmr.msra.gmra.mxu3 %vm5981_vm7, %v5965_v25  ;;  %v5545_v21 = vsel %vm13244_vm5, %v5540_v60, %v5544_v63  ;;  %v5555_v33 = vsel %vm13244_vm5, %v5550_v27, %v5554_v12  ;;  %v5659_v32 = vor.u32 %v5658_v9, %v5655_v52  ;;  %v5752_v14 = vshll.u32 %v5495_v55, 16  ;;  %v11172_v63 = vld [vmem:[%s11630_s24 + $0x20] sm:$0xff]  ;;  %v13293_v55 = vld [vmem:[#allocation3 + $0x14] sm:$0x1] }
 0x385   : > { %v5921_v23 = vunpack.c.l.b16 %v5545_v21  ;;  %v5674_v22 = vrot.slane %v5672_v19, 5  ;;  %v5922_v38 = vunpack.c.l.b16 %v5555_v33  ;;  %v5669_v47 = vor.u32 %v5668_v41, %v5664_v44  ;;  %6631 = vmatpush.bf16.msrb.mxu2 %v11172_v63  ;;  %v11168_v33 = vld [vmem:[%s11630_s24] sm:$0xff] }
 0x386   : > { %v5751_v49 = vrot.slane %v5749_v7, 4  ;;  %v5660_v4 = vrot.slane %v5659_v32, 4  ;;  %v5758_v16 = vshll.u32 %v5496_v29, 16  ;;  %v5762_v2 = vshrl.u32 %v5496_v29, 16  ;;  %v5489_v29 = vld [vmem:[#allocation3 + $0x48] sm:$0xf]  ;;  %6266 = vmatpush.bf16.msrb.mxu1 %v11168_v33 }
 0x387   : > { %v5768_v3 = vshll.u32 %v5522_v31, 16  ;;  %v5953_v39 = vpack.c.b16 %v5922_v38, %v5921_v23  ;;  %v5670_v11 = vrot.slane %v5669_v47, 4  ;;  %v5754_v5 = vrot.slane %v5752_v14, 5  ;;  %v11190_v7 = vld [vmem:[%s11630_s24 + $0x30] sm:$0xff]  ;;  %v13303_v47 = vld [vmem:[#allocation3 + $0x4c] sm:$0xf] }
 0x388   : > { %v5665_v18 = vsel %vm13244_vm5, %v5660_v4, %v5664_v44  ;;  %v5760_v8 = vrot.slane %v5758_v16, 5  ;;  %v5764_v0 = vrot.slane %v5762_v2, 4  ;;  %v5845_v56 = vshrl.u32 %v5503_v26, 16  ;;  %v13308_v2 = vld [vmem:[#allocation3 + $0x50] sm:$0x1]  ;;  %6930 = vmatpush.bf16.msrb.mxu3 %v11190_v7 }
 0x389   : > { %v5770_v40 = vrot.slane %v5768_v3, 5  ;;  %10616 = vmatmul.msk.bf16.vlgmr.msra.gmra.mxu0 %vm5981_vm7, %v5953_v39  ;;  %v5675_v20 = vsel %vm13244_vm5, %v5670_v11, %v5674_v22  ;;  %v5931_v17 = vunpack.c.l.b16 %v5665_v18  ;;  %v5755_v28 = vor.u32 %v5754_v5, %v5751_v49  ;;  %v11192_v49 = vld [vmem:[%s11630_s24 + $0x40] sm:$0xff]  ;;  %v5527_v7 = vld [vmem:[#allocation3 + $0xb0] sm:$0x1] }
 0x38a   : > { %v5932_v53 = vunpack.c.l.b16 %v5675_v20  ;;  %v5765_v24 = vor.u32 %v5764_v0, %v5760_v8  ;;  %v5848_v51 = vshll.u32 %v5503_v26, 16  ;;  %v5854_v43 = vshll.u32 %v5504_v62, 16  ;;  %7596 = vmatpush.bf16.msrb.mxu0 %v11192_v49 }
 0x38b   : > { %v5756_v10 = vrot.slane %v5755_v28, 4  ;;  %v5847_v1 = vrot.slane %v5845_v56, 4  ;;  %v5858_v57 = vshrl.u32 %v5504_v62, 16  ;;  %v5864_v48 = vshll.u32 %v5526_v59, 16  ;;  %v5497_v62 = vld [vmem:[#allocation3 + $0x78] sm:$0xf] }
 0x38c   : > { %v5958_v6 = vpack.c.b16 %v5932_v53, %v5931_v17  ;;  %v5766_v30 = vrot.slane %v5765_v24, 4  ;;  %v5850_v42 = vrot.slane %v5848_v51, 5  ;;  %v5856_v13 = vrot.slane %v5854_v43, 5  ;;  %v5498_v51 = vld [vmem:[#allocation3 + $0x7c] sm:$0xf] }
 0x38d   : > { %v5761_v12 = vsel %vm13244_vm5, %v5756_v10, %v5760_v8  ;;  %v5860_v36 = vrot.slane %v5858_v57, 4  ;;  %v5866_v15 = vrot.slane %v5864_v48, 5  ;;  %v5557_v54 = vshrl.u32 %v5479_v34, 16  ;;  %v5523_v48 = vld [vmem:[#allocation3 + $0x80] sm:$0x1] }
 0x38e   : > { %10621 = vmatmul.msk.bf16.gmra.mxu1 %vm5981_vm7, %v5958_v6  ;;  %v5771_v25 = vsel %vm13244_vm5, %v5766_v30, %v5770_v40  ;;  %v5939_v60 = vunpack.c.l.b16 %v5761_v12  ;;  %v5851_v45 = vor.u32 %v5850_v42, %v5847_v1  ;;  %v5560_v9 = vshll.u32 %v5479_v34, 16 }
 0x38f   : > { %v5940_v27 = vunpack.c.l.b16 %v5771_v25  ;;  %v5861_v52 = vor.u32 %v5860_v36, %v5856_v13  ;;  %v5566_v19 = vshll.u32 %v13289_v35, 16  ;;  %v5559_v44 = vrot.slane %v5557_v54, 4  ;;  %v5505_v25 = vld [vmem:[#allocation3 + $0xa8] sm:$0xf] }
 0x390   : > { %v5852_v21 = vrot.slane %v5851_v45, 4  ;;  %v5570_v41 = vshrl.u32 %v13289_v35, 16  ;;  %v5576_v31 = vshll.u32 %v13293_v55, 16  ;;  %v5562_v22 = vrot.slane %v5560_v9, 5 }
 0x391   : > { %v5962_v23 = vpack.c.b16 %v5940_v27, %v5939_v60  ;;  %v5862_v32 = vrot.slane %v5861_v52, 4  ;;  %v5568_v38 = vrot.slane %v5566_v19, 5  ;;  %v5677_v3 = vshrl.u32 %v5489_v29, 16  ;;  %v5506_v27 = vld [vmem:[#allocation3 + $0xac] sm:$0xf] }
 0x392   : > { %v5857_v14 = vsel %vm13244_vm5, %v5852_v21, %v5856_v13  ;;  %v5572_v4 = vrot.slane %v5570_v41, 4  ;;  %v5578_v16 = vrot.slane %v5576_v31, 5  ;;  %v5563_v11 = vor.u32 %v5562_v22, %v5559_v44 }
 0x393   : > { %10625 = vmatmul.msk.bf16.gmra.mxu2 %vm5981_vm7, %v5962_v23  ;;  %v5867_v26 = vsel %vm13244_vm5, %v5862_v32, %v5866_v15  ;;  %v5947_v39 = vunpack.c.l.b16 %v5857_v14  ;;  %v5680_v5 = vshll.u32 %v5489_v29, 16  ;;  %v5679_v0 = vrot.slane %v5677_v3, 4 }
 0x394   : > { %v5948_v18 = vunpack.c.l.b16 %v5867_v26  ;;  %v5573_v8 = vor.u32 %v5572_v4, %v5568_v38  ;;  %v5686_v40 = vshll.u32 %v13303_v47, 16  ;;  %v5564_v59 = vrot.slane %v5563_v11, 4  ;;  %v5481_v11 = vld [vmem:[#allocation3 + $0x18] sm:$0xf] }
 0x395   : > { %v5682_v20 = vrot.slane %v5680_v5, 5  ;;  %v5690_v17 = vshrl.u32 %v13303_v47, 16  ;;  %v5696_v28 = vshll.u32 %v13308_v2, 16  ;;  %v5773_v43 = vshrl.u32 %v5497_v62, 16 }
 0x396   : > { %v5966_v56 = vpack.c.b16 %v5948_v18, %v5947_v39  ;;  %v5574_v53 = vrot.slane %v5573_v8, 4  ;;  %v5688_v24 = vrot.slane %v5686_v40, 5  ;;  %v5569_v34 = vsel %vm13244_vm5, %v5564_v59, %v5568_v38 }
 0x397   : > { %v5683_v10 = vor.u32 %v5682_v20, %v5679_v0  ;;  %v5692_v1 = vrot.slane %v5690_v17, 4  ;;  %v5698_v57 = vrot.slane %v5696_v28, 5  ;;  %v5923_v6 = vunpack.c.l.b16 %v5569_v34  ;;  %v13328_v0 = vld [vmem:[#allocation3 + $0x1c] sm:$0xf]  ;;  %v13330_v17 = vld [vmem:[#allocation3 + $0x20] sm:$0x1] }
 0x398   : > { %10629 = vmatmul.msk.bf16.gmra.mxu3 %vm5981_vm7, %v5966_v56  ;;  %v5579_v63 = vsel %vm13244_vm5, %v5574_v53, %v5578_v16  ;;  %v5775_v30 = vrot.slane %v5773_v43, 4  ;;  %v5776_v42 = vshll.u32 %v5497_v62, 16  ;;  %v5782_v15 = vshll.u32 %v5498_v51, 16 }
 0x399   : > { %v5924_v13 = vunpack.c.l.b16 %v5579_v63  ;;  %v5684_v12 = vrot.slane %v5683_v10, 4  ;;  %v5693_v36 = vor.u32 %v5692_v1, %v5688_v24  ;;  %v5786_v45 = vshrl.u32 %v5498_v51, 16 }
 0x39a   : > { %v5778_v60 = vrot.slane %v5776_v42, 5  ;;  %v5792_v54 = vshll.u32 %v5523_v48, 16  ;;  %v5784_v29 = vrot.slane %v5782_v15, 5  ;;  %v5869_v23 = vshrl.u32 %v5505_v25, 16  ;;  %v13342_v15 = vld [vmem:[#allocation3 + $0x5c] sm:$0x1] }
 0x39b   : > { %v5954_v52 = vpack.c.b16 %v5924_v13, %v5923_v6  ;;  %v5689_v9 = vsel %vm13244_vm5, %v5684_v12, %v5688_v24  ;;  %v5694_v19 = vrot.slane %v5693_v36, 4  ;;  %v5788_v41 = vrot.slane %v5786_v45, 4  ;;  %v5491_v6 = vld [vmem:[#allocation3 + $0x54] sm:$0xf]  ;;  %v13340_v36 = vld [vmem:[#allocation3 + $0x58] sm:$0xf] }
 0x39c   : > { %v5933_v21 = vunpack.c.l.b16 %v5689_v9  ;;  %v5779_v44 = vor.u32 %v5778_v60, %v5775_v30  ;;  %v5794_v31 = vrot.slane %v5792_v54, 5  ;;  %v5872_v32 = vshll.u32 %v5505_v25, 16 }
 0x39d   : > { %10617 = vmatmul.msk.bf16.gmra.mxu0 %vm5981_vm7, %v5954_v52  ;;  %v5699_v33 = vsel %vm13244_vm5, %v5694_v19, %v5698_v57  ;;  %v5878_v22 = vshll.u32 %v5506_v27, 16  ;;  %v5789_v14 = vor.u32 %v5788_v41, %v5784_v29  ;;  %v5882_v4 = vshrl.u32 %v5506_v27, 16 }
 0x39e   : > { %v5934_v38 = vunpack.c.l.b16 %v5699_v33  ;;  %v5780_v49 = vrot.slane %v5779_v44, 4  ;;  %v5871_v16 = vrot.slane %v5869_v23, 4  ;;  %v5874_v3 = vrot.slane %v5872_v32, 5 }
 0x39f   : > { %v5880_v26 = vrot.slane %v5878_v22, 5  ;;  %v5888_v39 = vshll.u32 %v5527_v7, 16  ;;  %v5790_v18 = vrot.slane %v5789_v14, 4  ;;  %v5884_v8 = vrot.slane %v5882_v4, 4  ;;  %v5500_v22 = vld [vmem:[#allocation3 + $0x88] sm:$0xf] }
 0x3a0   : > { %v5959_v5 = vpack.c.b16 %v5934_v38, %v5933_v21  ;;  %v5785_v62 = vsel %vm13244_vm5, %v5780_v49, %v5784_v29  ;;  %v5875_v59 = vor.u32 %v5874_v3, %v5871_v16  ;;  %v5581_v53 = vshrl.u32 %v5481_v11, 16  ;;  %v5524_v16 = vld [vmem:[#allocation3 + $0x8c] sm:$0x1] }
 0x3a1   : > { %v5941_v40 = vunpack.c.l.b16 %v5785_v62  ;;  %v5890_v20 = vrot.slane %v5888_v39, 5  ;;  %v5795_v28 = vsel %vm13244_vm5, %v5790_v18, %v5794_v31  ;;  %v5885_v56 = vor.u32 %v5884_v8, %v5880_v26  ;;  %v5499_v31 = vld [vmem:[#allocation3 + $0x84] sm:$0xf] }
 0x3a2   : > { %10622 = vmatmul.msk.bf16.gmra.mxu1 %vm5981_vm7, %v5959_v5  ;;  %v5584_v24 = vshll.u32 %v5481_v11, 16  ;;  %v5942_v51 = vunpack.c.l.b16 %v5795_v28  ;;  %v5876_v43 = vrot.slane %v5875_v59, 4  ;;  %v5590_v34 = vshll.u32 %v13328_v0, 16 }
 0x3a3   : > { %v5594_v10 = vshrl.u32 %v13328_v0, 16  ;;  %v5886_v1 = vrot.slane %v5885_v56, 4  ;;  %v5583_v57 = vrot.slane %v5581_v53, 4  ;;  %v5600_v63 = vshll.u32 %v13330_v17, 16  ;;  %v5507_v56 = vld [vmem:[#allocation3 + $0xb4] sm:$0xf] }
 0x3a4   : > { %v5586_v48 = vrot.slane %v5584_v24, 5  ;;  %v5963_v30 = vpack.c.b16 %v5942_v51, %v5941_v40  ;;  %v5881_v42 = vsel %vm13244_vm5, %v5876_v43, %v5880_v26  ;;  %v5592_v13 = vrot.slane %v5590_v34, 5  ;;  %v5508_v34 = vld [vmem:[#allocation3 + $0xb8] sm:$0xf] }
 0x3a5   : > { %v5596_v12 = vrot.slane %v5594_v10, 4  ;;  %v5891_v25 = vsel %vm13244_vm5, %v5886_v1, %v5890_v20  ;;  %v5949_v60 = vunpack.c.l.b16 %v5881_v42  ;;  %v5602_v54 = vrot.slane %v5600_v63, 5  ;;  %v11213_v63 = vld [vmem:[%s11630_s24 + $0x68] sm:$0xff] }
 0x3a6   : > { %v5587_v45 = vor.u32 %v5586_v48, %v5583_v57  ;;  %10626 = vmatmul.msk.bf16.gmra.mxu2 %vm5981_vm7, %v5963_v30  ;;  %v5950_v27 = vunpack.c.l.b16 %v5891_v25  ;;  %v5701_v9 = vshrl.u32 %v5491_v6, 16  ;;  %v5704_v19 = vshll.u32 %v5491_v6, 16  ;;  %v5528_v48 = vld [vmem:[#allocation3 + $0xbc] sm:$0x1] }
 0x3a7   : > { %v5597_v52 = vor.u32 %v5596_v12, %v5592_v13  ;;  %v5710_v21 = vshll.u32 %v13340_v36, 16  ;;  %v5714_v44 = vshrl.u32 %v13340_v36, 16  ;;  %v5720_v41 = vshll.u32 %v13342_v15, 16  ;;  %8304 = vmatpush.bf16.msra.mxu2 %v11213_v63 }
 0x3a8   : > { %v5588_v29 = vrot.slane %v5587_v45, 4  ;;  %v5967_v7 = vpack.c.b16 %v5950_v27, %v5949_v60  ;;  %v5703_v23 = vrot.slane %v5701_v9, 4  ;;  %v5706_v32 = vrot.slane %v5704_v19, 5 }
 0x3a9   : > { %v5598_v33 = vrot.slane %v5597_v52, 4  ;;  %v5712_v49 = vrot.slane %v5710_v21, 5  ;;  %v5716_v14 = vrot.slane %v5714_v44, 4  ;;  %v5722_v4 = vrot.slane %v5720_v41, 5 }
 0x3aa   : > { %v5593_v38 = vsel %vm13244_vm5, %v5588_v29, %v5592_v13  ;;  %10630 = vmatmul.msk.bf16.gmra.mxu3 %vm5981_vm7, %v5967_v7  ;;  %v5707_v39 = vor.u32 %v5706_v32, %v5703_v23  ;;  %v5797_v11 = vshrl.u32 %v5499_v31, 16  ;;  %v5800_v18 = vshll.u32 %v5499_v31, 16  ;;  %v13361_v29 = vld [vmem:[#allocation3 + $0x28] sm:$0xf]  ;;  %v13363_v7 = vld [vmem:[#allocation3 + $0x2c] sm:$0x1] }
 0x3ab   : > { %v5603_v3 = vsel %vm13244_vm5, %v5598_v33, %v5602_v54  ;;  %v5925_v26 = vunpack.c.l.b16 %v5593_v38  ;;  %v5717_v62 = vor.u32 %v5716_v14, %v5712_v49  ;;  %v5806_v8 = vshll.u32 %v5500_v22, 16  ;;  %v5483_v54 = vld [vmem:[#allocation3 + $0x24] sm:$0xf]  ;;  %v11217_v14 = vld [vmem:[%s11630_s24 + $0x88] sm:$0xff] }
 0x3ac   : > { %v5926_v5 = vunpack.c.l.b16 %v5603_v3  ;;  %v5708_v40 = vrot.slane %v5707_v39, 4  ;;  %v5799_v59 = vrot.slane %v5797_v11, 4  ;;  %v5810_v20 = vshrl.u32 %v5500_v22, 16  ;;  %v11215_v38 = vld [vmem:[%s11630_s24 + $0x78] sm:$0xff]  ;;  %9380 = vmatpush.bf16.msra.mxu0 %v11217_v14 }
 0x3ad   : > { %v5816_v28 = vshll.u32 %v5524_v16, 16  ;;  %v5718_v24 = vrot.slane %v5717_v62, 4  ;;  %v5802_v51 = vrot.slane %v5800_v18, 5  ;;  %v5808_v43 = vrot.slane %v5806_v8, 5  ;;  %8970 = vmatpush.bf16.msra.mxu3 %v11215_v38 }
 0x3ae   : > { %v5955_v53 = vpack.c.b16 %v5926_v5, %v5925_v26  ;;  %v5713_v10 = vsel %vm13244_vm5, %v5708_v40, %v5712_v49  ;;  %v5812_v1 = vrot.slane %v5810_v20, 4  ;;  %v5893_v13 = vshrl.u32 %v5507_v56, 16  ;;  %v11195_v49 = vld [vmem:[%s11630_s24 + $0x58] sm:$0xff] }
 0x3af   : > { %v5818_v57 = vrot.slane %v5816_v28, 5  ;;  %v5723_v6 = vsel %vm13244_vm5, %v5718_v24, %v5722_v4  ;;  %v5935_v30 = vunpack.c.l.b16 %v5713_v10  ;;  %v5803_v42 = vor.u32 %v5802_v51, %v5799_v59  ;;  %8005 = vmatpush.bf16.msra.mxu1 %v11195_v49  ;;  %v6348_v59 = vld [vmem:[#allocation3] sm:$0xe]  ;;  %v7044_v24 = vld [vmem:[#allocation3 + $0xc] sm:$0xf] }
 0x3b0   : > { %10618 = vmatmul.msk.bf16.gmra.mxu0 %vm5981_vm7, %v5955_v53  ;;  %v5936_v12 = vunpack.c.l.b16 %v5723_v6  ;;  %v5813_v25 = vor.u32 %v5812_v1, %v5808_v43  ;;  %v5896_v60 = vshll.u32 %v5507_v56, 16  ;;  %v5902_v45 = vshll.u32 %v5508_v34, 16  ;;  %v7045_v10 = vld [vmem:[#allocation3 + $0x10] sm:$0xf] }
 0x3b1   : > { %v5804_v27 = vrot.slane %v5803_v42, 4  ;;  %v5895_v52 = vrot.slane %v5893_v13, 4  ;;  %v5906_v9 = vshrl.u32 %v5508_v34, 16  ;;  %v5912_v19 = vshll.u32 %v5528_v48, 16 }
 0x3b2   : > { %v5960_v21 = vpack.c.b16 %v5936_v12, %v5935_v30  ;;  %v5814_v44 = vrot.slane %v5813_v25, 4  ;;  %v5898_v41 = vrot.slane %v5896_v60, 5  ;;  %v5904_v31 = vrot.slane %v5902_v45, 5 }
 0x3b3   : > { %v6404_v33 = vrot.slane %v13260_v61, 5  ;;  %v5809_v23 = vsel %vm13244_vm5, %v5804_v27, %v5808_v43  ;;  %v5908_v32 = vrot.slane %v5906_v9, 4  ;;  %v5914_v22 = vrot.slane %v5912_v19, 5 }
 0x3b4   : > { %10623 = vmatmul.msk.bf16.gmra.mxu1 %vm5981_vm7, %v5960_v21  ;;  %v5819_v4 = vsel %vm13244_vm5, %v5814_v44, %v5818_v57  ;;  %v5943_v16 = vunpack.c.l.b16 %v5809_v23  ;;  %v5899_v3 = vor.u32 %v5898_v41, %v5895_v52  ;;  %v5605_v26 = vshrl.u32 %v5483_v54, 16  ;;  %v7046_v44 = vld [vmem:[#allocation3 + $0x14] sm:$0x1] }
 0x3b5   : > { %v5944_v39 = vunpack.c.l.b16 %v5819_v4  ;;  %v5909_v11 = vor.u32 %v5908_v32, %v5904_v31  ;;  %v5608_v5 = vshll.u32 %v5483_v54, 16  ;;  %v5614_v61 = vshll.u32 %v13361_v29, 16  ;;  %v11152_v4 = vld [vmem:[#allocation3] sm:$0xff] }
 0x3b6   : > { %v5900_v62 = vrot.slane %v5899_v3, 4  ;;  %v5607_v18 = vrot.slane %v5605_v26, 4  ;;  %v5618_v8 = vshrl.u32 %v13361_v29, 16  ;;  %v5624_v40 = vshll.u32 %v13363_v7, 16 }
 0x3b7   : > { %v5964_v20 = vpack.c.b16 %v5944_v39, %v5943_v16  ;;  %v5910_v28 = vrot.slane %v5909_v11, 4  ;;  %v5610_v56 = vrot.slane %v5608_v5, 5  ;;  %v5616_v53 = vrot.slane %v5614_v61, 5 }
 0x3b8   : > { %v5905_v51 = vsel %vm13244_vm5, %v5900_v62, %v5904_v31  ;;  %v5620_v43 = vrot.slane %v5618_v8, 4  ;;  %v5626_v34 = vrot.slane %v5624_v40, 5  ;;  %vm6396_vm8 = vcmask 1042432  }
 0x3b9   : > { %10627 = vmatmul.msk.bf16.gmra.mxu2 %vm5981_vm7, %v5964_v20  ;;  %v5915_v1 = vsel %vm13244_vm5, %v5910_v28, %v5914_v22  ;;  %v5951_v57 = vunpack.c.l.b16 %v5905_v51  ;;  %v5611_v48 = vor.u32 %v5610_v56, %v5607_v18  ;;  %vm6397_vm9 = vcmask 1046532   ;;  %v7047_v18 = vld [vmem:[#allocation3 + $0x18] sm:$0xf] }
 0x3ba   : > { %v5952_v63 = vunpack.c.l.b16 %v5915_v1  ;;  %v5621_v6 = vor.u32 %v5620_v43, %v5616_v53  ;;  %vm13382_vm12 = vmor %vm6396_vm8, %vm6397_vm9  ;;  %v10720_v42 = vrot.slane %v6348_v59, 9  ;;  %v6401_v13 = vrot.slane %v13256_v46, 5  ;;  %v6349_v59 = vld [vmem:[#allocation3 + $0xc] sm:$0xe] }
 0x3bb   : > { %v5612_v12 = vrot.slane %v5611_v48, 4  ;;  %v7093_v25 = vshrl.u32 %v7044_v24, 16  ;;  %v7096_v60 = vshll.u32 %v7044_v24, 16  ;;  %v7102_v45 = vshll.u32 %v7045_v10, 16  ;;  %v11174_v43 = vld [vmem:[#allocation3 + $0xc] sm:$0xff] }
 0x3bc   : > { %v5968_v54 = vpack.c.b16 %v5952_v63, %v5951_v57  ;;  %v5622_v27 = vrot.slane %v5621_v6, 4  ;;  %v6402_v52 = vsel %vm13382_vm12, %v10720_v42, %v6401_v13  ;;  %v6403_v9 = vrot.slane %v6401_v13, 4  ;;  %v7049_v13 = vld [vmem:[#allocation3 + $0x20] sm:$0x1] }
 0x3bd   : > { %v5617_v19 = vsel %vm13244_vm5, %v5612_v12, %v5616_v53  ;;  %v6516_v21 = vunpack.c.l.b16 %v6402_v52  ;;  %v7095_v41 = vrot.slane %v7093_v25, 4  ;;  %v7098_v31 = vrot.slane %v7096_v60, 5 }
 0x3be   : > { %10631 = vmatmul.msk.bf16.gmra.mxu3 %vm5981_vm7, %v5968_v54  ;;  %v5627_v46 = vsel %vm13244_vm5, %v5622_v27, %v5626_v34  ;;  %v5927_v23 = vunpack.c.l.b16 %v5617_v19  ;;  %v6405_v32 = vsel %vm13382_vm12, %v6403_v9, %v6404_v33  ;;  %v7104_v49 = vrot.slane %v7102_v45, 5  ;;  %v7048_v33 = vld [vmem:[#allocation3 + $0x1c] sm:$0xf]  ;;  %v11153_v54 = vld [vmem:[#allocation3 + $0xc] sm:$0xff] }
 0x3bf   : > { %v5928_v22 = vunpack.c.l.b16 %v5627_v46  ;;  %v6517_v38 = vunpack.c.l.b16 %v6405_v32  ;;  %v7106_v14 = vshrl.u32 %v7045_v10, 16  ;;  %v7099_v16 = vor.u32 %v7098_v31, %v7095_v41  ;;  %v7051_v31 = vld [vmem:[#allocation3 + $0x28] sm:$0xf] }
 0x3c0   : > { %v7112_v3 = vshll.u32 %v7046_v44, 16  ;;  %v6408_v40 = vrot.slane %v13289_v35, 5  ;;  %v7117_v20 = vshrl.u32 %v7047_v18, 16  ;;  %v7120_v28 = vshll.u32 %v7047_v18, 16 }
 0x3c1   : > { %v5956_v26 = vpack.c.b16 %v5928_v22, %v5927_v23  ;;  %v6548_v39 = vpack.c.b16 %v6517_v38, %v6516_v21  ;;  %v7108_v11 = vrot.slane %v7106_v14, 4  ;;  %v7100_v61 = vrot.slane %v7099_v16, 4  ;;  %v7050_v21 = vld [vmem:[#allocation3 + $0x24] sm:$0xf]  ;;  %v6350_v23 = vld [vmem:[#allocation3 + $0x18] sm:$0xe] }
 0x3c2   : > { %v7114_v62 = vrot.slane %v7112_v3, 5  ;;  %v7126_v24 = vshll.u32 %v7048_v33, 16  ;;  %v7130_v51 = vshrl.u32 %v7048_v33, 16  ;;  %v10721_v34 = vrot.slane %v6349_v59, 9  ;;  %v7052_v33 = vld [vmem:[#allocation3 + $0x2c] sm:$0x1] }
 0x3c3   : > { %10619 = vmatmul.msk.bf16.gmra.mxu0 %vm5981_vm7, %v5956_v26  ;;  %v7109_v5 = vor.u32 %v7108_v11, %v7104_v49  ;;  %v7105_v56 = vsel %vm13244_vm5, %v7100_v61, %v7104_v49  ;;  %v6410_v10 = vrot.slane %v6408_v40, 4  ;;  %v6411_v1 = vrot.slane %v13293_v55, 5  ;;  %v11175_v26 = vld [vmem:[#allocation3 + $0x18] sm:$0xff] }
 0x3c4   : > { %10704 = vmatmul.msk.bf16.vlgmr.msrb.gmra.mxu1 %vm5981_vm7, %v11152_v4  ;;  %v7481_v57 = vunpack.c.l.b16 %v7105_v56  ;;  %v7119_v48 = vrot.slane %v7117_v20, 4  ;;  %v7122_v63 = vrot.slane %v7120_v28, 5  ;;  %v7128_v6 = vrot.slane %v7126_v24, 5  ;;  %v11154_v24 = vld [vmem:[#allocation3 + $0x18] sm:$0xff] }
 0x3c5   : > { %v7110_v8 = vrot.slane %v7109_v5, 4  ;;  %v7132_v42 = vrot.slane %v7130_v51, 4  ;;  %v6409_v12 = vsel %vm13382_vm12, %v10721_v34, %v6408_v40  ;;  %v6412_v25 = vsel %vm13382_vm12, %v6410_v10, %v6411_v1 }
 0x3c6   : > { %v7123_v45 = vor.u32 %v7122_v63, %v7119_v48  ;;  %v7136_v55 = vshll.u32 %v7049_v13, 16  ;;  %v6518_v52 = vunpack.c.l.b16 %v6409_v12  ;;  %v6519_v9 = vunpack.c.l.b16 %v6412_v25 }
 0x3c7   : > { %v7115_v53 = vsel %vm13244_vm5, %v7110_v8, %v7114_v62  ;;  %v7133_v27 = vor.u32 %v7132_v42, %v7128_v6  ;;  %v6415_v32 = vrot.slane %v13328_v0, 5  ;;  %v7141_v22 = vshrl.u32 %v7050_v21, 16  ;;  %v6351_v42 = vld [vmem:[#allocation3 + $0x24] sm:$0xe] }
 0x3c8   : > { %v7482_v35 = vunpack.c.l.b16 %v7115_v53  ;;  %v7124_v19 = vrot.slane %v7123_v45, 4  ;;  %v7138_v41 = vrot.slane %v7136_v55, 5  ;;  %v6549_v46 = vpack.c.b16 %v6519_v9, %v6518_v52  ;;  %v11176_v45 = vld [vmem:[#allocation3 + $0x24] sm:$0xff] }
 0x3c9   : > { %10748 = vmatmul.msk.bf16.vlgmr.msrb.gmra.mxu2 %vm5981_vm7, %v6548_v39  ;;  %v7134_v44 = vrot.slane %v7133_v27, 4  ;;  %v7144_v49 = vshll.u32 %v7050_v21, 16  ;;  %v7150_v14 = vshll.u32 %v7051_v31, 16  ;;  %v7154_v4 = vshrl.u32 %v7051_v31, 16 }
 0x3ca   : > { %v7513_v60 = vpack.c.b16 %v7482_v35, %v7481_v57  ;;  %v7129_v38 = vsel %vm13244_vm5, %v7124_v19, %v7128_v6  ;;  %v10722_v3 = vrot.slane %v6350_v23, 9  ;;  %v6417_v11 = vrot.slane %v6415_v32, 4  ;;  %v7053_v57 = vld [vmem:[#allocation3 + $0x30] sm:$0xf]  ;;  %v7054_v35 = vld [vmem:[#allocation3 + $0x34] sm:$0xf] }
 0x3cb   : > { %v7139_v16 = vsel %vm13244_vm5, %v7134_v44, %v7138_v41  ;;  %v7483_v39 = vunpack.c.l.b16 %v7129_v38  ;;  %v6418_v5 = vrot.slane %v13330_v17, 5  ;;  %v7143_v61 = vrot.slane %v7141_v22, 4  ;;  %v7055_v41 = vld [vmem:[#allocation3 + $0x38] sm:$0x1] }
 0x3cc   : > { %v7484_v0 = vunpack.c.l.b16 %v7139_v16  ;;  %v7146_v62 = vrot.slane %v7144_v49, 5  ;;  %v7152_v18 = vrot.slane %v7150_v14, 5  ;;  %v7156_v8 = vrot.slane %v7154_v4, 4  ;;  %v7056_v4 = vld [vmem:[#allocation3 + $0x3c] sm:$0xf] }
 0x3cd   : > { %v6416_v40 = vsel %vm13382_vm12, %v10722_v3, %v6415_v32  ;;  %v6419_v59 = vsel %vm13382_vm12, %v6417_v11, %v6418_v5  ;;  %v7160_v53 = vshll.u32 %v7052_v33, 16  ;;  %v6422_v48 = vrot.slane %v13361_v29, 5  ;;  %v11155_v32 = vld [vmem:[#allocation3 + $0x24] sm:$0xff]  ;;  %v7057_v16 = vld [vmem:[#allocation3 + $0x40] sm:$0xf] }
 0x3ce   : > { %10840 = vmatmul.msk.bf16.vlgmr.msrb.gmra.mxu3 %vm5981_vm7, %v11174_v43  ;;  %v7514_v20 = vpack.c.b16 %v7484_v0, %v7483_v39  ;;  %v7147_v28 = vor.u32 %v7146_v62, %v7143_v61  ;;  %v7157_v56 = vor.u32 %v7156_v8, %v7152_v18  ;;  %v6520_v17 = vunpack.c.l.b16 %v6416_v40  ;;  %v11362_v5 = vld [vmem:[#allocation3 + $0x34] sm:$0xf]  ;;  %v6352_v0 = vld [vmem:[#allocation3 + $0x30] sm:$0xe] }
 0x3cf   : > { %v6521_v51 = vunpack.c.l.b16 %v6419_v59  ;;  %v7162_v10 = vrot.slane %v7160_v53, 5  ;;  %v7165_v13 = vshrl.u32 %v7053_v57, 16  ;;  %v7168_v12 = vshll.u32 %v7053_v57, 16  ;;  %v11363_v53 = vld [vmem:[#allocation3 + $0x38] sm:$0x1] }
 0x3d0   : > { %v7148_v43 = vrot.slane %v7147_v28, 4  ;;  %v7158_v34 = vrot.slane %v7157_v56, 4  ;;  %v7174_v25 = vshll.u32 %v7054_v35, 16  ;;  %v6424_v27 = vrot.slane %v6422_v48, 4 }
 0x3d1   : > { %v6550_v1 = vpack.c.b16 %v6521_v51, %v6520_v17  ;;  %v6425_v55 = vrot.slane %v13363_v7, 5  ;;  %v7167_v9 = vrot.slane %v7165_v13, 4  ;;  %v7170_v19 = vrot.slane %v7168_v12, 5  ;;  %v11177_v17 = vld [vmem:[#allocation3 + $0x30] sm:$0xff] }
 0x3d2   : > { %v7153_v63 = vsel %vm13244_vm5, %v7148_v43, %v7152_v18  ;;  %v7163_v6 = vsel %vm13244_vm5, %v7158_v34, %v7162_v10  ;;  %v7176_v21 = vrot.slane %v7174_v25, 5  ;;  %v7184_v7 = vshll.u32 %v7055_v41, 16  ;;  %v11156_v25 = vld [vmem:[#allocation3 + $0x30] sm:$0xff] }
 0x3d3   : > { %10868 = vmatmul.msk.bf16.vlgmr.msrb.gmra.mxu0 %vm5981_vm7, %v7513_v60  ;;  %v7178_v60 = vshrl.u32 %v7054_v35, 16  ;;  %v7485_v52 = vunpack.c.l.b16 %v7153_v63  ;;  %v7486_v29 = vunpack.c.l.b16 %v7163_v6  ;;  %v7171_v22 = vor.u32 %v7170_v19, %v7167_v9  ;;  %v7058_v35 = vld [vmem:[#allocation3 + $0x44] sm:$0x1]  ;;  %v7059_v9 = vld [vmem:[#allocation3 + $0x48] sm:$0xf] }
 0x3d4   : > { %10705 = vmatmul.msk.bf16.gmra.mxu1 %vm5981_vm7, %v11153_v54  ;;  %v10723_v54 = vrot.slane %v6351_v42, 9  ;;  %v7186_v39 = vrot.slane %v7184_v7, 5  ;;  %v6429_v61 = vrot.slane %v11362_v5, 5  ;;  %v7189_v62 = vshrl.u32 %v7056_v4, 16  ;;  %v7060_v19 = vld [vmem:[#allocation3 + $0x4c] sm:$0xf] }
 0x3d5   : > { %v7180_v44 = vrot.slane %v7178_v60, 4  ;;  %v7515_v23 = vpack.c.b16 %v7486_v29, %v7485_v52  ;;  %v7172_v3 = vrot.slane %v7171_v22, 4  ;;  %v7192_v18 = vshll.u32 %v7056_v4, 16  ;;  %v11178_v4 = vld [vmem:[#allocation3 + $0x3c] sm:$0xff] }
 0x3d6   : > { %v6423_v31 = vsel %vm13382_vm12, %v10723_v54, %v6422_v48  ;;  %v7198_v8 = vshll.u32 %v7057_v16, 16  ;;  %v7202_v33 = vshrl.u32 %v7057_v16, 16  ;;  %v10724_v28 = vrot.slane %v6352_v0, 9 }
 0x3d7   : > { %v7181_v38 = vor.u32 %v7180_v44, %v7176_v21  ;;  %v6522_v49 = vunpack.c.l.b16 %v6423_v31  ;;  %v7177_v59 = vsel %vm13244_vm5, %v7172_v3, %v7176_v21  ;;  %v6431_v56 = vrot.slane %v6429_v61, 4 }
 0x3d8   : > { %v7191_v51 = vrot.slane %v7189_v62, 4  ;;  %v7194_v43 = vrot.slane %v7192_v18, 5  ;;  %v7200_v34 = vrot.slane %v7198_v8, 5  ;;  %v7204_v10 = vrot.slane %v7202_v33, 4  ;;  %v7061_v18 = vld [vmem:[#allocation3 + $0x50] sm:$0x1] }
 0x3d9   : > { %10749 = vmatmul.msk.bf16.gmra.mxu2 %vm5981_vm7, %v6549_v46  ;;  %v6426_v46 = vsel %vm13382_vm12, %v6424_v27, %v6425_v55  ;;  %v6430_v48 = vsel %vm13382_vm12, %v10724_v28, %v6429_v61  ;;  %v7208_v13 = vshll.u32 %v7058_v35, 16  ;;  %v7213_v22 = vshrl.u32 %v7059_v9, 16 }
 0x3da   : > { %v6523_v14 = vunpack.c.l.b16 %v6426_v46  ;;  %v7195_v6 = vor.u32 %v7194_v43, %v7191_v51  ;;  %v7205_v42 = vor.u32 %v7204_v10, %v7200_v34  ;;  %v7222_v7 = vshll.u32 %v7060_v19, 16 }
 0x3db   : > { %v7210_v29 = vrot.slane %v7208_v13, 5  ;;  %v7215_v61 = vrot.slane %v7213_v22, 4 }
 0x3dc   : > { %v6551_v11 = vpack.c.b16 %v6523_v14, %v6522_v49  ;;  %v7196_v55 = vrot.slane %v7195_v6, 4  ;;  %v7206_v52 = vrot.slane %v7205_v42, 4  ;;  %v7226_v49 = vshrl.u32 %v7060_v19, 16 }
 0x3dd   : > { %v7224_v0 = vrot.slane %v7222_v7, 5  ;;  %v6443_v6 = vrot.slane %v13303_v47, 5  ;;  %v7064_v7 = vld [vmem:[#allocation3 + $0x5c] sm:$0x1] }
 0x3de   : > { %10841 = vmatmul.msk.bf16.gmra.mxu3 %vm5981_vm7, %v11175_v26  ;;  %v7182_v26 = vrot.slane %v7181_v38, 4  ;;  %v7201_v41 = vsel %vm13244_vm5, %v7196_v55, %v7200_v34  ;;  %v7211_v31 = vsel %vm13244_vm5, %v7206_v52, %v7210_v29  ;;  %v7216_v38 = vshll.u32 %v7059_v9, 16  ;;  %v11179_v29 = vld [vmem:[#allocation3 + $0x48] sm:$0xff] }
 0x3df   : > { %v7489_v14 = vunpack.c.l.b16 %v7201_v41  ;;  %v7490_v16 = vunpack.c.l.b16 %v7211_v31  ;;  %v7228_v62 = vrot.slane %v7226_v49, 4  ;;  %v6445_v47 = vrot.slane %v6443_v6, 4 }
 0x3e3   : > { %10869 = vmatmul.msk.bf16.gmra.mxu0 %vm5981_vm7, %v7514_v20  ;;  %v7187_v20 = vsel %vm13244_vm5, %v7182_v26, %v7186_v39 }
 0x3e4   : > { %10706 = vmatmul.msk.bf16.gmra.mxu1 %vm5981_vm7, %v11154_v24  ;;  %v6432_v24 = vrot.slane %v11363_v53, 5  ;;  %v7488_v57 = vunpack.c.l.b16 %v7187_v20 }
 0x3e6   : > { %v6433_v63 = vsel %vm13382_vm12, %v6431_v56, %v6432_v24  ;;  %v7232_v56 = vshll.u32 %v7061_v18, 16  ;;  %v11157_v24 = vld [vmem:[#allocation3 + $0x3c] sm:$0xff] }
 0x3e7   : > { %v6525_v54 = vunpack.c.l.b16 %v6433_v63  ;;  %v7063_v63 = vld [vmem:[#allocation3 + $0x58] sm:$0xf]  ;;  %v7065_v18 = vld [vmem:[#allocation3 + $0x60] sm:$0xf] }
 0x3e8   : > { %v7234_v10 = vrot.slane %v7232_v56, 5  ;;  %v7250_v55 = vshrl.u32 %v7063_v63, 16 }
 0x3e9   : > { %10750 = vmatmul.msk.bf16.gmra.mxu2 %vm5981_vm7, %v6550_v1  ;;  %v7487_v1 = vunpack.c.l.b16 %v7177_v59  ;;  %v7517_v59 = vpack.c.b16 %v7490_v16, %v7489_v14 }
 0x3eb   : > { %v7516_v12 = vpack.c.b16 %v7488_v57, %v7487_v1 }
 0x3ee   : > { %10842 = vmatmul.msk.bf16.gmra.mxu3 %vm5981_vm7, %v11176_v45  ;;  %v6524_v45 = vunpack.c.l.b16 %v6430_v48  ;;  %v7062_v48 = vld [vmem:[#allocation3 + $0x54] sm:$0xf] }
 0x3f0   : > { %v6552_v44 = vpack.c.b16 %v6525_v54, %v6524_v45  ;;  %v7240_v45 = vshll.u32 %v7062_v48, 16  ;;  %v7246_v54 = vshll.u32 %v7063_v63, 16 }
 0x3f2   : > { %v7248_v22 = vrot.slane %v7246_v54, 5  ;;  %v6453_v54 = vrot.slane %v13342_v15, 5 }
 0x3f3   : > { %10870 = vmatmul.msk.bf16.gmra.mxu0 %vm5981_vm7, %v7515_v23  ;;  %v6436_v23 = vrot.slane %v13270_v58, 5  ;;  %v7218_v58 = vrot.slane %v7216_v38, 5  ;;  %v7252_v38 = vrot.slane %v7250_v55, 4 }
 0x3f4   : > { %10707 = vmatmul.msk.bf16.gmra.mxu1 %vm5981_vm7, %v11155_v32  ;;  %v6353_v32 = vld [vmem:[#allocation3 + $0x3c] sm:$0xe] }
 0x3f5   : > { %v10725_v26 = vrot.slane %v6353_v32, 9  ;;  %v6438_v39 = vrot.slane %v6436_v23, 4  ;;  %v7219_v28 = vor.u32 %v7218_v58, %v7215_v61  ;;  %v7242_v32 = vrot.slane %v7240_v45, 5 }
 0x3f6   : > { %v7256_v61 = vshll.u32 %v7064_v7, 16  ;;  %v11159_v7 = vld [vmem:[#allocation3 + $0x54] sm:$0xff] }
 0x3f7   : > { %v6437_v8 = vsel %vm13382_vm12, %v10725_v26, %v6436_v23  ;;  %v7220_v43 = vrot.slane %v7219_v28, 4 }
 0x3f9   : > { %v13440_v40 = vpop.f32.mrf.mxu1  ;;  %10751 = vmatmul.msk.bf16.gmra.mxu2 %vm5981_vm7, %v6551_v11  ;;  %v6439_v11 = vrot.slane %v13273_v50, 5  ;;  %v7229_v50 = vor.u32 %v7228_v62, %v7224_v0  ;;  %v7225_v42 = vsel %vm13244_vm5, %v7220_v43, %v7224_v0  ;;  %v6450_v43 = vrot.slane %v13340_v36, 5 }
 0x3fa   : > { %v7491_v41 = vunpack.c.l.b16 %v7225_v42 }
 0x3fb   : > { %v6440_v33 = vsel %vm13382_vm12, %v6438_v39, %v6439_v11  ;;  %v7230_v34 = vrot.slane %v7229_v50, 4  ;;  %v7253_v11 = vor.u32 %v7252_v38, %v7248_v22  ;;  %v7258_v50 = vrot.slane %v7256_v61, 5 }
 0x3fc   : > { %v6527_v51 = vunpack.c.l.b16 %v6440_v33  ;;  %v6452_v36 = vrot.slane %v6450_v43, 4 }
 0x3fd   : > { %v7235_v13 = vsel %vm13244_vm5, %v7230_v34, %v7234_v10  ;;  %v7254_v28 = vrot.slane %v7253_v11, 4 }
 0x3fe   : > { %10843 = vmatmul.msk.bf16.gmra.mxu3 %vm5981_vm7, %v11177_v17  ;;  %v6526_v17 = vunpack.c.l.b16 %v6437_v8  ;;  %v7492_v31 = vunpack.c.l.b16 %v7235_v13  ;;  %v7066_v8 = vld [vmem:[#allocation3 + $0x64] sm:$0xf] }
 0x3ff   : > { %v7274_v34 = vshrl.u32 %v7066_v8, 16  ;;  %v7259_v63 = vsel %vm13244_vm5, %v7254_v28, %v7258_v50 }
 0x400   : > { %v6553_v57 = vpack.c.b16 %v6527_v51, %v6526_v17  ;;  %v7518_v16 = vpack.c.b16 %v7492_v31, %v7491_v41  ;;  %v7264_v17 = vshll.u32 %v7065_v18, 16  ;;  %v7270_v51 = vshll.u32 %v7066_v8, 16  ;;  %v7068_v8 = vld [vmem:[#allocation3 + $0x6c] sm:$0xf] }
 0x401   : > { %v13452_v60 = vpop.f32.mrf.mxu1  ;;  %v7276_v55 = vrot.slane %v7274_v34, 4  ;;  %v6356_v34 = vld [vmem:[#allocation3 + $0x60] sm:$0xe] }
 0x402   : > { %v13454_v27 = vpop.f32.mrf.mxu2  ;;  %v7266_v13 = vrot.slane %v7264_v17, 5  ;;  %v11364_v17 = vld [vmem:[#allocation3 + $0x64] sm:$0xf] }
 0x403   : > { %10871 = vmatmul.msk.bf16.gmra.mxu0 %vm5981_vm7, %v7516_v12  ;;  %v6354_v12 = vld [vmem:[#allocation3 + $0x48] sm:$0xe] }
 0x404   : > { %10708 = vmatmul.msk.bf16.gmra.mxu1 %vm5981_vm7, %v11156_v25  ;;  %v7237_v25 = vshrl.u32 %v7062_v48, 16  ;;  %v10726_v19 = vrot.slane %v6354_v12, 9  ;;  %v7272_v12 = vrot.slane %v7270_v51, 5  ;;  %v6457_v51 = vrot.slane %v11364_v17, 5 }
 0x406   : > { %v13458_v21 = vpop.f32.mrf.mxu0  ;;  %v7239_v23 = vrot.slane %v7237_v25, 4  ;;  %v6444_v14 = vsel %vm13382_vm12, %v10726_v19, %v6443_v6  ;;  %v11180_v25 = vld [vmem:[#allocation3 + $0x54] sm:$0xff]  ;;  %v7494_v19 = vunpack.c.l.b16 %v7259_v63  ;;  %v7277_v15 = vor.u32 %v7276_v55, %v7272_v12 }
 0x407   : > { %v13464_v46 = vpop.f32.mrf.mxu3  ;;  %v6528_v58 = vunpack.c.l.b16 %v6444_v14  ;;  %v11212_v14 = vld [vmem:[%s11630_s24 + $0x60] sm:$0xff] }
 0x408   : > { %v7243_v39 = vor.u32 %v7242_v32, %v7239_v23  ;;  %v6454_v32 = vsel %vm13382_vm12, %v6452_v36, %v6453_v54  ;;  %v7278_v61 = vrot.slane %v7277_v15, 4  ;;  %8305 = vmatpush.bf16.msra.mxu2 %v11212_v14 }
 0x409   : > { %10752 = vmatmul.msk.bf16.gmra.mxu2 %vm5981_vm7, %v6552_v44  ;;  %v6446_v44 = vrot.slane %v13308_v2, 5  ;;  %v11158_v2 = vld [vmem:[#allocation3 + $0x48] sm:$0xff] }
 0x40a   : > { %v13471_v5 = vpop.f32.mrf.mxu2 }
 0x40b   : > { %v13468_v3 = vpop.f32.mrf.mxu1 }
 0x40e   : > { %10844 = vmatmul.msk.bf16.gmra.mxu3 %vm5981_vm7, %v11178_v4  ;;  %v13478_v20 = vpop.f32.mrf.mxu0  ;;  %v6447_v4 = vsel %vm13382_vm12, %v6445_v47, %v6446_v44  ;;  %v7067_v47 = vld [vmem:[#allocation3 + $0x68] sm:$0x1] }
 0x40f   : > { %v13480_v53 = vpop.f32.mrf.mxu3  ;;  %v6529_v0 = vunpack.c.l.b16 %v6447_v4 }
 0x411   : > { %v6554_v56 = vpack.c.b16 %v6529_v0, %v6528_v58  ;;  %v11214_v0 = vld [vmem:[%s11630_s24 + $0x70] sm:$0xff] }
 0x412   : > { %8971 = vmatpush.bf16.msra.mxu3 %v11214_v0 }
 0x413   : > { %10872 = vmatmul.msk.bf16.gmra.mxu0 %vm5981_vm7, %v7517_v59  ;;  %v13484_v1 = vpop.f32.mrf.mxu1  ;;  %v7244_v59 = vrot.slane %v7243_v39, 4 }
 0x414   : > { %10709 = vmatmul.msk.bf16.gmra.mxu1 %vm5981_vm7, %v11157_v24  ;;  %v7261_v24 = vshrl.u32 %v7065_v18, 16  ;;  %v11194_v18 = vld [vmem:[%s11630_s24 + $0x50] sm:$0xff] }
 0x415   : > { %v7249_v48 = vsel %vm13244_vm5, %v7244_v59, %v7248_v22  ;;  %v7280_v22 = vshll.u32 %v7067_v47, 16  ;;  %v7069_v59 = vld [vmem:[#allocation3 + $0x70] sm:$0xf]  ;;  %8006 = vmatpush.bf16.msra.mxu1 %v11194_v18 }
 0x416   : > { %v13486_v35 = vpop.f32.mrf.mxu2  ;;  %v7263_v42 = vrot.slane %v7261_v24, 4  ;;  %v7294_v63 = vshll.u32 %v7069_v59, 16 }
 0x417   : > { %v7282_v58 = vrot.slane %v7280_v22, 5  ;;  %v7070_v22 = vld [vmem:[#allocation3 + $0x74] sm:$0x1] }
 0x418   : > { %v7267_v31 = vor.u32 %v7266_v13, %v7263_v42  ;;  %v7298_v42 = vshrl.u32 %v7069_v59, 16  ;;  %v11216_v13 = vld [vmem:[%s11630_s24 + $0x80] sm:$0xff] }
 0x419   : > { %10753 = vmatmul.msk.bf16.gmra.mxu2 %vm5981_vm7, %v6553_v57  ;;  %v6355_v57 = vld [vmem:[#allocation3 + $0x54] sm:$0xe]  ;;  %v7283_v24 = vsel %vm13244_vm5, %v7278_v61, %v7282_v58  ;;  %9381 = vmatpush.bf16.msra.mxu0 %v11216_v13  ;;  %v11160_v58 = vld [vmem:[#allocation3 + $0x60] sm:$0xff] }
 0x41a   : > { %v13493_v52 = vpop.f32.mrf.mxu0  ;;  %v10727_v45 = vrot.slane %v6355_v57, 9  ;;  %v7268_v11 = vrot.slane %v7267_v31, 4  ;;  %v7285_v57 = vshrl.u32 %v7068_v8, 16  ;;  %v7496_v55 = vunpack.c.l.b16 %v7283_v24 }
 0x41b   : > { %v13496_v9 = vpop.f32.mrf.mxu3 }
 0x41c   : > { %v6451_v23 = vsel %vm13382_vm12, %v10727_v45, %v6450_v43  ;;  %v7287_v47 = vrot.slane %v7285_v57, 4  ;;  %v7071_v57 = vld [vmem:[#allocation3 + $0x78] sm:$0xf] }
 0x41e   : > { %10845 = vmatmul.msk.bf16.gmra.mxu3 %vm5981_vm7, %v11179_v29  ;;  %v13506_v26 = vpop.f32.mrf.mxu2  ;;  %v7493_v29 = vunpack.c.l.b16 %v7249_v48  ;;  %v7288_v48 = vshll.u32 %v7068_v8, 16 }
 0x41f   : > { %v13500_v49 = vpop.f32.mrf.mxu1 }
 0x420   : > { %v7519_v38 = vpack.c.b16 %v7494_v19, %v7493_v29  ;;  %v10728_v29 = vrot.slane %v6356_v34, 9  ;;  %v6459_v19 = vrot.slane %v6457_v51, 4  ;;  %v7290_v31 = vrot.slane %v7288_v48, 5  ;;  %v7072_v48 = vld [vmem:[#allocation3 + $0x7c] sm:$0xf] }
 0x422   : > { %v13508_v62 = vpop.f32.mrf.mxu0 }
 0x423   : > { %10873 = vmatmul.msk.bf16.gmra.mxu0 %vm5981_vm7, %v7518_v16  ;;  %v13511_v33 = vpop.f32.mrf.mxu3  ;;  %v6530_v16 = vunpack.c.l.b16 %v6451_v23  ;;  %v7296_v23 = vrot.slane %v7294_v63, 5  ;;  %v11366_v63 = vld [vmem:[#allocation3 + $0x70] sm:$0xf] }
 0x424   : > { %10710 = vmatmul.msk.bf16.gmra.mxu1 %vm5981_vm7, %v11158_v2  ;;  %v6531_v2 = vunpack.c.l.b16 %v6454_v32  ;;  %v7300_v32 = vrot.slane %v7298_v42, 4  ;;  %v6464_v42 = vrot.slane %v11366_v63, 5 }
 0x426   : > { %v6555_v28 = vpack.c.b16 %v6531_v2, %v6530_v16  ;;  %v7291_v16 = vor.u32 %v7290_v31, %v7287_v47  ;;  %v7301_v2 = vor.u32 %v7300_v32, %v7296_v23  ;;  %v11367_v31 = vld [vmem:[#allocation3 + $0x74] sm:$0x1] }
 0x427   : > { %v13515_v10 = vpop.f32.mrf.mxu1  ;;  %v6467_v32 = vrot.slane %v11367_v31, 5 }
 0x428   : > { %v7302_v24 = vrot.slane %v7301_v2, 4 }
 0x429   : > { %10754 = vmatmul.msk.bf16.gmra.mxu2 %vm5981_vm7, %v6554_v56  ;;  %v13522_v6 = vpop.f32.mrf.mxu2  ;;  %v7273_v56 = vsel %vm13244_vm5, %v7268_v11, %v7272_v12  ;;  %v11181_v12 = vld [vmem:[#allocation3 + $0x60] sm:$0xff]  ;;  %v7304_v11 = vshll.u32 %v7070_v22, 16  ;;  %v11182_v22 = vld [vmem:[#allocation3 + $0x6c] sm:$0xff] }
 0x42a   : > { %v7495_v54 = vunpack.c.l.b16 %v7273_v56  ;;  %v7292_v56 = vrot.slane %v7291_v16, 4 }
 0x42b   : > { %v7306_v17 = vrot.slane %v7304_v11, 5 }
 0x42c   : > { %v7520_v14 = vpack.c.b16 %v7496_v55, %v7495_v54  ;;  %v7297_v13 = vsel %vm13244_vm5, %v7292_v56, %v7296_v23  ;;  %v7312_v54 = vshll.u32 %v7071_v57, 16  ;;  %v7318_v55 = vshll.u32 %v7072_v48, 16  ;;  %v7073_v56 = vld [vmem:[#allocation3 + $0x80] sm:$0x1] }
 0x42d   : > { %v13525_v44 = vpop.f32.mrf.mxu0  ;;  %v13527_v41 = vpop.f32.mrf.mxu3 }
 0x42e   : > { %10846 = vmatmul.msk.bf16.gmra.mxu3 %vm5981_vm7, %v11180_v25  ;;  %v11365_v25 = vld [vmem:[#allocation3 + $0x68] sm:$0x1] }
 0x42f   : > { %v6460_v45 = vrot.slane %v11365_v25, 5  ;;  %v6357_v25 = vld [vmem:[#allocation3 + $0x6c] sm:$0xe] }
 0x431   : > { %v13535_v4 = vpop.f32.mrf.mxu1  ;;  %v13537_v39 = vpop.f32.mrf.mxu2 }
 0x433   : > { %10874 = vmatmul.msk.bf16.gmra.mxu0 %vm5981_vm7, %v7519_v38  ;;  %v6458_v38 = vsel %vm13382_vm12, %v10728_v29, %v6457_v51  ;;  %v7322_v29 = vshrl.u32 %v7072_v48, 16 }
 0x434   : > { %10711 = vmatmul.msk.bf16.gmra.mxu1 %vm5981_vm7, %v11159_v7  ;;  %v6461_v7 = vsel %vm13382_vm12, %v6459_v19, %v6460_v45  ;;  %v6532_v8 = vunpack.c.l.b16 %v6458_v38  ;;  %v10729_v38 = vrot.slane %v6357_v25, 9 }
 0x435   : > { %v13543_v50 = vpop.f32.mrf.mxu0  ;;  %v13549_v43 = vpop.f32.mrf.mxu3  ;;  %v6533_v59 = vunpack.c.l.b16 %v6461_v7  ;;  %v6466_v7 = vrot.slane %v6464_v42, 4 }
 0x437   : > { %v6556_v34 = vpack.c.b16 %v6533_v59, %v6532_v8  ;;  %v7324_v8 = vrot.slane %v7322_v29, 4 }
 0x439   : > { %10755 = vmatmul.msk.bf16.gmra.mxu2 %vm5981_vm7, %v6555_v28  ;;  %v13553_v36 = vpop.f32.mrf.mxu1 }
 0x43c   : > { %v13555_v15 = vpop.f32.mrf.mxu2 }
 0x43e   : > { %10847 = vmatmul.msk.bf16.gmra.mxu3 %vm5981_vm7, %v11181_v12  ;;  %v7309_v12 = vshrl.u32 %v7071_v57, 16  ;;  %v11161_v57 = vld [vmem:[#allocation3 + $0x6c] sm:$0xff] }
 0x440   : > { %v13562_v61 = vpop.f32.mrf.mxu0  ;;  %v7311_v11 = vrot.slane %v7309_v12, 4 }
 0x441   : > { %v13564_v0 = vpop.f32.mrf.mxu3  ;;  %v6268_v18 = vpop.f32.mrf.mxu1 }
 0x442   : > { %v6269_v28 = vadd.f32 %v6268_v18, %v13458_v21  ;;  %v7307_v21 = vsel %vm13244_vm5, %v7302_v24, %v7306_v17  ;;  %v7320_v18 = vrot.slane %v7318_v55, 5  ;;  %v6465_v24 = vsel %vm13382_vm12, %v10729_v38, %v6464_v42 }
 0x443   : > { %10875 = vmatmul.msk.bf16.gmra.mxu0 %vm5981_vm7, %v7520_v14  ;;  %v7497_v14 = vunpack.c.l.b16 %v7297_v13  ;;  %v7498_v16 = vunpack.c.l.b16 %v7307_v21  ;;  %v6468_v17 = vsel %vm13382_vm12, %v6466_v7, %v6467_v32  ;;  %v7328_v13 = vshll.u32 %v7073_v56, 16  ;;  %v7074_v32 = vld [vmem:[#allocation3 + $0x84] sm:$0xf] }
 0x444   : > { %v13568_v51 = vpop.f32.mrf.mxu2  ;;  %10712 = vmatmul.msk.bf16.gmra.mxu1 %vm5981_vm7, %v11160_v58  ;;  %v7314_v58 = vrot.slane %v7312_v54, 5  ;;  %v7325_v63 = vor.u32 %v7324_v8, %v7320_v18  ;;  %v6534_v12 = vunpack.c.l.b16 %v6465_v24  ;;  %v6535_v54 = vunpack.c.l.b16 %v6468_v17 }
 0x445   : > { %v7330_v31 = vrot.slane %v7328_v13, 5  ;;  %v7336_v8 = vshll.u32 %v7074_v32, 16 }
 0x446   : > { %v7315_v48 = vor.u32 %v7314_v58, %v7311_v11  ;;  %v6557_v7 = vpack.c.b16 %v6535_v54, %v6534_v12  ;;  %v6358_v11 = vld [vmem:[#allocation3 + $0x78] sm:$0xe]  ;;  %v7333_v58 = vshrl.u32 %v7074_v32, 16 }
 0x448   : > { %v13575_v45 = vpop.f32.mrf.mxu0  ;;  %v7316_v42 = vrot.slane %v7315_v48, 4 }
 0x449   : > { %v13577_v19 = vpop.f32.mrf.mxu3  ;;  %10756 = vmatmul.msk.bf16.gmra.mxu2 %vm5981_vm7, %v6556_v34  ;;  %v6270_v47 = vpop.f32.mrf.mxu1 }
 0x44a   : > { %v6271_v23 = vadd.f32 %v6270_v47, %v13478_v20  ;;  %v7521_v20 = vpack.c.b16 %v7498_v16, %v7497_v14  ;;  %v7326_v47 = vrot.slane %v7325_v63, 4  ;;  %v7075_v14 = vld [vmem:[#allocation3 + $0x88] sm:$0xf]  ;;  %v11368_v16 = vld [vmem:[#allocation3 + $0x7c] sm:$0xf] }
 0x44b   : > { %v7342_v24 = vshll.u32 %v7075_v14, 16  ;;  %v7346_v17 = vshrl.u32 %v7075_v14, 16  ;;  %v11183_v63 = vld [vmem:[#allocation3 + $0x78] sm:$0xff]  ;;  %v7076_v14 = vld [vmem:[#allocation3 + $0x8c] sm:$0x1] }
 0x44c   : > { %v6633_v2 = vpop.f32.mrf.mxu2  ;;  %v7331_v56 = vsel %vm13244_vm5, %v7326_v47, %v7330_v31 }
 0x44d   : > { %v6713_v59 = vadd.f32 %v6633_v2, %v6269_v28  ;;  %v6471_v2 = vrot.slane %v11368_v16, 5  ;;  %v7500_v54 = vunpack.c.l.b16 %v7331_v56  ;;  %v7348_v47 = vrot.slane %v7346_v17, 4 }
 0x44e   : > { %10848 = vmatmul.msk.bf16.gmra.mxu3 %vm5981_vm7, %v11182_v22 }
 0x450   : > { %v7598_v34 = vpop.f32.mrf.mxu0 }
 0x451   : > { %v6932_v21 = vpop.f32.mrf.mxu3  ;;  %v6273_v25 = vpop.f32.mrf.mxu1 }
 0x452   : > { %v7012_v28 = vadd.f32 %v6932_v21, %v6713_v59  ;;  %v6274_v55 = vadd.f32 %v6273_v25, %v13493_v52  ;;  %v7321_v59 = vsel %vm13244_vm5, %v7316_v42, %v7320_v18  ;;  %v10730_v21 = vrot.slane %v6358_v11, 9 }
 0x453   : > { %10876 = vmatmul.msk.bf16.gmra.mxu0 %vm5981_vm7, %v7521_v20  ;;  %v11369_v20 = vld [vmem:[#allocation3 + $0x80] sm:$0x1]  ;;  %v6473_v25 = vrot.slane %v6471_v2, 4  ;;  %v7499_v12 = vunpack.c.l.b16 %v7321_v59  ;;  %v7335_v18 = vrot.slane %v7333_v58, 4  ;;  %v7344_v42 = vrot.slane %v7342_v24, 5  ;;  %v11162_v58 = vld [vmem:[#allocation3 + $0x78] sm:$0xff] }
 0x454   : > { %v6635_v29 = vpop.f32.mrf.mxu2  ;;  %10713 = vmatmul.msk.bf16.gmra.mxu1 %vm5981_vm7, %v11161_v57  ;;  %v13589_v22 = vadd.f32 %v7598_v34, %v7012_v28  ;;  %v6474_v34 = vrot.slane %v11369_v20, 5  ;;  %v7338_v28 = vrot.slane %v7336_v8, 5  ;;  %v7352_v59 = vshll.u32 %v7076_v14, 16 }
 0x455   : > { %v6714_v38 = vadd.f32 %v6635_v29, %v6271_v23  ;;  %v7349_v8 = vor.u32 %v7348_v47, %v7344_v42 }
 0x456   : > { %v7339_v16 = vor.u32 %v7338_v28, %v7335_v18 }
 0x458   : > { %v7600_v52 = vpop.f32.mrf.mxu0 }
 0x459   : > { %v6934_v57 = vpop.f32.mrf.mxu3  ;;  %10757 = vmatmul.msk.bf16.gmra.mxu2 %vm5981_vm7, %v6557_v7  ;;  %v6275_v23 = vpop.f32.mrf.mxu1  ;;  %v7522_v7 = vpack.c.b16 %v7500_v54, %v7499_v12  ;;  %v7078_v12 = vld [vmem:[#allocation3 + $0x94] sm:$0xf]  ;;  %v11370_v54 = vld [vmem:[#allocation3 + $0x88] sm:$0xf] }
 0x45a   : > { %v7013_v48 = vadd.f32 %v6934_v57, %v6714_v38  ;;  %v6276_v13 = vadd.f32 %v6275_v23, %v13508_v62  ;;  %v6472_v38 = vsel %vm13382_vm12, %v10730_v21, %v6471_v2  ;;  %v6475_v62 = vsel %vm13382_vm12, %v6473_v25, %v6474_v34 }
 0x45b   : > { %v6537_v17 = vunpack.c.l.b16 %v6475_v62  ;;  %v7340_v57 = vrot.slane %v7339_v16, 4  ;;  %v7350_v34 = vrot.slane %v7349_v8, 4  ;;  %v7354_v23 = vrot.slane %v7352_v59, 5  ;;  %v11184_v8 = vld [vmem:[#allocation3 + $0x84] sm:$0xff] }
 0x45c   : > { %v6638_v29 = vpop.f32.mrf.mxu2  ;;  %v13597_v31 = vadd.f32 %v7600_v52, %v7013_v48  ;;  %v6536_v52 = vunpack.c.l.b16 %v6472_v38  ;;  %v7077_v48 = vld [vmem:[#allocation3 + $0x90] sm:$0xf]  ;;  %v6478_v18 = vrot.slane %v11370_v54, 5  ;;  %v7366_v38 = vshll.u32 %v7078_v12, 16 }
 0x45d   : > { %v6715_v32 = vadd.f32 %v6638_v29, %v6274_v55  ;;  %v7345_v28 = vsel %vm13244_vm5, %v7340_v57, %v7344_v42  ;;  %v7357_v29 = vshrl.u32 %v7077_v48, 16  ;;  %v7360_v14 = vshll.u32 %v7077_v48, 16 }
 0x45e   : > { %10849 = vmatmul.msk.bf16.gmra.mxu3 %vm5981_vm7, %v11183_v63  ;;  %v6558_v25 = vpack.c.b16 %v6537_v17, %v6536_v52  ;;  %v7370_v62 = vshrl.u32 %v7078_v12, 16  ;;  %v7079_v12 = vld [vmem:[#allocation3 + $0x98] sm:$0x1] }
 0x45f   : > { %v7359_v17 = vrot.slane %v7357_v29, 4  ;;  %v7362_v57 = vrot.slane %v7360_v14, 5 }
 0x460   : > { %v7603_v11 = vpop.f32.mrf.mxu0 }
 0x461   : > { %v6937_v56 = vpop.f32.mrf.mxu3  ;;  %v6278_v24 = vpop.f32.mrf.mxu1 }
 0x462   : > { %v7014_v55 = vadd.f32 %v6937_v56, %v6715_v32  ;;  %v6279_v20 = vadd.f32 %v6278_v24, %v13525_v44  ;;  %v6359_v44 = vld [vmem:[#allocation3 + $0x84] sm:$0xe]  ;;  %v7355_v32 = vsel %vm13244_vm5, %v7350_v34, %v7354_v23  ;;  %v6480_v56 = vrot.slane %v6478_v18, 4 }
 0x463   : > { %10877 = vmatmul.msk.bf16.gmra.mxu0 %vm5981_vm7, %v7522_v7  ;;  %v11371_v7 = vld [vmem:[#allocation3 + $0x8c] sm:$0x1]  ;;  %v10731_v42 = vrot.slane %v6359_v44, 9  ;;  %v7501_v24 = vunpack.c.l.b16 %v7345_v28  ;;  %v7502_v52 = vunpack.c.l.b16 %v7355_v32  ;;  %v7372_v34 = vrot.slane %v7370_v62, 4  ;;  %v11163_v28 = vld [vmem:[#allocation3 + $0x84] sm:$0xff] }
 0x464   : > { %v6640_v2 = vpop.f32.mrf.mxu2  ;;  %10714 = vmatmul.msk.bf16.gmra.mxu1 %vm5981_vm7, %v11162_v58  ;;  %v13607_v63 = vadd.f32 %v7603_v11, %v7014_v55  ;;  %v6481_v16 = vrot.slane %v11371_v7, 5  ;;  %v7363_v44 = vor.u32 %v7362_v57, %v7359_v17  ;;  %v7376_v32 = vshll.u32 %v7079_v12, 16 }
 0x465   : > { %v6716_v21 = vadd.f32 %v6640_v2, %v6276_v13  ;;  %v7368_v2 = vrot.slane %v7366_v38, 5 }
 0x467   : > { %v7373_v29 = vor.u32 %v7372_v34, %v7368_v2  ;;  %v6360_v34 = vld [vmem:[#allocation3 + $0x90] sm:$0xe] }
 0x468   : > { %v7605_v47 = vpop.f32.mrf.mxu0 }
 0x469   : > { %v6939_v11 = vpop.f32.mrf.mxu3  ;;  %10758 = vmatmul.msk.bf16.gmra.mxu2 %vm5981_vm7, %v6558_v25  ;;  %v6280_v13 = vpop.f32.mrf.mxu1  ;;  %v7523_v25 = vpack.c.b16 %v7502_v52, %v7501_v24  ;;  %v7081_v24 = vld [vmem:[#allocation3 + $0xa0] sm:$0xf] }
 0x46a   : > { %v7015_v58 = vadd.f32 %v6939_v11, %v6716_v21  ;;  %v6281_v59 = vadd.f32 %v6280_v13, %v13543_v50  ;;  %v6479_v21 = vsel %vm13382_vm12, %v10731_v42, %v6478_v18  ;;  %v6482_v50 = vsel %vm13382_vm12, %v6480_v56, %v6481_v16  ;;  %v7080_v11 = vld [vmem:[#allocation3 + $0x9c] sm:$0xf] }
 0x46b   : > { %v6539_v62 = vunpack.c.l.b16 %v6482_v50  ;;  %v7364_v16 = vrot.slane %v7363_v44, 4  ;;  %v7374_v13 = vrot.slane %v7373_v29, 4  ;;  %v7381_v52 = vshrl.u32 %v7080_v11, 16 }
 0x46c   : > { %v6643_v55 = vpop.f32.mrf.mxu2  ;;  %v13615_v23 = vadd.f32 %v7605_v47, %v7015_v58  ;;  %v6538_v47 = vunpack.c.l.b16 %v6479_v21  ;;  %v7378_v58 = vrot.slane %v7376_v32, 5  ;;  %v7384_v17 = vshll.u32 %v7080_v11, 16 }
 0x46d   : > { %v6717_v48 = vadd.f32 %v6643_v55, %v6279_v20  ;;  %v11372_v55 = vld [vmem:[#allocation3 + $0x94] sm:$0xf]  ;;  %v7390_v21 = vshll.u32 %v7081_v24, 16  ;;  %v7394_v50 = vshrl.u32 %v7081_v24, 16  ;;  %v7383_v44 = vrot.slane %v7381_v52, 4 }
 0x46e   : > { %10850 = vmatmul.msk.bf16.gmra.mxu3 %vm5981_vm7, %v11184_v8  ;;  %v6559_v56 = vpack.c.b16 %v6539_v62, %v6538_v47  ;;  %v6485_v57 = vrot.slane %v11372_v55, 5  ;;  %v7379_v12 = vsel %vm13244_vm5, %v7374_v13, %v7378_v58  ;;  %v7386_v29 = vrot.slane %v7384_v17, 5  ;;  %v7082_v24 = vld [vmem:[#allocation3 + $0xa4] sm:$0x1]  ;;  %v11164_v55 = vld [vmem:[#allocation3 + $0x90] sm:$0xff] }
 0x46f   : > { %v10732_v47 = vrot.slane %v6360_v34, 9 }
 0x470   : > { %v7608_v54 = vpop.f32.mrf.mxu0  ;;  %v6487_v62 = vrot.slane %v6485_v57, 4 }
 0x471   : > { %v6942_v14 = vpop.f32.mrf.mxu3  ;;  %v6283_v38 = vpop.f32.mrf.mxu1 }
 0x472   : > { %v7016_v20 = vadd.f32 %v6942_v14, %v6717_v48  ;;  %v6284_v7 = vadd.f32 %v6283_v38, %v13562_v61  ;;  %v7369_v48 = vsel %vm13244_vm5, %v7364_v16, %v7368_v2  ;;  %v11185_v14 = vld [vmem:[#allocation3 + $0x90] sm:$0xff]  ;;  %v7396_v16 = vrot.slane %v7394_v50, 4 }
 0x473   : > { %10878 = vmatmul.msk.bf16.gmra.mxu0 %vm5981_vm7, %v7523_v25  ;;  %v11373_v25 = vld [vmem:[#allocation3 + $0x98] sm:$0x1]  ;;  %v7503_v2 = vunpack.c.l.b16 %v7369_v48  ;;  %v7400_v48 = vshll.u32 %v7082_v24, 16 }
 0x474   : > { %v6645_v18 = vpop.f32.mrf.mxu2  ;;  %10715 = vmatmul.msk.bf16.gmra.mxu1 %vm5981_vm7, %v11163_v28  ;;  %v13625_v8 = vadd.f32 %v7608_v54, %v7016_v20  ;;  %v6488_v54 = vrot.slane %v11373_v25, 5  ;;  %v7504_v20 = vunpack.c.l.b16 %v7379_v12 }
 0x475   : > { %v6718_v42 = vadd.f32 %v6645_v18, %v6281_v59  ;;  %v7392_v18 = vrot.slane %v7390_v21, 5 }
 0x476   : > { %v7524_v52 = vpack.c.b16 %v7504_v20, %v7503_v2  ;;  %v11374_v2 = vld [vmem:[#allocation3 + $0xa0] sm:$0xf] }
 0x477   : > { %v7397_v34 = vor.u32 %v7396_v16, %v7392_v18  ;;  %v6492_v20 = vrot.slane %v11374_v2, 5  ;;  %v6361_v16 = vld [vmem:[#allocation3 + $0x9c] sm:$0xe] }
 0x478   : > { %v7610_v61 = vpop.f32.mrf.mxu0 }
 0x479   : > { %v6944_v28 = vpop.f32.mrf.mxu3  ;;  %10759 = vmatmul.msk.bf16.gmra.mxu2 %vm5981_vm7, %v6559_v56  ;;  %v6285_v59 = vpop.f32.mrf.mxu1  ;;  %v6486_v56 = vsel %vm13382_vm12, %v10732_v47, %v6485_v57  ;;  %v7398_v57 = vrot.slane %v7397_v34, 4 }
 0x47a   : > { %v7017_v32 = vadd.f32 %v6944_v28, %v6718_v42  ;;  %v6286_v38 = vadd.f32 %v6285_v59, %v13575_v45  ;;  %v6489_v42 = vsel %vm13382_vm12, %v6487_v62, %v6488_v54  ;;  %v7387_v45 = vor.u32 %v7386_v29, %v7383_v44  ;;  %v7083_v28 = vld [vmem:[#allocation3 + $0xa8] sm:$0xf]  ;;  %v7084_v44 = vld [vmem:[#allocation3 + $0xac] sm:$0xf] }
 0x47b   : > { %v6541_v50 = vunpack.c.l.b16 %v6489_v42  ;;  %v7402_v54 = vrot.slane %v7400_v48, 5  ;;  %v7405_v47 = vshrl.u32 %v7083_v28, 16  ;;  %v7418_v24 = vshrl.u32 %v7084_v44, 16 }
 0x47c   : > { %v6648_v11 = vpop.f32.mrf.mxu2  ;;  %v13633_v13 = vadd.f32 %v7610_v61, %v7017_v32  ;;  %v6540_v61 = vunpack.c.l.b16 %v6486_v56  ;;  %v7388_v25 = vrot.slane %v7387_v45, 4  ;;  %v11375_v45 = vld [vmem:[#allocation3 + $0xa4] sm:$0x1] }
 0x47d   : > { %v6719_v58 = vadd.f32 %v6648_v11, %v6284_v7  ;;  %v7408_v11 = vshll.u32 %v7083_v28, 16  ;;  %v7403_v42 = vsel %vm13244_vm5, %v7398_v57, %v7402_v54  ;;  %v7407_v34 = vrot.slane %v7405_v47, 4  ;;  %v7085_v57 = vld [vmem:[#allocation3 + $0xb0] sm:$0x1] }
 0x47e   : > { %10851 = vmatmul.msk.bf16.gmra.mxu3 %vm5981_vm7, %v11185_v14  ;;  %v6560_v14 = vpack.c.b16 %v6541_v50, %v6540_v61  ;;  %v7393_v62 = vsel %vm13244_vm5, %v7388_v25, %v7392_v18  ;;  %v11186_v18 = vld [vmem:[#allocation3 + $0x9c] sm:$0xff]  ;;  %v6494_v61 = vrot.slane %v6492_v20, 4  ;;  %v7506_v25 = vunpack.c.l.b16 %v7403_v42 }
 0x47f   : > { %v7410_v50 = vrot.slane %v7408_v11, 5 }
 0x480   : > { %v7613_v17 = vpop.f32.mrf.mxu0 }
 0x481   : > { %v6947_v12 = vpop.f32.mrf.mxu3  ;;  %v6288_v21 = vpop.f32.mrf.mxu1  ;;  %v7411_v47 = vor.u32 %v7410_v50, %v7407_v34 }
 0x482   : > { %v7018_v7 = vadd.f32 %v6947_v12, %v6719_v58  ;;  %v7414_v58 = vshll.u32 %v7084_v44, 16  ;;  %v10733_v12 = vrot.slane %v6361_v16, 9  ;;  %v11165_v16 = vld [vmem:[#allocation3 + $0x9c] sm:$0xff] }
 0x483   : > { %10879 = vmatmul.msk.bf16.gmra.mxu0 %vm5981_vm7, %v7524_v52  ;;  %v6495_v52 = vrot.slane %v11375_v45, 5 }
 0x484   : > { %v6650_v59 = vpop.f32.mrf.mxu2  ;;  %10716 = vmatmul.msk.bf16.gmra.mxu1 %vm5981_vm7, %v11164_v55  ;;  %v13642_v29 = vadd.f32 %v7613_v17, %v7018_v7  ;;  %v6289_v7 = vadd.f32 %v6288_v21, %v13440_v40  ;;  %v7416_v28 = vrot.slane %v7414_v58, 5  ;;  %v7424_v40 = vshll.u32 %v7085_v57, 16 }
 0x485   : > { %v6720_v32 = vadd.f32 %v6650_v59, %v6286_v38  ;;  %v7505_v38 = vunpack.c.l.b16 %v7393_v62  ;;  %v7420_v59 = vrot.slane %v7418_v24, 4 }
 0x487   : > { %v7525_v62 = vpack.c.b16 %v7506_v25, %v7505_v38  ;;  %v7421_v11 = vor.u32 %v7420_v59, %v7416_v28  ;;  %v7087_v38 = vld [vmem:[#allocation3 + $0xb8] sm:$0xf] }
 0x488   : > { %v7615_v56 = vpop.f32.mrf.mxu0 }
 0x489   : > { %v6949_v17 = vpop.f32.mrf.mxu3  ;;  %10760 = vmatmul.msk.bf16.gmra.mxu2 %vm5981_vm7, %v6560_v14  ;;  %v6290_v55 = vpop.f32.mrf.mxu1  ;;  %v6493_v14 = vsel %vm13382_vm12, %v10733_v12, %v6492_v20  ;;  %v7422_v20 = vrot.slane %v7421_v11, 4  ;;  %v7086_v12 = vld [vmem:[#allocation3 + $0xb4] sm:$0xf] }
 0x48a   : > { %v7019_v48 = vadd.f32 %v6949_v17, %v6720_v32  ;;  %v6496_v32 = vsel %vm13382_vm12, %v6494_v61, %v6495_v52  ;;  %v6542_v42 = vunpack.c.l.b16 %v6493_v14  ;;  %v7412_v17 = vrot.slane %v7411_v47, 4  ;;  %v11377_v47 = vld [vmem:[#allocation3 + $0xb0] sm:$0x1] }
 0x48b   : > { %v7429_v57 = vshrl.u32 %v7086_v12, 16  ;;  %v7442_v14 = vshrl.u32 %v7087_v38, 16 }
 0x48c   : > { %v6653_v44 = vpop.f32.mrf.mxu2  ;;  %v13650_v54 = vadd.f32 %v7615_v56, %v7019_v48  ;;  %v6543_v56 = vunpack.c.l.b16 %v6496_v32  ;;  %v6291_v48 = vadd.f32 %v6290_v55, %v13452_v60  ;;  %v7417_v59 = vsel %vm13244_vm5, %v7412_v17, %v7416_v28 }
 0x48d   : > { %v6721_v2 = vadd.f32 %v6653_v44, %v6289_v7  ;;  %v11376_v7 = vld [vmem:[#allocation3 + $0xac] sm:$0xf]  ;;  %v6362_v44 = vld [vmem:[#allocation3 + $0xa8] sm:$0xe]  ;;  %v7432_v55 = vshll.u32 %v7086_v12, 16  ;;  %v7507_v28 = vunpack.c.l.b16 %v7417_v59 }
 0x48e   : > { %10852 = vmatmul.msk.bf16.gmra.mxu3 %vm5981_vm7, %v11186_v18  ;;  %v7426_v18 = vrot.slane %v7424_v40, 5  ;;  %v6561_v50 = vpack.c.b16 %v6543_v56, %v6542_v42  ;;  %v6499_v25 = vrot.slane %v11376_v7, 5  ;;  %v11187_v42 = vld [vmem:[#allocation3 + $0xa8] sm:$0xff]  ;;  %v7088_v7 = vld [vmem:[#allocation3 + $0xbc] sm:$0x1] }
 0x490   : > { %v7618_v21 = vpop.f32.mrf.mxu0  ;;  %v7427_v60 = vsel %vm13244_vm5, %v7422_v20, %v7426_v18  ;;  %v7444_v18 = vrot.slane %v7442_v14, 4 }
 0x491   : > { %v6952_v58 = vpop.f32.mrf.mxu3  ;;  %v6293_v24 = vpop.f32.mrf.mxu1  ;;  %v7508_v56 = vunpack.c.l.b16 %v7427_v60 }
 0x492   : > { %v7020_v45 = vadd.f32 %v6952_v58, %v6721_v2  ;;  %v7438_v2 = vshll.u32 %v7087_v38, 16  ;;  %v6294_v17 = vadd.f32 %v6293_v24, %v13468_v3 }
 0x493   : > { %10880 = vmatmul.msk.bf16.gmra.mxu0 %vm5981_vm7, %v7525_v62  ;;  %v6502_v62 = vrot.slane %v11377_v47, 5  ;;  %v7526_v59 = vpack.c.b16 %v7508_v56, %v7507_v28  ;;  %v7089_v47 = vld [vmem:[#allocation3 + $0xc0] sm:$0xf] }
 0x494   : > { %v6655_v52 = vpop.f32.mrf.mxu2  ;;  %10717 = vmatmul.msk.bf16.gmra.mxu1 %vm5981_vm7, %v11165_v16  ;;  %v13660_v34 = vadd.f32 %v7618_v21, %v7020_v45  ;;  %v10734_v21 = vrot.slane %v6362_v44, 9  ;;  %v6501_v16 = vrot.slane %v6499_v25, 4  ;;  %v7431_v45 = vrot.slane %v7429_v57, 4  ;;  %v11166_v57 = vld [vmem:[#allocation3 + $0xa8] sm:$0xff] }
 0x495   : > { %v6722_v61 = vadd.f32 %v6655_v52, %v6291_v48  ;;  %v7434_v48 = vrot.slane %v7432_v55, 5  ;;  %v13668_v20 = vrot.slane %v7438_v2, 5  ;;  %v7448_v2 = vshll.u32 %v7088_v7, 16 }
 0x497   : > { %v7435_v44 = vor.u32 %v7434_v48, %v7431_v45  ;;  %v7445_v3 = vor.u32 %v7444_v18, %v13668_v20  ;;  %v7450_v45 = vrot.slane %v7448_v2, 5  ;;  %v7456_v48 = vshll.u32 %v7089_v47, 16 }
 0x498   : > { %v7620_v32 = vpop.f32.mrf.mxu0 }
 0x499   : > { %v6954_v11 = vpop.f32.mrf.mxu3  ;;  %10761 = vmatmul.msk.bf16.gmra.mxu2 %vm5981_vm7, %v6561_v50  ;;  %v6295_v40 = vpop.f32.mrf.mxu1  ;;  %v6500_v50 = vsel %vm13382_vm12, %v10734_v21, %v6499_v25  ;;  %v7090_v25 = vld [vmem:[#allocation3 + $0xc4] sm:$0xf]  ;;  %v11378_v21 = vld [vmem:[#allocation3 + $0x10] sm:$0xf] }
 0x49a   : > { %v7021_v58 = vadd.f32 %v6954_v11, %v6722_v61  ;;  %v6503_v61 = vsel %vm13382_vm12, %v6501_v16, %v6502_v62  ;;  %v6544_v60 = vunpack.c.l.b16 %v6500_v50  ;;  %v6296_v62 = vadd.f32 %v6295_v40, %v13484_v1  ;;  %v11381_v40 = vld [vmem:[#allocation3 + $0x14] sm:$0x1] }
 0x49b   : > { %v6545_v55 = vunpack.c.l.b16 %v6503_v61  ;;  %v7436_v16 = vrot.slane %v7435_v44, 4  ;;  %v7466_v50 = vshrl.u32 %v7090_v25, 16  ;;  %v11379_v61 = vld [vmem:[#allocation3 + $0xb8] sm:$0xf]  ;;  %v7779_v44 = vrot.slane %v11381_v40, 5 }
 0x49c   : > { %v6658_v12 = vpop.f32.mrf.mxu2  ;;  %v13670_v52 = vadd.f32 %v7620_v32, %v7021_v58  ;;  %v7776_v58 = vrot.slane %v11378_v21, 5  ;;  %v6506_v7 = vrot.slane %v11379_v61, 5  ;;  %v6363_v21 = vld [vmem:[#allocation3 + $0xb4] sm:$0xe] }
 0x49d   : > { %v6723_v38 = vadd.f32 %v6658_v12, %v6294_v17  ;;  %v6562_v56 = vpack.c.b16 %v6545_v55, %v6544_v60  ;;  %v7453_v17 = vshrl.u32 %v7089_v47, 16  ;;  %v7462_v12 = vshll.u32 %v7090_v25, 16  ;;  %v11188_v61 = vld [vmem:[#allocation3 + $0xb4] sm:$0xff] }
 0x49e   : > { %14757 = vst [vmem:[#allocation24_spill] sm:$0xff] %v13670_v52  ;;  %10853 = vmatmul.msk.bf16.gmra.mxu3 %vm5981_vm7, %v11187_v42  ;;  %v7446_v42 = vrot.slane %v7445_v3, 4  ;;  %v7778_v1 = vrot.slane %v7776_v58, 4  ;;  %v7458_v47 = vrot.slane %v7456_v48, 5  ;;  %v7468_v25 = vrot.slane %v7466_v50, 4 }
 0x49f   : > { %v7455_v2 = vrot.slane %v7453_v17, 4  ;;  %v6508_v40 = vrot.slane %v6506_v7, 4 }
 0x4a0   : > { %v7623_v24 = vpop.f32.mrf.mxu0  ;;  %v7451_v60 = vsel %vm13244_vm5, %v7446_v42, %v7450_v45  ;;  %v7091_v45 = vld [vmem:[#allocation3 + $0xc8] sm:$0x1]  ;;  %v7780_v17 = vsel %vm13382_vm12, %v7778_v1, %v7779_v44 }
 0x4a1   : > { %v6957_v14 = vpop.f32.mrf.mxu3  ;;  %v6298_v32 = vpop.f32.mrf.mxu1  ;;  %v7510_v52 = vunpack.c.l.b16 %v7451_v60  ;;  %v7472_v60 = vshll.u32 %v7091_v45, 16 }
 0x4a2   : > { %v7022_v11 = vadd.f32 %v6957_v14, %v6723_v38  ;;  %v11380_v14 = vld [vmem:[#allocation3 + $0xbc] sm:$0x1] }
 0x4a3   : > { %10881 = vmatmul.msk.bf16.gmra.mxu0 %vm5981_vm7, %v7526_v59  ;;  %v6509_v59 = vrot.slane %v11380_v14, 5  ;;  %v10735_v14 = vrot.slane %v6363_v21, 9 }
 0x4a4   : > { %v6660_v28 = vpop.f32.mrf.mxu2  ;;  %10718 = vmatmul.msk.bf16.gmra.mxu1 %vm5981_vm7, %v11166_v57  ;;  %v13681_v38 = vadd.f32 %v7623_v24, %v7022_v11  ;;  %v7441_v57 = vsel %vm13244_vm5, %v7436_v16, %v13668_v20  ;;  %v13689_v11 = vrot.slane %v7462_v12, 5  ;;  %v6299_v20 = vadd.f32 %v6298_v32, %v13500_v49 }
 0x4a5   : > { %v6724_v18 = vadd.f32 %v6660_v28, %v6296_v62  ;;  %v7710_v62 = vld [vmem:[#allocation3 + $0xc] sm:$0xe]  ;;  %v7509_v16 = vunpack.c.l.b16 %v7441_v57  ;;  %v7459_v12 = vor.u32 %v7458_v47, %v7455_v2  ;;  %v6507_v21 = vsel %vm13382_vm12, %v10735_v14, %v6506_v7  ;;  %v13706_v2 = vld [vmem:[#allocation3 + $0x1c] sm:$0xf] }
 0x4a6   : > { %14758 = vst [vmem:[#allocation25_spill] sm:$0xff] %v13681_v38  ;;  %v10884_v38 = vrot.slane %v7710_v62, 9  ;;  %v6510_v49 = vsel %vm13382_vm12, %v6508_v40, %v6509_v59  ;;  %v7469_v32 = vor.u32 %v7468_v25, %v13689_v11 }
 0x4a7   : > { %v7527_v57 = vpack.c.b16 %v7510_v52, %v7509_v16  ;;  %v6547_v7 = vunpack.c.l.b16 %v6510_v49  ;;  %v7460_v14 = vrot.slane %v7459_v12, 4  ;;  %v7474_v16 = vrot.slane %v7472_v60, 5  ;;  %v8421_v49 = vld [vmem:[#allocation3 + $0x20] sm:$0x1] }
 0x4a8   : > { %v7625_v3 = vpop.f32.mrf.mxu0  ;;  %v7470_v59 = vrot.slane %v7469_v32, 4 }
 0x4a9   : > { %v6959_v55 = vpop.f32.mrf.mxu3  ;;  %10762 = vmatmul.msk.bf16.gmra.mxu2 %vm5981_vm7, %v6562_v56  ;;  %v6300_v24 = vpop.f32.mrf.mxu1  ;;  %v7777_v56 = vsel %vm13382_vm12, %v10884_v38, %v7776_v58  ;;  %v8419_v38 = vld [vmem:[#allocation3 + $0x18] sm:$0xf] }
 0x4aa   : > { %v7023_v28 = vadd.f32 %v6959_v55, %v6724_v18  ;;  %v7891_v50 = vunpack.c.l.b16 %v7777_v56  ;;  %v7892_v18 = vunpack.c.l.b16 %v7780_v17  ;;  %v11167_v55 = vld [vmem:[#allocation3 + $0xb4] sm:$0xff]  ;;  %v8468_v40 = vshrl.u32 %v8419_v38, 16 }
 0x4ab   : > { %v8471_v25 = vshll.u32 %v8419_v38, 16  ;;  %v6301_v52 = vadd.f32 %v6300_v24, %v13515_v10  ;;  %v7475_v10 = vsel %vm13244_vm5, %v7470_v59, %v7474_v16  ;;  %v11189_v38 = vld [vmem:[#allocation3 + $0xc0] sm:$0xff] }
 0x4ac   : > { %v6663_v42 = vpop.f32.mrf.mxu2  ;;  %v13702_v58 = vpack.c.b16 %v7892_v18, %v7891_v50  ;;  %v13704_v1 = vadd.f32 %v7625_v3, %v7023_v28  ;;  %v8477_v3 = vshll.u32 %v13706_v2, 16  ;;  %v8481_v28 = vshrl.u32 %v13706_v2, 16  ;;  %v8422_v59 = vld [vmem:[#allocation3 + $0x24] sm:$0xf] }
 0x4ad   : > { %v6725_v48 = vadd.f32 %v6663_v42, %v6299_v20  ;;  %v8473_v12 = vrot.slane %v8471_v25, 5  ;;  %v7465_v50 = vsel %vm13244_vm5, %v7460_v14, %v13689_v11  ;;  %v8487_v11 = vshll.u32 %v8421_v49, 16 }
 0x4ae   : > { %10854 = vmatmul.msk.bf16.gmra.mxu3 %vm5981_vm7, %v11188_v61  ;;  %v6546_v61 = vunpack.c.l.b16 %v6507_v21  ;;  %v8479_v24 = vrot.slane %v8477_v3, 5  ;;  %v8483_v18 = vrot.slane %v8481_v28, 4  ;;  %v9085_v28 = vld [vmem:[#allocation3 + $0x18] sm:$0xe] }
 0x4af   : > { %v8489_v3 = vrot.slane %v8487_v11, 5  ;;  %v9154_v11 = vrot.slane %v8421_v49, 5 }
 0x4b0   : > { %v7628_v44 = vpop.f32.mrf.mxu0  ;;  %v6563_v56 = vpack.c.b16 %v6547_v7, %v6546_v61  ;;  %v8484_v7 = vor.u32 %v8483_v18, %v8479_v24  ;;  %v11382_v18 = vld [vmem:[#allocation3 + $0x1c] sm:$0xf] }
 0x4b1   : > { %v6962_v47 = vpop.f32.mrf.mxu3  ;;  %v6303_v62 = vpop.f32.mrf.mxu1 }
 0x4b2   : > { %v7024_v20 = vadd.f32 %v6962_v47, %v6725_v48  ;;  %v8470_v48 = vrot.slane %v8468_v40, 4  ;;  %v6304_v61 = vadd.f32 %v6303_v62, %v13535_v4  ;;  %v13722_v40 = vld [vmem:[#allocation3 + $0x28] sm:$0xf]  ;;  %v8485_v16 = vrot.slane %v8484_v7, 4 }
 0x4b3   : > { %10882 = vmatmul.msk.bf16.gmra.mxu0 %vm5981_vm7, %v7527_v57  ;;  %v8492_v4 = vshrl.u32 %v8422_v59, 16  ;;  %v8495_v62 = vshll.u32 %v8422_v59, 16 }
 0x4b4   : > { %v6665_v42 = vpop.f32.mrf.mxu2  ;;  %10719 = vmatmul.msk.bf16.gmra.mxu1 %vm5981_vm7, %v11167_v55  ;;  %v13713_v17 = vadd.f32 %v7628_v44, %v7024_v20  ;;  %v7511_v44 = vunpack.c.l.b16 %v7465_v50  ;;  %v7512_v55 = vunpack.c.l.b16 %v7475_v10  ;;  %v8474_v47 = vor.u32 %v8473_v12, %v8470_v48 }
 0x4b5   : > { %v6726_v45 = vadd.f32 %v6665_v42, %v6301_v52  ;;  %v9151_v42 = vrot.slane %v13706_v2, 5  ;;  %v8501_v48 = vshll.u32 %v13722_v40, 16  ;;  %v8505_v12 = vshrl.u32 %v13722_v40, 16 }
 0x4b6   : > { %v7528_v25 = vpack.c.b16 %v7512_v55, %v7511_v44  ;;  %v8475_v52 = vrot.slane %v8474_v47, 4  ;;  %v11048_v2 = vrot.slane %v9085_v28, 9  ;;  %v8494_v59 = vrot.slane %v8492_v4, 4  ;;  %v11196_v28 = vld [vmem:[#allocation3 + $0x18] sm:$0xff] }
 0x4b7   : > { %v9153_v7 = vrot.slane %v9151_v42, 4 }
 0x4b8   : > { %v7630_v21 = vpop.f32.mrf.mxu0  ;;  %v8480_v47 = vsel %vm13244_vm5, %v8475_v52, %v8479_v24  ;;  %v8507_v24 = vrot.slane %v8505_v12, 4 }
 0x4b9   : > { %v6964_v32 = vpop.f32.mrf.mxu3  ;;  %10763 = vmatmul.msk.bf16.gmra.mxu2 %vm5981_vm7, %v6563_v56  ;;  %v6305_v57 = vpop.f32.mrf.mxu1 }
 0x4ba   : > { %v7025_v60 = vadd.f32 %v6964_v32, %v6726_v45  ;;  %v7783_v32 = vrot.slane %v11382_v18, 5 }
 0x4bc   : > { %v6668_v14 = vpop.f32.mrf.mxu2  ;;  %v13726_v45 = vadd.f32 %v7630_v21, %v7025_v60  ;;  %v7711_v21 = vld [vmem:[#allocation3 + $0x18] sm:$0xe]  ;;  %v6306_v60 = vadd.f32 %v6305_v57, %v13553_v36  ;;  %v8856_v36 = vunpack.c.l.b16 %v8480_v47 }
 0x4bd   : > { %v6727_v20 = vadd.f32 %v6668_v14, %v6304_v61  ;;  %v8490_v61 = vsel %vm13244_vm5, %v8485_v16, %v8489_v3  ;;  %v10885_v18 = vrot.slane %v7711_v21, 9  ;;  %v13742_v16 = vld [vmem:[#allocation3 + $0x2c] sm:$0x1]  ;;  %v9152_v3 = vsel %vm13382_vm12, %v11048_v2, %v9151_v42 }
 0x4be   : > { %10855 = vmatmul.msk.bf16.gmra.mxu3 %vm5981_vm7, %v11189_v38  ;;  %v11383_v38 = vld [vmem:[#allocation3 + $0x20] sm:$0x1]  ;;  %v8857_v57 = vunpack.c.l.b16 %v8490_v61  ;;  %v8511_v47 = vshll.u32 %v13742_v16, 16 }
 0x4bf   : > { %v7786_v44 = vrot.slane %v11383_v38, 5 }
 0x4c0   : > { %v7633_v56 = vpop.f32.mrf.mxu0  ;;  %v8888_v42 = vpack.c.b16 %v8857_v57, %v8856_v36  ;;  %v11384_v57 = vld [vmem:[#allocation3 + $0x28] sm:$0xf] }
 0x4c1   : > { %v6967_v50 = vpop.f32.mrf.mxu3  ;;  %v6308_v10 = vpop.f32.mrf.mxu1 }
 0x4c2   : > { %v7026_v55 = vadd.f32 %v6967_v50, %v6727_v20  ;;  %v8497_v20 = vrot.slane %v8495_v62, 5  ;;  %v13738_v50 = vrot.slane %v8501_v48, 5  ;;  %v6309_v2 = vadd.f32 %v6308_v10, %v13454_v27 }
 0x4c3   : > { %10883 = vmatmul.msk.bf16.gmra.mxu0 %vm5981_vm7, %v7528_v25  ;;  %v7785_v25 = vrot.slane %v7783_v32, 4 }
 0x4c4   : > { %v6670_v14 = vpop.f32.mrf.mxu2  ;;  %10912 = vmatmul.msk.bf16.vlgmr.msra.gmra.mxu1 %vm5981_vm7, %v13702_v58  ;;  %v13740_v38 = vadd.f32 %v7633_v56, %v7026_v55  ;;  %v9155_v58 = vsel %vm13382_vm12, %v9153_v7, %v9154_v11  ;;  %v8498_v4 = vor.u32 %v8497_v20, %v8494_v59  ;;  %v7784_v56 = vsel %vm13382_vm12, %v10885_v18, %v7783_v32  ;;  %v8425_v18 = vld [vmem:[#allocation3 + $0x30] sm:$0xf] }
 0x4c5   : > { %v6728_v52 = vadd.f32 %v6670_v14, %v6306_v60  ;;  %v7787_v12 = vsel %vm13382_vm12, %v7785_v25, %v7786_v44  ;;  %v8508_v55 = vor.u32 %v8507_v24, %v13738_v50  ;;  %v9266_v60 = vunpack.c.l.b16 %v9152_v3  ;;  %v9086_v44 = vld [vmem:[#allocation3 + $0x24] sm:$0xe] }
 0x4c6   : > { %v9267_v61 = vunpack.c.l.b16 %v9155_v58  ;;  %v7893_v11 = vunpack.c.l.b16 %v7784_v56  ;;  %v7894_v14 = vunpack.c.l.b16 %v7787_v12  ;;  %v8499_v20 = vrot.slane %v8498_v4, 4 }
 0x4c7   : > { %v8513_v32 = vrot.slane %v8511_v47, 5  ;;  %v9158_v25 = vrot.slane %v13722_v40, 5  ;;  %v7790_v3 = vrot.slane %v11384_v57, 5  ;;  %v11049_v12 = vrot.slane %v9086_v44, 9 }
 0x4c8   : > { %v7635_v49 = vpop.f32.mrf.mxu0  ;;  %v9298_v24 = vpack.c.b16 %v9267_v61, %v9266_v60  ;;  %v7924_v10 = vpack.c.b16 %v7894_v14, %v7893_v11  ;;  %v8504_v4 = vsel %vm13244_vm5, %v8499_v20, %v13738_v50  ;;  %v8516_v40 = vshrl.u32 %v8425_v18, 16  ;;  %v11385_v50 = vld [vmem:[#allocation3 + $0x2c] sm:$0x1] }
 0x4c9   : > { %v6969_v62 = vpop.f32.mrf.mxu3  ;;  %11004 = vmatmul.msk.bf16.vlgmr.msra.gmra.mxu2 %vm5981_vm7, %v11196_v28  ;;  %v6310_v48 = vpop.f32.mrf.mxu1  ;;  %v8509_v28 = vrot.slane %v8508_v55, 4  ;;  %v7712_v55 = vld [vmem:[#allocation3 + $0x24] sm:$0xe]  ;;  %v9160_v60 = vrot.slane %v9158_v25, 4  ;;  %v9161_v61 = vrot.slane %v13742_v16, 5  ;;  %v8858_v14 = vunpack.c.l.b16 %v8504_v4 }
 0x4ca   : > { %v7027_v21 = vadd.f32 %v6969_v62, %v6728_v52  ;;  %v13758_v52 = vld [vmem:[#allocation3 + $0x34] sm:$0xf]  ;;  %v10886_v20 = vrot.slane %v7712_v55, 9  ;;  %v13785_v55 = vld [vmem:[#allocation3 + $0x38] sm:$0x1] }
 0x4cb   : > { %v8514_v56 = vsel %vm13244_vm5, %v8509_v28, %v8513_v32  ;;  %v11197_v32 = vld [vmem:[#allocation3 + $0x24] sm:$0xff] }
 0x4cc   : > { %v6673_v7 = vpop.f32.mrf.mxu2  ;;  %v13760_v36 = vadd.f32 %v7635_v49, %v7027_v21  ;;  %v8525_v49 = vshll.u32 %v13758_v52, 16  ;;  %v8529_v21 = vshrl.u32 %v13758_v52, 16  ;;  %v8859_v44 = vunpack.c.l.b16 %v8514_v56 }
 0x4cd   : > { %v6729_v59 = vadd.f32 %v6673_v7, %v6309_v2  ;;  %v6311_v2 = vadd.f32 %v6310_v48, %v13471_v5  ;;  %v7793_v7 = vrot.slane %v11385_v50, 5  ;;  %v8518_v5 = vrot.slane %v8516_v40, 4 }
 0x4ce   : > { %11032 = vmatmul.msk.bf16.vlgmr.msra.gmra.mxu3 %vm5981_vm7, %v8888_v42  ;;  %v8519_v42 = vshll.u32 %v8425_v18, 16  ;;  %v9159_v18 = vsel %vm13382_vm12, %v11049_v12, %v9158_v25  ;;  %v13777_v57 = vrot.slane %v8525_v49, 5  ;;  %v8531_v16 = vrot.slane %v8529_v21, 4 }
 0x4cf   : > { %v7791_v4 = vsel %vm13382_vm12, %v10886_v20, %v7790_v3  ;;  %v9268_v12 = vunpack.c.l.b16 %v9159_v18  ;;  %v13791_v20 = vld [vmem:[#allocation3 + $0x40] sm:$0xf]  ;;  %v9087_v18 = vld [vmem:[#allocation3 + $0x30] sm:$0xe] }
 0x4d0   : > { %v7638_v27 = vpop.f32.mrf.mxu0  ;;  %v8521_v48 = vrot.slane %v8519_v42, 5  ;;  %v8532_v21 = vor.u32 %v8531_v16, %v13777_v57 }
 0x4d1   : > { %v6972_v58 = vpop.f32.mrf.mxu3  ;;  %v6313_v62 = vpop.f32.mrf.mxu1 }
 0x4d2   : > { %v7028_v47 = vadd.f32 %v6972_v58, %v6729_v59  ;;  %v7792_v59 = vrot.slane %v7790_v3, 4  ;;  %v9162_v58 = vsel %vm13382_vm12, %v9160_v60, %v9161_v61  ;;  %v8522_v49 = vor.u32 %v8521_v48, %v8518_v5 }
 0x4d3   : > { %11076 = vmatmul.msk.bf16.vlgmr.msra.gmra.mxu0 %vm5981_vm7, %v9298_v24  ;;  %v9269_v42 = vunpack.c.l.b16 %v9162_v58  ;;  %v7895_v60 = vunpack.c.l.b16 %v7791_v4  ;;  %v8535_v61 = vshll.u32 %v13785_v55, 16  ;;  %v9165_v5 = vrot.slane %v13758_v52, 5  ;;  %v7713_v52 = vld [vmem:[#allocation3 + $0x30] sm:$0xe] }
 0x4d4   : > { %v6675_v11 = vpop.f32.mrf.mxu2  ;;  %10913 = vmatmul.msk.bf16.gmra.mxu1 %vm5981_vm7, %v7924_v10  ;;  %v13775_v24 = vadd.f32 %v7638_v27, %v7028_v47  ;;  %v7794_v56 = vsel %vm13382_vm12, %v7792_v59, %v7793_v7  ;;  %v8889_v27 = vpack.c.b16 %v8859_v44, %v8858_v14  ;;  %v8523_v59 = vrot.slane %v8522_v49, 4 }
 0x4d5   : > { %v6730_v28 = vadd.f32 %v6675_v11, %v6311_v2  ;;  %v6314_v2 = vadd.f32 %v6313_v62, %v13486_v35  ;;  %v7896_v3 = vunpack.c.l.b16 %v7794_v56  ;;  %v8428_v11 = vld [vmem:[#allocation3 + $0x3c] sm:$0xf]  ;;  %v9299_v14 = vpack.c.b16 %v9269_v42, %v9268_v12  ;;  %v11387_v42 = vld [vmem:[#allocation3 + $0x38] sm:$0x1] }
 0x4d6   : > { %v8537_v44 = vrot.slane %v8535_v61, 5  ;;  %v8540_v48 = vshrl.u32 %v8428_v11, 16  ;;  %v8543_v16 = vshll.u32 %v8428_v11, 16  ;;  %v8549_v58 = vshll.u32 %v13791_v20, 16 }
 0x4d7   : > { %v8553_v4 = vshrl.u32 %v13791_v20, 16  ;;  %v7800_v49 = vrot.slane %v11387_v42, 5  ;;  %v9167_v61 = vrot.slane %v9165_v5, 4 }
 0x4d8   : > { %v7640_v10 = vpop.f32.mrf.mxu0  ;;  %v8545_v11 = vrot.slane %v8543_v16, 5 }
 0x4d9   : > { %v6974_v25 = vpop.f32.mrf.mxu3  ;;  %11005 = vmatmul.msk.bf16.gmra.mxu2 %vm5981_vm7, %v11197_v32  ;;  %v6315_v40 = vpop.f32.mrf.mxu1  ;;  %v7925_v32 = vpack.c.b16 %v7896_v3, %v7895_v60  ;;  %v9168_v60 = vrot.slane %v13785_v55, 5  ;;  %v8555_v55 = vrot.slane %v8553_v4, 4 }
 0x4da   : > { %v7029_v47 = vadd.f32 %v6974_v25, %v6730_v28  ;;  %v8533_v28 = vrot.slane %v8532_v21, 4 }
 0x4dc   : > { %v6678_v50 = vpop.f32.mrf.mxu2  ;;  %v13795_v35 = vadd.f32 %v7640_v10, %v7029_v47  ;;  %v6316_v10 = vadd.f32 %v6315_v40, %v13506_v26  ;;  %v8528_v47 = vsel %vm13244_vm5, %v8523_v59, %v13777_v57  ;;  %v8538_v3 = vsel %vm13244_vm5, %v8533_v28, %v8537_v44  ;;  %v13812_v59 = vld [vmem:[#allocation3 + $0x44] sm:$0x1] }
 0x4dd   : > { %v6731_v7 = vadd.f32 %v6678_v50, %v6314_v2  ;;  %v11050_v2 = vrot.slane %v9087_v18, 9  ;;  %v13808_v18 = vrot.slane %v8549_v58, 5  ;;  %v8860_v42 = vunpack.c.l.b16 %v8528_v47 }
 0x4de   : > { %11033 = vmatmul.msk.bf16.gmra.mxu3 %vm5981_vm7, %v8889_v27  ;;  %v11386_v27 = vld [vmem:[#allocation3 + $0x34] sm:$0xf]  ;;  %v8861_v57 = vunpack.c.l.b16 %v8538_v3 }
 0x4df   : > { %v7797_v12 = vrot.slane %v11386_v27, 5  ;;  %v10887_v27 = vrot.slane %v7713_v52, 9  ;;  %v9166_v44 = vsel %vm13382_vm12, %v11050_v2, %v9165_v5  ;;  %v8559_v52 = vshll.u32 %v13812_v59, 16 }
 0x4e0   : > { %v7643_v62 = vpop.f32.mrf.mxu0  ;;  %v8890_v5 = vpack.c.b16 %v8861_v57, %v8860_v42  ;;  %v11388_v57 = vld [vmem:[#allocation3 + $0x40] sm:$0xf] }
 0x4e1   : > { %v6977_v56 = vpop.f32.mrf.mxu3  ;;  %v6318_v25 = vpop.f32.mrf.mxu1  ;;  %v7799_v26 = vrot.slane %v7797_v12, 4 }
 0x4e2   : > { %v7030_v21 = vadd.f32 %v6977_v56, %v6731_v7  ;;  %v8542_v7 = vrot.slane %v8540_v48, 4  ;;  %v6319_v2 = vadd.f32 %v6318_v25, %v13522_v6 }
 0x4e3   : > { %11077 = vmatmul.msk.bf16.gmra.mxu0 %vm5981_vm7, %v9299_v14  ;;  %v11198_v14 = vld [vmem:[#allocation3 + $0x30] sm:$0xff]  ;;  %v7801_v4 = vsel %vm13382_vm12, %v7799_v26, %v7800_v49  ;;  %v9088_v49 = vld [vmem:[#allocation3 + $0x3c] sm:$0xe]  ;;  %v9172_v26 = vrot.slane %v13791_v20, 5 }
 0x4e4   : > { %v6680_v50 = vpop.f32.mrf.mxu2  ;;  %10914 = vmatmul.msk.bf16.gmra.mxu1 %vm5981_vm7, %v7925_v32  ;;  %v13810_v40 = vadd.f32 %v7643_v62, %v7030_v21  ;;  %v9169_v32 = vsel %vm13382_vm12, %v9167_v61, %v9168_v60  ;;  %v8546_v48 = vor.u32 %v8545_v11, %v8542_v7  ;;  %v7798_v62 = vsel %vm13382_vm12, %v10887_v27, %v7797_v12  ;;  %v8431_v27 = vld [vmem:[#allocation3 + $0x48] sm:$0xf] }
 0x4e5   : > { %v6732_v56 = vadd.f32 %v6680_v50, %v6316_v10  ;;  %v8556_v21 = vor.u32 %v8555_v55, %v13808_v18  ;;  %v9270_v60 = vunpack.c.l.b16 %v9166_v44  ;;  %v9271_v47 = vunpack.c.l.b16 %v9169_v32 }
 0x4e6   : > { %v7897_v61 = vunpack.c.l.b16 %v7798_v62  ;;  %v7898_v50 = vunpack.c.l.b16 %v7801_v4  ;;  %v8547_v11 = vrot.slane %v8546_v48, 4  ;;  %v8561_v12 = vrot.slane %v8559_v52, 5 }
 0x4e7   : > { %v9300_v55 = vpack.c.b16 %v9271_v47, %v9270_v60  ;;  %v7804_v44 = vrot.slane %v11388_v57, 5  ;;  %v11051_v4 = vrot.slane %v9088_v49, 9  ;;  %v8564_v20 = vshrl.u32 %v8431_v27, 16 }
 0x4e8   : > { %v7645_v28 = vpop.f32.mrf.mxu0  ;;  %v7926_v25 = vpack.c.b16 %v7898_v50, %v7897_v61  ;;  %v8552_v48 = vsel %vm13244_vm5, %v8547_v11, %v13808_v18  ;;  %v9174_v60 = vrot.slane %v9172_v26, 4  ;;  %v9175_v47 = vrot.slane %v13812_v59, 5  ;;  %v11389_v18 = vld [vmem:[#allocation3 + $0x44] sm:$0x1] }
 0x4e9   : > { %v6979_v16 = vpop.f32.mrf.mxu3  ;;  %11006 = vmatmul.msk.bf16.gmra.mxu2 %vm5981_vm7, %v11198_v14  ;;  %v6320_v58 = vpop.f32.mrf.mxu1  ;;  %v8557_v14 = vrot.slane %v8556_v21, 4  ;;  %v7714_v21 = vld [vmem:[#allocation3 + $0x3c] sm:$0xe]  ;;  %v8862_v50 = vunpack.c.l.b16 %v8552_v48 }
 0x4ea   : > { %v7031_v10 = vadd.f32 %v6979_v16, %v6732_v56  ;;  %v13828_v56 = vld [vmem:[#allocation3 + $0x4c] sm:$0xf]  ;;  %v10888_v11 = vrot.slane %v7714_v21, 9  ;;  %v13855_v21 = vld [vmem:[#allocation3 + $0x50] sm:$0x1] }
 0x4eb   : > { %v8562_v62 = vsel %vm13244_vm5, %v8557_v14, %v8561_v12  ;;  %v11199_v12 = vld [vmem:[#allocation3 + $0x3c] sm:$0xff] }
 0x4ec   : > { %v6683_v3 = vpop.f32.mrf.mxu2  ;;  %v13830_v42 = vadd.f32 %v7645_v28, %v7031_v10  ;;  %v8573_v28 = vshll.u32 %v13828_v56, 16  ;;  %v8577_v10 = vshrl.u32 %v13828_v56, 16  ;;  %v8863_v49 = vunpack.c.l.b16 %v8562_v62 }
 0x4ed   : > { %v6733_v7 = vadd.f32 %v6683_v3, %v6319_v2  ;;  %v6321_v2 = vadd.f32 %v6320_v58, %v13537_v39  ;;  %v7807_v3 = vrot.slane %v11389_v18, 5  ;;  %v8566_v39 = vrot.slane %v8564_v20, 4 }
 0x4ee   : > { %11034 = vmatmul.msk.bf16.gmra.mxu3 %vm5981_vm7, %v8890_v5  ;;  %v8567_v5 = vshll.u32 %v8431_v27, 16  ;;  %v9173_v27 = vsel %vm13382_vm12, %v11051_v4, %v9172_v26  ;;  %v13847_v57 = vrot.slane %v8573_v28, 5  ;;  %v8579_v59 = vrot.slane %v8577_v10, 4 }
 0x4ef   : > { %v7805_v48 = vsel %vm13382_vm12, %v10888_v11, %v7804_v44  ;;  %v9272_v4 = vunpack.c.l.b16 %v9173_v27  ;;  %v13861_v11 = vld [vmem:[#allocation3 + $0x58] sm:$0xf]  ;;  %v9089_v27 = vld [vmem:[#allocation3 + $0x48] sm:$0xe] }
 0x4f0   : > { %v7648_v6 = vpop.f32.mrf.mxu0  ;;  %v8569_v58 = vrot.slane %v8567_v5, 5  ;;  %v8580_v10 = vor.u32 %v8579_v59, %v13847_v57 }
 0x4f1   : > { %v6982_v32 = vpop.f32.mrf.mxu3  ;;  %v6323_v16 = vpop.f32.mrf.mxu1 }
 0x4f2   : > { %v7032_v52 = vadd.f32 %v6982_v32, %v6733_v7  ;;  %v7806_v7 = vrot.slane %v7804_v44, 4  ;;  %v9176_v32 = vsel %vm13382_vm12, %v9174_v60, %v9175_v47  ;;  %v8570_v28 = vor.u32 %v8569_v58, %v8566_v39 }
 0x4f3   : > { %11078 = vmatmul.msk.bf16.gmra.mxu0 %vm5981_vm7, %v9300_v55  ;;  %v9273_v5 = vunpack.c.l.b16 %v9176_v32  ;;  %v7899_v60 = vunpack.c.l.b16 %v7805_v48  ;;  %v8583_v47 = vshll.u32 %v13855_v21, 16  ;;  %v9179_v39 = vrot.slane %v13828_v56, 5  ;;  %v7715_v56 = vld [vmem:[#allocation3 + $0x48] sm:$0xe] }
 0x4f4   : > { %v6685_v61 = vpop.f32.mrf.mxu2  ;;  %10915 = vmatmul.msk.bf16.gmra.mxu1 %vm5981_vm7, %v7926_v25  ;;  %v13845_v55 = vadd.f32 %v7648_v6, %v7032_v52  ;;  %v7808_v62 = vsel %vm13382_vm12, %v7806_v7, %v7807_v3  ;;  %v8891_v6 = vpack.c.b16 %v8863_v49, %v8862_v50  ;;  %v8571_v7 = vrot.slane %v8570_v28, 4 }
 0x4f5   : > { %v6734_v14 = vadd.f32 %v6685_v61, %v6321_v2  ;;  %v6324_v2 = vadd.f32 %v6323_v16, %v13555_v15  ;;  %v7900_v44 = vunpack.c.l.b16 %v7808_v62  ;;  %v8434_v61 = vld [vmem:[#allocation3 + $0x54] sm:$0xf]  ;;  %v9301_v50 = vpack.c.b16 %v9273_v5, %v9272_v4  ;;  %v11391_v5 = vld [vmem:[#allocation3 + $0x50] sm:$0x1] }
 0x4f6   : > { %v8585_v49 = vrot.slane %v8583_v47, 5  ;;  %v8588_v58 = vshrl.u32 %v8434_v61, 16  ;;  %v8591_v59 = vshll.u32 %v8434_v61, 16  ;;  %v8597_v32 = vshll.u32 %v13861_v11, 16 }
 0x4f7   : > { %v8601_v48 = vshrl.u32 %v13861_v11, 16  ;;  %v7814_v28 = vrot.slane %v11391_v5, 5  ;;  %v9181_v47 = vrot.slane %v9179_v39, 4 }
 0x4f8   : > { %v7650_v25 = vpop.f32.mrf.mxu0  ;;  %v8593_v61 = vrot.slane %v8591_v59, 5 }
 0x4f9   : > { %v6984_v26 = vpop.f32.mrf.mxu3  ;;  %11007 = vmatmul.msk.bf16.gmra.mxu2 %vm5981_vm7, %v11199_v12  ;;  %v6325_v20 = vpop.f32.mrf.mxu1  ;;  %v7927_v12 = vpack.c.b16 %v7900_v44, %v7899_v60  ;;  %v9182_v60 = vrot.slane %v13855_v21, 5  ;;  %v8603_v21 = vrot.slane %v8601_v48, 4 }
 0x4fa   : > { %v7033_v52 = vadd.f32 %v6984_v26, %v6734_v14  ;;  %v8581_v14 = vrot.slane %v8580_v10, 4 }
 0x4fc   : > { %v6688_v18 = vpop.f32.mrf.mxu2  ;;  %v13865_v15 = vadd.f32 %v7650_v25, %v7033_v52  ;;  %v6326_v25 = vadd.f32 %v6325_v20, %v13568_v51  ;;  %v8576_v52 = vsel %vm13244_vm5, %v8571_v7, %v13847_v57  ;;  %v8586_v44 = vsel %vm13244_vm5, %v8581_v14, %v8585_v49  ;;  %v13882_v7 = vld [vmem:[#allocation3 + $0x5c] sm:$0x1] }
 0x4fd   : > { %v6735_v3 = vadd.f32 %v6688_v18, %v6324_v2  ;;  %v11052_v2 = vrot.slane %v9089_v27, 9  ;;  %v13878_v27 = vrot.slane %v8597_v32, 5  ;;  %v8864_v5 = vunpack.c.l.b16 %v8576_v52 }
 0x4fe   : > { %11035 = vmatmul.msk.bf16.gmra.mxu3 %vm5981_vm7, %v8891_v6  ;;  %v11390_v6 = vld [vmem:[#allocation3 + $0x4c] sm:$0xf]  ;;  %v8865_v57 = vunpack.c.l.b16 %v8586_v44 }
 0x4ff   : > { %v7811_v4 = vrot.slane %v11390_v6, 5  ;;  %v10889_v6 = vrot.slane %v7715_v56, 9  ;;  %v9180_v49 = vsel %vm13382_vm12, %v11052_v2, %v9179_v39  ;;  %v8607_v56 = vshll.u32 %v13882_v7, 16 }
 0x500   : > { %v7653_v16 = vpop.f32.mrf.mxu0  ;;  %v8892_v39 = vpack.c.b16 %v8865_v57, %v8864_v5  ;;  %v11392_v57 = vld [vmem:[#allocation3 + $0x58] sm:$0xf] }
 0x501   : > { %v6987_v62 = vpop.f32.mrf.mxu3  ;;  %v6328_v26 = vpop.f32.mrf.mxu1  ;;  %v7813_v51 = vrot.slane %v7811_v4, 4 }
 0x502   : > { %v7034_v10 = vadd.f32 %v6987_v62, %v6735_v3  ;;  %v8590_v3 = vrot.slane %v8588_v58, 4  ;;  %v6329_v2 = vadd.f32 %v6328_v26, %v13464_v46 }
 0x503   : > { %11079 = vmatmul.msk.bf16.gmra.mxu0 %vm5981_vm7, %v9301_v50  ;;  %v11200_v50 = vld [vmem:[#allocation3 + $0x48] sm:$0xff]  ;;  %v7815_v48 = vsel %vm13382_vm12, %v7813_v51, %v7814_v28  ;;  %v9090_v28 = vld [vmem:[#allocation3 + $0x54] sm:$0xe]  ;;  %v9186_v51 = vrot.slane %v13861_v11, 5 }
 0x504   : > { %v6690_v18 = vpop.f32.mrf.mxu2  ;;  %10916 = vmatmul.msk.bf16.gmra.mxu1 %vm5981_vm7, %v7927_v12  ;;  %v13880_v20 = vadd.f32 %v7653_v16, %v7034_v10  ;;  %v9183_v12 = vsel %vm13382_vm12, %v9181_v47, %v9182_v60  ;;  %v8594_v58 = vor.u32 %v8593_v61, %v8590_v3  ;;  %v7812_v16 = vsel %vm13382_vm12, %v10889_v6, %v7811_v4  ;;  %v8437_v6 = vld [vmem:[#allocation3 + $0x60] sm:$0xf] }
 0x505   : > { %v6736_v62 = vadd.f32 %v6690_v18, %v6326_v25  ;;  %v8604_v10 = vor.u32 %v8603_v21, %v13878_v27  ;;  %v9274_v60 = vunpack.c.l.b16 %v9180_v49  ;;  %v9275_v52 = vunpack.c.l.b16 %v9183_v12 }
 0x506   : > { %v7901_v47 = vunpack.c.l.b16 %v7812_v16  ;;  %v7902_v18 = vunpack.c.l.b16 %v7815_v48  ;;  %v8595_v61 = vrot.slane %v8594_v58, 4  ;;  %v8609_v4 = vrot.slane %v8607_v56, 5 }
 0x507   : > { %v9302_v21 = vpack.c.b16 %v9275_v52, %v9274_v60  ;;  %v7818_v49 = vrot.slane %v11392_v57, 5  ;;  %v11053_v48 = vrot.slane %v9090_v28, 9  ;;  %v8612_v11 = vshrl.u32 %v8437_v6, 16 }
 0x508   : > { %v7655_v14 = vpop.f32.mrf.mxu0  ;;  %v7928_v26 = vpack.c.b16 %v7902_v18, %v7901_v47  ;;  %v8600_v58 = vsel %vm13244_vm5, %v8595_v61, %v13878_v27  ;;  %v9188_v60 = vrot.slane %v9186_v51, 4  ;;  %v9189_v52 = vrot.slane %v13882_v7, 5  ;;  %v11393_v27 = vld [vmem:[#allocation3 + $0x5c] sm:$0x1] }
 0x509   : > { %v6989_v59 = vpop.f32.mrf.mxu3  ;;  %11008 = vmatmul.msk.bf16.gmra.mxu2 %vm5981_vm7, %v11200_v50  ;;  %v6330_v32 = vpop.f32.mrf.mxu1  ;;  %v8605_v50 = vrot.slane %v8604_v10, 4  ;;  %v7716_v10 = vld [vmem:[#allocation3 + $0x54] sm:$0xe]  ;;  %v8866_v18 = vunpack.c.l.b16 %v8600_v58 }
 0x50a   : > { %v7035_v25 = vadd.f32 %v6989_v59, %v6736_v62  ;;  %v13898_v62 = vld [vmem:[#allocation3 + $0x64] sm:$0xf]  ;;  %v10890_v61 = vrot.slane %v7716_v10, 9  ;;  %v13925_v10 = vld [vmem:[#allocation3 + $0x68] sm:$0x1] }
 0x50b   : > { %v8610_v16 = vsel %vm13244_vm5, %v8605_v50, %v8609_v4  ;;  %v11201_v4 = vld [vmem:[#allocation3 + $0x54] sm:$0xff] }
 0x50c   : > { %v6693_v44 = vpop.f32.mrf.mxu2  ;;  %v13900_v5 = vadd.f32 %v7655_v14, %v7035_v25  ;;  %v8621_v14 = vshll.u32 %v13898_v62, 16  ;;  %v8625_v25 = vshrl.u32 %v13898_v62, 16  ;;  %v8867_v28 = vunpack.c.l.b16 %v8610_v16 }
 0x50d   : > { %v6737_v3 = vadd.f32 %v6693_v44, %v6329_v2  ;;  %v6331_v2 = vadd.f32 %v6330_v32, %v13480_v53  ;;  %v7821_v44 = vrot.slane %v11393_v27, 5  ;;  %v8614_v53 = vrot.slane %v8612_v11, 4 }
 0x50e   : > { %11036 = vmatmul.msk.bf16.gmra.mxu3 %vm5981_vm7, %v8892_v39  ;;  %v8615_v39 = vshll.u32 %v8437_v6, 16  ;;  %v9187_v6 = vsel %vm13382_vm12, %v11053_v48, %v9186_v51  ;;  %v13917_v57 = vrot.slane %v8621_v14, 5  ;;  %v8627_v7 = vrot.slane %v8625_v25, 4 }
 0x50f   : > { %v7819_v58 = vsel %vm13382_vm12, %v10890_v61, %v7818_v49  ;;  %v9276_v48 = vunpack.c.l.b16 %v9187_v6  ;;  %v13931_v61 = vld [vmem:[#allocation3 + $0x70] sm:$0xf]  ;;  %v9091_v6 = vld [vmem:[#allocation3 + $0x60] sm:$0xe] }
 0x510   : > { %v7658_v46 = vpop.f32.mrf.mxu0  ;;  %v8617_v32 = vrot.slane %v8615_v39, 5  ;;  %v8628_v25 = vor.u32 %v8627_v7, %v13917_v57 }
 0x511   : > { %v6992_v12 = vpop.f32.mrf.mxu3  ;;  %v6333_v59 = vpop.f32.mrf.mxu1 }
 0x512   : > { %v7036_v56 = vadd.f32 %v6992_v12, %v6737_v3  ;;  %v7820_v3 = vrot.slane %v7818_v49, 4  ;;  %v9190_v12 = vsel %vm13382_vm12, %v9188_v60, %v9189_v52  ;;  %v8618_v14 = vor.u32 %v8617_v32, %v8614_v53 }
 0x513   : > { %11080 = vmatmul.msk.bf16.gmra.mxu0 %vm5981_vm7, %v9302_v21  ;;  %v9277_v39 = vunpack.c.l.b16 %v9190_v12  ;;  %v7903_v60 = vunpack.c.l.b16 %v7819_v58  ;;  %v8631_v52 = vshll.u32 %v13925_v10, 16  ;;  %v9193_v53 = vrot.slane %v13898_v62, 5  ;;  %v7717_v62 = vld [vmem:[#allocation3 + $0x60] sm:$0xe] }
 0x514   : > { %v6695_v47 = vpop.f32.mrf.mxu2  ;;  %10917 = vmatmul.msk.bf16.gmra.mxu1 %vm5981_vm7, %v7928_v26  ;;  %v13915_v21 = vadd.f32 %v7658_v46, %v7036_v56  ;;  %v7822_v16 = vsel %vm13382_vm12, %v7820_v3, %v7821_v44  ;;  %v8893_v46 = vpack.c.b16 %v8867_v28, %v8866_v18  ;;  %v8619_v3 = vrot.slane %v8618_v14, 4 }
 0x515   : > { %v6738_v50 = vadd.f32 %v6695_v47, %v6331_v2  ;;  %v6334_v2 = vadd.f32 %v6333_v59, %v13496_v9  ;;  %v7904_v49 = vunpack.c.l.b16 %v7822_v16  ;;  %v8440_v47 = vld [vmem:[#allocation3 + $0x6c] sm:$0xf]  ;;  %v9303_v18 = vpack.c.b16 %v9277_v39, %v9276_v48  ;;  %v11395_v39 = vld [vmem:[#allocation3 + $0x68] sm:$0x1] }
 0x516   : > { %v8633_v28 = vrot.slane %v8631_v52, 5  ;;  %v8636_v32 = vshrl.u32 %v8440_v47, 16  ;;  %v8639_v7 = vshll.u32 %v8440_v47, 16  ;;  %v8645_v12 = vshll.u32 %v13931_v61, 16 }
 0x517   : > { %v8649_v58 = vshrl.u32 %v13931_v61, 16  ;;  %v7828_v14 = vrot.slane %v11395_v39, 5  ;;  %v9195_v52 = vrot.slane %v9193_v53, 4 }
 0x518   : > { %v7660_v26 = vpop.f32.mrf.mxu0  ;;  %v8641_v47 = vrot.slane %v8639_v7, 5 }
 0x519   : > { %v6994_v51 = vpop.f32.mrf.mxu3  ;;  %11009 = vmatmul.msk.bf16.gmra.mxu2 %vm5981_vm7, %v11201_v4  ;;  %v6335_v11 = vpop.f32.mrf.mxu1  ;;  %v7929_v4 = vpack.c.b16 %v7904_v49, %v7903_v60  ;;  %v9196_v60 = vrot.slane %v13925_v10, 5  ;;  %v8651_v10 = vrot.slane %v8649_v58, 4 }
 0x51a   : > { %v7037_v56 = vadd.f32 %v6994_v51, %v6738_v50  ;;  %v8629_v50 = vrot.slane %v8628_v25, 4 }
 0x51c   : > { %v6698_v27 = vpop.f32.mrf.mxu2  ;;  %v13935_v9 = vadd.f32 %v7660_v26, %v7037_v56  ;;  %v6336_v26 = vadd.f32 %v6335_v11, %v13511_v33  ;;  %v8624_v56 = vsel %vm13244_vm5, %v8619_v3, %v13917_v57  ;;  %v8634_v49 = vsel %vm13244_vm5, %v8629_v50, %v8633_v28  ;;  %v13950_v57 = vld [vmem:[#allocation3 + $0x74] sm:$0x1] }
 0x51d   : > { %v6739_v44 = vadd.f32 %v6698_v27, %v6334_v2  ;;  %v11054_v2 = vrot.slane %v9091_v6, 9  ;;  %v8647_v6 = vrot.slane %v8645_v12, 5  ;;  %v8868_v11 = vunpack.c.l.b16 %v8624_v56 }
 0x51e   : > { %11037 = vmatmul.msk.bf16.gmra.mxu3 %vm5981_vm7, %v8893_v46  ;;  %14759 = vst [vmem:[#allocation26_spill] sm:$0xff] %v13935_v9  ;;  %v11394_v46 = vld [vmem:[#allocation3 + $0x64] sm:$0xf]  ;;  %v8869_v9 = vunpack.c.l.b16 %v8634_v49 }
 0x51f   : > { %v7825_v48 = vrot.slane %v11394_v46, 5  ;;  %v11202_v46 = vld [vmem:[#allocation3 + $0x60] sm:$0xff]  ;;  %v9194_v50 = vsel %vm13382_vm12, %v11054_v2, %v9193_v53  ;;  %v8652_v58 = vor.u32 %v8651_v10, %v8647_v6 }
 0x520   : > { %v7663_v59 = vpop.f32.mrf.mxu0  ;;  %v9278_v2 = vunpack.c.l.b16 %v9194_v50 }
 0x521   : > { %v6997_v16 = vpop.f32.mrf.mxu3  ;;  %v6338_v51 = vpop.f32.mrf.mxu1  ;;  %v7827_v39 = vrot.slane %v7825_v48, 4 }
 0x522   : > { %v7038_v25 = vadd.f32 %v6997_v16, %v6739_v44  ;;  %v8638_v44 = vrot.slane %v8636_v32, 4  ;;  %v6339_v53 = vadd.f32 %v6338_v51, %v13527_v41 }
 0x523   : > { %11081 = vmatmul.msk.bf16.gmra.mxu0 %vm5981_vm7, %v9303_v18  ;;  %v10891_v18 = vrot.slane %v7717_v62, 9  ;;  %v7829_v12 = vsel %vm13382_vm12, %v7827_v39, %v7828_v14  ;;  %v8443_v14 = vld [vmem:[#allocation3 + $0x78] sm:$0xf] }
 0x524   : > { %v6700_v27 = vpop.f32.mrf.mxu2  ;;  %10918 = vmatmul.msk.bf16.gmra.mxu1 %vm5981_vm7, %v7929_v4  ;;  %v13948_v33 = vadd.f32 %v7663_v59, %v7038_v25  ;;  %v9197_v4 = vsel %vm13382_vm12, %v9195_v52, %v9196_v60  ;;  %v8642_v28 = vor.u32 %v8641_v47, %v8638_v44  ;;  %v8655_v25 = vshll.u32 %v13950_v57, 16 }
 0x525   : > { %v6740_v16 = vadd.f32 %v6700_v27, %v6336_v26  ;;  %v7826_v59 = vsel %vm13382_vm12, %v10891_v18, %v7825_v48  ;;  %v8894_v26 = vpack.c.b16 %v8869_v9, %v8868_v11  ;;  %v9279_v60 = vunpack.c.l.b16 %v9197_v4  ;;  %v9092_v48 = vld [vmem:[#allocation3 + $0x6c] sm:$0xe] }
 0x526   : > { %v7905_v49 = vunpack.c.l.b16 %v7826_v59  ;;  %v7906_v52 = vunpack.c.l.b16 %v7829_v12  ;;  %v8643_v44 = vrot.slane %v8642_v28, 4  ;;  %v8653_v47 = vrot.slane %v8652_v58, 4  ;;  %v11396_v59 = vld [vmem:[#allocation3 + $0x70] sm:$0xf] }
 0x527   : > { %v9304_v10 = vpack.c.b16 %v9279_v60, %v9278_v2  ;;  %v9200_v18 = vrot.slane %v13931_v61, 5  ;;  %v11055_v39 = vrot.slane %v9092_v48, 9  ;;  %v7832_v12 = vrot.slane %v11396_v59, 5 }
 0x528   : > { %v7665_v3 = vpop.f32.mrf.mxu0  ;;  %v7930_v51 = vpack.c.b16 %v7906_v52, %v7905_v49  ;;  %v8648_v4 = vsel %vm13244_vm5, %v8643_v44, %v8647_v6  ;;  %v8660_v58 = vshrl.u32 %v8443_v14, 16  ;;  %v9203_v6 = vrot.slane %v13950_v57, 5  ;;  %v11203_v44 = vld [vmem:[#allocation3 + $0x6c] sm:$0xff] }
 0x529   : > { %v6999_v32 = vpop.f32.mrf.mxu3  ;;  %11010 = vmatmul.msk.bf16.gmra.mxu2 %vm5981_vm7, %v11202_v46  ;;  %v6340_v7 = vpop.f32.mrf.mxu1  ;;  %v8657_v46 = vrot.slane %v8655_v25, 5  ;;  %v8663_v25 = vshll.u32 %v8443_v14, 16  ;;  %v8870_v60 = vunpack.c.l.b16 %v8648_v4  ;;  %v9201_v49 = vsel %vm13382_vm12, %v11055_v39, %v9200_v18  ;;  %v13987_v4 = vld [vmem:[#allocation3 + $0x80] sm:$0x1] }
 0x52a   : > { %v7039_v62 = vadd.f32 %v6999_v32, %v6740_v16  ;;  %v13965_v16 = vld [vmem:[#allocation3 + $0x7c] sm:$0xf]  ;;  %v7718_v32 = vld [vmem:[#allocation3 + $0x6c] sm:$0xe] }
 0x52b   : > { %v8658_v28 = vsel %vm13244_vm5, %v8653_v47, %v8657_v46  ;;  %v10892_v52 = vrot.slane %v7718_v32, 9  ;;  %v7834_v47 = vrot.slane %v7832_v12, 4  ;;  %v11397_v46 = vld [vmem:[#allocation3 + $0x74] sm:$0x1] }
 0x52c   : > { %v6703_v56 = vpop.f32.mrf.mxu2  ;;  %v13967_v9 = vadd.f32 %v7665_v3, %v7039_v62  ;;  %v8669_v3 = vshll.u32 %v13965_v16, 16  ;;  %v8673_v62 = vshrl.u32 %v13965_v16, 16  ;;  %v7835_v48 = vrot.slane %v11397_v46, 5 }
 0x52d   : > { %v6741_v27 = vadd.f32 %v6703_v56, %v6339_v53  ;;  %v9202_v53 = vrot.slane %v9200_v18, 4  ;;  %v8871_v56 = vunpack.c.l.b16 %v8658_v28  ;;  %v9280_v28 = vunpack.c.l.b16 %v9201_v49  ;;  %v13997_v49 = vld [vmem:[#allocation3 + $0x88] sm:$0xf] }
 0x52e   : > { %11038 = vmatmul.msk.bf16.gmra.mxu3 %vm5981_vm7, %v8894_v26  ;;  %v6341_v26 = vadd.f32 %v6340_v7, %v13549_v43  ;;  %v8662_v43 = vrot.slane %v8660_v58, 4  ;;  %v8665_v7 = vrot.slane %v8663_v25, 5  ;;  %v8675_v57 = vrot.slane %v8673_v62, 4 }
 0x52f   : > { %v8895_v39 = vpack.c.b16 %v8871_v56, %v8870_v60  ;;  %v7836_v59 = vsel %vm13382_vm12, %v7834_v47, %v7835_v48  ;;  %v8446_v60 = vld [vmem:[#allocation3 + $0x84] sm:$0xf]  ;;  %v9207_v46 = vrot.slane %v13965_v16, 5 }
 0x530   : > { %v7668_v41 = vpop.f32.mrf.mxu0  ;;  %v8666_v25 = vor.u32 %v8665_v7, %v8662_v43  ;;  %v8684_v48 = vshrl.u32 %v8446_v60, 16  ;;  %v8687_v7 = vshll.u32 %v8446_v60, 16 }
 0x531   : > { %v7002_v11 = vpop.f32.mrf.mxu3  ;;  %v6343_v50 = vpop.f32.mrf.mxu1 }
 0x532   : > { %v7040_v61 = vadd.f32 %v7002_v11, %v6741_v27  ;;  %v6344_v62 = vadd.f32 %v6343_v50, %v13564_v0 }
 0x533   : > { %11082 = vmatmul.msk.bf16.gmra.mxu0 %vm5981_vm7, %v9304_v10  ;;  %v13983_v10 = vrot.slane %v8669_v3, 5 }
 0x534   : > { %v6705_v2 = vpop.f32.mrf.mxu2  ;;  %10919 = vmatmul.msk.bf16.gmra.mxu1 %vm5981_vm7, %v7930_v51  ;;  %v13981_v14 = vadd.f32 %v7668_v41, %v7040_v61  ;;  %v9204_v51 = vsel %vm13382_vm12, %v9202_v53, %v9203_v6  ;;  %v7833_v41 = vsel %vm13382_vm12, %v10892_v52, %v7832_v12  ;;  %v8667_v52 = vrot.slane %v8666_v25, 4 }
 0x535   : > { %v6742_v27 = vadd.f32 %v6705_v2, %v6341_v26  ;;  %v9281_v61 = vunpack.c.l.b16 %v9204_v51  ;;  %v8676_v3 = vor.u32 %v8675_v57, %v13983_v10  ;;  %v8679_v26 = vshll.u32 %v13987_v4, 16 }
 0x536   : > { %v7907_v6 = vunpack.c.l.b16 %v7833_v41  ;;  %v7908_v2 = vunpack.c.l.b16 %v7836_v59  ;;  %v8693_v57 = vshll.u32 %v13997_v49, 16  ;;  %v8697_v51 = vshrl.u32 %v13997_v49, 16  ;;  %v11398_v59 = vld [vmem:[#allocation3 + $0x7c] sm:$0xf] }
 0x537   : > { %v9305_v12 = vpack.c.b16 %v9281_v61, %v9280_v28  ;;  %v8681_v47 = vrot.slane %v8679_v26, 5  ;;  %v7719_v28 = vld [vmem:[#allocation3 + $0x78] sm:$0xe]  ;;  %v7839_v61 = vrot.slane %v11398_v59, 5  ;;  %v8672_v16 = vsel %vm13244_vm5, %v8667_v52, %v13983_v10 }
 0x538   : > { %v7670_v11 = vpop.f32.mrf.mxu0  ;;  %v7931_v43 = vpack.c.b16 %v7908_v2, %v7907_v6  ;;  %v9209_v26 = vrot.slane %v9207_v46, 4  ;;  %v10893_v2 = vrot.slane %v7719_v28, 9  ;;  %v8695_v60 = vrot.slane %v8693_v57, 5  ;;  %v11204_v10 = vld [vmem:[#allocation3 + $0x78] sm:$0xff] }
 0x539   : > { %v7004_v18 = vpop.f32.mrf.mxu3  ;;  %11011 = vmatmul.msk.bf16.gmra.mxu2 %vm5981_vm7, %v11203_v44  ;;  %v6345_v32 = vpop.f32.mrf.mxu1  ;;  %v9093_v44 = vld [vmem:[#allocation3 + $0x78] sm:$0xe]  ;;  %v7841_v52 = vrot.slane %v7839_v61, 4 }
 0x53a   : > { %v7041_v58 = vadd.f32 %v7004_v18, %v6742_v27  ;;  %v8677_v27 = vrot.slane %v8676_v3, 4 }
 0x53c   : > { %v6708_v53 = vpop.f32.mrf.mxu2  ;;  %v14001_v0 = vadd.f32 %v7670_v11, %v7041_v58  ;;  %v9210_v11 = vrot.slane %v13987_v4, 5  ;;  %v6346_v58 = vadd.f32 %v6345_v32, %v13577_v19  ;;  %v11399_v4 = vld [vmem:[#allocation3 + $0x80] sm:$0x1]  ;;  %v8872_v19 = vunpack.c.l.b16 %v8672_v16 }
 0x53d   : > { %v6743_v56 = vadd.f32 %v6708_v53, %v6344_v62  ;;  %v8682_v62 = vsel %vm13244_vm5, %v8677_v27, %v8681_v47  ;;  %v8686_v53 = vrot.slane %v8684_v48, 4 }
 0x53e   : > { %11039 = vmatmul.msk.bf16.gmra.mxu3 %vm5981_vm7, %v8895_v39  ;;  %v11056_v39 = vrot.slane %v9093_v44, 9  ;;  %v8873_v32 = vunpack.c.l.b16 %v8682_v62  ;;  %v9211_v48 = vsel %vm13382_vm12, %v9209_v26, %v9210_v11 }
 0x53f   : > { %v9283_v11 = vunpack.c.l.b16 %v9211_v48 }
 0x540   : > { %v7673_v50 = vpop.f32.mrf.mxu0  ;;  %v9208_v47 = vsel %vm13382_vm12, %v11056_v39, %v9207_v46  ;;  %v8896_v16 = vpack.c.b16 %v8873_v32, %v8872_v19 }
 0x541   : > { %v7007_v18 = vpop.f32.mrf.mxu3  ;;  %v8008_v41 = vpop.f32.mrf.mxu1  ;;  %v9282_v39 = vunpack.c.l.b16 %v9208_v47 }
 0x542   : > { %v7042_v25 = vadd.f32 %v7007_v18, %v6743_v56  ;;  %v8088_v3 = vadd.f32 %v8008_v41, %v13589_v22  ;;  %v8689_v22 = vrot.slane %v8687_v7, 5  ;;  %v8699_v56 = vrot.slane %v8697_v51, 4  ;;  %v14017_v41 = vld [vmem:[#allocation3 + $0x8c] sm:$0x1] }
 0x543   : > { %11083 = vmatmul.msk.bf16.gmra.mxu0 %vm5981_vm7, %v9305_v12  ;;  %v7842_v18 = vrot.slane %v11399_v4, 5  ;;  %v8703_v59 = vshll.u32 %v14017_v41, 16  ;;  %v14032_v4 = vld [vmem:[#allocation3 + $0x94] sm:$0xf] }
 0x544   : > { %v6710_v6 = vpop.f32.mrf.mxu2  ;;  %10920 = vmatmul.msk.bf16.gmra.mxu1 %vm5981_vm7, %v7931_v43  ;;  %v14015_v12 = vadd.f32 %v7673_v50, %v7042_v25  ;;  %v8690_v43 = vor.u32 %v8689_v22, %v8686_v53  ;;  %v7840_v50 = vsel %vm13382_vm12, %v10893_v2, %v7839_v61  ;;  %v8700_v28 = vor.u32 %v8699_v56, %v8695_v60 }
 0x545   : > { %v6744_v44 = vadd.f32 %v6710_v6, %v6346_v58  ;;  %v7843_v51 = vsel %vm13382_vm12, %v7841_v52, %v7842_v18  ;;  %v7909_v62 = vunpack.c.l.b16 %v7840_v50  ;;  %v9094_v6 = vld [vmem:[#allocation3 + $0x84] sm:$0xe]  ;;  %v8705_v61 = vrot.slane %v8703_v59, 5  ;;  %v8449_v52 = vld [vmem:[#allocation3 + $0x90] sm:$0xf] }
 0x546   : > { %v7910_v26 = vunpack.c.l.b16 %v7843_v51  ;;  %v8691_v53 = vrot.slane %v8690_v43, 4  ;;  %v9214_v2 = vrot.slane %v13997_v49, 5  ;;  %v9306_v56 = vpack.c.b16 %v9283_v11, %v9282_v39  ;;  %v11400_v50 = vld [vmem:[#allocation3 + $0x88] sm:$0xf] }
 0x547   : > { %v8711_v47 = vshll.u32 %v8449_v52, 16  ;;  %v7846_v51 = vrot.slane %v11400_v50, 5 }
 0x548   : > { %v7675_v27 = vpop.f32.mrf.mxu0  ;;  %v7932_v19 = vpack.c.b16 %v7910_v26, %v7909_v62  ;;  %v8696_v32 = vsel %vm13244_vm5, %v8691_v53, %v8695_v60  ;;  %v8717_v60 = vshll.u32 %v14032_v4, 16 }
 0x549   : > { %v7009_v7 = vpop.f32.mrf.mxu3  ;;  %11012 = vmatmul.msk.bf16.gmra.mxu2 %vm5981_vm7, %v11204_v10  ;;  %v8010_v57 = vpop.f32.mrf.mxu1  ;;  %v8701_v10 = vrot.slane %v8700_v28, 4  ;;  %v8874_v39 = vunpack.c.l.b16 %v8696_v32  ;;  %v8713_v53 = vrot.slane %v8711_v47, 5 }
 0x54a   : > { %v7043_v25 = vadd.f32 %v7009_v7, %v6744_v44  ;;  %v8089_v46 = vadd.f32 %v8010_v57, %v13597_v31  ;;  %v11057_v44 = vrot.slane %v9094_v6, 9  ;;  %v9216_v7 = vrot.slane %v9214_v2, 4 }
 0x54b   : > { %v8706_v49 = vsel %vm13244_vm5, %v8701_v10, %v8705_v61  ;;  %v9217_v57 = vrot.slane %v14017_v41, 5  ;;  %v7848_v10 = vrot.slane %v7846_v51, 4  ;;  %v11401_v61 = vld [vmem:[#allocation3 + $0x8c] sm:$0x1]  ;;  %v14054_v32 = vrot.slane %v8717_v60, 5 }
 0x54c   : > { %v8307_v58 = vpop.f32.mrf.mxu2  ;;  %v14034_v31 = vadd.f32 %v7675_v27, %v7043_v25  ;;  %v14042_v27 = vld [vmem:[%s11625_s29] ss:$0 sm:$0xff]  ;;  %v7720_v25 = vld [vmem:[#allocation3 + $0x84] sm:$0xe]  ;;  %v9215_v11 = vsel %vm13382_vm12, %v11057_v44, %v9214_v2  ;;  %v8875_v62 = vunpack.c.l.b16 %v8706_v49  ;;  %v14056_v44 = vld [vmem:[#allocation3 + $0x98] sm:$0x1] }
 0x54d   : > { %v8387_v22 = vadd.f32 %v8307_v58, %v8088_v3  ;;  %v8708_v3 = vshrl.u32 %v8449_v52, 16  ;;  %v7849_v52 = vrot.slane %v11401_v61, 5 }
 0x54e   : > { %11040 = vmatmul.msk.bf16.gmra.mxu3 %vm5981_vm7, %v8896_v16  ;;  %v8721_v16 = vshrl.u32 %v14032_v4, 16 }
 0x54f   : > { %v8710_v26 = vrot.slane %v8708_v3, 4  ;;  %v8897_v3 = vpack.c.b16 %v8875_v62, %v8874_v39  ;;  %v8452_v62 = vld [vmem:[#allocation3 + $0x9c] sm:$0xf] }
 0x550   : > { %v9383_v18 = vpop.f32.mrf.mxu0  ;;  %v8723_v2 = vrot.slane %v8721_v16, 4  ;;  %v8727_v16 = vshll.u32 %v14056_v44, 16 }
 0x551   : > { %v8973_v48 = vpop.f32.mrf.mxu3  ;;  %v8013_v43 = vpop.f32.mrf.mxu1 }
 0x552   : > { %v9053_v28 = vadd.f32 %v8973_v48, %v8387_v22  ;;  %v8090_v59 = vadd.f32 %v8013_v43, %v13607_v63  ;;  %v11205_v63 = vld [vmem:[#allocation3 + $0x84] sm:$0xff]  ;;  %v10894_v22 = vrot.slane %v7720_v25, 9  ;;  %v8724_v60 = vor.u32 %v8723_v2, %v14054_v32 }
 0x553   : > { %11084 = vmatmul.msk.bf16.gmra.mxu0 %vm5981_vm7, %v9306_v56  ;;  %v9218_v56 = vsel %vm13382_vm12, %v9216_v7, %v9217_v57  ;;  %v7850_v7 = vsel %vm13382_vm12, %v7848_v10, %v7849_v52  ;;  %v8714_v57 = vor.u32 %v8713_v53, %v8710_v26  ;;  %v8732_v10 = vshrl.u32 %v8452_v62, 16 }
 0x554   : > { %v9463_v58 = vadd.f32 %v9383_v18, %v9053_v28  ;;  %v8309_v41 = vpop.f32.mrf.mxu2  ;;  %10921 = vmatmul.msk.bf16.gmra.mxu1 %vm5981_vm7, %v7932_v19  ;;  %v9285_v43 = vunpack.c.l.b16 %v9218_v56  ;;  %v7847_v50 = vsel %vm13382_vm12, %v10894_v22, %v7846_v51  ;;  %v8725_v53 = vrot.slane %v8724_v60, 4 }
 0x555   : > { %v8388_v6 = vadd.f32 %v8309_v41, %v8089_v46  ;;  %v9284_v46 = vunpack.c.l.b16 %v9215_v11  ;;  %v7912_v41 = vunpack.c.l.b16 %v7850_v7  ;;  %v8715_v26 = vrot.slane %v8714_v57, 4 }
 0x556   : > { %v9498_v48 = vadd.f32 %v14042_v27, %v9463_v58  ;;  %v7911_v58 = vunpack.c.l.b16 %v7847_v50  ;;  %v8735_v52 = vshll.u32 %v8452_v62, 16 }
 0x557   : > { %v9307_v61 = vpack.c.b16 %v9285_v43, %v9284_v46 }
 0x558   : > { %v14058_v18 = vmax.f32 %v9498_v48, 0.0  ;;  %v9385_v19 = vpop.f32.mrf.mxu0 }
 0x559   : > { %v8975_v47 = vpop.f32.mrf.mxu3  ;;  %11013 = vmatmul.msk.bf16.gmra.mxu2 %vm5981_vm7, %v11205_v63  ;;  %v8015_v49 = vpop.f32.mrf.mxu1  ;;  %v14068_v63 = vld [vmem:[#allocation3 + $0xa0] sm:$0xf] }
 0x55a   : > { %v9054_v28 = vadd.f32 %v8975_v47, %v8388_v6  ;;  %v8091_v25 = vadd.f32 %v8015_v49, %v13615_v23  ;;  %v8729_v23 = vrot.slane %v8727_v16, 5  ;;  %v9095_v6 = vld [vmem:[#allocation3 + $0x90] sm:$0xe]  ;;  %v8741_v48 = vshll.u32 %v14068_v63, 16 }
 0x55b   : > { %v8745_v56 = vshrl.u32 %v14068_v63, 16  ;;  %v7933_v47 = vpack.c.b16 %v7912_v41, %v7911_v58  ;;  %v11058_v49 = vrot.slane %v9095_v6, 9  ;;  %v7721_v16 = vld [vmem:[#allocation3 + $0x90] sm:$0xe]  ;;  %v11403_v6 = vld [vmem:[#allocation3 + $0x98] sm:$0x1] }
 0x55c   : > { %v9464_v39 = vadd.f32 %v9385_v19, %v9054_v28  ;;  %v8312_v11 = vpop.f32.mrf.mxu2  ;;  %v8720_v28 = vsel %vm13244_vm5, %v8715_v26, %v14054_v32  ;;  %v8730_v60 = vsel %vm13244_vm5, %v8725_v53, %v8729_v23  ;;  %v11206_v26 = vld [vmem:[#allocation3 + $0x90] sm:$0xff]  ;;  %v10895_v53 = vrot.slane %v7721_v16, 9 }
 0x55d   : > { %v8389_v51 = vadd.f32 %v8312_v11, %v8090_v59  ;;  %v9221_v59 = vrot.slane %v14032_v4, 5  ;;  %v8737_v4 = vrot.slane %v8735_v52, 5  ;;  %v14084_v11 = vrot.slane %v8741_v48, 5 }
 0x55e   : > { %v9499_v22 = vadd.f32 %v14042_v27, %v9464_v39  ;;  %11041 = vmatmul.msk.bf16.gmra.mxu3 %vm5981_vm7, %v8897_v3  ;;  %v11402_v3 = vld [vmem:[#allocation3 + $0x94] sm:$0xf]  ;;  %v8734_v39 = vrot.slane %v8732_v10, 4  ;;  %v8747_v58 = vrot.slane %v8745_v56, 4  ;;  %v8876_v52 = vunpack.c.l.b16 %v8720_v28 }
 0x55f   : > { %v7853_v50 = vrot.slane %v11402_v3, 5  ;;  %v8877_v48 = vunpack.c.l.b16 %v8730_v60  ;;  %v9222_v56 = vsel %vm13382_vm12, %v11058_v49, %v9221_v59 }
 0x560   : > { %v14074_v2 = vmax.f32 %v9499_v22, 0.0  ;;  %v9388_v19 = vpop.f32.mrf.mxu0  ;;  %v14088_v22 = vld [vmem:[#allocation3 + $0xa4] sm:$0x1]  ;;  %v9286_v16 = vunpack.c.l.b16 %v9222_v56 }
 0x561   : > { %v8978_v46 = vpop.f32.mrf.mxu3  ;;  %v8018_v43 = vpop.f32.mrf.mxu1  ;;  %v7855_v23 = vrot.slane %v7853_v50, 4  ;;  %v7854_v28 = vsel %vm13382_vm12, %v10895_v53, %v7853_v50  ;;  %v8898_v60 = vpack.c.b16 %v8877_v48, %v8876_v52  ;;  %v9228_v50 = vrot.slane %v14068_v63, 5  ;;  %v8455_v53 = vld [vmem:[#allocation3 + $0xa8] sm:$0xf]  ;;  %v14113_v48 = vld [vmem:[#allocation3 + $0xac] sm:$0xf] }
 0x562   : > { %v9055_v7 = vadd.f32 %v8978_v46, %v8389_v51  ;;  %v8092_v57 = vadd.f32 %v8018_v43, %v13625_v8  ;;  %v9223_v8 = vrot.slane %v9221_v59, 4  ;;  %v9224_v51 = vrot.slane %v14056_v44, 5 }
 0x563   : > { %11085 = vmatmul.msk.bf16.gmra.mxu0 %vm5981_vm7, %v9307_v61  ;;  %v7856_v61 = vrot.slane %v11403_v6, 5  ;;  %v8751_v44 = vshll.u32 %v14088_v22, 16  ;;  %v7913_v6 = vunpack.c.l.b16 %v7854_v28 }
 0x564   : > { %v9465_v41 = vadd.f32 %v9388_v19, %v9055_v7  ;;  %v8314_v62 = vpop.f32.mrf.mxu2  ;;  %10922 = vmatmul.msk.bf16.gmra.mxu1 %vm5981_vm7, %v7933_v47  ;;  %v8738_v19 = vor.u32 %v8737_v4, %v8734_v39  ;;  %v8748_v47 = vor.u32 %v8747_v58, %v14084_v11  ;;  %v9225_v43 = vsel %vm13382_vm12, %v9223_v8, %v9224_v51 }
 0x565   : > { %v8390_v32 = vadd.f32 %v8314_v62, %v8091_v25  ;;  %v7857_v59 = vsel %vm13382_vm12, %v7855_v23, %v7856_v61  ;;  %v9287_v4 = vunpack.c.l.b16 %v9225_v43  ;;  %v8753_v62 = vrot.slane %v8751_v44, 5 }
 0x566   : > { %v9500_v10 = vadd.f32 %v14042_v27, %v9465_v41  ;;  %v8739_v58 = vrot.slane %v8738_v19, 4  ;;  %v8749_v41 = vrot.slane %v8748_v47, 4  ;;  %v8756_v19 = vshrl.u32 %v8455_v53, 16 }
 0x567   : > { %v8759_v47 = vshll.u32 %v8455_v53, 16  ;;  %v9230_v43 = vrot.slane %v9228_v50, 4 }
 0x568   : > { %v14095_v46 = vmax.f32 %v9500_v10, 0.0  ;;  %v9390_v25 = vpop.f32.mrf.mxu0  ;;  %v9096_v10 = vld [vmem:[#allocation3 + $0x9c] sm:$0xe]  ;;  %v8754_v61 = vsel %vm13244_vm5, %v8749_v41, %v8753_v62 }
 0x569   : > { %v8980_v3 = vpop.f32.mrf.mxu3  ;;  %11014 = vmatmul.msk.bf16.gmra.mxu2 %vm5981_vm7, %v11206_v26  ;;  %v8020_v7 = vpop.f32.mrf.mxu1  ;;  %v7914_v26 = vunpack.c.l.b16 %v7857_v59  ;;  %v11059_v52 = vrot.slane %v9096_v10, 9  ;;  %v11405_v10 = vld [vmem:[#allocation3 + $0xa4] sm:$0x1] }
 0x56a   : > { %14760 = vst [vmem:[#allocation27_spill] sm:$0xff] %v14095_v46  ;;  %v9056_v49 = vadd.f32 %v8980_v3, %v8390_v32  ;;  %v8093_v39 = vadd.f32 %v8020_v7, %v13633_v13  ;;  %v9308_v32 = vpack.c.b16 %v9287_v4, %v9286_v16  ;;  %v8744_v13 = vsel %vm13244_vm5, %v8739_v58, %v14084_v11  ;;  %v11404_v7 = vld [vmem:[#allocation3 + $0xa0] sm:$0xf] }
 0x56b   : > { %v7934_v63 = vpack.c.b16 %v7914_v26, %v7913_v6  ;;  %v9231_v3 = vrot.slane %v14088_v22, 5  ;;  %v7860_v28 = vrot.slane %v11404_v7, 5  ;;  %v8769_v16 = vshrl.u32 %v14113_v48, 16 }
 0x56c   : > { %v9466_v8 = vadd.f32 %v9390_v25, %v9056_v49  ;;  %v8317_v51 = vpop.f32.mrf.mxu2  ;;  %v7722_v49 = vld [vmem:[#allocation3 + $0x9c] sm:$0xe]  ;;  %v8878_v4 = vunpack.c.l.b16 %v8744_v13  ;;  %v8879_v58 = vunpack.c.l.b16 %v8754_v61  ;;  %v9229_v22 = vsel %vm13382_vm12, %v11059_v52, %v9228_v50 }
 0x56d   : > { %v8391_v46 = vadd.f32 %v8317_v51, %v8092_v57  ;;  %v10896_v6 = vrot.slane %v7722_v49, 9  ;;  %v7862_v26 = vrot.slane %v7860_v28, 4  ;;  %v7863_v53 = vrot.slane %v11405_v10, 5 }
 0x56e   : > { %v9501_v23 = vadd.f32 %v14042_v27, %v9466_v8  ;;  %11042 = vmatmul.msk.bf16.gmra.mxu3 %vm5981_vm7, %v8898_v60  ;;  %v8765_v60 = vshll.u32 %v14113_v48, 16  ;;  %v8758_v8 = vrot.slane %v8756_v19, 4  ;;  %v8771_v61 = vrot.slane %v8769_v16, 4 }
 0x56f   : > { %v8899_v52 = vpack.c.b16 %v8879_v58, %v8878_v4 }
 0x570   : > { %v14115_v56 = vmax.f32 %v9501_v23, 0.0  ;;  %v9393_v57 = vpop.f32.mrf.mxu0  ;;  %v14128_v13 = vrot.slane %v8765_v60, 5 }
 0x571   : > { %v8983_v44 = vpop.f32.mrf.mxu3  ;;  %v8023_v25 = vpop.f32.mrf.mxu1 }
 0x572   : > { %v9057_v11 = vadd.f32 %v8983_v44, %v8391_v46  ;;  %v8094_v59 = vadd.f32 %v8023_v25, %v13642_v29  ;;  %v8761_v46 = vrot.slane %v8759_v47, 5  ;;  %v11207_v29 = vld [vmem:[#allocation3 + $0x9c] sm:$0xff]  ;;  %v7861_v25 = vsel %vm13382_vm12, %v10896_v6, %v7860_v28 }
 0x573   : > { %11086 = vmatmul.msk.bf16.gmra.mxu0 %vm5981_vm7, %v9308_v32  ;;  %v9232_v32 = vsel %vm13382_vm12, %v9230_v43, %v9231_v3  ;;  %v7864_v43 = vsel %vm13382_vm12, %v7862_v26, %v7863_v53  ;;  %v8772_v49 = vor.u32 %v8771_v61, %v14128_v13  ;;  %v7915_v58 = vunpack.c.l.b16 %v7861_v25 }
 0x574   : > { %v9467_v41 = vadd.f32 %v9393_v57, %v9057_v11  ;;  %v8319_v62 = vpop.f32.mrf.mxu2  ;;  %10923 = vmatmul.msk.bf16.gmra.mxu1 %vm5981_vm7, %v7934_v63  ;;  %v14130_v57 = vld [vmem:[#allocation3 + $0xb0] sm:$0x1]  ;;  %v9289_v47 = vunpack.c.l.b16 %v9232_v32  ;;  %v8762_v3 = vor.u32 %v8761_v46, %v8758_v8 }
 0x575   : > { %v8392_v51 = vadd.f32 %v8319_v62, %v8093_v39  ;;  %v9288_v39 = vunpack.c.l.b16 %v9229_v22  ;;  %v8775_v60 = vshll.u32 %v14130_v57, 16  ;;  %v8458_v62 = vld [vmem:[#allocation3 + $0xb4] sm:$0xf]  ;;  %v14142_v22 = vld [vmem:[#allocation3 + $0xb8] sm:$0xf]  ;;  %v8773_v46 = vrot.slane %v8772_v49, 4 }
 0x576   : > { %v9502_v23 = vadd.f32 %v14042_v27, %v9467_v41  ;;  %v7916_v41 = vunpack.c.l.b16 %v7864_v43  ;;  %v8763_v8 = vrot.slane %v8762_v3, 4  ;;  %v8780_v26 = vshrl.u32 %v8458_v62, 16  ;;  %v7723_v49 = vld [vmem:[#allocation3 + $0xa8] sm:$0xe] }
 0x577   : > { %v8783_v10 = vshll.u32 %v8458_v62, 16  ;;  %v8789_v53 = vshll.u32 %v14142_v22, 16  ;;  %v9238_v62 = vrot.slane %v14130_v57, 5 }
 0x578   : > { %v14132_v63 = vmax.f32 %v9502_v23, 0.0  ;;  %v9395_v50 = vpop.f32.mrf.mxu0  ;;  %v8793_v23 = vshrl.u32 %v14142_v22, 16  ;;  %v8768_v3 = vsel %vm13244_vm5, %v8763_v8, %v14128_v13  ;;  %v10897_v8 = vrot.slane %v7723_v49, 9  ;;  %v14762_v49 = vld [vmem:[#allocation24_spill] sm:$0xff] }
 0x579   : > { %v8985_v19 = vpop.f32.mrf.mxu3  ;;  %11015 = vmatmul.msk.bf16.gmra.mxu2 %vm5981_vm7, %v11207_v29  ;;  %v8025_v44 = vpop.f32.mrf.mxu1  ;;  %v9309_v29 = vpack.c.b16 %v9289_v47, %v9288_v39 }
 0x57a   : > { %v9058_v7 = vadd.f32 %v8985_v19, %v8392_v51  ;;  %v8095_v11 = vadd.f32 %v8025_v44, %v13650_v54  ;;  %v8777_v54 = vrot.slane %v8775_v60, 5  ;;  %v9097_v51 = vld [vmem:[#allocation3 + $0xa8] sm:$0xe]  ;;  %v8782_v60 = vrot.slane %v8780_v26, 4 }
 0x57b   : > { %v11060_v47 = vrot.slane %v9097_v51, 9  ;;  %v8880_v26 = vunpack.c.l.b16 %v8768_v3 }
 0x57c   : > { %v9468_v16 = vadd.f32 %v9395_v50, %v9058_v7  ;;  %v8322_v4 = vpop.f32.mrf.mxu2  ;;  %v7935_v50 = vpack.c.b16 %v7916_v41, %v7915_v58  ;;  %v8778_v7 = vsel %vm13244_vm5, %v8773_v46, %v8777_v54  ;;  %v11407_v54 = vld [vmem:[#allocation3 + $0xb0] sm:$0x1] }
 0x57d   : > { %v8393_v28 = vadd.f32 %v8322_v4, %v8094_v59  ;;  %v9235_v59 = vrot.slane %v14113_v48, 5  ;;  %v8785_v48 = vrot.slane %v8783_v10, 5  ;;  %v8795_v4 = vrot.slane %v8793_v23, 4 }
 0x57e   : > { %v9503_v6 = vadd.f32 %v14042_v27, %v9468_v16  ;;  %11043 = vmatmul.msk.bf16.gmra.mxu3 %vm5981_vm7, %v8899_v52  ;;  %v11406_v52 = vld [vmem:[#allocation3 + $0xac] sm:$0xf]  ;;  %v14158_v16 = vrot.slane %v8789_v53, 5  ;;  %v8881_v10 = vunpack.c.l.b16 %v8778_v7 }
 0x57f   : > { %v7867_v44 = vrot.slane %v11406_v52, 5  ;;  %v9236_v53 = vsel %vm13382_vm12, %v11060_v47, %v9235_v59  ;;  %v8786_v23 = vor.u32 %v8785_v48, %v8782_v60 }
 0x580   : > { %v14148_v32 = vmax.f32 %v9503_v6, 0.0  ;;  %v9398_v61 = vpop.f32.mrf.mxu0  ;;  %v11208_v6 = vld [vmem:[#allocation3 + $0xa8] sm:$0xff]  ;;  %v8900_v3 = vpack.c.b16 %v8881_v10, %v8880_v26  ;;  %v9290_v7 = vunpack.c.l.b16 %v9236_v53  ;;  %v14187_v26 = vld [vmem:[#allocation3 + $0xc4] sm:$0xf] }
 0x581   : > { %v8988_v39 = vpop.f32.mrf.mxu3  ;;  %v8028_v19 = vpop.f32.mrf.mxu1  ;;  %v7869_v46 = vrot.slane %v7867_v44, 4 }
 0x582   : > { %v9059_v25 = vadd.f32 %v8988_v39, %v8393_v28  ;;  %v8096_v43 = vadd.f32 %v8028_v19, %v13660_v34  ;;  %v9237_v34 = vrot.slane %v9235_v59, 4  ;;  %v14162_v28 = vld [vmem:[#allocation3 + $0xbc] sm:$0x1] }
 0x583   : > { %11087 = vmatmul.msk.bf16.gmra.mxu0 %vm5981_vm7, %v9309_v29  ;;  %v7870_v29 = vrot.slane %v11407_v54, 5  ;;  %v8799_v57 = vshll.u32 %v14162_v28, 16 }
 0x584   : > { %v9469_v58 = vadd.f32 %v9398_v61, %v9059_v25  ;;  %v8324_v41 = vpop.f32.mrf.mxu2  ;;  %10924 = vmatmul.msk.bf16.gmra.mxu1 %vm5981_vm7, %v7935_v50  ;;  %v8796_v61 = vor.u32 %v8795_v4, %v14158_v16  ;;  %v9239_v39 = vsel %vm13382_vm12, %v9237_v34, %v9238_v62  ;;  %v7868_v25 = vsel %vm13382_vm12, %v10897_v8, %v7867_v44 }
 0x585   : > { %v8394_v13 = vadd.f32 %v8324_v41, %v8095_v11  ;;  %v7871_v59 = vsel %vm13382_vm12, %v7869_v46, %v7870_v29  ;;  %v9291_v48 = vunpack.c.l.b16 %v9239_v39  ;;  %v8787_v4 = vrot.slane %v8786_v23, 4  ;;  %v9098_v23 = vld [vmem:[#allocation3 + $0xb4] sm:$0xe] }
 0x586   : > { %v9504_v51 = vadd.f32 %v14042_v27, %v9469_v58  ;;  %v8797_v58 = vrot.slane %v8796_v61, 4  ;;  %v8801_v41 = vrot.slane %v8799_v57, 5  ;;  %v7917_v54 = vunpack.c.l.b16 %v7868_v25 }
 0x587   : > { %v9310_v8 = vpack.c.b16 %v9291_v48, %v9290_v7  ;;  %v9242_v29 = vrot.slane %v14142_v22, 5  ;;  %v8817_v22 = vshrl.u32 %v14187_v26, 16  ;;  %v11061_v48 = vrot.slane %v9098_v23, 9  ;;  %v14200_v23 = vld [vmem:[#allocation3 + $0xc8] sm:$0x1] }
 0x588   : > { %v14169_v50 = vmax.f32 %v9504_v51, 0.0  ;;  %v9400_v11 = vpop.f32.mrf.mxu0  ;;  %v8802_v46 = vsel %vm13244_vm5, %v8797_v58, %v8801_v41  ;;  %v9245_v41 = vrot.slane %v14162_v28, 5 }
 0x589   : > { %v8990_v19 = vpop.f32.mrf.mxu3  ;;  %11016 = vmatmul.msk.bf16.gmra.mxu2 %vm5981_vm7, %v11208_v6  ;;  %v8030_v52 = vpop.f32.mrf.mxu1  ;;  %v7918_v6 = vunpack.c.l.b16 %v7871_v59  ;;  %v9243_v28 = vsel %vm13382_vm12, %v11061_v48, %v9242_v29  ;;  %v8823_v48 = vshll.u32 %v14200_v23, 16 }
 0x58a   : > { %14761 = vst [vmem:[#allocation28_spill] sm:$0xff] %v14169_v50  ;;  %v9060_v47 = vadd.f32 %v8990_v19, %v8394_v13  ;;  %v8097_v60 = vadd.f32 %v8030_v52, %v14762_v49  ;;  %v8461_v50 = vld [vmem:[#allocation3 + $0xc0] sm:$0xf]  ;;  %v8792_v13 = vsel %vm13244_vm5, %v8787_v4, %v14158_v16  ;;  %v11408_v19 = vld [vmem:[#allocation3 + $0xb8] sm:$0xf]  ;;  %v8883_v49 = vunpack.c.l.b16 %v8802_v46 }
 0x58b   : > { %v7936_v53 = vpack.c.b16 %v7918_v6, %v7917_v54  ;;  %v8804_v61 = vshrl.u32 %v8461_v50, 16  ;;  %v8807_v57 = vshll.u32 %v8461_v50, 16  ;;  %v7874_v52 = vrot.slane %v11408_v19, 5  ;;  %v14763_v16 = vld [vmem:[#allocation25_spill] sm:$0xff]  ;;  %v11209_v6 = vld [vmem:[#allocation3 + $0xb4] sm:$0xff] }
 0x58c   : > { %v9470_v34 = vadd.f32 %v9400_v11, %v9060_v47  ;;  %v8327_v62 = vpop.f32.mrf.mxu2  ;;  %v7724_v47 = vld [vmem:[#allocation3 + $0xb4] sm:$0xe]  ;;  %v8882_v7 = vunpack.c.l.b16 %v8792_v13  ;;  %v9244_v4 = vrot.slane %v9242_v29, 4  ;;  %v8819_v46 = vrot.slane %v8817_v22, 4 }
 0x58d   : > { %v8395_v51 = vadd.f32 %v8327_v62, %v8096_v43  ;;  %v8809_v62 = vrot.slane %v8807_v57, 5 }
 0x58e   : > { %v9505_v44 = vadd.f32 %v14042_v27, %v9470_v34  ;;  %11044 = vmatmul.msk.bf16.gmra.mxu3 %vm5981_vm7, %v8900_v3  ;;  %v8813_v3 = vshll.u32 %v14187_v26, 16  ;;  %v8806_v34 = vrot.slane %v8804_v61, 4  ;;  %v8901_v57 = vpack.c.b16 %v8883_v49, %v8882_v7 }
 0x590   : > { %v14189_v10 = vmax.f32 %v9505_v44, 0.0  ;;  %v9403_v43 = vpop.f32.mrf.mxu0  ;;  %v7876_v44 = vrot.slane %v7874_v52, 4  ;;  %v14198_v13 = vrot.slane %v8813_v3, 5 }
 0x591   : > { %v8993_v11 = vpop.f32.mrf.mxu3  ;;  %v8033_v39 = vpop.f32.mrf.mxu1 }
 0x592   : > { %v9061_v25 = vadd.f32 %v8993_v11, %v8395_v51  ;;  %v8098_v59 = vadd.f32 %v8033_v39, %v14763_v16  ;;  %v10898_v51 = vrot.slane %v7724_v47, 9  ;;  %v11409_v11 = vld [vmem:[#allocation3 + $0xbc] sm:$0x1]  ;;  %v8810_v47 = vor.u32 %v8809_v62, %v8806_v34 }
 0x593   : > { %11088 = vmatmul.msk.bf16.gmra.mxu0 %vm5981_vm7, %v9310_v8  ;;  %v7877_v39 = vrot.slane %v11409_v11, 5  ;;  %v8820_v29 = vor.u32 %v8819_v46, %v14198_v13  ;;  %v8825_v62 = vrot.slane %v8823_v48, 5  ;;  %v8464_v46 = vld [vmem:[#allocation3 + $0xcc] sm:$0xf] }
 0x594   : > { %v9471_v58 = vadd.f32 %v9403_v43, %v9061_v25  ;;  %v8329_v50 = vpop.f32.mrf.mxu2  ;;  %10925 = vmatmul.msk.bf16.gmra.mxu1 %vm5981_vm7, %v7936_v53  ;;  %v7875_v25 = vsel %vm13382_vm12, %v10898_v51, %v7874_v52  ;;  %v8811_v51 = vrot.slane %v8810_v47, 4 }
 0x595   : > { %v8396_v54 = vadd.f32 %v8329_v50, %v8097_v60  ;;  %v9246_v60 = vsel %vm13382_vm12, %v9244_v4, %v9245_v41  ;;  %v7878_v16 = vsel %vm13382_vm12, %v7876_v44, %v7877_v39  ;;  %v9292_v4 = vunpack.c.l.b16 %v9243_v28 }
 0x596   : > { %v9506_v8 = vadd.f32 %v14042_v27, %v9471_v58  ;;  %v9293_v58 = vunpack.c.l.b16 %v9246_v60  ;;  %v7919_v7 = vunpack.c.l.b16 %v7875_v25  ;;  %v7920_v49 = vunpack.c.l.b16 %v7878_v16 }
 0x597   : > { %v8821_v34 = vrot.slane %v8820_v29, 4  ;;  %v8816_v16 = vsel %vm13244_vm5, %v8811_v51, %v14198_v13  ;;  %v8831_v29 = vshll.u32 %v8464_v46, 16 }
 0x598   : > { %v14202_v43 = vmax.f32 %v9506_v8, 0.0  ;;  %v9405_v53 = vpop.f32.mrf.mxu0  ;;  %v7937_v39 = vpack.c.b16 %v7920_v49, %v7919_v7  ;;  %v9249_v8 = vrot.slane %v14187_v26, 5  ;;  %v8828_v26 = vshrl.u32 %v8464_v46, 16  ;;  %v11210_v7 = vld [vmem:[#allocation3 + $0xc0] sm:$0xff] }
 0x599   : > { %v8995_v61 = vpop.f32.mrf.mxu3  ;;  %11017 = vmatmul.msk.bf16.gmra.mxu2 %vm5981_vm7, %v11209_v6  ;;  %v8035_v19 = vpop.f32.mrf.mxu1  ;;  %v8826_v47 = vsel %vm13244_vm5, %v8821_v34, %v8825_v62  ;;  %v8884_v62 = vunpack.c.l.b16 %v8816_v16  ;;  %v8833_v46 = vrot.slane %v8831_v29, 5 }
 0x59a   : > { %v9062_v3 = vadd.f32 %v8995_v61, %v8396_v54  ;;  %v8099_v22 = vadd.f32 %v8035_v19, %v13704_v1  ;;  %v9099_v54 = vld [vmem:[#allocation3 + $0xc0] sm:$0xe]  ;;  %v9311_v1 = vpack.c.b16 %v9293_v58, %v9292_v4  ;;  %v11410_v61 = vld [vmem:[#allocation3 + $0xc4] sm:$0xf] }
 0x59b   : > { %v11062_v60 = vrot.slane %v9099_v54, 9  ;;  %v7881_v19 = vrot.slane %v11410_v61, 5  ;;  %v8885_v54 = vunpack.c.l.b16 %v8826_v47  ;;  %v8466_v61 = vld [vmem:[#allocation3 + $0xd4] sm:$0x1] }
 0x59c   : > { %v9472_v50 = vadd.f32 %v9405_v53, %v9062_v3  ;;  %v8332_v41 = vpop.f32.mrf.mxu2  ;;  %v14221_v53 = vld [vmem:[#allocation3 + $0xd0] sm:$0xf]  ;;  %v7725_v3 = vld [vmem:[#allocation3 + $0xc0] sm:$0xe] }
 0x59d   : > { %v8397_v6 = vadd.f32 %v8332_v41, %v8098_v59  ;;  %v8837_v48 = vshll.u32 %v14221_v53, 16  ;;  %v8841_v4 = vshrl.u32 %v14221_v53, 16  ;;  %v9252_v41 = vrot.slane %v14200_v23, 5 }
 0x59e   : > { %v9507_v52 = vadd.f32 %v14042_v27, %v9472_v50  ;;  %11045 = vmatmul.msk.bf16.gmra.mxu3 %vm5981_vm7, %v8901_v57  ;;  %v10899_v49 = vrot.slane %v7725_v3, 9  ;;  %v8902_v47 = vpack.c.b16 %v8885_v54, %v8884_v62  ;;  %v9256_v54 = vrot.slane %v14221_v53, 5 }
 0x5a0   : > { %v14218_v44 = vmax.f32 %v9507_v52, 0.0  ;;  %v9408_v11 = vpop.f32.mrf.mxu0  ;;  %v11411_v52 = vld [vmem:[#allocation3 + $0xc8] sm:$0x1]  ;;  %v7882_v16 = vsel %vm13382_vm12, %v10899_v49, %v7881_v19  ;;  %v9258_v53 = vrot.slane %v9256_v54, 4 }
 0x5a1   : > { %v8998_v28 = vpop.f32.mrf.mxu3  ;;  %v8038_v59 = vpop.f32.mrf.mxu1  ;;  %v7884_v51 = vrot.slane %v11411_v52, 5  ;;  %v7921_v52 = vunpack.c.l.b16 %v7882_v16  ;;  %v9259_v16 = vrot.slane %v8466_v61, 5 }
 0x5a2   : > { %v9063_v57 = vadd.f32 %v8998_v28, %v8397_v6  ;;  %v8100_v25 = vadd.f32 %v8038_v59, %v13713_v17  ;;  %v9251_v17 = vrot.slane %v9249_v8, 4  ;;  %v7883_v6 = vrot.slane %v7881_v19, 4 }
 0x5a3   : > { %11089 = vmatmul.msk.bf16.gmra.mxu0 %vm5981_vm7, %v9311_v1  ;;  %v9250_v1 = vsel %vm13382_vm12, %v11062_v60, %v9249_v8  ;;  %v8839_v28 = vrot.slane %v8837_v48, 5 }
 0x5a4   : > { %v9473_v58 = vadd.f32 %v9408_v11, %v9063_v57  ;;  %v8334_v50 = vpop.f32.mrf.mxu2  ;;  %10926 = vmatmul.msk.bf16.gmra.mxu1 %vm5981_vm7, %v7937_v39  ;;  %v8830_v11 = vrot.slane %v8828_v26, 4  ;;  %v8843_v39 = vrot.slane %v8841_v4, 4  ;;  %v7885_v8 = vsel %vm13382_vm12, %v7883_v6, %v7884_v51 }
 0x5a5   : > { %v8398_v13 = vadd.f32 %v8334_v50, %v8099_v22  ;;  %v9253_v22 = vsel %vm13382_vm12, %v9251_v17, %v9252_v41  ;;  %v9294_v26 = vunpack.c.l.b16 %v9250_v1  ;;  %v8847_v50 = vshll.u32 %v8466_v61, 16 }
 0x5a6   : > { %v9508_v34 = vadd.f32 %v14042_v27, %v9473_v58  ;;  %v9295_v48 = vunpack.c.l.b16 %v9253_v22  ;;  %v8834_v4 = vor.u32 %v8833_v46, %v8830_v11  ;;  %v8844_v58 = vor.u32 %v8843_v39, %v8839_v28  ;;  %v9100_v46 = vld [vmem:[#allocation3 + $0xcc] sm:$0xe] }
 0x5a7   : > { %v8849_v6 = vrot.slane %v8847_v50, 5 }
 0x5a8   : > { %v14237_v59 = vmax.f32 %v9508_v34, 0.0  ;;  %v9410_v23 = vpop.f32.mrf.mxu0  ;;  %v9312_v19 = vpack.c.b16 %v9295_v48, %v9294_v26  ;;  %v8835_v49 = vrot.slane %v8834_v4, 4 }
 0x5a9   : > { %v9000_v57 = vpop.f32.mrf.mxu3  ;;  %11018 = vmatmul.msk.bf16.gmra.mxu2 %vm5981_vm7, %v11210_v7  ;;  %v8040_v3 = vpop.f32.mrf.mxu1  ;;  %v7922_v7 = vunpack.c.l.b16 %v7885_v8 }
 0x5aa   : > { %14764 = vst [vmem:[#allocation24_spill] sm:$0xff] %v14237_v59  ;;  %v9064_v60 = vadd.f32 %v9000_v57, %v8398_v13  ;;  %v8101_v29 = vadd.f32 %v8040_v3, %v13726_v45  ;;  %v8845_v13 = vrot.slane %v8844_v58, 4  ;;  %v11063_v3 = vrot.slane %v9100_v46, 9 }
 0x5ab   : > { %v7938_v62 = vpack.c.b16 %v7922_v7, %v7921_v52 }
 0x5ac   : > { %v9474_v17 = vadd.f32 %v9410_v23, %v9064_v60  ;;  %v8337_v41 = vpop.f32.mrf.mxu2  ;;  %v8840_v23 = vsel %vm13244_vm5, %v8835_v49, %v8839_v28  ;;  %v8850_v22 = vsel %vm13244_vm5, %v8845_v13, %v8849_v6  ;;  %v11211_v60 = vld [vmem:[#allocation3 + $0xcc] sm:$0xff]  ;;  %v9257_v37 = vsel %vm13382_vm12, %v11063_v3, %v9256_v54 }
 0x5ad   : > { %v8399_v34 = vadd.f32 %v8337_v41, %v8100_v25  ;;  %v8887_v26 = vunpack.c.l.b16 %v8850_v22  ;;  %v9260_v28 = vsel %vm13382_vm12, %v9258_v53, %v9259_v16  ;;  %v9296_v41 = vunpack.c.l.b16 %v9257_v37 }
 0x5ae   : > { %v9509_v59 = vadd.f32 %v14042_v27, %v9474_v17  ;;  %11046 = vmatmul.msk.bf16.gmra.mxu3 %vm5981_vm7, %v8902_v47  ;;  %v9297_v52 = vunpack.c.l.b16 %v9260_v28 }
 0x5b0   : > { %v14249_v51 = vmax.f32 %v9509_v59, 0.0  ;;  %v9413_v45 = vpop.f32.mrf.mxu0  ;;  %v9313_v13 = vpack.c.b16 %v9297_v52, %v9296_v41 }
 0x5b1   : > { %v9003_v1 = vpop.f32.mrf.mxu3  ;;  %v8043_v11 = vpop.f32.mrf.mxu1 }
 0x5b2   : > { %v9065_v39 = vadd.f32 %v9003_v1, %v8399_v34  ;;  %v8102_v25 = vadd.f32 %v8043_v11, %v13740_v38  ;;  %v8886_v38 = vunpack.c.l.b16 %v8840_v23 }
 0x5b3   : > { %11090 = vmatmul.msk.bf16.gmra.mxu0 %vm5981_vm7, %v9312_v19 }
 0x5b4   : > { %v9475_v59 = vadd.f32 %v9413_v45, %v9065_v39  ;;  %v8339_v57 = vpop.f32.mrf.mxu2  ;;  %10927 = vmatmul.msk.bf16.gmra.mxu1 %vm5981_vm7, %v7938_v62 }
 0x5b5   : > { %v8400_v8 = vadd.f32 %v8339_v57, %v8101_v29  ;;  %v8903_v29 = vpack.c.b16 %v8887_v26, %v8886_v38 }
 0x5b6   : > { %v9510_v47 = vadd.f32 %v14042_v27, %v9475_v59 }
 0x5b8   : > { %v14260_v48 = vmax.f32 %v9510_v47, 0.0  ;;  %v9415_v4 = vpop.f32.mrf.mxu0 }
 0x5b9   : > { %v9005_v58 = vpop.f32.mrf.mxu3  ;;  %11019 = vmatmul.msk.bf16.gmra.mxu2 %vm5981_vm7, %v11211_v60  ;;  %v8045_v50 = vpop.f32.mrf.mxu1 }
 0x5ba   : > { %v9066_v61 = vadd.f32 %v9005_v58, %v8400_v8  ;;  %v8103_v17 = vadd.f32 %v8045_v50, %v13760_v36 }
 0x5bc   : > { %v9476_v7 = vadd.f32 %v9415_v4, %v9066_v61  ;;  %v8342_v34 = vpop.f32.mrf.mxu2 }
 0x5bd   : > { %v8401_v19 = vadd.f32 %v8342_v34, %v8102_v25 }
 0x5be   : > { %v9511_v49 = vadd.f32 %v14042_v27, %v9476_v7  ;;  %11047 = vmatmul.msk.bf16.gmra.mxu3 %vm5981_vm7, %v8903_v29 }
 0x5c0   : > { %v14270_v30 = vmax.f32 %v9511_v49, 0.0  ;;  %v9418_v6 = vpop.f32.mrf.mxu0 }
 0x5c1   : > { %v9008_v45 = vpop.f32.mrf.mxu3  ;;  %v8048_v62 = vpop.f32.mrf.mxu1 }
 0x5c2   : > { %v9067_v54 = vadd.f32 %v9008_v45, %v8401_v19  ;;  %v8104_v1 = vadd.f32 %v8048_v62, %v13775_v24 }
 0x5c3   : > { %11091 = vmatmul.msk.bf16.gmra.mxu0 %vm5981_vm7, %v9313_v13 }
 0x5c4   : > { %v9477_v36 = vadd.f32 %v9418_v6, %v9067_v54  ;;  %v8344_v11 = vpop.f32.mrf.mxu2 }
 0x5c5   : > { %v8402_v46 = vadd.f32 %v8344_v11, %v8103_v17 }
 0x5c6   : > { %v9512_v39 = vadd.f32 %v14042_v27, %v9477_v36 }
 0x5c8   : > { %v14275_v25 = vmax.f32 %v9512_v39, 0.0  ;;  %v9420_v23 = vpop.f32.mrf.mxu0 }
 0x5c9   : > { %v9010_v22 = vpop.f32.mrf.mxu3  ;;  %v8050_v59 = vpop.f32.mrf.mxu1 }
 0x5ca   : > { %v9068_v57 = vadd.f32 %v9010_v22, %v8402_v46  ;;  %v8105_v3 = vadd.f32 %v8050_v59, %v13795_v35 }
 0x5cc   : > { %v9478_v53 = vadd.f32 %v9420_v23, %v9068_v57  ;;  %v8347_v16 = vpop.f32.mrf.mxu2 }
 0x5cd   : > { %v8403_v8 = vadd.f32 %v8347_v16, %v8104_v1 }
 0x5ce   : > { %v9513_v24 = vadd.f32 %v14042_v27, %v9478_v53 }
 0x5d0   : > { %v14279_v60 = vmax.f32 %v9513_v24, 0.0  ;;  %v9423_v47 = vpop.f32.mrf.mxu0 }
 0x5d1   : > { %v9013_v38 = vpop.f32.mrf.mxu3  ;;  %v8053_v26 = vpop.f32.mrf.mxu1 }
 0x5d2   : > { %v9069_v4 = vadd.f32 %v9013_v38, %v8403_v8  ;;  %v8106_v37 = vadd.f32 %v8053_v26, %v13810_v40 }
 0x5d4   : > { %v9479_v28 = vadd.f32 %v9423_v47, %v9069_v4  ;;  %v8349_v58 = vpop.f32.mrf.mxu2 }
 0x5d5   : > { %v8404_v50 = vadd.f32 %v8349_v58, %v8105_v3 }
 0x5d6   : > { %v9514_v61 = vadd.f32 %v14042_v27, %v9479_v28 }
 0x5d8   : > { %v14283_v29 = vmax.f32 %v9514_v61, 0.0  ;;  %v9425_v35 = vpop.f32.mrf.mxu0 }
 0x5d9   : > { %v9015_v17 = vpop.f32.mrf.mxu3  ;;  %v8055_v41 = vpop.f32.mrf.mxu1 }
 0x5da   : > { %v9070_v52 = vadd.f32 %v9015_v17, %v8404_v50  ;;  %v8107_v7 = vadd.f32 %v8055_v41, %v13830_v42 }
 0x5dc   : > { %v9480_v34 = vadd.f32 %v9425_v35, %v9070_v52  ;;  %v8352_v19 = vpop.f32.mrf.mxu2 }
 0x5dd   : > { %v8405_v49 = vadd.f32 %v8352_v19, %v8106_v37 }
 0x5de   : > { %v9515_v13 = vadd.f32 %v14042_v27, %v9480_v34 }
 0x5e0   : > { %v14287_v6 = vmax.f32 %v9515_v13, 0.0  ;;  %v9428_v40 = vpop.f32.mrf.mxu0 }
 0x5e1   : > { %v9018_v45 = vpop.f32.mrf.mxu3  ;;  %v8058_v62 = vpop.f32.mrf.mxu1 }
 0x5e2   : > { %v9071_v54 = vadd.f32 %v9018_v45, %v8405_v49  ;;  %v8108_v1 = vadd.f32 %v8058_v62, %v13845_v55 }
 0x5e4   : > { %v9481_v36 = vadd.f32 %v9428_v40, %v9071_v54  ;;  %v8354_v11 = vpop.f32.mrf.mxu2 }
 0x5e5   : > { %v8406_v46 = vadd.f32 %v8354_v11, %v8107_v7 }
 0x5e6   : > { %v9516_v39 = vadd.f32 %v14042_v27, %v9481_v36 }
 0x5e8   : > { %v14291_v23 = vmax.f32 %v9516_v39, 0.0  ;;  %v9430_v42 = vpop.f32.mrf.mxu0 }
 0x5e9   : > { %v9020_v22 = vpop.f32.mrf.mxu3  ;;  %v8060_v59 = vpop.f32.mrf.mxu1 }
 0x5ea   : > { %v9072_v57 = vadd.f32 %v9020_v22, %v8406_v46  ;;  %v8109_v3 = vadd.f32 %v8060_v59, %v13865_v15  ;;  %v14306_v46 = vld [vmem:[%s11625_s29] ss:$0 sm:$0xff] }
 0x5ec   : > { %v9482_v53 = vadd.f32 %v9430_v42, %v9072_v57  ;;  %v8357_v16 = vpop.f32.mrf.mxu2 }
 0x5ed   : > { %v8407_v8 = vadd.f32 %v8357_v16, %v8108_v1 }
 0x5ee   : > { %v9517_v24 = vadd.f32 %v14042_v27, %v9482_v53 }
 0x5f0   : > { %v14295_v47 = vmax.f32 %v9517_v24, 0.0  ;;  %v9433_v55 = vpop.f32.mrf.mxu0 }
 0x5f1   : > { %v9023_v38 = vpop.f32.mrf.mxu3  ;;  %v8063_v26 = vpop.f32.mrf.mxu1 }
 0x5f2   : > { %v9073_v4 = vadd.f32 %v9023_v38, %v8407_v8  ;;  %v8110_v37 = vadd.f32 %v8063_v26, %v13880_v20 }
 0x5f4   : > { %v9483_v28 = vadd.f32 %v9433_v55, %v9073_v4  ;;  %v8359_v58 = vpop.f32.mrf.mxu2 }
 0x5f5   : > { %v8408_v50 = vadd.f32 %v8359_v58, %v8109_v3 }
 0x5f6   : > { %v9518_v61 = vadd.f32 %v14042_v27, %v9483_v28  ;;  %v14765_v28 = vld [vmem:[#allocation26_spill] sm:$0xff] }
 0x5f8   : > { %v14299_v35 = vmax.f32 %v9518_v61, 0.0  ;;  %v9435_v15 = vpop.f32.mrf.mxu0 }
 0x5f9   : > { %v9025_v17 = vpop.f32.mrf.mxu3  ;;  %v8065_v41 = vpop.f32.mrf.mxu1 }
 0x5fa   : > { %v9074_v52 = vadd.f32 %v9025_v17, %v8408_v50  ;;  %v8111_v7 = vadd.f32 %v8065_v41, %v13900_v5 }
 0x5fc   : > { %v9484_v34 = vadd.f32 %v9435_v15, %v9074_v52  ;;  %v8362_v19 = vpop.f32.mrf.mxu2 }
 0x5fd   : > { %v8409_v49 = vadd.f32 %v8362_v19, %v8110_v37 }
 0x5fe   : > { %v9519_v13 = vadd.f32 %v14042_v27, %v9484_v34 }
 0x600   : > { %v14303_v20 = vmax.f32 %v9519_v13, 0.0  ;;  %v9438_v40 = vpop.f32.mrf.mxu0 }
 0x601   : > { %v9028_v45 = vpop.f32.mrf.mxu3  ;;  %v8068_v62 = vpop.f32.mrf.mxu1 }
 0x602   : > { %v9075_v54 = vadd.f32 %v9028_v45, %v8409_v49  ;;  %v8112_v3 = vadd.f32 %v8068_v62, %v13915_v21 }
 0x604   : > { %v9485_v1 = vadd.f32 %v9438_v40, %v9075_v54  ;;  %v8364_v36 = vpop.f32.mrf.mxu2 }
 0x605   : > { %v8410_v11 = vadd.f32 %v8364_v36, %v8111_v7 }
 0x606   : > { %v9520_v39 = vadd.f32 %v14306_v46, %v9485_v1 }
 0x608   : > { %v14309_v42 = vmax.f32 %v9520_v39, 0.0  ;;  %v9440_v5 = vpop.f32.mrf.mxu0 }
 0x609   : > { %v9030_v22 = vpop.f32.mrf.mxu3  ;;  %v8070_v59 = vpop.f32.mrf.mxu1 }
 0x60a   : > { %v9076_v57 = vadd.f32 %v9030_v22, %v8410_v11  ;;  %v8113_v58 = vadd.f32 %v8070_v59, %v14765_v28 }
 0x60c   : > { %v9486_v27 = vadd.f32 %v9440_v5, %v9076_v57  ;;  %v8367_v53 = vpop.f32.mrf.mxu2 }
 0x60d   : > { %v8411_v8 = vadd.f32 %v8367_v53, %v8112_v3 }
 0x60e   : > { %v9521_v16 = vadd.f32 %v14306_v46, %v9486_v27 }
 0x610   : > { %v14313_v24 = vmax.f32 %v9521_v16, 0.0  ;;  %v9443_v55 = vpop.f32.mrf.mxu0 }
 0x611   : > { %v9033_v38 = vpop.f32.mrf.mxu3  ;;  %v8073_v26 = vpop.f32.mrf.mxu1 }
 0x612   : > { %v9077_v4 = vadd.f32 %v9033_v38, %v8411_v8  ;;  %v8114_v19 = vadd.f32 %v8073_v26, %v13948_v33 }
 0x614   : > { %v9487_v37 = vadd.f32 %v9443_v55, %v9077_v4  ;;  %v8369_v50 = vpop.f32.mrf.mxu2 }
 0x615   : > { %v8412_v15 = vadd.f32 %v8369_v50, %v8113_v58 }
 0x616   : > { %v9522_v61 = vadd.f32 %v14306_v46, %v9487_v37 }
 0x618   : > { %v14317_v17 = vmax.f32 %v9522_v61, 0.0  ;;  %v9445_v21 = vpop.f32.mrf.mxu0 }
 0x619   : > { %v9035_v41 = vpop.f32.mrf.mxu3  ;;  %v8075_v52 = vpop.f32.mrf.mxu1 }
 0x61a   : > { %v9078_v7 = vadd.f32 %v9035_v41, %v8412_v15  ;;  %v8115_v39 = vadd.f32 %v8075_v52, %v13967_v9 }
 0x61c   : > { %v9488_v34 = vadd.f32 %v9445_v21, %v9078_v7  ;;  %v8372_v49 = vpop.f32.mrf.mxu2 }
 0x61d   : > { %v8413_v40 = vadd.f32 %v8372_v49, %v8114_v19 }
 0x61e   : > { %v9523_v13 = vadd.f32 %v14306_v46, %v9488_v34 }
 0x620   : > { %v14321_v45 = vmax.f32 %v9523_v13, 0.0  ;;  %v9448_v62 = vpop.f32.mrf.mxu0 }
 0x621   : > { %v9038_v54 = vpop.f32.mrf.mxu3  ;;  %v8078_v36 = vpop.f32.mrf.mxu1 }
 0x622   : > { %v9079_v1 = vadd.f32 %v9038_v54, %v8413_v40  ;;  %v8116_v16 = vadd.f32 %v8078_v36, %v13981_v14 }
 0x624   : > { %v9489_v11 = vadd.f32 %v9448_v62, %v9079_v1  ;;  %v8374_v5 = vpop.f32.mrf.mxu2 }
 0x625   : > { %v8414_v59 = vadd.f32 %v8374_v5, %v8115_v39 }
 0x626   : > { %v9524_v22 = vadd.f32 %v14306_v46, %v9489_v11 }
 0x628   : > { %v14325_v57 = vmax.f32 %v9524_v22, 0.0  ;;  %v9450_v33 = vpop.f32.mrf.mxu0 }
 0x629   : > { %v9040_v27 = vpop.f32.mrf.mxu3  ;;  %v8080_v55 = vpop.f32.mrf.mxu1 }
 0x62a   : > { %v9080_v3 = vadd.f32 %v9040_v27, %v8414_v59  ;;  %v8117_v50 = vadd.f32 %v8080_v55, %v14001_v0 }
 0x62c   : > { %v9490_v53 = vadd.f32 %v9450_v33, %v9080_v3  ;;  %v8377_v8 = vpop.f32.mrf.mxu2 }
 0x62d   : > { %v8415_v26 = vadd.f32 %v8377_v8, %v8116_v16 }
 0x62e   : > { %v9525_v38 = vadd.f32 %v14306_v46, %v9490_v53 }
 0x630   : > { %v14329_v4 = vmax.f32 %v9525_v38, 0.0  ;;  %v9453_v9 = vpop.f32.mrf.mxu0 }
 0x631   : > { %v9043_v37 = vpop.f32.mrf.mxu3  ;;  %v8083_v41 = vpop.f32.mrf.mxu1 }
 0x632   : > { %v9081_v28 = vadd.f32 %v9043_v37, %v8415_v26  ;;  %v8118_v49 = vadd.f32 %v8083_v41, %v14015_v12 }
 0x634   : > { %v9491_v58 = vadd.f32 %v9453_v9, %v9081_v28  ;;  %v8379_v61 = vpop.f32.mrf.mxu2 }
 0x635   : > { %v8416_v21 = vadd.f32 %v8379_v61, %v8117_v50 }
 0x636   : > { %v9526_v15 = vadd.f32 %v14306_v46, %v9491_v58 }
 0x638   : > { %v14333_v52 = vmax.f32 %v9526_v15, 0.0  ;;  %v9455_v14 = vpop.f32.mrf.mxu0 }
 0x639   : > { %v9045_v7 = vpop.f32.mrf.mxu3  ;;  %v8085_v0 = vpop.f32.mrf.mxu1 }
 0x63a   : > { %v9082_v34 = vadd.f32 %v9045_v7, %v8416_v21  ;;  %v8119_v5 = vadd.f32 %v8085_v0, %v14034_v31 }
 0x63c   : > { %v9492_v19 = vadd.f32 %v9455_v14, %v9082_v34  ;;  %v8382_v13 = vpop.f32.mrf.mxu2 }
 0x63d   : > { %v8417_v62 = vadd.f32 %v8382_v13, %v8118_v49 }
 0x63e   : > { %v9527_v40 = vadd.f32 %v14306_v46, %v9492_v19 }
 0x640   : > { %v14337_v54 = vmax.f32 %v9527_v40, 0.0  ;;  %v9458_v1 = vpop.f32.mrf.mxu0 }
 0x641   : > { %v9048_v36 = vpop.f32.mrf.mxu3 }
 0x642   : > { %v9083_v11 = vadd.f32 %v9048_v36, %v8417_v62 }
 0x644   : > { %v9493_v39 = vadd.f32 %v9458_v1, %v9083_v11  ;;  %v8384_v22 = vpop.f32.mrf.mxu2 }
 0x645   : > { %v8418_v33 = vadd.f32 %v8384_v22, %v8119_v5 }
 0x646   : > { %v9528_v59 = vadd.f32 %v14306_v46, %v9493_v39 }
 0x648   : > { %v14341_v27 = vmax.f32 %v9528_v59, 0.0  ;;  %v9460_v53 = vpop.f32.mrf.mxu0 }
 0x649   : > { %v9050_v12 = vpop.f32.mrf.mxu3 }
 0x64a   : > { %v9084_v3 = vadd.f32 %v9050_v12, %v8418_v33 }
 0x64c   : > { %v9494_v16 = vadd.f32 %v9460_v53, %v9084_v3  ;;  %9565 = sbr.rel (%p11092_p4) target bundleno = 1649 (0x671), region = 52 }
 0x64e   : > { %v9529_v8 = vadd.f32 %v14306_v46, %v9494_v16 }
 0x650   : > { %v14344_v55 = vmax.f32 %v9529_v8, 0.0 }
 0x651   : > { %9566 = vst.msk [vmem:[%s11632_s23] sm:$0xff] %vm5981_vm7, %v14058_v18  ;;  %v14766_v31 = vld [vmem:[#allocation27_spill] sm:$0xff]  ;;  %v14767_v46 = vld [vmem:[#allocation28_spill] sm:$0xff] }
 0x652   : > { %9567 = vst.msk [vmem:[%s11632_s23 + $0x8] sm:$0xff] %vm5981_vm7, %v14074_v2  ;;  %v14768_v38 = vld [vmem:[#allocation24_spill] sm:$0xff] }
 0x653   : > { %9568 = vst.msk [vmem:[%s11632_s23 + $0x10] sm:$0xff] %vm5981_vm7, %v14766_v31 }
 0x654   : > { %9569 = vst.msk [vmem:[%s11632_s23 + $0x18] sm:$0xff] %vm5981_vm7, %v14115_v56 }
 0x655   : > { %9570 = vst.msk [vmem:[%s11632_s23 + $0x20] sm:$0xff] %vm5981_vm7, %v14132_v63 }
 0x656   : > { %9571 = vst.msk [vmem:[%s11632_s23 + $0x28] sm:$0xff] %vm5981_vm7, %v14148_v32 }
 0x657   : > { %9572 = vst.msk [vmem:[%s11632_s23 + $0x30] sm:$0xff] %vm5981_vm7, %v14767_v46 }
 0x658   : > { %9573 = vst.msk [vmem:[%s11632_s23 + $0x38] sm:$0xff] %vm5981_vm7, %v14189_v10 }
 0x659   : > { %9574 = vst.msk [vmem:[%s11632_s23 + $0x40] sm:$0xff] %vm5981_vm7, %v14202_v43 }
 0x65a   : > { %9575 = vst.msk [vmem:[%s11632_s23 + $0x48] sm:$0xff] %vm5981_vm7, %v14218_v44 }
 0x65b   : > { %9576 = vst.msk [vmem:[%s11632_s23 + $0x50] sm:$0xff] %vm5981_vm7, %v14768_v38 }
 0x65c   : > { %9577 = vst.msk [vmem:[%s11632_s23 + $0x58] sm:$0xff] %vm5981_vm7, %v14249_v51 }
 0x65d   : > { %9578 = vst.msk [vmem:[%s11632_s23 + $0x60] sm:$0xff] %vm5981_vm7, %v14260_v48 }
 0x65e   : > { %9579 = vst.msk [vmem:[%s11632_s23 + $0x68] sm:$0xff] %vm5981_vm7, %v14270_v30 }
 0x65f   : > { %9580 = vst.msk [vmem:[%s11632_s23 + $0x70] sm:$0xff] %vm5981_vm7, %v14275_v25 }
 0x660   : > { %9581 = vst.msk [vmem:[%s11632_s23 + $0x78] sm:$0xff] %vm5981_vm7, %v14279_v60 }
 0x661   : > { %9582 = vst.msk [vmem:[%s11632_s23 + $0x80] sm:$0xff] %vm5981_vm7, %v14283_v29 }
 0x662   : > { %9583 = vst.msk [vmem:[%s11632_s23 + $0x88] sm:$0xff] %vm5981_vm7, %v14287_v6 }
 0x663   : > { %9584 = vst.msk [vmem:[%s11632_s23 + $0x90] sm:$0xff] %vm5981_vm7, %v14291_v23 }
 0x664   : > { %9585 = vst.msk [vmem:[%s11632_s23 + $0x98] sm:$0xff] %vm5981_vm7, %v14295_v47 }
 0x665   : > { %9586 = vst.msk [vmem:[%s11632_s23 + $0xa0] sm:$0xff] %vm5981_vm7, %v14299_v35 }
 0x666   : > { %9587 = vst.msk [vmem:[%s11632_s23 + $0xa8] sm:$0xff] %vm5981_vm7, %v14303_v20 }
 0x667   : > { %9588 = vst.msk [vmem:[%s11632_s23 + $0xb0] sm:$0xff] %vm5981_vm7, %v14309_v42 }
 0x668   : > { %9589 = vst.msk [vmem:[%s11632_s23 + $0xb8] sm:$0xff] %vm5981_vm7, %v14313_v24 }
 0x669   : > { %9590 = vst.msk [vmem:[%s11632_s23 + $0xc0] sm:$0xff] %vm5981_vm7, %v14317_v17 }
 0x66a   : > { %9591 = vst.msk [vmem:[%s11632_s23 + $0xc8] sm:$0xff] %vm5981_vm7, %v14321_v45 }
 0x66b   : > { %9592 = vst.msk [vmem:[%s11632_s23 + $0xd0] sm:$0xff] %vm5981_vm7, %v14325_v57 }
 0x66c   : > { %9593 = vst.msk [vmem:[%s11632_s23 + $0xd8] sm:$0xff] %vm5981_vm7, %v14329_v4 }
 0x66d   : > { %9594 = vst.msk [vmem:[%s11632_s23 + $0xe0] sm:$0xff] %vm5981_vm7, %v14333_v52 }
 0x66e   : > { %9595 = vst.msk [vmem:[%s11632_s23 + $0xe8] sm:$0xff] %vm5981_vm7, %v14337_v54 }
 0x66f   : > { %9596 = vst.msk [vmem:[%s11632_s23 + $0xf0] sm:$0xff] %vm5981_vm7, %v14341_v27 }
 0x670   : > { %9597 = vst.msk [vmem:[%s11632_s23 + $0xf8] sm:$0xff] %vm5981_vm7, %v14344_v55 }
 0x671 PF: > { %p11093_p5 = scmp.ge.s32.totalorder %s11491_s21, 2 }
 0x673   : > { %9601 = sbr.rel (%p11093_p5) target bundleno = 1724 (0x6bc), region = 56 }
 0x678   : > { %v9602_v26 = vpack.c.bf16 %v14058_v18, %v14058_v18  ;;  %vm9957_vm13 = vcmask 257024   ;;  %vm9958_vm14 = vsmask.f32 7938  ;;  %v9603_v9 = vpack.c.bf16 %v14074_v2, %v14074_v2  ;;  %v14769_v37 = vld [vmem:[#allocation27_spill] sm:$0xff]  ;;  %v9960_v34 = vld [vmem:[#allocation3 + $0xc] sm:$0xf] }
 0x679   : > { %vm9634_vm15 = vsmask.f32 256  ;;  %vm9635_vm6 = vsmask.f32 4368  ;;  %vm9965_vm2 = vcmask 253952   ;;  %v9604_v28 = vpack.c.bf16 %v14769_v37, %v14769_v37  ;;  %vm14451_vm1 = vmand %vm9957_vm13, %vm9958_vm14  ;;  %v14774_v40 = vld [vmem:[#allocation28_spill] sm:$0xff] }
 0x67a   : > { %v9638_v58 = vshrl.u32 %v9602_v26, 16  ;;  %v9641_v50 = vshll.u32 %v9602_v26, 16  ;;  %v9646_v61 = vshrl.u32 %v9603_v9, 16  ;;  %v9649_v15 = vshll.u32 %v9603_v9, 16  ;;  %vm14460_vm10 = vmor %vm9634_vm15, %vm9635_vm6  ;;  %v9970_v33 = vld [vmem:[#allocation3 + $0x18] sm:$0xf] }
 0x67b   : > { %v9655_v18 = vshrl.u32 %v9604_v28, 16  ;;  %v9658_v41 = vshll.u32 %v9604_v28, 16  ;;  %v9605_v2 = vpack.c.bf16 %v14115_v56, %v14115_v56  ;;  %v9606_v14 = vpack.c.bf16 %v14132_v63, %v14132_v63  ;;  %vm14470_vm11 = vmand %vm9965_vm2, %vm9634_vm15  ;;  %v9967_v63 = vld [vmem:[#allocation3 + $0x14] sm:$0x1]  ;;  %v9974_v46 = vld [vmem:[#allocation3 + $0x20] sm:$0x1] }
 0x67c   : > { %v9640_v7 = vrot.slane %v9638_v58, 7  ;;  %v9648_v49 = vrot.slane %v9646_v61, 7  ;;  %v9607_v13 = vpack.c.bf16 %v14148_v32, %v14148_v32  ;;  %v9608_v62 = vpack.c.bf16 %v14774_v40, %v14774_v40  ;;  %v9977_v28 = vld [vmem:[#allocation3 + $0x24] sm:$0xf]  ;;  %v9981_v40 = vld [vmem:[#allocation3 + $0x2c] sm:$0x1] }
 0x67d   : > { %v9657_v0 = vrot.slane %v9655_v18, 7  ;;  %v9663_v1 = vshrl.u32 %v9605_v2, 16  ;;  %v9666_v36 = vshll.u32 %v9605_v2, 16  ;;  %v9672_v11 = vshrl.u32 %v9606_v14, 16 }
 0x67e   : > { %v9643_v39 = vor.u32 %v9641_v50, %v9640_v7  ;;  %v9644_v5 = vrot.slane %v9640_v7, 4  ;;  %v9651_v22 = vor.u32 %v9649_v15, %v9648_v49  ;;  %v9653_v59 = vrot.slane %v9648_v49, 4 }
 0x67f   : > { %v9660_v32 = vor.u32 %v9658_v41, %v9657_v0  ;;  %v9661_v12 = vrot.slane %v9657_v0, 4  ;;  %v9665_v3 = vrot.slane %v9663_v1, 7  ;;  %v9674_v53 = vrot.slane %v9672_v11, 7  ;;  %v9984_v0 = vld [vmem:[#allocation3 + $0x30] sm:$0xf]  ;;  %v14777_v11 = vld [vmem:[#allocation24_spill] sm:$0xff] }
 0x680   : > { %v9961_v16 = vsel %vm14451_vm1, %v9643_v39, %v9960_v34  ;;  %v9652_v8 = vsel %vm14460_vm10, %v9644_v5, %v9651_v22  ;;  %v9968_v31 = vsel %vm14470_vm11, %v9653_v59, %v9967_v63  ;;  %v9675_v38 = vshll.u32 %v9606_v14, 16 }
 0x681   : > { %9962 = vst [vmem:[#allocation3 + $0xc] sm:$0xf] %v9961_v16  ;;  %v9971_v26 = vsel %vm14451_vm1, %v9660_v32, %v9970_v33  ;;  %v9668_v9 = vor.u32 %v9666_v36, %v9665_v3  ;;  %v9670_v37 = vrot.slane %v9665_v3, 4  ;;  %v9678_v58 = vrot.slane %v9674_v53, 4  ;;  %v9988_v16 = vld [vmem:[#allocation3 + $0x38] sm:$0x1] }
 0x682   : > { %9964 = vst.msk [vmem:[#allocation3 + $0x10] sm:$0xf] %vm9957_vm13, %v9652_v8  ;;  %v9677_v50 = vor.u32 %v9675_v38, %v9674_v53  ;;  %v9680_v61 = vshrl.u32 %v9607_v13, 16  ;;  %v9683_v15 = vshll.u32 %v9607_v13, 16  ;;  %v9689_v18 = vshrl.u32 %v9608_v62, 16 }
 0x683   : > { %9969 = vst [vmem:[#allocation3 + $0x14] sm:$0x1] %v9968_v31  ;;  %v9669_v41 = vsel %vm14460_vm10, %v9661_v12, %v9668_v9  ;;  %v9975_v2 = vsel %vm14470_vm11, %v9670_v37, %v9974_v46  ;;  %v9692_v14 = vshll.u32 %v9608_v62, 16  ;;  %v9609_v7 = vpack.c.bf16 %v14189_v10, %v14189_v10  ;;  %v9991_v8 = vld [vmem:[#allocation3 + $0x3c] sm:$0xf] }
 0x684   : > { %9972 = vst [vmem:[#allocation3 + $0x18] sm:$0xf] %v9971_v26  ;;  %v9978_v34 = vsel %vm14451_vm1, %v9677_v50, %v9977_v28  ;;  %v9682_v49 = vrot.slane %v9680_v61, 7  ;;  %v9691_v63 = vrot.slane %v9689_v18, 7  ;;  %v9610_v13 = vpack.c.bf16 %v14202_v43, %v14202_v43  ;;  %v9995_v37 = vld [vmem:[#allocation3 + $0x44] sm:$0x1] }
 0x685   : > { %9973 = vst.msk [vmem:[#allocation3 + $0x1c] sm:$0xf] %vm9957_vm13, %v9669_v41  ;;  %v9697_v1 = vshrl.u32 %v9609_v7, 16  ;;  %v9700_v36 = vshll.u32 %v9609_v7, 16  ;;  %v9611_v62 = vpack.c.bf16 %v14218_v44, %v14218_v44  ;;  %v9612_v10 = vpack.c.bf16 %v14777_v11, %v14777_v11 }
 0x686   : > { %9976 = vst [vmem:[#allocation3 + $0x20] sm:$0x1] %v9975_v2  ;;  %v9685_v39 = vor.u32 %v9683_v15, %v9682_v49  ;;  %v9687_v5 = vrot.slane %v9682_v49, 4  ;;  %v9694_v22 = vor.u32 %v9692_v14, %v9691_v63  ;;  %v9695_v59 = vrot.slane %v9691_v63, 4  ;;  %v9998_v14 = vld [vmem:[#allocation3 + $0x48] sm:$0xf] }
 0x687   : > { %9979 = vst [vmem:[#allocation3 + $0x24] sm:$0xf] %v9978_v34  ;;  %v9699_v33 = vrot.slane %v9697_v1, 7  ;;  %v9706_v32 = vshrl.u32 %v9610_v13, 16  ;;  %v9709_v43 = vshll.u32 %v9610_v13, 16  ;;  %v9714_v12 = vshrl.u32 %v9611_v62, 16 }
 0x688   : > { %v9686_v3 = vsel %vm14460_vm10, %v9678_v58, %v9685_v39  ;;  %v9982_v53 = vsel %vm14470_vm11, %v9687_v5, %v9981_v40  ;;  %v9985_v44 = vsel %vm14451_vm1, %v9694_v22, %v9984_v0  ;;  %v9717_v31 = vshll.u32 %v9611_v62, 16 }
 0x689   : > { %9980 = vst.msk [vmem:[#allocation3 + $0x28] sm:$0xf] %vm9957_vm13, %v9686_v3  ;;  %v9702_v46 = vor.u32 %v9700_v36, %v9699_v33  ;;  %v9704_v38 = vrot.slane %v9699_v33, 4  ;;  %v9708_v26 = vrot.slane %v9706_v32, 7  ;;  %v9716_v9 = vrot.slane %v9714_v12, 7 }
 0x68a   : > { %9983 = vst [vmem:[#allocation3 + $0x2c] sm:$0x1] %v9982_v53  ;;  %v9723_v28 = vshrl.u32 %v9612_v10, 16  ;;  %v9726_v50 = vshll.u32 %v9612_v10, 16  ;;  %v9613_v58 = vpack.c.bf16 %v14249_v51, %v14249_v51  ;;  %v9614_v61 = vpack.c.bf16 %v14260_v48, %v14260_v48  ;;  %v10005_v33 = vld [vmem:[#allocation3 + $0x54] sm:$0xf] }
 0x68b   : > { %9986 = vst [vmem:[#allocation3 + $0x30] sm:$0xf] %v9985_v44  ;;  %v9703_v15 = vsel %vm14460_vm10, %v9695_v59, %v9702_v46  ;;  %v9989_v18 = vsel %vm14470_vm11, %v9704_v38, %v9988_v16  ;;  %v9711_v41 = vor.u32 %v9709_v43, %v9708_v26  ;;  %v9712_v2 = vrot.slane %v9708_v26, 4  ;;  %v10002_v59 = vld [vmem:[#allocation3 + $0x50] sm:$0x1] }
 0x68c   : > { %9987 = vst.msk [vmem:[#allocation3 + $0x34] sm:$0xf] %vm9957_vm13, %v9703_v15  ;;  %v9719_v7 = vor.u32 %v9717_v31, %v9716_v9  ;;  %v9721_v34 = vrot.slane %v9716_v9, 4  ;;  %v9725_v49 = vrot.slane %v9723_v28, 7  ;;  %v9731_v40 = vshrl.u32 %v9613_v58, 16 }
 0x68d   : > { %9990 = vst [vmem:[#allocation3 + $0x38] sm:$0x1] %v9989_v18  ;;  %v9992_v51 = vsel %vm14451_vm1, %v9711_v41, %v9991_v8  ;;  %v9734_v48 = vshll.u32 %v9613_v58, 16  ;;  %v9740_v63 = vshrl.u32 %v9614_v61, 16  ;;  %v9743_v13 = vshll.u32 %v9614_v61, 16 }
 0x68e   : > { %9993 = vst [vmem:[#allocation3 + $0x3c] sm:$0xf] %v9992_v51  ;;  %v9720_v0 = vsel %vm14460_vm10, %v9712_v2, %v9719_v7  ;;  %v9996_v1 = vsel %vm14470_vm11, %v9721_v34, %v9995_v37  ;;  %v9728_v36 = vor.u32 %v9726_v50, %v9725_v49  ;;  %v9729_v62 = vrot.slane %v9725_v49, 4  ;;  %v10009_v38 = vld [vmem:[#allocation3 + $0x5c] sm:$0x1] }
 0x68f   : > { %9994 = vst.msk [vmem:[#allocation3 + $0x40] sm:$0xf] %vm9957_vm13, %v9720_v0  ;;  %v9733_v11 = vrot.slane %v9731_v40, 7  ;;  %v9742_v10 = vrot.slane %v9740_v63, 7  ;;  %v9615_v39 = vpack.c.bf16 %v14270_v30, %v14270_v30  ;;  %v9616_v5 = vpack.c.bf16 %v14275_v25, %v14275_v25  ;;  %v10016_v34 = vld [vmem:[#allocation3 + $0x68] sm:$0x1] }
 0x690   : > { %9997 = vst [vmem:[#allocation3 + $0x44] sm:$0x1] %v9996_v1  ;;  %v9999_v22 = vsel %vm14451_vm1, %v9728_v36, %v9998_v14  ;;  %v9617_v32 = vpack.c.bf16 %v14279_v60, %v14279_v60  ;;  %v9618_v43 = vpack.c.bf16 %v14283_v29, %v14283_v29  ;;  %v9619_v12 = vpack.c.bf16 %v14287_v6, %v14287_v6  ;;  %v10012_v6 = vld [vmem:[#allocation3 + $0x60] sm:$0xf]  ;;  %v10019_v1 = vld [vmem:[#allocation3 + $0x6c] sm:$0xf] }
 0x691   : > { %10000 = vst [vmem:[#allocation3 + $0x48] sm:$0xf] %v9999_v22  ;;  %v9736_v30 = vor.u32 %v9734_v48, %v9733_v11  ;;  %v9738_v3 = vrot.slane %v9733_v11, 4  ;;  %v9745_v53 = vor.u32 %v9743_v13, %v9742_v10  ;;  %v9746_v25 = vrot.slane %v9742_v10, 4 }
 0x692   : > { %v9748_v44 = vshrl.u32 %v9615_v39, 16  ;;  %v9751_v16 = vshll.u32 %v9615_v39, 16  ;;  %v9757_v8 = vshrl.u32 %v9616_v5, 16  ;;  %v9760_v31 = vshll.u32 %v9616_v5, 16  ;;  %v10023_v5 = vld [vmem:[#allocation3 + $0x74] sm:$0x1] }
 0x693   : > { %v9737_v46 = vsel %vm14460_vm10, %v9729_v62, %v9736_v30  ;;  %v10003_v60 = vsel %vm14470_vm11, %v9738_v3, %v10002_v59  ;;  %v10006_v29 = vsel %vm14451_vm1, %v9745_v53, %v10005_v33  ;;  %v9765_v26 = vshrl.u32 %v9617_v32, 16 }
 0x694   : > { %10001 = vst.msk [vmem:[#allocation3 + $0x4c] sm:$0xf] %vm9957_vm13, %v9737_v46  ;;  %v9750_v9 = vrot.slane %v9748_v44, 7  ;;  %v9759_v37 = vrot.slane %v9757_v8, 7  ;;  %v9768_v28 = vshll.u32 %v9617_v32, 16  ;;  %v9774_v50 = vshrl.u32 %v9618_v43, 16 }
 0x695   : > { %10004 = vst [vmem:[#allocation3 + $0x50] sm:$0x1] %v10003_v60  ;;  %v9767_v58 = vrot.slane %v9765_v26, 7  ;;  %v9777_v61 = vshll.u32 %v9618_v43, 16  ;;  %v9782_v15 = vshrl.u32 %v9619_v12, 16  ;;  %v9785_v18 = vshll.u32 %v9619_v12, 16 }
 0x696   : > { %10007 = vst [vmem:[#allocation3 + $0x54] sm:$0xf] %v10006_v29  ;;  %v9753_v41 = vor.u32 %v9751_v16, %v9750_v9  ;;  %v9755_v2 = vrot.slane %v9750_v9, 4  ;;  %v9762_v14 = vor.u32 %v9760_v31, %v9759_v37  ;;  %v9763_v7 = vrot.slane %v9759_v37, 4  ;;  %v10026_v44 = vld [vmem:[#allocation3 + $0x78] sm:$0xf] }
 0x697   : > { %v9770_v49 = vor.u32 %v9768_v28, %v9767_v58  ;;  %v9772_v40 = vrot.slane %v9767_v58, 4  ;;  %v9776_v51 = vrot.slane %v9774_v50, 7  ;;  %v9784_v48 = vrot.slane %v9782_v15, 7  ;;  %v10030_v60 = vld [vmem:[#allocation3 + $0x80] sm:$0x1] }
 0x698   : > { %v9754_v63 = vsel %vm14460_vm10, %v9746_v25, %v9753_v41  ;;  %v10010_v13 = vsel %vm14470_vm11, %v9755_v2, %v10009_v38  ;;  %v10013_v0 = vsel %vm14451_vm1, %v9762_v14, %v10012_v6  ;;  %v9620_v36 = vpack.c.bf16 %v14291_v23, %v14291_v23  ;;  %v10033_v28 = vld [vmem:[#allocation3 + $0x84] sm:$0xf]  ;;  %v10037_v14 = vld [vmem:[#allocation3 + $0x8c] sm:$0x1] }
 0x699   : > { %10008 = vst.msk [vmem:[#allocation3 + $0x58] sm:$0xf] %vm9957_vm13, %v9754_v63  ;;  %v9771_v62 = vsel %vm14460_vm10, %v9763_v7, %v9770_v49  ;;  %v10017_v11 = vsel %vm14470_vm11, %v9772_v40, %v10016_v34  ;;  %v9779_v10 = vor.u32 %v9777_v61, %v9776_v51  ;;  %v9780_v39 = vrot.slane %v9776_v51, 4 }
 0x69a   : > { %10011 = vst [vmem:[#allocation3 + $0x5c] sm:$0x1] %v10010_v13  ;;  %v9787_v22 = vor.u32 %v9785_v18, %v9784_v48  ;;  %v9789_v59 = vrot.slane %v9784_v48, 4  ;;  %v9791_v33 = vshrl.u32 %v9620_v36, 16  ;;  %v9794_v32 = vshll.u32 %v9620_v36, 16 }
 0x69b   : > { %10014 = vst [vmem:[#allocation3 + $0x60] sm:$0xf] %v10013_v0  ;;  %v10020_v23 = vsel %vm14451_vm1, %v9779_v10, %v10019_v1  ;;  %v9621_v43 = vpack.c.bf16 %v14295_v47, %v14295_v47  ;;  %v9622_v12 = vpack.c.bf16 %v14299_v35, %v14299_v35  ;;  %v9623_v30 = vpack.c.bf16 %v14303_v20, %v14303_v20 }
 0x69c   : > { %10015 = vst.msk [vmem:[#allocation3 + $0x64] sm:$0xf] %vm9957_vm13, %v9771_v62  ;;  %v9788_v3 = vsel %vm14460_vm10, %v9780_v39, %v9787_v22  ;;  %v10024_v53 = vsel %vm14470_vm11, %v9789_v59, %v10023_v5  ;;  %v9793_v25 = vrot.slane %v9791_v33, 7  ;;  %v9624_v16 = vpack.c.bf16 %v14309_v42, %v14309_v42  ;;  %v10044_v22 = vld [vmem:[#allocation3 + $0x98] sm:$0x1] }
 0x69d   : > { %10018 = vst [vmem:[#allocation3 + $0x68] sm:$0x1] %v10017_v11  ;;  %v9799_v47 = vshrl.u32 %v9621_v43, 16  ;;  %v9802_v8 = vshll.u32 %v9621_v43, 16  ;;  %v9808_v35 = vshrl.u32 %v9622_v12, 16  ;;  %v9811_v31 = vshll.u32 %v9622_v12, 16 }
 0x69e   : > { %10021 = vst [vmem:[#allocation3 + $0x6c] sm:$0xf] %v10020_v23  ;;  %v9796_v20 = vor.u32 %v9794_v32, %v9793_v25  ;;  %v9797_v46 = vrot.slane %v9793_v25, 4  ;;  %v9816_v29 = vshrl.u32 %v9623_v30, 16  ;;  %v9819_v38 = vshll.u32 %v9623_v30, 16 }
 0x69f   : > { %10022 = vst.msk [vmem:[#allocation3 + $0x70] sm:$0xf] %vm9957_vm13, %v9788_v3  ;;  %v9801_v6 = vrot.slane %v9799_v47, 7  ;;  %v9810_v26 = vrot.slane %v9808_v35, 7  ;;  %v9825_v9 = vshrl.u32 %v9624_v16, 16  ;;  %v9828_v37 = vshll.u32 %v9624_v16, 16 }
 0x6a0   : > { %10025 = vst [vmem:[#allocation3 + $0x74] sm:$0x1] %v10024_v53  ;;  %v10027_v42 = vsel %vm14451_vm1, %v9796_v20, %v10026_v44  ;;  %v9818_v50 = vrot.slane %v9816_v29, 7  ;;  %v9625_v58 = vpack.c.bf16 %v14313_v24, %v14313_v24  ;;  %v9626_v61 = vpack.c.bf16 %v14317_v17, %v14317_v17  ;;  %v10040_v17 = vld [vmem:[#allocation3 + $0x90] sm:$0xf] }
 0x6a1   : > { %10028 = vst [vmem:[#allocation3 + $0x78] sm:$0xf] %v10027_v42  ;;  %v9804_v15 = vor.u32 %v9802_v8, %v9801_v6  ;;  %v9806_v18 = vrot.slane %v9801_v6, 4  ;;  %v9813_v41 = vor.u32 %v9811_v31, %v9810_v26  ;;  %v9814_v2 = vrot.slane %v9810_v26, 4  ;;  %v10047_v59 = vld [vmem:[#allocation3 + $0x9c] sm:$0xf] }
 0x6a2   : > { %v9821_v7 = vor.u32 %v9819_v38, %v9818_v50  ;;  %v9823_v34 = vrot.slane %v9818_v50, 4  ;;  %v9827_v49 = vrot.slane %v9825_v9, 7  ;;  %v9833_v40 = vshrl.u32 %v9625_v58, 16  ;;  %v10051_v47 = vld [vmem:[#allocation3 + $0xa4] sm:$0x1] }
 0x6a3   : > { %v9805_v51 = vsel %vm14460_vm10, %v9797_v46, %v9804_v15  ;;  %v10031_v48 = vsel %vm14470_vm11, %v9806_v18, %v10030_v60  ;;  %v10034_v24 = vsel %vm14451_vm1, %v9813_v41, %v10033_v28  ;;  %v9836_v63 = vshll.u32 %v9625_v58, 16  ;;  %v10054_v60 = vld [vmem:[#allocation3 + $0xa8] sm:$0xf]  ;;  %v10058_v28 = vld [vmem:[#allocation3 + $0xb0] sm:$0x1] }
 0x6a4   : > { %10029 = vst.msk [vmem:[#allocation3 + $0x7c] sm:$0xf] %vm9957_vm13, %v9805_v51  ;;  %v9822_v13 = vsel %vm14460_vm10, %v9814_v2, %v9821_v7  ;;  %v10038_v0 = vsel %vm14470_vm11, %v9823_v34, %v10037_v14  ;;  %v9830_v1 = vor.u32 %v9828_v37, %v9827_v49  ;;  %v9831_v36 = vrot.slane %v9827_v49, 4 }
 0x6a5   : > { %10032 = vst [vmem:[#allocation3 + $0x80] sm:$0x1] %v10031_v48  ;;  %v9835_v62 = vrot.slane %v9833_v40, 7  ;;  %v9842_v11 = vshrl.u32 %v9626_v61, 16  ;;  %v9845_v10 = vshll.u32 %v9626_v61, 16  ;;  %v9627_v39 = vpack.c.bf16 %v14321_v45, %v14321_v45 }
 0x6a6   : > { %10035 = vst [vmem:[#allocation3 + $0x84] sm:$0xf] %v10034_v24  ;;  %v10041_v5 = vsel %vm14451_vm1, %v9830_v1, %v10040_v17  ;;  %v9628_v33 = vpack.c.bf16 %v14325_v57, %v14325_v57  ;;  %v9629_v32 = vpack.c.bf16 %v14329_v4, %v14329_v4  ;;  %v9630_v23 = vpack.c.bf16 %v14333_v52, %v14333_v52 }
 0x6a7   : > { %10036 = vst.msk [vmem:[#allocation3 + $0x88] sm:$0xf] %vm9957_vm13, %v9822_v13  ;;  %v9838_v43 = vor.u32 %v9836_v63, %v9835_v62  ;;  %v9840_v12 = vrot.slane %v9835_v62, 4  ;;  %v9844_v45 = vrot.slane %v9842_v11, 7  ;;  %v9850_v30 = vshrl.u32 %v9627_v39, 16 }
 0x6a8   : > { %10039 = vst [vmem:[#allocation3 + $0x8c] sm:$0x1] %v10038_v0  ;;  %v9853_v3 = vshll.u32 %v9627_v39, 16  ;;  %v9859_v53 = vshrl.u32 %v9628_v33, 16  ;;  %v9862_v25 = vshll.u32 %v9628_v33, 16  ;;  %v9867_v44 = vshrl.u32 %v9629_v32, 16 }
 0x6a9   : > { %10042 = vst [vmem:[#allocation3 + $0x90] sm:$0xf] %v10041_v5  ;;  %v9839_v57 = vsel %vm14460_vm10, %v9831_v36, %v9838_v43  ;;  %v10045_v4 = vsel %vm14470_vm11, %v9840_v12, %v10044_v22  ;;  %v9847_v16 = vor.u32 %v9845_v10, %v9844_v45  ;;  %v9848_v52 = vrot.slane %v9844_v45, 4  ;;  %v10065_v63 = vld [vmem:[#allocation3 + $0xbc] sm:$0x1] }
 0x6aa   : > { %10043 = vst.msk [vmem:[#allocation3 + $0x94] sm:$0xf] %vm9957_vm13, %v9839_v57  ;;  %v9852_v8 = vrot.slane %v9850_v30, 7  ;;  %v9861_v35 = vrot.slane %v9859_v53, 7  ;;  %v9869_v31 = vrot.slane %v9867_v44, 7  ;;  %v9870_v20 = vshll.u32 %v9629_v32, 16 }
 0x6ab   : > { %10046 = vst [vmem:[#allocation3 + $0x98] sm:$0x1] %v10045_v4  ;;  %v10048_v46 = vsel %vm14451_vm1, %v9847_v16, %v10047_v59  ;;  %v9876_v29 = vshrl.u32 %v9630_v23, 16  ;;  %v9879_v38 = vshll.u32 %v9630_v23, 16  ;;  %v9631_v6 = vpack.c.bf16 %v14337_v54, %v14337_v54  ;;  %v10061_v54 = vld [vmem:[#allocation3 + $0xb4] sm:$0xf] }
 0x6ac   : > { %10049 = vst [vmem:[#allocation3 + $0x9c] sm:$0xf] %v10048_v46  ;;  %v9855_v26 = vor.u32 %v9853_v3, %v9852_v8  ;;  %v9857_v9 = vrot.slane %v9852_v8, 4  ;;  %v9864_v37 = vor.u32 %v9862_v25, %v9861_v35  ;;  %v9865_v42 = vrot.slane %v9861_v35, 4  ;;  %v10068_v39 = vld [vmem:[#allocation3 + $0xc0] sm:$0xf] }
 0x6ad   : > { %v9872_v50 = vor.u32 %v9870_v20, %v9869_v31  ;;  %v9874_v58 = vrot.slane %v9869_v31, 4  ;;  %v9878_v61 = vrot.slane %v9876_v29, 7  ;;  %v9884_v15 = vshrl.u32 %v9631_v6, 16  ;;  %v10072_v33 = vld [vmem:[#allocation3 + $0xc8] sm:$0x1] }
 0x6ae   : > { %v9856_v18 = vsel %vm14460_vm10, %v9848_v52, %v9855_v26  ;;  %v10052_v41 = vsel %vm14470_vm11, %v9857_v9, %v10051_v47  ;;  %v10055_v2 = vsel %vm14451_vm1, %v9864_v37, %v10054_v60  ;;  %v9887_v14 = vshll.u32 %v9631_v6, 16 }
 0x6af   : > { %10050 = vst.msk [vmem:[#allocation3 + $0xa0] sm:$0xf] %vm9957_vm13, %v9856_v18  ;;  %v9873_v7 = vsel %vm14460_vm10, %v9865_v42, %v9872_v50  ;;  %v10059_v34 = vsel %vm14470_vm11, %v9874_v58, %v10058_v28  ;;  %v9881_v49 = vor.u32 %v9879_v38, %v9878_v61  ;;  %v9882_v40 = vrot.slane %v9878_v61, 4 }
 0x6b0   : > { %10053 = vst [vmem:[#allocation3 + $0xa4] sm:$0x1] %v10052_v41  ;;  %v9886_v51 = vrot.slane %v9884_v15, 7  ;;  %v9632_v48 = vpack.c.bf16 %v14341_v27, %v14341_v27  ;;  %v9633_v24 = vpack.c.bf16 %v14344_v55, %v14344_v55 }
 0x6b1   : > { %10056 = vst [vmem:[#allocation3 + $0xa8] sm:$0xf] %v10055_v2  ;;  %v10062_v17 = vsel %vm14451_vm1, %v9881_v49, %v10061_v54 }
 0x6b2   : > { %10057 = vst.msk [vmem:[#allocation3 + $0xac] sm:$0xf] %vm9957_vm13, %v9873_v7  ;;  %v9889_v13 = vor.u32 %v9887_v14, %v9886_v51  ;;  %v9891_v0 = vrot.slane %v9886_v51, 4  ;;  %v9893_v1 = vshrl.u32 %v9632_v48, 16  ;;  %v9896_v36 = vshll.u32 %v9632_v48, 16 }
 0x6b3   : > { %10060 = vst [vmem:[#allocation3 + $0xb0] sm:$0x1] %v10059_v34  ;;  %v9901_v62 = vshrl.u32 %v9633_v24, 16  ;;  %v9904_v11 = vshll.u32 %v9633_v24, 16 }
 0x6b4   : > { %10063 = vst [vmem:[#allocation3 + $0xb4] sm:$0xf] %v10062_v17  ;;  %v9890_v27 = vsel %vm14460_vm10, %v9882_v40, %v9889_v13  ;;  %v10066_v55 = vsel %vm14470_vm11, %v9891_v0, %v10065_v63  ;;  %v9895_v10 = vrot.slane %v9893_v1, 7 }
 0x6b5   : > { %10064 = vst.msk [vmem:[#allocation3 + $0xb8] sm:$0xf] %vm9957_vm13, %v9890_v27  ;;  %v9903_v5 = vrot.slane %v9901_v62, 7 }
 0x6b6   : > { %10067 = vst [vmem:[#allocation3 + $0xbc] sm:$0x1] %v10066_v55  ;;  %v9898_v22 = vor.u32 %v9896_v36, %v9895_v10  ;;  %v9899_v59 = vrot.slane %v9895_v10, 4 }
 0x6b7   : > { %v9906_v32 = vor.u32 %v9904_v11, %v9903_v5  ;;  %v9908_v23 = vrot.slane %v9903_v5, 4 }
 0x6b8   : > { %v10069_v43 = vsel %vm14451_vm1, %v9898_v22, %v10068_v39 }
 0x6b9   : > { %10070 = vst [vmem:[#allocation3 + $0xc0] sm:$0xf] %v10069_v43  ;;  %v9907_v12 = vsel %vm14460_vm10, %v9899_v59, %v9906_v32  ;;  %v10073_v45 = vsel %vm14470_vm11, %v9908_v23, %v10072_v33 }
 0x6ba   : > { %10071 = vst.msk [vmem:[#allocation3 + $0xc4] sm:$0xf] %vm9957_vm13, %v9907_v12 }
 0x6bb   : > { %10074 = vst [vmem:[#allocation3 + $0xc8] sm:$0x1] %v10073_v45 }
 0x6bc PF: > { %s11218_s21 = sshll.u32 %s11495_s22, 8  ;;  %s10088_s7 = sshll.u32 %s11632_s23, 4  ;;  %s10089_s7 = int_to_ptr.vmem [resolvable:$true] %s10088_s7 }
 0x6bd   : > { %s10087_s27 = scalar_lea.hbm %s14686_s5, %s11218_s21  ;;  %s14778_s12 = sand.u32 1, %s11483_s19  }
 0x6be   : > { %s10090_s8 = sshll.u32 %s10087_s27, 4  ;;  %s10076_s13 = scalar_lea.sflag [#allocation5], %s14778_s12  ;;  %s10091_s8 = int_to_ptr.hbm [resolvable:$true] %s10090_s8 }
 0x6bf   : > { %s11427_s28 = sshra.s32 %s10091_s8, 4  ;;  %s11433_s22 = scalar_lea.hbm %s14686_s5, 512  ;;  %s11428_s28 = int_to_ptr.hbm [resolvable:$true] %s11427_s28 }
 0x6c0   : > { %s11429_s10 = scalar_lea.hbm %s11428_s28, 256  ;;  %p11434_p10 = scmp.lt.s32.totalorder %s11428_s28, %s14686_s5 }
 0x6c1   : > { %p11430_p6 = scmp.ne.s32.totalorder %s11428_s28, %s11429_s10  ;;  %p11435_p11 = scmp.lt.s32.totalorder %s11433_s22, %s11429_s10 }
 0x6c3   : > { %p11431_p7 = pnand %p11430_p6, %p11591_p3  ;;  %p11436_p12 = por %p11435_p11, %p11434_p10 }
 0x6c5   : > { %p11432_p8 = pneg %p11431_p7 }
 0x6c7   : > { %p11437_p13 = pnand %p11436_p12, %p11432_p8 }
 0x6c9   : > { %11440 = shalt.err (!%p11437_p13)
}
 0x6ca   : > { %s11510_s23 = smov 128   ;;  %s11511_s16 = smov 8  }
 0x6cb   : > { %11229 = dma.vmem_to_hbm [thread:$0]  (%p11591_p3), %s10089_s7, 4096, %s10091_s8, %s10076_s13, %s11510_s23, %s11510_s23, %s11511_s16  }
 0x6cc PF: > { %p11235_p0 = scmp.ge.s32.totalorder %s11507_s25, 2  ;;  %s10105_s17 = sand.u32 1, %s11479_s18  }
 0x6cd   : > { %s10106_s21 = scalar_lea.sflag [#allocation5], %s10105_s17 }
 0x6ce   : > { %p11232_p1 = pnand %p11235_p0, %p11601_p9 }
 0x6d0   : > { %p11233_p2 = pneg %p11232_p1 }
 0x6d2   : > { %11474 = dma.done.wait (%p11233_p2), %s10106_s21, 4096  }
 0x6d3   : > { %11476 = vsyncadd (%p11233_p2), %s10106_s21, 4294963200  ;;  %s18_s25 = sadd.s32 1, %s11507_s25   ;;  %s14779_s21 = sld [smem:[#allocation7_spill]] }
 0x6d4   : > { %p15_p4 = scmp.ge.s32.totalorder %s18_s25, 8   ;;  %s14780_s22 = sld [smem:[#allocation8_spill]] }
 0x6d5   : > { %s14781_s23 = sld [smem:[#allocation9_spill]]  ;;  %s14783_s18 = smov %s11483_s19 }
 0x6d6   : > { %s14782_s24 = sld [smem:[#allocation10_spill]]  ;;  %s14784_s19 = smov %s11487_s20 }
 0x6d7   : > { %s14785_s20 = smov %s11609_s9  ;;  %17 = sbr.rel (!%p15_p4) target bundleno = 5 (0x5), region = 120 }
 0x6dc   :  { %10112 = vsyncpa [#allocation5], 1 }
 0x6dd   :  { %10114 = vsyncpa [#allocation5 + $0x1], 1 }

</bundles_post_ra>
